<compile_context>
chip_gen: v5e
topology: v5e:2x2
jax: 0.10.0
libtpu: 0.0.40
codegen_flags: <defaults>
</compile_context>

<pallas_src>
import functools
import math

import jax
import jax.numpy as jnp
from jax import lax
from jax.experimental import pallas as pl
from jax.experimental.pallas import tpu as pltpu


_LANE = 128
# Contract over dim 0 of both operands: feat[M,Cf] x dlogit[M,Cp] -> [Cf,Cp].
# (Checked as a transposed-operand MXU matmul; no explicit feat transpose.)
_TN_DIMS = (((0,), (0,)), ((), ()))


def _round_up(x, m):
    return (x + m - 1) // m * m


# ----------------------------------------------------------------------------
# Fused Pallas kernel (support phase + inner SGD + query phase)
# ----------------------------------------------------------------------------

def _meta_kernel(cols_ref, wpos_ref, wsum_ref, wb_ref, bb_ref, wh_ref, bh_ref,
                 loss_in_ref, loss_out_ref,
                 gw_ref, gb_ref, fw_ref, fb_ref,
                 *, n_support_tiles, update_lr):
    step = pl.program_id(0)
    is_support = step < n_support_tiles

    @pl.when(step == 0)
    def _init():
        loss_in_ref[0, 0] = 0.0
        loss_out_ref[0, 0] = 0.0
        gw_ref[...] = jnp.zeros_like(gw_ref)
        gb_ref[...] = jnp.zeros_like(gb_ref)
        # Fast head == original adapted head for the whole support phase.
        fw_ref[...] = wh_ref[...]
        fb_ref[...] = bh_ref[...]

    # Learner forward: conv-as-matmul body (+bias+ReLU) and 1x1 head.  All
    # intermediates stay in vregs/VMEM.  The head always reads the resident
    # fast weights (updated only at the phase boundary below).
    feat = jnp.maximum(
        jnp.dot(cols_ref[...], wb_ref[...], preferred_element_type=jnp.float32)
        + bb_ref[...], 0.0)
    x = (jnp.dot(feat, fw_ref[...], preferred_element_type=jnp.float32)
         + fb_ref[...])

    # Per-element class weights, precomputed in XLA.  They already include
    # the 1/N mean normalisation and zero padding on the padded class lanes.
    wpos = wpos_ref[...]
    wsum = wsum_ref[...]          # = w_pos + w_neg

    # log-sigmoid identities (one exp + one log per element):
    #   softplus(x) = -log(1-p),  softplus(-x) = softplus(x) - x
    #   loss_elem   = wpos*softplus(-x) + wneg*softplus(x)
    #               = wsum*softplus(x) - wpos*x
    e = jnp.exp(-jnp.abs(x))
    sp_pos = jnp.maximum(x, 0.0) + jnp.log(1.0 + e)
    tile_loss = jnp.sum(wsum * sp_pos - wpos * x)

    @pl.when(is_support)
    def _support():
        loss_in_ref[0, 0] += tile_loss
        # p = sigmoid(x) from the shared exp(-|x|) + a cheap EUP reciprocal.
        p = jnp.where(x >= 0.0, 1.0, e) * pl.reciprocal(1.0 + e, approx=True)
        # analytic d(loss)/d(logit) = wsum*p - wpos  (normalisation included)
        dlogit = wsum * p - wpos
        # head-only gradient: contract over the row dim on the MXU
        gw_ref[...] += lax.dot_general(feat, dlogit, _TN_DIMS,
                                       preferred_element_type=jnp.float32)
        gb_ref[...] += jnp.sum(dlogit, axis=0, keepdims=True)

    @pl.when(step == n_support_tiles - 1)
    def _adapt():
        # Inner SGD step once all support tiles have been accumulated.
        fw_ref[...] = wh_ref[...] - update_lr * gw_ref[...]
        fb_ref[...] = bh_ref[...] - update_lr * gb_ref[...]

    @pl.when(step >= n_support_tiles)
    def _query():
        loss_out_ref[0, 0] += tile_loss


# ----------------------------------------------------------------------------
# pallas_call wrapper
# ----------------------------------------------------------------------------

def _max_tile_rows(k_pad, c_pad):
    """VMEM-budget-derived cap on rows per tile (generation aware)."""
    try:
        vmem = pltpu.get_tpu_info().vmem_capacity_bytes
    except Exception:
        vmem = 64 * 1024 * 1024          # v7x physical floor
    budget = vmem // 4                   # headroom for weights/scratch/pipeline
    per_row = 2 * 4 * (k_pad + 2 * c_pad)  # double-buffered f32 row tiles
    return max(8, (budget // per_row) // 8 * 8)


def _pick_m_tile(ms, mq, max_rows):
    """Largest tile dividing both Ms and Mq (phase boundary must align with a
    tile boundary), preferably a multiple of 8, capped by the VMEM budget."""
    g = math.gcd(ms, mq)
    cap = min(g, max_rows)
    for t in range(cap - cap % 8, 0, -8):
        if g % t == 0:
            return t
    for t in range(cap, 0, -1):
        if g % t == 0:
            return t
    return g


def _replicated(shape):
    """Full-array block, same block every grid step (stays resident in VMEM).
    (pl.Buffered(1) would halve its footprint; weights are <100 KiB so the
    default pipelining is kept for robustness.)"""
    return pl.BlockSpec(shape, lambda i: (0,) * len(shape))


def meta_fused(cols, wpos, wsum, w_body, b_body, w_head, b_head,
               *, n_support_tiles, tm, update_lr):
    m_tot, kp = cols.shape
    cf = w_body.shape[1]
    cp = w_head.shape[1]

    kernel = functools.partial(
        _meta_kernel, n_support_tiles=int(n_support_tiles),
        update_lr=float(update_lr))

    return pl.pallas_call(
        kernel,
        grid=(m_tot // tm,),
        in_specs=[
            pl.BlockSpec((tm, kp), lambda i: (i, 0)),      # im2col cols (padded)
            pl.BlockSpec((tm, cp), lambda i: (i, 0)),      # w_pos (padded, /N)
            pl.BlockSpec((tm, cp), lambda i: (i, 0)),      # w_pos + w_neg
            _replicated((kp, cf)),                         # body W (padded rows)
            _replicated((1, cf)),                          # body b
            _replicated((cf, cp)),                         # adapted head W (padded)
            _replicated((1, cp)),                          # adapted head b (padded)
        ],
        out_shape=(
            jax.ShapeDtypeStruct((1, 1), jnp.float32),      # loss_inner
            jax.ShapeDtypeStruct((1, 1), jnp.float32),      # loss_outer
        ),
        out_specs=(
            pl.BlockSpec(memory_space=pltpu.MemorySpace.SMEM),
            pl.BlockSpec(memory_space=pltpu.MemorySpace.SMEM),
        ),
        scratch_shapes=[
            pltpu.VMEM((cf, cp), jnp.float32),   # grad-W accumulator
            pltpu.VMEM((1, cp), jnp.float32),    # grad-b accumulator
            pltpu.VMEM((cf, cp), jnp.float32),   # fast head W
            pltpu.VMEM((1, cp), jnp.float32),    # fast head b
        ],
        compiler_params=pltpu.CompilerParams(
            dimension_semantics=("arbitrary",)),
    )(cols, wpos, wsum, w_body, b_body, w_head, b_head)


# ----------------------------------------------------------------------------
# Layout glue (trace-time XLA, single ops)
# ----------------------------------------------------------------------------

def _im2col_3x3_s2(x_nchw):
    """3x3, stride 2, pad 1 im2col:  [B, C, 24, 24] -> [B*12*12, 9*C]."""
    x_nhwc = jnp.transpose(x_nchw, (0, 2, 3, 1))
    b, h, w, c = x_nhwc.shape
    ho, wo = h // 2, w // 2
    patches = lax.conv_general_dilated_patches(
        x_nhwc, filter_shape=(3, 3), window_strides=(2, 2),
        padding=((1, 1), (1, 1)),
        dimension_numbers=("NHWC", "HWIO", "NHWC"))    # [B, 12, 12, 9*C]
    return patches.reshape(b * ho * wo, 9 * c)


def labels_to_mat(labels):
    """[b, setsz, 48, 12, 12] (NCHW) -> [b*setsz*12*12, 48] matching logits."""
    b, s, c, h, w = labels.shape
    lab = labels.reshape(b * s, c, h, w)
    lab = jnp.transpose(lab, (0, 2, 3, 1))             # NHWC
    return lab.reshape(b * s * h * w, c)


def _focal_weights(lab, alpha, beta, gamma, inv_n, c_pad):
    """Per-element weights of the weighted-BCE focal loss, precomputed once in
    XLA with the 1/N mean normalisation folded in, zero-padded to 128 lanes.
    pos (label==1) -> alpha, soft-neg (0<label<1) -> beta, hard-neg -> gamma."""
    _, c = lab.shape
    y = jnp.clip(lab, 0.0, 1.0)
    pos = (y >= 1.0 - 1e-6).astype(jnp.float32)
    neg2 = (y <= 1e-6).astype(jnp.float32)
    neg1 = 1.0 - pos - neg2
    w_pos = (alpha * inv_n) * pos
    w_sum = w_pos + inv_n * (beta * neg1 + gamma * neg2)
    pad = ((0, 0), (0, c_pad - c))
    return jnp.pad(w_pos, pad), jnp.pad(w_sum, pad)


# ----------------------------------------------------------------------------
# Meta forward
# ----------------------------------------------------------------------------

def meta_forward(support, support_label, query, query_label, params, cfg):
    """Returns (loss_inner, loss_outer), matching Meta.forward."""
    w_body, b_body, w_head, b_head = params
    b, setsz, C, H, W = support.shape
    qsz = query.shape[1]
    cout = w_head.shape[1]

    cols_s = _im2col_3x3_s2(support.reshape(b * setsz, C, H, W))
    cols_q = _im2col_3x3_s2(query.reshape(b * qsz, C, H, W))
    lab_s = labels_to_mat(support_label)
    lab_q = labels_to_mat(query_label)

    ms, k = cols_s.shape
    mq = cols_q.shape[0]
    kp = _round_up(k, _LANE)
    cp = _round_up(cout, _LANE)

    # Lane-dense, pre-normalised class weights (padded class lanes weigh 0).
    wpos_s, wsum_s = _focal_weights(
        lab_s, cfg["inner_pos_weight"], cfg["inner_neg1_weight"],
        cfg["inner_neg2_weight"], 1.0 / float(ms * cout), cp)
    wpos_q, wsum_q = _focal_weights(
        lab_q, cfg["pos_weight"], cfg["neg1_weight"],
        cfg["neg2_weight"], 1.0 / float(mq * cout), cp)

    # Concatenate support+query rows so a single grid covers both phases.
    cols = jnp.pad(jnp.concatenate([cols_s, cols_q], axis=0),
                   ((0, 0), (0, kp - k)))
    wpos = jnp.concatenate([wpos_s, wpos_q], axis=0)
    wsum = jnp.concatenate([wsum_s, wsum_q], axis=0)

    # Zero-pad the weights consistently with the lane-padded operands.
    w_body_p = jnp.pad(w_body, ((0, kp - k), (0, 0)))
    w_head_p = jnp.pad(w_head, ((0, 0), (0, cp - cout)))
    b_head_p = jnp.pad(b_head, ((0, 0), (0, cp - cout)))

    tm = _pick_m_tile(ms, mq, _max_tile_rows(kp, cp))
    n_support_tiles = ms // tm

    loss_inner, loss_outer = meta_fused(
        cols, wpos, wsum, w_body_p, b_body, w_head_p, b_head_p,
        n_support_tiles=n_support_tiles, tm=tm,
        update_lr=cfg["update_lr"])

    return loss_inner[0, 0], loss_outer[0, 0]


# ----------------------------------------------------------------------------
# Pure-JAX reference (same representative Learner / loss, for a sanity check)
# ----------------------------------------------------------------------------

def _reference(support, support_label, query, query_label, params, cfg):
    w_body, b_body, w_head, b_head = params
    b, setsz, C, H, W = support.shape
    qsz = query.shape[1]
    cols_s = _im2col_3x3_s2(support.reshape(b * setsz, C, H, W))
    cols_q = _im2col_3x3_s2(query.reshape(b * qsz, C, H, W))
    lab_s = labels_to_mat(support_label)
    lab_q = labels_to_mat(query_label)

    def loss_and_grad(cols, lab, wh, bh, a, be, ga):
        feat = jnp.maximum(cols @ w_body + b_body, 0.0)
        x = feat @ wh + bh
        y = jnp.clip(lab, 0.0, 1.0)
        pos = (y >= 1.0 - 1e-6).astype(jnp.float32)
        neg2 = (y <= 1e-6).astype(jnp.float32)
        neg1 = 1.0 - pos - neg2
        wp = a * pos
        wn = be * neg1 + ga * neg2
        sp_pos = jnp.maximum(x, 0.0) + jnp.log1p(jnp.exp(-jnp.abs(x)))
        sp_neg = sp_pos - x
        loss = jnp.mean(wp * sp_neg + wn * sp_pos)
        p = jax.nn.sigmoid(x)
        dl = (wp * (p - 1.0) + wn * p) / x.size
        return loss, feat.T @ dl, jnp.sum(dl, axis=0, keepdims=True)

    li, gw, gb = loss_and_grad(cols_s, lab_s, w_head, b_head,
                               cfg["inner_pos_weight"], cfg["inner_neg1_weight"],
                               cfg["inner_neg2_weight"])
    fw = w_head - cfg["update_lr"] * gw
    fb = b_head - cfg["update_lr"] * gb
    lo, _, _ = loss_and_grad(cols_q, lab_q, fw, fb,
                             cfg["pos_weight"], cfg["neg1_weight"],
                             cfg["neg2_weight"])
    return li, lo


# ----------------------------------------------------------------------------
# Main
# ----------------------------------------------------------------------------

if __name__ == "__main__":
    key = jax.random.PRNGKey(0)
    k1, k2, k3, k4, k5, k6, k7, k8 = jax.random.split(key, 8)

    # Small shapes consistent with the module's docstring:
    #   support: [b, setsz, C, H, W], labels: [b, setsz, 48, 12, 12]
    b, setsz, qsz = 2, 4, 4
    C, H, W = 4, 24, 24        # 3x3/stride-2 conv -> 12x12
    Cf, Cout = 32, 48

    support = jax.random.normal(k1, (b, setsz, C, H, W), jnp.float32)
    query = jax.random.normal(k2, (b, qsz, C, H, W), jnp.float32)

    # labels in {0, 0.5, 1}: hard-neg / soft-neg / pos classes
    def make_labels(k, shape):
        u = jax.random.uniform(k, shape)
        return jnp.where(u > 0.95, 1.0,
                         jnp.where(u > 0.7, 0.5, 0.0)).astype(jnp.float32)

    support_label = make_labels(k3, (b, setsz, Cout, 12, 12))
    query_label = make_labels(k4, (b, qsz, Cout, 12, 12))

    # Deterministic synthetic Learner parameters.
    # body: 3x3 conv C->Cf as an im2col weight matrix [9*C, Cf]
    # adapted head: 1x1 conv Cf->48 as [Cf, 48] (+ biases, shaped [1, N])
    w_body = 0.1 * jax.random.normal(k5, (9 * C, Cf), jnp.float32)
    b_body = 0.01 * jax.random.normal(k6, (1, Cf), jnp.float32)
    w_head = 0.1 * jax.random.normal(k7, (Cf, Cout), jnp.float32)
    b_head = 0.01 * jax.random.normal(k8, (1, Cout), jnp.float32)
    params = (w_body, b_body, w_head, b_head)

    cfg = dict(
        update_lr=0.01,
        inner_pos_weight=2.0, inner_neg1_weight=0.5, inner_neg2_weight=1.0,
        pos_weight=1.0, neg1_weight=0.25, neg2_weight=1.0,
    )

    loss_inner, loss_outer = jax.jit(
        functools.partial(meta_forward, cfg=cfg))(
        support, support_label, query, query_label, params)
    jax.block_until_ready((loss_inner, loss_outer))

    assert jnp.isfinite(loss_inner) and jnp.isfinite(loss_outer)

    # Sanity check against the pure-JAX reference of the same math.
    ref_li, ref_lo = _reference(support, support_label, query, query_label,
                                params, cfg)
    assert jnp.allclose(loss_inner, ref_li, rtol=2e-3, atol=1e-5)
    assert jnp.allclose(loss_outer, ref_lo, rtol=2e-3, atol=1e-5)

    print("KERNEL_OK")
</pallas_src>

<mosaic_0001>
module attributes {stable_mosaic.version = 11 : i64} {
  func.func @_meta_kernel(%arg0: i32, %arg1: memref<1152x128xf32, #tpu.memory_space<vmem>>, %arg2: memref<1152x128xf32, #tpu.memory_space<vmem>>, %arg3: memref<1152x128xf32, #tpu.memory_space<vmem>>, %arg4: memref<128x32xf32, #tpu.memory_space<vmem>>, %arg5: memref<1x32xf32, #tpu.memory_space<vmem>>, %arg6: memref<32x128xf32, #tpu.memory_space<vmem>>, %arg7: memref<1x128xf32, #tpu.memory_space<vmem>>, %arg8: memref<1x1xf32, #tpu.memory_space<smem>>, %arg9: memref<1x1xf32, #tpu.memory_space<smem>>, %arg10: memref<32x128xf32, #tpu.memory_space<vmem>>, %arg11: memref<1x128xf32, #tpu.memory_space<vmem>>, %arg12: memref<32x128xf32, #tpu.memory_space<vmem>>, %arg13: memref<1x128xf32, #tpu.memory_space<vmem>>) attributes {dimension_semantics = [#tpu.dimension_semantics<arbitrary>], iteration_bounds = array<i64: 2>, scalar_prefetch = 0 : i64, scratch_operands = 4 : i64, tpu.core_type = #tpu.core_type<tc>, window_params = [{transform_indices = @transform_0, window_bounds = array<i64: 1152, 128>}, {transform_indices = @transform_1, window_bounds = array<i64: 1152, 128>}, {transform_indices = @transform_2, window_bounds = array<i64: 1152, 128>}, {pipeline_mode = #tpu.pipeline_mode<synchronous>, transform_indices = @transform_3, window_bounds = array<i64: 128, 32>}, {pipeline_mode = #tpu.pipeline_mode<synchronous>, transform_indices = @transform_4, window_bounds = array<i64: 1, 32>}, {pipeline_mode = #tpu.pipeline_mode<synchronous>, transform_indices = @transform_5, window_bounds = array<i64: 32, 128>}, {pipeline_mode = #tpu.pipeline_mode<synchronous>, transform_indices = @transform_6, window_bounds = array<i64: 1, 128>}, {transform_indices = @transform_7, window_bounds = array<i64: 1, 1>}, {transform_indices = @transform_8, window_bounds = array<i64: 1, 1>}]} {
    %c1_i32 = arith.constant 1 : i32
    %0 = arith.cmpi slt, %arg0, %c1_i32 : i32
    %c0_i32 = arith.constant 0 : i32
    %1 = arith.cmpi eq, %arg0, %c0_i32 : i32
    %2 = arith.extui %1 : i1 to i32
    %c0_i32_0 = arith.constant 0 : i32
    %3 = arith.cmpi ne, %2, %c0_i32_0 : i32
    scf.if %3 {
      %cst_25 = arith.constant 0.000000e+00 : f32
      %c0_26 = arith.constant 0 : index
      %c0_27 = arith.constant 0 : index
      %44 = memref.load %arg8[%c0_26, %c0_27] : memref<1x1xf32, #tpu.memory_space<smem>>
      memref.store %cst_25, %arg8[%c0_26, %c0_27] : memref<1x1xf32, #tpu.memory_space<smem>>
      %cst_28 = arith.constant 0.000000e+00 : f32
      %c0_29 = arith.constant 0 : index
      %c0_30 = arith.constant 0 : index
      %45 = memref.load %arg9[%c0_29, %c0_30] : memref<1x1xf32, #tpu.memory_space<smem>>
      memref.store %cst_28, %arg9[%c0_29, %c0_30] : memref<1x1xf32, #tpu.memory_space<smem>>
      %cst_31 = arith.constant 0.000000e+00 : f32
      %46 = vector.broadcast %cst_31 : f32 to vector<32x128xf32>
      %c0_32 = arith.constant 0 : index
      %c0_33 = arith.constant 0 : index
      %47 = vector.load %arg10[%c0_32, %c0_33] : memref<32x128xf32, #tpu.memory_space<vmem>>, vector<32x128xf32>
      tpu.vector_store %arg10[%c0_32, %c0_33], %46 {strides = array<i32>} : memref<32x128xf32, #tpu.memory_space<vmem>>, vector<32x128xf32>,
      %cst_34 = arith.constant 0.000000e+00 : f32
      %48 = vector.broadcast %cst_34 : f32 to vector<1x128xf32>
      %c0_35 = arith.constant 0 : index
      %c0_36 = arith.constant 0 : index
      %49 = vector.load %arg11[%c0_35, %c0_36] : memref<1x128xf32, #tpu.memory_space<vmem>>, vector<1x128xf32>
      tpu.vector_store %arg11[%c0_35, %c0_36], %48 {strides = array<i32>} : memref<1x128xf32, #tpu.memory_space<vmem>>, vector<1x128xf32>,
      %c0_37 = arith.constant 0 : index
      %c0_38 = arith.constant 0 : index
      %50 = vector.load %arg6[%c0_37, %c0_38] : memref<32x128xf32, #tpu.memory_space<vmem>>, vector<32x128xf32>
      %c0_39 = arith.constant 0 : index
      %c0_40 = arith.constant 0 : index
      %51 = vector.load %arg12[%c0_39, %c0_40] : memref<32x128xf32, #tpu.memory_space<vmem>>, vector<32x128xf32>
      tpu.vector_store %arg12[%c0_39, %c0_40], %50 {strides = array<i32>} : memref<32x128xf32, #tpu.memory_space<vmem>>, vector<32x128xf32>,
      %c0_41 = arith.constant 0 : index
      %c0_42 = arith.constant 0 : index
      %52 = vector.load %arg7[%c0_41, %c0_42] : memref<1x128xf32, #tpu.memory_space<vmem>>, vector<1x128xf32>
      %c0_43 = arith.constant 0 : index
      %c0_44 = arith.constant 0 : index
      %53 = vector.load %arg13[%c0_43, %c0_44] : memref<1x128xf32, #tpu.memory_space<vmem>>, vector<1x128xf32>
      tpu.vector_store %arg13[%c0_43, %c0_44], %52 {strides = array<i32>} : memref<1x128xf32, #tpu.memory_space<vmem>>, vector<1x128xf32>,
    } else {
    }
    %c0 = arith.constant 0 : index
    %c0_1 = arith.constant 0 : index
    %4 = vector.load %arg1[%c0, %c0_1] : memref<1152x128xf32, #tpu.memory_space<vmem>>, vector<1152x128xf32>
    %c0_2 = arith.constant 0 : index
    %c0_3 = arith.constant 0 : index
    %5 = vector.load %arg4[%c0_2, %c0_3] : memref<128x32xf32, #tpu.memory_space<vmem>>, vector<128x32xf32>
    %cst = arith.constant dense<0.000000e+00> : vector<1152x32xf32>
    %6 = tpu.matmul %4, %5, %cst {dimension_numbers = #tpu.dot_dimension_numbers<[1], [0], [0], [1], [0, 0, 1, 1], [], []>} : vector<1152x128xf32>, vector<128x32xf32>, vector<1152x32xf32> -> vector<1152x32xf32>
    %c0_4 = arith.constant 0 : index
    %c0_5 = arith.constant 0 : index
    %7 = vector.load %arg5[%c0_4, %c0_5] : memref<1x32xf32, #tpu.memory_space<vmem>>, vector<1x32xf32>
    %8 = vector.broadcast %7 : vector<1x32xf32> to vector<1152x32xf32>
    %9 = arith.addf %6, %8 : vector<1152x32xf32>
    %cst_6 = arith.constant 0.000000e+00 : f32
    %10 = vector.broadcast %cst_6 : f32 to vector<1152x32xf32>
    %11 = arith.maximumf %9, %10 : vector<1152x32xf32>
    %c0_7 = arith.constant 0 : index
    %c0_8 = arith.constant 0 : index
    %12 = vector.load %arg12[%c0_7, %c0_8] : memref<32x128xf32, #tpu.memory_space<vmem>>, vector<32x128xf32>
    %cst_9 = arith.constant dense<0.000000e+00> : vector<1152x128xf32>
    %13 = tpu.matmul %11, %12, %cst_9 {dimension_numbers = #tpu.dot_dimension_numbers<[1], [0], [0], [1], [0, 0, 1, 1], [], []>} : vector<1152x32xf32>, vector<32x128xf32>, vector<1152x128xf32> -> vector<1152x128xf32>
    %c0_10 = arith.constant 0 : index
    %c0_11 = arith.constant 0 : index
    %14 = vector.load %arg13[%c0_10, %c0_11] : memref<1x128xf32, #tpu.memory_space<vmem>>, vector<1x128xf32>
    %15 = vector.broadcast %14 : vector<1x128xf32> to vector<1152x128xf32>
    %16 = arith.addf %13, %15 : vector<1152x128xf32>
    %c0_12 = arith.constant 0 : index
    %c0_13 = arith.constant 0 : index
    %17 = vector.load %arg2[%c0_12, %c0_13] : memref<1152x128xf32, #tpu.memory_space<vmem>>, vector<1152x128xf32>
    %c0_14 = arith.constant 0 : index
    %c0_15 = arith.constant 0 : index
    %18 = vector.load %arg3[%c0_14, %c0_15] : memref<1152x128xf32, #tpu.memory_space<vmem>>, vector<1152x128xf32>
    %19 = math.absf %16 : vector<1152x128xf32>
    %cst_16 = arith.constant 0.000000e+00 : f32
    %20 = vector.broadcast %cst_16 : f32 to vector<1152x128xf32>
    %21 = arith.subf %20, %19 : vector<1152x128xf32>
    %22 = math.exp %21 : vector<1152x128xf32>
    %cst_17 = arith.constant 0.000000e+00 : f32
    %23 = vector.broadcast %cst_17 : f32 to vector<1152x128xf32>
    %24 = arith.maximumf %16, %23 : vector<1152x128xf32>
    %cst_18 = arith.constant 1.000000e+00 : f32
    %25 = vector.broadcast %cst_18 : f32 to vector<1152x128xf32>
    %26 = arith.addf %25, %22 : vector<1152x128xf32>
    %27 = math.log %26 : vector<1152x128xf32>
    %28 = arith.addf %24, %27 : vector<1152x128xf32>
    %29 = arith.mulf %18, %28 : vector<1152x128xf32>
    %30 = arith.mulf %17, %16 : vector<1152x128xf32>
    %31 = arith.subf %29, %30 : vector<1152x128xf32>
    %32 = vector.shape_cast %31 : vector<1152x128xf32> to vector<1x1152x128xf32>
    %cst_19 = arith.constant dense<0.000000e+00> : vector<1xf32>
    %33 = vector.multi_reduction <add>, %32, %cst_19 [1, 2] : vector<1x1152x128xf32> to vector<1xf32>
    %34 = vector.shape_cast %33 : vector<1xf32> to vector<1x1x1xf32>
    %35 = vector.extract %34[0, 0, 0] : f32 from vector<1x1x1xf32>
    %36 = arith.extui %0 : i1 to i32
    %c0_i32_20 = arith.constant 0 : i32
    %37 = arith.cmpi ne, %36, %c0_i32_20 : i32
    scf.if %37 {
      %c0_25 = arith.constant 0 : index
      %c0_26 = arith.constant 0 : index
      %44 = memref.load %arg8[%c0_25, %c0_26] : memref<1x1xf32, #tpu.memory_space<smem>>
      %45 = arith.addf %44, %35 : f32
      %c0_27 = arith.constant 0 : index
      %c0_28 = arith.constant 0 : index
      %46 = memref.load %arg8[%c0_27, %c0_28] : memref<1x1xf32, #tpu.memory_space<smem>>
      memref.store %45, %arg8[%c0_27, %c0_28] : memref<1x1xf32, #tpu.memory_space<smem>>
      %cst_29 = arith.constant 0.000000e+00 : f32
      %47 = vector.broadcast %cst_29 : f32 to vector<1152x128xf32>
      %48 = arith.cmpf oge, %16, %47 : vector<1152x128xf32>
      %cst_30 = arith.constant 1.000000e+00 : f32
      %49 = vector.broadcast %cst_30 : f32 to vector<1152x128xf32>
      %50 = arith.select %48, %49, %22 : vector<1152x128xi1>, vector<1152x128xf32>
      %cst_31 = arith.constant 1.000000e+00 : f32
      %51 = vector.broadcast %cst_31 : f32 to vector<1152x128xf32>
      %52 = arith.addf %51, %22 : vector<1152x128xf32>
      %53 = tpu.reciprocal %52 {approx = true} : vector<1152x128xf32> -> vector<1152x128xf32>
      %54 = arith.mulf %50, %53 : vector<1152x128xf32>
      %55 = arith.mulf %18, %54 : vector<1152x128xf32>
      %56 = arith.subf %55, %17 : vector<1152x128xf32>
      %c0_32 = arith.constant 0 : index
      %c0_33 = arith.constant 0 : index
      %57 = vector.load %arg10[%c0_32, %c0_33] : memref<32x128xf32, #tpu.memory_space<vmem>>, vector<32x128xf32>
      %cst_34 = arith.constant dense<0.000000e+00> : vector<32x128xf32>
      %58 = tpu.matmul %11, %56, %cst_34 {dimension_numbers = #tpu.dot_dimension_numbers<[0], [0], [1], [1], [0, 1, 1, 1], [], []>} : vector<1152x32xf32>, vector<1152x128xf32>, vector<32x128xf32> -> vector<32x128xf32>
      %59 = arith.addf %57, %58 : vector<32x128xf32>
      %c0_35 = arith.constant 0 : index
      %c0_36 = arith.constant 0 : index
      %60 = vector.load %arg10[%c0_35, %c0_36] : memref<32x128xf32, #tpu.memory_space<vmem>>, vector<32x128xf32>
      tpu.vector_store %arg10[%c0_35, %c0_36], %59 {strides = array<i32>} : memref<32x128xf32, #tpu.memory_space<vmem>>, vector<32x128xf32>,
      %c0_37 = arith.constant 0 : index
      %c0_38 = arith.constant 0 : index
      %61 = vector.load %arg11[%c0_37, %c0_38] : memref<1x128xf32, #tpu.memory_space<vmem>>, vector<1x128xf32>
      %cst_39 = arith.constant dense<0.000000e+00> : vector<128xf32>
      %62 = vector.multi_reduction <add>, %56, %cst_39 [0] : vector<1152x128xf32> to vector<128xf32>
      %63 = vector.shape_cast %62 : vector<128xf32> to vector<1x128xf32>
      %64 = arith.addf %61, %63 : vector<1x128xf32>
      %c0_40 = arith.constant 0 : index
      %c0_41 = arith.constant 0 : index
      %65 = vector.load %arg11[%c0_40, %c0_41] : memref<1x128xf32, #tpu.memory_space<vmem>>, vector<1x128xf32>
      tpu.vector_store %arg11[%c0_40, %c0_41], %64 {strides = array<i32>} : memref<1x128xf32, #tpu.memory_space<vmem>>, vector<1x128xf32>,
    } else {
    }
    %c0_i32_21 = arith.constant 0 : i32
    %38 = arith.cmpi eq, %arg0, %c0_i32_21 : i32
    %39 = arith.extui %38 : i1 to i32
    %c0_i32_22 = arith.constant 0 : i32
    %40 = arith.cmpi ne, %39, %c0_i32_22 : i32
    scf.if %40 {
      %c0_25 = arith.constant 0 : index
      %c0_26 = arith.constant 0 : index
      %44 = vector.load %arg6[%c0_25, %c0_26] : memref<32x128xf32, #tpu.memory_space<vmem>>, vector<32x128xf32>
      %c0_27 = arith.constant 0 : index
      %c0_28 = arith.constant 0 : index
      %45 = vector.load %arg10[%c0_27, %c0_28] : memref<32x128xf32, #tpu.memory_space<vmem>>, vector<32x128xf32>
      %cst_29 = arith.constant 0.00999999977 : f32
      %46 = vector.broadcast %cst_29 : f32 to vector<32x128xf32>
      %47 = arith.mulf %46, %45 : vector<32x128xf32>
      %48 = arith.subf %44, %47 : vector<32x128xf32>
      %c0_30 = arith.constant 0 : index
      %c0_31 = arith.constant 0 : index
      %49 = vector.load %arg12[%c0_30, %c0_31] : memref<32x128xf32, #tpu.memory_space<vmem>>, vector<32x128xf32>
      tpu.vector_store %arg12[%c0_30, %c0_31], %48 {strides = array<i32>} : memref<32x128xf32, #tpu.memory_space<vmem>>, vector<32x128xf32>,
      %c0_32 = arith.constant 0 : index
      %c0_33 = arith.constant 0 : index
      %50 = vector.load %arg7[%c0_32, %c0_33] : memref<1x128xf32, #tpu.memory_space<vmem>>, vector<1x128xf32>
      %c0_34 = arith.constant 0 : index
      %c0_35 = arith.constant 0 : index
      %51 = vector.load %arg11[%c0_34, %c0_35] : memref<1x128xf32, #tpu.memory_space<vmem>>, vector<1x128xf32>
      %cst_36 = arith.constant 0.00999999977 : f32
      %52 = vector.broadcast %cst_36 : f32 to vector<1x128xf32>
      %53 = arith.mulf %52, %51 : vector<1x128xf32>
      %54 = arith.subf %50, %53 : vector<1x128xf32>
      %c0_37 = arith.constant 0 : index
      %c0_38 = arith.constant 0 : index
      %55 = vector.load %arg13[%c0_37, %c0_38] : memref<1x128xf32, #tpu.memory_space<vmem>>, vector<1x128xf32>
      tpu.vector_store %arg13[%c0_37, %c0_38], %54 {strides = array<i32>} : memref<1x128xf32, #tpu.memory_space<vmem>>, vector<1x128xf32>,
    } else {
    }
    %c1_i32_23 = arith.constant 1 : i32
    %41 = arith.cmpi sge, %arg0, %c1_i32_23 : i32
    %42 = arith.extui %41 : i1 to i32
    %c0_i32_24 = arith.constant 0 : i32
    %43 = arith.cmpi ne, %42, %c0_i32_24 : i32
    scf.if %43 {
      %c0_25 = arith.constant 0 : index
      %c0_26 = arith.constant 0 : index
      %44 = memref.load %arg9[%c0_25, %c0_26] : memref<1x1xf32, #tpu.memory_space<smem>>
      %45 = arith.addf %44, %35 : f32
      %c0_27 = arith.constant 0 : index
      %c0_28 = arith.constant 0 : index
      %46 = memref.load %arg9[%c0_27, %c0_28] : memref<1x1xf32, #tpu.memory_space<smem>>
      memref.store %45, %arg9[%c0_27, %c0_28] : memref<1x1xf32, #tpu.memory_space<smem>>
    } else {
    }
    return
  }
  func.func @transform_0(%arg0: i32) -> (i32, i32) {
    %c0_i32 = arith.constant 0 : i32
    %c0_i32_0 = arith.constant 0 : i32
    return %arg0, %c0_i32 : i32, i32
  }
  func.func @transform_1(%arg0: i32) -> (i32, i32) {
    %c0_i32 = arith.constant 0 : i32
    %c0_i32_0 = arith.constant 0 : i32
    return %arg0, %c0_i32 : i32, i32
  }
  func.func @transform_2(%arg0: i32) -> (i32, i32) {
    %c0_i32 = arith.constant 0 : i32
    %c0_i32_0 = arith.constant 0 : i32
    return %arg0, %c0_i32 : i32, i32
  }
  func.func @transform_3(%arg0: i32) -> (i32, i32) {
    %c0_i32 = arith.constant 0 : i32
    %c0_i32_0 = arith.constant 0 : i32
    %c0_i32_1 = arith.constant 0 : i32
    return %c0_i32, %c0_i32_0 : i32, i32
  }
  func.func @transform_4(%arg0: i32) -> (i32, i32) {
    %c0_i32 = arith.constant 0 : i32
    %c0_i32_0 = arith.constant 0 : i32
    %c0_i32_1 = arith.constant 0 : i32
    return %c0_i32, %c0_i32_0 : i32, i32
  }
  func.func @transform_5(%arg0: i32) -> (i32, i32) {
    %c0_i32 = arith.constant 0 : i32
    %c0_i32_0 = arith.constant 0 : i32
    %c0_i32_1 = arith.constant 0 : i32
    return %c0_i32, %c0_i32_0 : i32, i32
  }
  func.func @transform_6(%arg0: i32) -> (i32, i32) {
    %c0_i32 = arith.constant 0 : i32
    %c0_i32_0 = arith.constant 0 : i32
    %c0_i32_1 = arith.constant 0 : i32
    return %c0_i32, %c0_i32_0 : i32, i32
  }
  func.func @transform_7(%arg0: i32) -> (i32, i32) {
    %c0_i32 = arith.constant 0 : i32
    %c0_i32_0 = arith.constant 0 : i32
    %c0_i32_1 = arith.constant 0 : i32
    return %c0_i32, %c0_i32_0 : i32, i32
  }
  func.func @transform_8(%arg0: i32) -> (i32, i32) {
    %c0_i32 = arith.constant 0 : i32
    %c0_i32_0 = arith.constant 0 : i32
    %c0_i32_1 = arith.constant 0 : i32
    return %c0_i32, %c0_i32_0 : i32, i32
  }
}

</mosaic_0001>

<bundles_post_ra>
// kernel: meta_forward.1
= control target key start
LH: loop header
LB: loop body
LE: loop exit
PB: predicated region body
PF: predicated region fallthrough
CT: control target
= control target key end

     0   :  { %14 = vsyncpa [#allocation7], 0  ;;  %s14422_s0 = inlined_call_operand.vmem [shape: f32[2304,128], index: 0, kind: input, shape index: {}]   ;;  %s14423_s1 = inlined_call_operand.vmem [shape: f32[2304,128], index: 1, kind: input, shape index: {}]   ;;  %s14424_s2 = inlined_call_operand.vmem [shape: f32[2304,128], index: 2, kind: input, shape index: {}]   ;;  %s14425_s3 = inlined_call_operand.vmem [shape: f32[128,32], index: 3, kind: input, shape index: {}]   ;;  %s14426_s4 = inlined_call_operand.vmem [shape: f32[1,32], index: 4, kind: input, shape index: {}]   ;;  %s14427_s5 = inlined_call_operand.vmem [shape: f32[32,128], index: 5, kind: input, shape index: {}]   ;;  %s14428_s6 = inlined_call_operand.vmem [shape: f32[1,128], index: 6, kind: input, shape index: {}]   ;;  %s14429_s7 = inlined_call_operand.hbm [shape: f32[1,1], index: 7, kind: output, shape index: {0}]   ;;  %s14430_s8 = inlined_call_operand.hbm [shape: f32[1,1], index: 8, kind: output, shape index: {1}]  }
   0x1   :  { %15 = vsyncpa [#allocation9], 0  ;;  %s7362_s27 = smov 0  }
   0x2 LB: > { %s7368_s28 = sadd.s32 4294967295, %s7311_s27   ;;  %p5892_p0 = scmp.ge.s32.totalorder %s7311_s27, 1  ;;  %s7311_s27 = sphi %s7362_s27, %s21_s27  }
   0x3   : > { %p280_p1 = scmp.lt.s32.totalorder %s7311_s27, 3 }
   0x5   : > { %p281_p2 = pnand %p5892_p0, %p280_p1 }
   0x7   : > { %284 = sbr.rel (%p281_p2) target bundleno = 2173 (0x87d), region = 48 }
   0xc   : > { %s319_s29 = smul.u32 144, %s7368_s28  ;;  %p5896_p4 = scmp.ne.s32.totalorder %s7368_s28, 0 }
   0xd   : > { %s7313_s18 = smov (!%p5896_p4), 0.0  }
   0xe   : > { %p320_p3 = scmp.lt.s32.totalorder %s319_s29, 287  ;;  %343 = sst [smem:[#allocation6]] (!%p5896_p4), %s7313_s18 }
   0xf   : > { %341 = sbr.rel (%p5896_p4) target bundleno = 31 (0x1f), region = 52  ;;  %345 = sst [smem:[#allocation8]] (!%p5896_p4), %s7313_s18 }
  0x10   : > { %s17792_s29 = smov (!%p320_p3, %s319_s29), 287 }
  0x11   : > { %s5893_s30 = sshll.u32 %s17792_s29, 3 }
  0x12   : > { %s7376_s11 = scalar_lea.vmem %s14422_s0, %s5893_s30  ;;  %s7381_s14 = scalar_lea.vmem %s14423_s1, %s5893_s30 }
  0x13   : > { %s7386_s17 = scalar_lea.vmem %s14424_s2, %s5893_s30 }
  0x14   : > { %v7314_v0 = vmov 0.0   ;;  %v351_v1 = vld [vmem:[%s14427_s5] sm:$0xff]  ;;  %v352_v2 = vld [vmem:[%s14427_s5 + $0x8] sm:$0xff]  ;;  %v353_v3 = vld [vmem:[%s14427_s5 + $0x10] sm:$0xff] }
  0x15   : > { %346 = vst [vmem:[#allocation2 + $0x10] sm:$0xff] %v7314_v0  ;;  %v354_v4 = vld [vmem:[%s14427_s5 + $0x18] sm:$0xff]  ;;  %v359_v5 = vld [vmem:[%s14428_s6] sm:$0x1] }
  0x16   : > { %347 = vst [vmem:[#allocation2] sm:$0xff] %v7314_v0 }
  0x17   : > { %348 = vst [vmem:[#allocation2 + $0x18] sm:$0xff] %v7314_v0 }
  0x18   : > { %349 = vst [vmem:[#allocation2 + $0x8] sm:$0xff] %v7314_v0 }
  0x19   : > { %350 = vst [vmem:[#allocation3] sm:$0x1] %v7314_v0 }
  0x1a   : > { %355 = vst [vmem:[#allocation4] sm:$0xff] %v351_v1 }
  0x1b   : > { %356 = vst [vmem:[#allocation4 + $0x18] sm:$0xff] %v352_v2 }
  0x1c   : > { %357 = vst [vmem:[#allocation4 + $0x8] sm:$0xff] %v353_v3 }
  0x1d   : > { %358 = vst [vmem:[#allocation4 + $0x10] sm:$0xff] %v354_v4 }
  0x1e   : > { %360 = vst [vmem:[#allocation5] sm:$0x1] %v359_v5 }
  0x1f PF: > { %v520_v6 = vld [vmem:[%s14425_s3 + $0x78] sm:$0xff]  ;;  %v519_v7 = vld [vmem:[%s14425_s3 + $0x70] sm:$0xff]  ;;  %v518_v8 = vld [vmem:[%s14425_s3 + $0x68] sm:$0xff]  ;;  %vm1126_vm0 = vcmask 261120   ;;  %p6041_p5 = scmp.ge.s32.totalorder %s7368_s28, 1 }
  0x20   : > { %525 = vmatpush.msra.mxu0 %v520_v6  ;;  %6050 = vmatpush.msra.mxu2 %v520_v6  ;;  %v517_v9 = vld [vmem:[%s14425_s3 + $0x60] sm:$0xff]  ;;  %v516_v10 = vld [vmem:[%s14425_s3 + $0x58] sm:$0xff]  ;;  %v515_v11 = vld [vmem:[%s14425_s3 + $0x50] sm:$0xff] }
  0x21   : > { %6051 = vmatpush.msra.mxu3 %v520_v6  ;;  %v514_v12 = vld [vmem:[%s14425_s3 + $0x48] sm:$0xff]  ;;  %v513_v13 = vld [vmem:[%s14425_s3 + $0x40] sm:$0xff]  ;;  %v512_v14 = vld [vmem:[%s14425_s3 + $0x38] sm:$0xff] }
  0x22   : > { %526 = vmatpush.msra.mxu0 %v519_v7  ;;  %6052 = vmatpush.msra.mxu2 %v519_v7  ;;  %v511_v15 = vld [vmem:[%s14425_s3 + $0x30] sm:$0xff]  ;;  %v510_v16 = vld [vmem:[%s14425_s3 + $0x28] sm:$0xff]  ;;  %v509_v17 = vld [vmem:[%s14425_s3 + $0x20] sm:$0xff] }
  0x23   : > { %6053 = vmatpush.msra.mxu3 %v519_v7  ;;  %v508_v18 = vld [vmem:[%s14425_s3 + $0x18] sm:$0xff]  ;;  %v507_v19 = vld [vmem:[%s14425_s3 + $0x10] sm:$0xff]  ;;  %v506_v20 = vld [vmem:[%s14425_s3 + $0x8] sm:$0xff] }
  0x24   : > { %527 = vmatpush.msra.mxu0 %v518_v8  ;;  %6054 = vmatpush.msra.mxu2 %v518_v8  ;;  %v505_v21 = vld [vmem:[%s14425_s3] sm:$0xff]  ;;  %v432_v23 = vld [vmem:[%s7376_s11 + $0x238] sm:$0xff]  ;;  %v362_v24 = vld [vmem:[%s7376_s11 + $0x8] sm:$0xff] }
  0x25   : > { %6055 = vmatpush.msra.mxu3 %v518_v8  ;;  %v361_v22 = vld [vmem:[%s7376_s11] sm:$0xff]  ;;  %v363_v26 = vld [vmem:[%s7376_s11 + $0x10] sm:$0xff]  ;;  %v434_v27 = vld [vmem:[%s7376_s11 + $0x248] sm:$0xff] }
  0x26   : > { %528 = vmatpush.msra.mxu0 %v517_v9  ;;  %6056 = vmatpush.msra.mxu2 %v517_v9  ;;  %v433_v25 = vld [vmem:[%s7376_s11 + $0x240] sm:$0xff]  ;;  %v364_v28 = vld [vmem:[%s7376_s11 + $0x18] sm:$0xff]  ;;  %v435_v29 = vld [vmem:[%s7376_s11 + $0x250] sm:$0xff] }
  0x27   : > { %6057 = vmatpush.msra.mxu3 %v517_v9  ;;  %v365_v30 = vld [vmem:[%s7376_s11 + $0x20] sm:$0xff]  ;;  %v436_v31 = vld [vmem:[%s7376_s11 + $0x258] sm:$0xff]  ;;  %v366_v32 = vld [vmem:[%s7376_s11 + $0x28] sm:$0xff] }
  0x28   : > { %529 = vmatpush.msra.mxu0 %v516_v10  ;;  %6058 = vmatpush.msra.mxu2 %v516_v10  ;;  %v437_v33 = vld [vmem:[%s7376_s11 + $0x260] sm:$0xff]  ;;  %v367_v34 = vld [vmem:[%s7376_s11 + $0x30] sm:$0xff]  ;;  %v438_v35 = vld [vmem:[%s7376_s11 + $0x268] sm:$0xff] }
  0x29   : > { %6059 = vmatpush.msra.mxu3 %v516_v10  ;;  %v368_v36 = vld [vmem:[%s7376_s11 + $0x38] sm:$0xff]  ;;  %v439_v37 = vld [vmem:[%s7376_s11 + $0x270] sm:$0xff]  ;;  %v369_v38 = vld [vmem:[%s7376_s11 + $0x40] sm:$0xff] }
  0x2a   : > { %530 = vmatpush.msra.mxu0 %v515_v11  ;;  %6060 = vmatpush.msra.mxu2 %v515_v11  ;;  %v440_v39 = vld [vmem:[%s7376_s11 + $0x278] sm:$0xff]  ;;  %v370_v40 = vld [vmem:[%s7376_s11 + $0x48] sm:$0xff]  ;;  %v441_v41 = vld [vmem:[%s7376_s11 + $0x280] sm:$0xff] }
  0x2b   : > { %6061 = vmatpush.msra.mxu3 %v515_v11  ;;  %v371_v42 = vld [vmem:[%s7376_s11 + $0x50] sm:$0xff]  ;;  %v442_v43 = vld [vmem:[%s7376_s11 + $0x288] sm:$0xff]  ;;  %v372_v44 = vld [vmem:[%s7376_s11 + $0x58] sm:$0xff] }
  0x2c   : > { %531 = vmatpush.msra.mxu0 %v514_v12  ;;  %6062 = vmatpush.msra.mxu2 %v514_v12  ;;  %v443_v45 = vld [vmem:[%s7376_s11 + $0x290] sm:$0xff]  ;;  %v373_v48 = vld [vmem:[%s7376_s11 + $0x60] sm:$0xff]  ;;  %v444_v49 = vld [vmem:[%s7376_s11 + $0x298] sm:$0xff] }
  0x2d   : > { %6063 = vmatpush.msra.mxu3 %v514_v12  ;;  %v1121_v46 = vld [vmem:[#allocation4 + $0x10] sm:$0xff]  ;;  %v1120_v47 = vld [vmem:[#allocation4 + $0x8] sm:$0xff]  ;;  %v1119_v50 = vld [vmem:[#allocation4 + $0x18] sm:$0xff] }
  0x2e   : > { %532 = vmatpush.msra.mxu0 %v513_v13  ;;  %6064 = vmatpush.msra.mxu2 %v513_v13  ;;  %v1118_v51 = vld [vmem:[#allocation4] sm:$0xff]  ;;  %v375_v54 = vld [vmem:[%s7376_s11 + $0x70] sm:$0xff]  ;;  %v376_v56 = vld [vmem:[%s7376_s11 + $0x78] sm:$0xff] }
  0x2f   : > { %6065 = vmatpush.msra.mxu3 %v513_v13  ;;  %1571 = vmatpush.msra.mxu1 %v1121_v46  ;;  %v374_v52 = vld [vmem:[%s7376_s11 + $0x68] sm:$0xff]  ;;  %v445_v53 = vld [vmem:[%s7376_s11 + $0x2a0] sm:$0xff]  ;;  %v447_v57 = vld [vmem:[%s7376_s11 + $0x2b0] sm:$0xff] }
  0x30   : > { %533 = vmatpush.msra.mxu0 %v512_v14  ;;  %6066 = vmatpush.msra.mxu2 %v512_v14  ;;  %v446_v55 = vld [vmem:[%s7376_s11 + $0x2a8] sm:$0xff]  ;;  %v504_v58 = vld [vmem:[%s7376_s11 + $0x478] sm:$0xff]  ;;  %v7490_v59 = vld [vmem:[%s14426_s4] ss:$0 sm:$0xff] }
  0x31   : > { %6067 = vmatpush.msra.mxu3 %v512_v14  ;;  %1572 = vmatpush.msra.mxu1 %v1120_v47  ;;  %v377_v61 = vld [vmem:[%s7376_s11 + $0x80] sm:$0xff]  ;;  %v448_v62 = vld [vmem:[%s7376_s11 + $0x2b8] sm:$0xff]  ;;  %v378_v3 = vld [vmem:[%s7376_s11 + $0x88] sm:$0xff] }
  0x32   : > { %534 = vmatpush.msra.mxu0 %v511_v15  ;;  %6068 = vmatpush.msra.mxu2 %v511_v15  ;;  %v449_v4 = vld [vmem:[%s7376_s11 + $0x2c0] sm:$0xff]  ;;  %v379_v9 = vld [vmem:[%s7376_s11 + $0x90] sm:$0xff]  ;;  %v450_v10 = vld [vmem:[%s7376_s11 + $0x2c8] sm:$0xff] }
  0x33   : > { %6069 = vmatpush.msra.mxu3 %v511_v15  ;;  %1573 = vmatpush.msra.mxu1 %v1119_v50  ;;  %v380_v15 = vld [vmem:[%s7376_s11 + $0x98] sm:$0xff] }
  0x34   : > { %535 = vmatpush.msra.mxu0 %v510_v16  ;;  %6070 = vmatpush.msra.mxu2 %v510_v16 }
  0x35   : > { %6071 = vmatpush.msra.mxu3 %v510_v16  ;;  %1574 = vmatpush.msra.mxu1 %v1118_v51  ;;  %v451_v16 = vld [vmem:[%s7376_s11 + $0x2d0] sm:$0xff] }
  0x36   : > { %536 = vmatpush.msra.mxu0 %v509_v17  ;;  %6072 = vmatpush.msra.mxu2 %v509_v17 }
  0x37   : > { %6073 = vmatpush.msra.mxu3 %v509_v17 }
  0x38   : > { %537 = vmatpush.msra.mxu0 %v508_v18  ;;  %6074 = vmatpush.msra.mxu2 %v508_v18 }
  0x39   : > { %6075 = vmatpush.msra.mxu3 %v508_v18 }
  0x3a   : > { %538 = vmatpush.msra.mxu0 %v507_v19  ;;  %6076 = vmatpush.msra.mxu2 %v507_v19 }
  0x3b   : > { %6077 = vmatpush.msra.mxu3 %v507_v19 }
  0x3c   : > { %539 = vmatpush.msra.mxu0 %v506_v20  ;;  %6078 = vmatpush.msra.mxu2 %v506_v20 }
  0x3d   : > { %6079 = vmatpush.msra.mxu3 %v506_v20 }
  0x3e   : > { %540 = vmatpush.msra.mxu0 %v505_v21  ;;  %6080 = vmatpush.msra.mxu2 %v505_v21 }
  0x3f   : > { %541 = vmatmul.f32.vlgmr.msra.gmra.mxu0 %v361_v22  ;;  %754 = vmatmul.f32.vlgmr.msra.gmra.mxu2 %v432_v23  ;;  %v381_v22 = vld [vmem:[%s7376_s11 + $0xa0] sm:$0xff]  ;;  %v452_v23 = vld [vmem:[%s7376_s11 + $0x2d8] sm:$0xff] }
  0x40   : > { %6081 = vmatpush.msra.mxu3 %v505_v21 }
  0x41   : > { %970 = vmatmul.f32.vlgmr.msra.gmra.mxu3 %v504_v58 }
  0x42   : > { %6082 = vmatpush.msrb.mxu3 %v1121_v46  ;;  %v384_v46 = vld [vmem:[%s7376_s11 + $0xb8] sm:$0xff] }
  0x44   : > { %6083 = vmatpush.msrb.mxu3 %v1120_v47  ;;  %v455_v47 = vld [vmem:[%s7376_s11 + $0x2f0] sm:$0xff] }
  0x46   : > { %6084 = vmatpush.msrb.mxu3 %v1119_v50 }
  0x47   : > { %544 = vmatmul.f32.gmra.mxu0 %v362_v24  ;;  %757 = vmatmul.f32.gmra.mxu2 %v433_v25 }
  0x48   : > { %6085 = vmatpush.msrb.mxu3 %v1118_v51 }
  0x4f   : > { %547 = vmatmul.f32.gmra.mxu0 %v363_v26  ;;  %760 = vmatmul.f32.gmra.mxu2 %v434_v27 }
  0x57   : > { %550 = vmatmul.f32.gmra.mxu0 %v364_v28  ;;  %763 = vmatmul.f32.gmra.mxu2 %v435_v29 }
  0x5f   : > { %553 = vmatmul.f32.gmra.mxu0 %v365_v30  ;;  %766 = vmatmul.f32.gmra.mxu2 %v436_v31  ;;  %v382_v30 = vld [vmem:[%s7376_s11 + $0xa8] sm:$0xff]  ;;  %v453_v31 = vld [vmem:[%s7376_s11 + $0x2e0] sm:$0xff] }
  0x67   : > { %556 = vmatmul.f32.gmra.mxu0 %v366_v32  ;;  %769 = vmatmul.f32.gmra.mxu2 %v437_v33 }
  0x6f   : > { %559 = vmatmul.f32.gmra.mxu0 %v367_v34  ;;  %772 = vmatmul.f32.gmra.mxu2 %v438_v35 }
  0x77   : > { %562 = vmatmul.f32.gmra.mxu0 %v368_v36  ;;  %775 = vmatmul.f32.gmra.mxu2 %v439_v37 }
  0x7f   : > { %565 = vmatmul.f32.gmra.mxu0 %v369_v38  ;;  %778 = vmatmul.f32.gmra.mxu2 %v440_v39  ;;  %v383_v38 = vld [vmem:[%s7376_s11 + $0xb0] sm:$0xff]  ;;  %v454_v39 = vld [vmem:[%s7376_s11 + $0x2e8] sm:$0xff] }
  0x87   : > { %568 = vmatmul.f32.gmra.mxu0 %v370_v40  ;;  %781 = vmatmul.f32.gmra.mxu2 %v441_v41 }
  0x8f   : > { %571 = vmatmul.f32.gmra.mxu0 %v371_v42  ;;  %784 = vmatmul.f32.gmra.mxu2 %v442_v43 }
  0x97   : > { %574 = vmatmul.f32.gmra.mxu0 %v372_v44  ;;  %787 = vmatmul.f32.gmra.mxu2 %v443_v45 }
  0x9f   : > { %577 = vmatmul.f32.gmra.mxu0 %v373_v48  ;;  %790 = vmatmul.f32.gmra.mxu2 %v444_v49 }
  0xa7   : > { %580 = vmatmul.f32.gmra.mxu0 %v374_v52  ;;  %793 = vmatmul.f32.gmra.mxu2 %v445_v53 }
  0xaf   : > { %583 = vmatmul.f32.gmra.mxu0 %v375_v54  ;;  %796 = vmatmul.f32.gmra.mxu2 %v446_v55  ;;  %v385_v54 = vld [vmem:[%s7376_s11 + $0xc0] sm:$0xff]  ;;  %v456_v55 = vld [vmem:[%s7376_s11 + $0x2f8] sm:$0xff] }
  0xb7   : > { %586 = vmatmul.f32.gmra.mxu0 %v376_v56  ;;  %799 = vmatmul.f32.gmra.mxu2 %v447_v57 }
  0xbc   : > { %v542_v60 = vpop.f32.mrf.mxu0 }
  0xbd   : > { %v7495_v63 = vadd.f32 %v7490_v59, %v542_v60 }
  0xbf   : > { %15548 = vst [vmem:[#allocation12_spill] sm:$0xff] %v7495_v63  ;;  %v14470_v0 = vmax.f32 %v7495_v63, 0.0  ;;  %589 = vmatmul.f32.gmra.mxu0 %v377_v61  ;;  %802 = vmatmul.f32.gmra.mxu2 %v448_v62 }
  0xc1   : > { %5897 = vmatmul.msk.f32.vlgmr.msra.gmra.mxu1 %vm1126_vm0, %v14470_v0 }
  0xc2   : > { %v7501_v1 = vpop.f32.mrf.mxu2 }
  0xc4   : > { %v545_v2 = vpop.f32.mrf.mxu0 }
  0xc5   : > { %v7506_v5 = vadd.f32 %v7490_v59, %v545_v2  ;;  %v386_v2 = vld [vmem:[%s7376_s11 + $0xc8] sm:$0xff] }
  0xc7   : > { %15549 = vst [vmem:[#allocation13_spill] sm:$0xff] %v7506_v5  ;;  %v14466_v6 = vmax.f32 %v7506_v5, 0.0  ;;  %592 = vmatmul.f32.gmra.mxu0 %v378_v3  ;;  %805 = vmatmul.f32.gmra.mxu2 %v449_v4  ;;  %v457_v3 = vld [vmem:[%s7376_s11 + $0x300] sm:$0xff] }
  0xc8   : > { %v489_v5 = vld [vmem:[%s7376_s11 + $0x400] sm:$0xff] }
  0xc9   : > { %5898 = vmatmul.msk.f32.gmra.mxu1 %vm1126_vm0, %v14466_v6 }
  0xca   : > { %v7512_v7 = vpop.f32.mrf.mxu2 }
  0xcc   : > { %v548_v8 = vpop.f32.mrf.mxu0 }
  0xcd   : > { %v7517_v11 = vadd.f32 %v7490_v59, %v548_v8 }
  0xcf   : > { %15550 = vst [vmem:[#allocation14_spill] sm:$0xff] %v7517_v11  ;;  %v14464_v12 = vmax.f32 %v7517_v11, 0.0  ;;  %595 = vmatmul.f32.gmra.mxu0 %v379_v9  ;;  %808 = vmatmul.f32.gmra.mxu2 %v450_v10 }
  0xd1   : > { %5899 = vmatmul.msk.f32.gmra.mxu1 %vm1126_vm0, %v14464_v12 }
  0xd2   : > { %v7523_v13 = vpop.f32.mrf.mxu2 }
  0xd3   : > { %15551 = vst [vmem:[#allocation15_spill] sm:$0xff] %v7523_v13  ;;  %v8472_v13 = vld [vmem:[%s7386_s17 + $0x10] sm:$0xff] }
  0xd4   : > { %v551_v14 = vpop.f32.mrf.mxu0  ;;  %15693 = vst [vmem:[#allocation154_spill] sm:$0xff] %v8472_v13 }
  0xd5   : > { %v7528_v17 = vadd.f32 %v7490_v59, %v551_v14 }
  0xd7   : > { %15552 = vst [vmem:[#allocation16_spill] sm:$0xff] %v7528_v17  ;;  %v14460_v18 = vmax.f32 %v7528_v17, 0.0  ;;  %598 = vmatmul.f32.gmra.mxu0 %v380_v15  ;;  %811 = vmatmul.f32.gmra.mxu2 %v451_v16  ;;  %v387_v16 = vld [vmem:[%s7376_s11 + $0xd0] sm:$0xff] }
  0xd9   : > { %5900 = vmatmul.msk.f32.gmra.mxu1 %vm1126_vm0, %v14460_v18 }
  0xda   : > { %v764_v19 = vpop.f32.mrf.mxu2 }
  0xdb   : > { %v7535_v20 = vadd.f32 %v7490_v59, %v764_v19  ;;  %v458_v19 = vld [vmem:[%s7376_s11 + $0x308] sm:$0xff] }
  0xdc   : > { %v554_v21 = vpop.f32.mrf.mxu0 }
  0xdd   : > { %15553 = vst [vmem:[#allocation17_spill] sm:$0xff] %v7535_v20  ;;  %v14436_v24 = vmax.f32 %v7535_v20, 0.0  ;;  %v7541_v25 = vadd.f32 %v7490_v59, %v554_v21 }
  0xdf   : > { %15554 = vst [vmem:[#allocation18_spill] sm:$0xff] %v7541_v25  ;;  %v14458_v26 = vmax.f32 %v7541_v25, 0.0  ;;  %601 = vmatmul.f32.gmra.mxu0 %v381_v22  ;;  %814 = vmatmul.f32.gmra.mxu2 %v452_v23  ;;  %v414_v25 = vld [vmem:[%s7376_s11 + $0x1a8] sm:$0xff] }
  0xe0   : > { %5971 = vmatmul.msk.f32.vlgmr.msrb.gmra.mxu3 %vm1126_vm0, %v14436_v24 }
  0xe1   : > { %5901 = vmatmul.msk.f32.gmra.mxu1 %vm1126_vm0, %v14458_v26 }
  0xe2   : > { %v767_v27 = vpop.f32.mrf.mxu2 }
  0xe3   : > { %v7551_v28 = vadd.f32 %v7490_v59, %v767_v27 }
  0xe4   : > { %v557_v29 = vpop.f32.mrf.mxu0 }
  0xe5   : > { %15555 = vst [vmem:[#allocation19_spill] sm:$0xff] %v7551_v28  ;;  %v14435_v32 = vmax.f32 %v7551_v28, 0.0  ;;  %v7557_v33 = vadd.f32 %v7490_v59, %v557_v29 }
  0xe7   : > { %15556 = vst [vmem:[#allocation20_spill] sm:$0xff] %v7557_v33  ;;  %v14457_v34 = vmax.f32 %v7557_v33, 0.0  ;;  %604 = vmatmul.f32.gmra.mxu0 %v382_v30  ;;  %817 = vmatmul.f32.gmra.mxu2 %v453_v31  ;;  %v388_v31 = vld [vmem:[%s7376_s11 + $0xd8] sm:$0xff] }
  0xe8   : > { %5972 = vmatmul.msk.f32.gmra.mxu3 %vm1126_vm0, %v14435_v32 }
  0xe9   : > { %5902 = vmatmul.msk.f32.gmra.mxu1 %vm1126_vm0, %v14457_v34 }
  0xea   : > { %v770_v35 = vpop.f32.mrf.mxu2 }
  0xeb   : > { %v7567_v36 = vadd.f32 %v7490_v59, %v770_v35  ;;  %v459_v35 = vld [vmem:[%s7376_s11 + $0x310] sm:$0xff] }
  0xec   : > { %v560_v37 = vpop.f32.mrf.mxu0 }
  0xed   : > { %15557 = vst [vmem:[#allocation21_spill] sm:$0xff] %v7567_v36  ;;  %v14434_v40 = vmax.f32 %v7567_v36, 0.0  ;;  %v7573_v41 = vadd.f32 %v7490_v59, %v560_v37  ;;  %v401_v36 = vld [vmem:[%s7376_s11 + $0x140] sm:$0xff] }
  0xef   : > { %15558 = vst [vmem:[#allocation22_spill] sm:$0xff] %v7573_v41  ;;  %v14456_v42 = vmax.f32 %v7573_v41, 0.0  ;;  %607 = vmatmul.f32.gmra.mxu0 %v383_v38  ;;  %820 = vmatmul.f32.gmra.mxu2 %v454_v39 }
  0xf0   : > { %5973 = vmatmul.msk.f32.gmra.mxu3 %vm1126_vm0, %v14434_v40 }
  0xf1   : > { %5903 = vmatmul.msk.f32.gmra.mxu1 %vm1126_vm0, %v14456_v42 }
  0xf2   : > { %v773_v43 = vpop.f32.mrf.mxu2 }
  0xf3   : > { %v7583_v44 = vadd.f32 %v7490_v59, %v773_v43 }
  0xf4   : > { %v563_v45 = vpop.f32.mrf.mxu0 }
  0xf5   : > { %15559 = vst [vmem:[#allocation23_spill] sm:$0xff] %v7583_v44  ;;  %v14433_v48 = vmax.f32 %v7583_v44, 0.0  ;;  %v7589_v49 = vadd.f32 %v7490_v59, %v563_v45 }
  0xf7   : > { %15560 = vst [vmem:[#allocation24_spill] sm:$0xff] %v7589_v49  ;;  %v14454_v50 = vmax.f32 %v7589_v49, 0.0  ;;  %610 = vmatmul.f32.gmra.mxu0 %v384_v46  ;;  %823 = vmatmul.f32.gmra.mxu2 %v455_v47  ;;  %v389_v47 = vld [vmem:[%s7376_s11 + $0xe0] sm:$0xff]  ;;  %v483_v49 = vld [vmem:[%s7376_s11 + $0x3d0] sm:$0xff] }
  0xf8   : > { %5974 = vmatmul.msk.f32.gmra.mxu3 %vm1126_vm0, %v14433_v48  ;;  %v464_v48 = vld [vmem:[%s7376_s11 + $0x338] sm:$0xff] }
  0xf9   : > { %5904 = vmatmul.msk.f32.gmra.mxu1 %vm1126_vm0, %v14454_v50 }
  0xfa   : > { %v776_v51 = vpop.f32.mrf.mxu2 }
  0xfb   : > { %v7599_v52 = vadd.f32 %v7490_v59, %v776_v51  ;;  %v460_v51 = vld [vmem:[%s7376_s11 + $0x318] sm:$0xff] }
  0xfc   : > { %v566_v53 = vpop.f32.mrf.mxu0 }
  0xfd   : > { %15561 = vst [vmem:[#allocation25_spill] sm:$0xff] %v7599_v52  ;;  %v14432_v56 = vmax.f32 %v7599_v52, 0.0  ;;  %v7605_v57 = vadd.f32 %v7490_v59, %v566_v53 }
  0xff   : > { %15562 = vst [vmem:[#allocation26_spill] sm:$0xff] %v7605_v57  ;;  %v14453_v58 = vmax.f32 %v7605_v57, 0.0  ;;  %613 = vmatmul.f32.gmra.mxu0 %v385_v54  ;;  %826 = vmatmul.f32.gmra.mxu2 %v456_v55 }
 0x100   : > { %5975 = vmatmul.msk.f32.gmra.mxu3 %vm1126_vm0, %v14432_v56  ;;  %v393_v56 = vld [vmem:[%s7376_s11 + $0x100] sm:$0xff] }
 0x101   : > { %5905 = vmatmul.msk.f32.gmra.mxu1 %vm1126_vm0, %v14453_v58  ;;  %v397_v58 = vld [vmem:[%s7376_s11 + $0x120] sm:$0xff] }
 0x102   : > { %v779_v60 = vpop.f32.mrf.mxu2 }
 0x103   : > { %v7615_v61 = vadd.f32 %v7490_v59, %v779_v60 }
 0x104   : > { %v569_v62 = vpop.f32.mrf.mxu0 }
 0x105   : > { %15563 = vst [vmem:[#allocation27_spill] sm:$0xff] %v7615_v61  ;;  %v14431_v4 = vmax.f32 %v7615_v61, 0.0  ;;  %v7621_v8 = vadd.f32 %v7490_v59, %v569_v62  ;;  %v400_v61 = vld [vmem:[%s7376_s11 + $0x138] sm:$0xff] }
 0x107   : > { %15564 = vst [vmem:[#allocation28_spill] sm:$0xff] %v7621_v8  ;;  %v14452_v9 = vmax.f32 %v7621_v8, 0.0  ;;  %616 = vmatmul.f32.gmra.mxu0 %v386_v2  ;;  %829 = vmatmul.f32.gmra.mxu2 %v457_v3  ;;  %v390_v3 = vld [vmem:[%s7376_s11 + $0xe8] sm:$0xff] }
 0x108   : > { %5976 = vmatmul.msk.f32.gmra.mxu3 %vm1126_vm0, %v14431_v4 }
 0x109   : > { %5906 = vmatmul.msk.f32.gmra.mxu1 %vm1126_vm0, %v14452_v9 }
 0x10a   : > { %v782_v10 = vpop.f32.mrf.mxu2 }
 0x10b   : > { %v7631_v14 = vadd.f32 %v7490_v59, %v782_v10  ;;  %v461_v10 = vld [vmem:[%s7376_s11 + $0x320] sm:$0xff] }
 0x10c   : > { %v572_v15 = vpop.f32.mrf.mxu0 }
 0x10d   : > { %15565 = vst [vmem:[#allocation29_spill] sm:$0xff] %v7631_v14  ;;  %v14449_v21 = vmax.f32 %v7631_v14, 0.0  ;;  %v7637_v22 = vadd.f32 %v7490_v59, %v572_v15  ;;  %v409_v14 = vld [vmem:[%s7376_s11 + $0x180] sm:$0xff] }
 0x10f   : > { %15566 = vst [vmem:[#allocation30_spill] sm:$0xff] %v7637_v22  ;;  %v14451_v23 = vmax.f32 %v7637_v22, 0.0  ;;  %619 = vmatmul.f32.gmra.mxu0 %v387_v16  ;;  %832 = vmatmul.f32.gmra.mxu2 %v458_v19 }
 0x110   : > { %5977 = vmatmul.msk.f32.gmra.mxu3 %vm1126_vm0, %v14449_v21 }
 0x111   : > { %5907 = vmatmul.msk.f32.gmra.mxu1 %vm1126_vm0, %v14451_v23 }
 0x112   : > { %v785_v27 = vpop.f32.mrf.mxu2 }
 0x113   : > { %v7647_v29 = vadd.f32 %v7490_v59, %v785_v27 }
 0x114   : > { %v575_v30 = vpop.f32.mrf.mxu0 }
 0x115   : > { %15567 = vst [vmem:[#allocation31_spill] sm:$0xff] %v7647_v29  ;;  %v14447_v37 = vmax.f32 %v7647_v29, 0.0  ;;  %v7653_v38 = vadd.f32 %v7490_v59, %v575_v30 }
 0x117   : > { %15568 = vst [vmem:[#allocation32_spill] sm:$0xff] %v7653_v38  ;;  %v14448_v39 = vmax.f32 %v7653_v38, 0.0  ;;  %622 = vmatmul.f32.gmra.mxu0 %v388_v31  ;;  %835 = vmatmul.f32.gmra.mxu2 %v459_v35  ;;  %v391_v35 = vld [vmem:[%s7376_s11 + $0xf0] sm:$0xff] }
 0x118   : > { %5978 = vmatmul.msk.f32.gmra.mxu3 %vm1126_vm0, %v14447_v37  ;;  %v396_v37 = vld [vmem:[%s7376_s11 + $0x118] sm:$0xff] }
 0x119   : > { %5908 = vmatmul.msk.f32.gmra.mxu1 %vm1126_vm0, %v14448_v39  ;;  %v467_v39 = vld [vmem:[%s7376_s11 + $0x350] sm:$0xff] }
 0x11a   : > { %v788_v43 = vpop.f32.mrf.mxu2 }
 0x11b   : > { %v7663_v45 = vadd.f32 %v7490_v59, %v788_v43  ;;  %v462_v43 = vld [vmem:[%s7376_s11 + $0x328] sm:$0xff] }
 0x11c   : > { %v578_v46 = vpop.f32.mrf.mxu0 }
 0x11d   : > { %15569 = vst [vmem:[#allocation33_spill] sm:$0xff] %v7663_v45  ;;  %v14444_v53 = vmax.f32 %v7663_v45, 0.0  ;;  %v7669_v54 = vadd.f32 %v7490_v59, %v578_v46 }
 0x11f   : > { %15570 = vst [vmem:[#allocation34_spill] sm:$0xff] %v7669_v54  ;;  %v14446_v55 = vmax.f32 %v7669_v54, 0.0  ;;  %625 = vmatmul.f32.gmra.mxu0 %v389_v47  ;;  %838 = vmatmul.f32.gmra.mxu2 %v460_v51 }
 0x120   : > { %5979 = vmatmul.msk.f32.gmra.mxu3 %vm1126_vm0, %v14444_v53 }
 0x121   : > { %5909 = vmatmul.msk.f32.gmra.mxu1 %vm1126_vm0, %v14446_v55 }
 0x122   : > { %v791_v60 = vpop.f32.mrf.mxu2 }
 0x123   : > { %v7679_v62 = vadd.f32 %v7490_v59, %v791_v60 }
 0x124   : > { %v581_v2 = vpop.f32.mrf.mxu0 }
 0x125   : > { %15571 = vst [vmem:[#allocation35_spill] sm:$0xff] %v7679_v62  ;;  %v14442_v15 = vmax.f32 %v7679_v62, 0.0  ;;  %v7685_v16 = vadd.f32 %v7490_v59, %v581_v2 }
 0x127   : > { %15572 = vst [vmem:[#allocation36_spill] sm:$0xff] %v7685_v16  ;;  %v14443_v19 = vmax.f32 %v7685_v16, 0.0  ;;  %628 = vmatmul.f32.gmra.mxu0 %v390_v3  ;;  %841 = vmatmul.f32.gmra.mxu2 %v461_v10  ;;  %v392_v10 = vld [vmem:[%s7376_s11 + $0xf8] sm:$0xff] }
 0x128   : > { %5980 = vmatmul.msk.f32.gmra.mxu3 %vm1126_vm0, %v14442_v15  ;;  %v395_v15 = vld [vmem:[%s7376_s11 + $0x110] sm:$0xff] }
 0x129   : > { %5910 = vmatmul.msk.f32.gmra.mxu1 %vm1126_vm0, %v14443_v19  ;;  %v466_v19 = vld [vmem:[%s7376_s11 + $0x348] sm:$0xff] }
 0x12a   : > { %v794_v27 = vpop.f32.mrf.mxu2 }
 0x12b   : > { %v7695_v30 = vadd.f32 %v7490_v59, %v794_v27  ;;  %v463_v27 = vld [vmem:[%s7376_s11 + $0x330] sm:$0xff] }
 0x12c   : > { %v584_v31 = vpop.f32.mrf.mxu0 }
 0x12d   : > { %15573 = vst [vmem:[#allocation37_spill] sm:$0xff] %v7695_v30  ;;  %v14439_v46 = vmax.f32 %v7695_v30, 0.0  ;;  %v7701_v47 = vadd.f32 %v7490_v59, %v584_v31 }
 0x12f   : > { %15574 = vst [vmem:[#allocation38_spill] sm:$0xff] %v7701_v47  ;;  %v14441_v51 = vmax.f32 %v7701_v47, 0.0  ;;  %631 = vmatmul.f32.gmra.mxu0 %v391_v35  ;;  %844 = vmatmul.f32.gmra.mxu2 %v462_v43 }
 0x130   : > { %5981 = vmatmul.msk.f32.gmra.mxu3 %vm1126_vm0, %v14439_v46 }
 0x131   : > { %5911 = vmatmul.msk.f32.gmra.mxu1 %vm1126_vm0, %v14441_v51 }
 0x132   : > { %v797_v60 = vpop.f32.mrf.mxu2 }
 0x133   : > { %v7711_v2 = vadd.f32 %v7490_v59, %v797_v60 }
 0x134   : > { %v587_v3 = vpop.f32.mrf.mxu0 }
 0x135   : > { %15575 = vst [vmem:[#allocation39_spill] sm:$0xff] %v7711_v2  ;;  %v14437_v31 = vmax.f32 %v7711_v2, 0.0  ;;  %v7717_v35 = vadd.f32 %v7490_v59, %v587_v3 }
 0x137   : > { %15576 = vst [vmem:[#allocation40_spill] sm:$0xff] %v7717_v35  ;;  %v14438_v43 = vmax.f32 %v7717_v35, 0.0  ;;  %634 = vmatmul.f32.gmra.mxu0 %v392_v10  ;;  %847 = vmatmul.f32.gmra.mxu2 %v463_v27 }
 0x138   : > { %5982 = vmatmul.msk.f32.gmra.mxu3 %vm1126_vm0, %v14437_v31  ;;  %v394_v31 = vld [vmem:[%s7376_s11 + $0x108] sm:$0xff] }
 0x139   : > { %5912 = vmatmul.msk.f32.gmra.mxu1 %vm1126_vm0, %v14438_v43  ;;  %v465_v43 = vld [vmem:[%s7376_s11 + $0x340] sm:$0xff] }
 0x13a   : > { %v800_v60 = vpop.f32.mrf.mxu2 }
 0x13b   : > { %v7727_v4 = vadd.f32 %v7490_v59, %v800_v60 }
 0x13c   : > { %v590_v3 = vpop.f32.mrf.mxu0 }
 0x13d   : > { %15577 = vst [vmem:[#allocation41_spill] sm:$0xff] %v7727_v4  ;;  %v14440_v10 = vmax.f32 %v7727_v4, 0.0  ;;  %v7733_v27 = vadd.f32 %v7490_v59, %v590_v3 }
 0x13e   : > { %v7735_v40 = vpop.f32.mrf.mxu1 }
 0x13f   : > { %15578 = vst [vmem:[#allocation42_spill] sm:$0xff] %v7733_v27  ;;  %v14469_v32 = vmax.f32 %v7733_v27, 0.0  ;;  %637 = vmatmul.f32.gmra.mxu0 %v393_v56  ;;  %850 = vmatmul.f32.gmra.mxu2 %v464_v48 }
 0x140   : > { %5983 = vmatmul.msk.f32.gmra.mxu3 %vm1126_vm0, %v14440_v10 }
 0x141   : > { %5913 = vmatmul.msk.f32.gmra.mxu1 %vm1126_vm0, %v14469_v32 }
 0x142   : > { %v803_v60 = vpop.f32.mrf.mxu2 }
 0x143   : > { %v7745_v24 = vadd.f32 %v7490_v59, %v803_v60 }
 0x144   : > { %v593_v3 = vpop.f32.mrf.mxu0 }
 0x145   : > { %15579 = vst [vmem:[#allocation43_spill] sm:$0xff] %v7745_v24  ;;  %v14445_v56 = vmax.f32 %v7745_v24, 0.0  ;;  %v7751_v48 = vadd.f32 %v7490_v59, %v593_v3 }
 0x146   : > { %v7753_v46 = vpop.f32.mrf.mxu1 }
 0x147   : > { %15580 = vst [vmem:[#allocation44_spill] sm:$0xff] %v7751_v48  ;;  %v14465_v10 = vmax.f32 %v7751_v48, 0.0  ;;  %640 = vmatmul.f32.gmra.mxu0 %v394_v31  ;;  %853 = vmatmul.f32.gmra.mxu2 %v465_v43 }
 0x148   : > { %5984 = vmatmul.msk.f32.gmra.mxu3 %vm1126_vm0, %v14445_v56 }
 0x149   : > { %5914 = vmatmul.msk.f32.gmra.mxu1 %vm1126_vm0, %v14465_v10  ;;  %v399_v10 = vld [vmem:[%s7376_s11 + $0x130] sm:$0xff] }
 0x14a   : > { %v806_v60 = vpop.f32.mrf.mxu2 }
 0x14b   : > { %v7763_v51 = vadd.f32 %v7490_v59, %v806_v60 }
 0x14c   : > { %v596_v3 = vpop.f32.mrf.mxu0 }
 0x14d   : > { %15581 = vst [vmem:[#allocation45_spill] sm:$0xff] %v7763_v51  ;;  %v14450_v31 = vmax.f32 %v7763_v51, 0.0  ;;  %v7769_v43 = vadd.f32 %v7490_v59, %v596_v3  ;;  %v403_v51 = vld [vmem:[%s7376_s11 + $0x150] sm:$0xff] }
 0x14e   : > { %v7771_v53 = vpop.f32.mrf.mxu1 }
 0x14f   : > { %15582 = vst [vmem:[#allocation46_spill] sm:$0xff] %v7769_v43  ;;  %v14463_v56 = vmax.f32 %v7769_v43, 0.0  ;;  %643 = vmatmul.f32.gmra.mxu0 %v395_v15  ;;  %856 = vmatmul.f32.gmra.mxu2 %v466_v19 }
 0x150   : > { %5985 = vmatmul.msk.f32.gmra.mxu3 %vm1126_vm0, %v14450_v31 }
 0x151   : > { %5915 = vmatmul.msk.f32.gmra.mxu1 %vm1126_vm0, %v14463_v56 }
 0x152   : > { %v809_v60 = vpop.f32.mrf.mxu2 }
 0x153   : > { %v7781_v55 = vadd.f32 %v7490_v59, %v809_v60  ;;  %v7798_v60 = vpop.f32.mrf.mxu3 }
 0x154   : > { %v599_v3 = vpop.f32.mrf.mxu0  ;;  %15585 = vst [vmem:[#allocation49_spill] sm:$0xff] %v7798_v60 }
 0x155   : > { %15583 = vst [vmem:[#allocation47_spill] sm:$0xff] %v7781_v55  ;;  %v14455_v15 = vmax.f32 %v7781_v55, 0.0  ;;  %v7787_v19 = vadd.f32 %v7490_v59, %v599_v3 }
 0x156   : > { %v7789_v21 = vpop.f32.mrf.mxu1 }
 0x157   : > { %15584 = vst [vmem:[#allocation48_spill] sm:$0xff] %v7787_v19  ;;  %v14459_v31 = vmax.f32 %v7787_v19, 0.0  ;;  %646 = vmatmul.f32.gmra.mxu0 %v396_v37  ;;  %859 = vmatmul.f32.gmra.mxu2 %v467_v39  ;;  %v468_v37 = vld [vmem:[%s7376_s11 + $0x358] sm:$0xff]  ;;  %v415_v19 = vld [vmem:[%s7376_s11 + $0x1b0] sm:$0xff] }
 0x158   : > { %5986 = vmatmul.msk.f32.gmra.mxu3 %vm1126_vm0, %v14455_v15 }
 0x159   : > { %5916 = vmatmul.msk.f32.gmra.mxu1 %vm1126_vm0, %v14459_v31  ;;  %v398_v31 = vld [vmem:[%s7376_s11 + $0x128] sm:$0xff] }
 0x15a   : > { %v812_v23 = vpop.f32.mrf.mxu2 }
 0x15b   : > { %v7801_v3 = vadd.f32 %v7490_v59, %v812_v23 }
 0x15c   : > { %v602_v9 = vpop.f32.mrf.mxu0 }
 0x15d   : > { %15586 = vst [vmem:[#allocation50_spill] sm:$0xff] %v7801_v3  ;;  %v14461_v39 = vmax.f32 %v7801_v3, 0.0  ;;  %v7807_v50 = vadd.f32 %v7490_v59, %v602_v9 }
 0x15e   : > { %v7809_v15 = vpop.f32.mrf.mxu1 }
 0x15f   : > { %15587 = vst [vmem:[#allocation51_spill] sm:$0xff] %v7807_v50  ;;  %v14462_v42 = vmax.f32 %v7807_v50, 0.0  ;;  %649 = vmatmul.f32.gmra.mxu0 %v397_v58  ;;  %862 = vmatmul.f32.gmra.mxu2 %v468_v37  ;;  %v469_v58 = vld [vmem:[%s7376_s11 + $0x360] sm:$0xff] }
 0x160   : > { %5987 = vmatmul.msk.f32.gmra.mxu3 %vm1126_vm0, %v14461_v39 }
 0x161   : > { %5917 = vmatmul.msk.f32.gmra.mxu1 %vm1126_vm0, %v14462_v42 }
 0x162   : > { %v815_v23 = vpop.f32.mrf.mxu2 }
 0x163   : > { %v7819_v34 = vadd.f32 %v7490_v59, %v815_v23  ;;  %v7821_v9 = vpop.f32.mrf.mxu3 }
 0x164   : > { %v605_v26 = vpop.f32.mrf.mxu0 }
 0x165   : > { %15588 = vst [vmem:[#allocation52_spill] sm:$0xff] %v7819_v34  ;;  %v14467_v37 = vmax.f32 %v7819_v34, 0.0  ;;  %v7827_v18 = vadd.f32 %v7490_v59, %v605_v26 }
 0x166   : > { %v7829_v39 = vpop.f32.mrf.mxu1 }
 0x167   : > { %15589 = vst [vmem:[#allocation53_spill] sm:$0xff] %v7827_v18  ;;  %v14468_v42 = vmax.f32 %v7827_v18, 0.0  ;;  %652 = vmatmul.f32.gmra.mxu0 %v398_v31  ;;  %865 = vmatmul.f32.gmra.mxu2 %v469_v58  ;;  %v470_v31 = vld [vmem:[%s7376_s11 + $0x368] sm:$0xff]  ;;  %v484_v18 = vld [vmem:[%s7376_s11 + $0x3d8] sm:$0xff] }
 0x168   : > { %5988 = vmatmul.msk.f32.gmra.mxu3 %vm1126_vm0, %v14467_v37 }
 0x169   : > { %5918 = vmatmul.msk.f32.gmra.mxu1 %vm1126_vm0, %v14468_v42 }
 0x16a   : > { %v818_v23 = vpop.f32.mrf.mxu2 }
 0x16b   : > { %v7839_v56 = vadd.f32 %v7490_v59, %v818_v23  ;;  %v7841_v26 = vpop.f32.mrf.mxu3 }
 0x16c   : > { %v608_v12 = vpop.f32.mrf.mxu0 }
 0x16d   : > { %15590 = vst [vmem:[#allocation54_spill] sm:$0xff] %v7839_v56  ;;  %v14473_v58 = vmax.f32 %v7839_v56, 0.0  ;;  %v7847_v6 = vadd.f32 %v7490_v59, %v608_v12 }
 0x16e   : > { %v7849_v37 = vpop.f32.mrf.mxu1 }
 0x16f   : > { %15591 = vst [vmem:[#allocation55_spill] sm:$0xff] %v7847_v6  ;;  %v14474_v42 = vmax.f32 %v7847_v6, 0.0  ;;  %655 = vmatmul.f32.gmra.mxu0 %v399_v10  ;;  %868 = vmatmul.f32.gmra.mxu2 %v470_v31  ;;  %v471_v10 = vld [vmem:[%s7376_s11 + $0x370] sm:$0xff] }
 0x170   : > { %5989 = vmatmul.msk.f32.gmra.mxu3 %vm1126_vm0, %v14473_v58 }
 0x171   : > { %5919 = vmatmul.msk.f32.gmra.mxu1 %vm1126_vm0, %v14474_v42 }
 0x172   : > { %v821_v23 = vpop.f32.mrf.mxu2 }
 0x173   : > { %v7859_v32 = vadd.f32 %v7490_v59, %v821_v23  ;;  %v7861_v12 = vpop.f32.mrf.mxu3 }
 0x174   : > { %v611_v0 = vpop.f32.mrf.mxu0 }
 0x175   : > { %15592 = vst [vmem:[#allocation56_spill] sm:$0xff] %v7859_v32  ;;  %v14479_v31 = vmax.f32 %v7859_v32, 0.0  ;;  %v7867_v52 = vadd.f32 %v7490_v59, %v611_v0 }
 0x176   : > { %v7869_v58 = vpop.f32.mrf.mxu1 }
 0x177   : > { %15593 = vst [vmem:[#allocation57_spill] sm:$0xff] %v7867_v52  ;;  %v14480_v42 = vmax.f32 %v7867_v52, 0.0  ;;  %658 = vmatmul.f32.gmra.mxu0 %v400_v61  ;;  %871 = vmatmul.f32.gmra.mxu2 %v471_v10  ;;  %v472_v61 = vld [vmem:[%s7376_s11 + $0x378] sm:$0xff] }
 0x178   : > { %5990 = vmatmul.msk.f32.gmra.mxu3 %vm1126_vm0, %v14479_v31 }
 0x179   : > { %5920 = vmatmul.msk.f32.gmra.mxu1 %vm1126_vm0, %v14480_v42 }
 0x17a   : > { %v824_v23 = vpop.f32.mrf.mxu2 }
 0x17b   : > { %v7879_v44 = vadd.f32 %v7490_v59, %v824_v23  ;;  %v7881_v0 = vpop.f32.mrf.mxu3 }
 0x17c   : > { %v614_v56 = vpop.f32.mrf.mxu0 }
 0x17d   : > { %15594 = vst [vmem:[#allocation58_spill] sm:$0xff] %v7879_v44  ;;  %v14484_v10 = vmax.f32 %v7879_v44, 0.0  ;;  %v7889_v31 = vadd.f32 %v7490_v59, %v614_v56 }
 0x17e   : > { %v7886_v32 = vpop.f32.mrf.mxu1 }
 0x17f   : > { %15595 = vst [vmem:[#allocation59_spill] sm:$0xff] %v7889_v31  ;;  %661 = vmatmul.f32.gmra.mxu0 %v401_v36  ;;  %874 = vmatmul.f32.gmra.mxu2 %v472_v61  ;;  %v14487_v23 = vmax.f32 %v7889_v31, 0.0  ;;  %v402_v36 = vld [vmem:[%s7376_s11 + $0x148] sm:$0xff]  ;;  %v473_v61 = vld [vmem:[%s7376_s11 + $0x380] sm:$0xff] }
 0x180   : > { %5991 = vmatmul.msk.f32.gmra.mxu3 %vm1126_vm0, %v14484_v10 }
 0x181   : > { %5921 = vmatmul.msk.f32.gmra.mxu1 %vm1126_vm0, %v14487_v23 }
 0x182   : > { %v827_v42 = vpop.f32.mrf.mxu2 }
 0x183   : > { %v7899_v34 = vadd.f32 %v7490_v59, %v827_v42  ;;  %v7901_v28 = vpop.f32.mrf.mxu3 }
 0x184   : > { %v617_v56 = vpop.f32.mrf.mxu0 }
 0x185   : > { %15596 = vst [vmem:[#allocation60_spill] sm:$0xff] %v7899_v34  ;;  %v14490_v44 = vmax.f32 %v7899_v34, 0.0  ;;  %v7907_v10 = vadd.f32 %v7490_v59, %v617_v56 }
 0x186   : > { %v7909_v3 = vpop.f32.mrf.mxu1 }
 0x187   : > { %15597 = vst [vmem:[#allocation61_spill] sm:$0xff] %v7907_v10  ;;  %v14492_v20 = vmax.f32 %v7907_v10, 0.0  ;;  %664 = vmatmul.f32.gmra.mxu0 %v402_v36  ;;  %877 = vmatmul.f32.gmra.mxu2 %v473_v61  ;;  %v474_v36 = vld [vmem:[%s7376_s11 + $0x388] sm:$0xff] }
 0x188   : > { %5992 = vmatmul.msk.f32.gmra.mxu3 %vm1126_vm0, %v14490_v44  ;;  %v410_v10 = vld [vmem:[%s7376_s11 + $0x188] sm:$0xff] }
 0x189   : > { %5922 = vmatmul.msk.f32.gmra.mxu1 %vm1126_vm0, %v14492_v20 }
 0x18a   : > { %v830_v42 = vpop.f32.mrf.mxu2 }
 0x18b   : > { %v7918_v23 = vpop.f32.mrf.mxu3  ;;  %v7921_v56 = vadd.f32 %v7490_v59, %v830_v42 }
 0x18c   : > { %15598 = vst [vmem:[#allocation62_spill] sm:$0xff] %v7918_v23  ;;  %v620_v55 = vpop.f32.mrf.mxu0  ;;  %v8581_v23 = vld [vmem:[%s7386_s17 + $0x20] sm:$0xff] }
 0x18d   : > { %15599 = vst [vmem:[#allocation63_spill] sm:$0xff] %v7921_v56  ;;  %v7926_v61 = vadd.f32 %v7490_v59, %v620_v55  ;;  %v14496_v44 = vmax.f32 %v7921_v56, 0.0 }
 0x18e   : > { %v7929_v34 = vpop.f32.mrf.mxu1  ;;  %15718 = vst [vmem:[#allocation174_spill] sm:$0xff] %v8581_v23 }
 0x18f   : > { %15600 = vst [vmem:[#allocation64_spill] sm:$0xff] %v7926_v61  ;;  %667 = vmatmul.f32.gmra.mxu0 %v403_v51  ;;  %880 = vmatmul.f32.gmra.mxu2 %v474_v36  ;;  %v14498_v42 = vmax.f32 %v7926_v61, 0.0  ;;  %v404_v51 = vld [vmem:[%s7376_s11 + $0x158] sm:$0xff]  ;;  %v475_v36 = vld [vmem:[%s7376_s11 + $0x390] sm:$0xff] }
 0x190   : > { %5993 = vmatmul.msk.f32.gmra.mxu3 %vm1126_vm0, %v14496_v44  ;;  %v480_v61 = vld [vmem:[%s7376_s11 + $0x3b8] sm:$0xff] }
 0x191   : > { %5923 = vmatmul.msk.f32.gmra.mxu1 %vm1126_vm0, %v14498_v42 }
 0x192   : > { %v833_v20 = vpop.f32.mrf.mxu2 }
 0x193   : > { %v7939_v55 = vadd.f32 %v7490_v59, %v833_v20  ;;  %v7941_v24 = vpop.f32.mrf.mxu3 }
 0x194   : > { %15602 = vst [vmem:[#allocation66_spill] sm:$0xff] %v7941_v24  ;;  %v623_v4 = vpop.f32.mrf.mxu0 }
 0x195   : > { %15601 = vst [vmem:[#allocation65_spill] sm:$0xff] %v7939_v55  ;;  %v14503_v56 = vmax.f32 %v7939_v55, 0.0  ;;  %v7947_v44 = vadd.f32 %v7490_v59, %v623_v4 }
 0x196   : > { %v7949_v2 = vpop.f32.mrf.mxu1 }
 0x197   : > { %15603 = vst [vmem:[#allocation67_spill] sm:$0xff] %v7947_v44  ;;  %670 = vmatmul.f32.gmra.mxu0 %v404_v51  ;;  %883 = vmatmul.f32.gmra.mxu2 %v475_v36  ;;  %v14504_v42 = vmax.f32 %v7947_v44, 0.0  ;;  %v405_v51 = vld [vmem:[%s7376_s11 + $0x160] sm:$0xff]  ;;  %v476_v36 = vld [vmem:[%s7376_s11 + $0x398] sm:$0xff] }
 0x198   : > { %5994 = vmatmul.msk.f32.gmra.mxu3 %vm1126_vm0, %v14503_v56 }
 0x199   : > { %5924 = vmatmul.msk.f32.gmra.mxu1 %vm1126_vm0, %v14504_v42 }
 0x19a   : > { %v836_v20 = vpop.f32.mrf.mxu2 }
 0x19b   : > { %v7958_v35 = vpop.f32.mrf.mxu3  ;;  %v7961_v4 = vadd.f32 %v7490_v59, %v836_v20 }
 0x19c   : > { %15604 = vst [vmem:[#allocation68_spill] sm:$0xff] %v7958_v35  ;;  %v626_v30 = vpop.f32.mrf.mxu0 }
 0x19d   : > { %15605 = vst [vmem:[#allocation69_spill] sm:$0xff] %v7961_v4  ;;  %v14508_v47 = vmax.f32 %v7961_v4, 0.0  ;;  %v7967_v55 = vadd.f32 %v7490_v59, %v626_v30 }
 0x19e   : > { %v7969_v56 = vpop.f32.mrf.mxu1 }
 0x19f   : > { %15606 = vst [vmem:[#allocation70_spill] sm:$0xff] %v7967_v55  ;;  %673 = vmatmul.f32.gmra.mxu0 %v405_v51  ;;  %886 = vmatmul.f32.gmra.mxu2 %v476_v36  ;;  %v14510_v20 = vmax.f32 %v7967_v55, 0.0  ;;  %v406_v51 = vld [vmem:[%s7376_s11 + $0x168] sm:$0xff]  ;;  %v477_v36 = vld [vmem:[%s7376_s11 + $0x3a0] sm:$0xff] }
 0x1a0   : > { %5995 = vmatmul.msk.f32.gmra.mxu3 %vm1126_vm0, %v14508_v47 }
 0x1a1   : > { %5925 = vmatmul.msk.f32.gmra.mxu1 %vm1126_vm0, %v14510_v20 }
 0x1a2   : > { %v839_v42 = vpop.f32.mrf.mxu2 }
 0x1a3   : > { %v7979_v62 = vadd.f32 %v7490_v59, %v839_v42  ;;  %v7981_v30 = vpop.f32.mrf.mxu3 }
 0x1a4   : > { %15608 = vst [vmem:[#allocation72_spill] sm:$0xff] %v7981_v30  ;;  %v629_v16 = vpop.f32.mrf.mxu0 }
 0x1a5   : > { %15607 = vst [vmem:[#allocation71_spill] sm:$0xff] %v7979_v62  ;;  %v14514_v4 = vmax.f32 %v7979_v62, 0.0  ;;  %v7987_v47 = vadd.f32 %v7490_v59, %v629_v16 }
 0x1a6   : > { %v7989_v45 = vpop.f32.mrf.mxu1 }
 0x1a7   : > { %15609 = vst [vmem:[#allocation73_spill] sm:$0xff] %v7987_v47  ;;  %676 = vmatmul.f32.gmra.mxu0 %v406_v51  ;;  %889 = vmatmul.f32.gmra.mxu2 %v477_v36  ;;  %v14516_v42 = vmax.f32 %v7987_v47, 0.0  ;;  %v407_v51 = vld [vmem:[%s7376_s11 + $0x170] sm:$0xff]  ;;  %v478_v36 = vld [vmem:[%s7376_s11 + $0x3a8] sm:$0xff] }
 0x1a8   : > { %5996 = vmatmul.msk.f32.gmra.mxu3 %vm1126_vm0, %v14514_v4 }
 0x1a9   : > { %5926 = vmatmul.msk.f32.gmra.mxu1 %vm1126_vm0, %v14516_v42 }
 0x1aa   : > { %v842_v20 = vpop.f32.mrf.mxu2 }
 0x1ab   : > { %v7998_v55 = vpop.f32.mrf.mxu3  ;;  %v8001_v16 = vadd.f32 %v7490_v59, %v842_v20 }
 0x1ac   : > { %15610 = vst [vmem:[#allocation74_spill] sm:$0xff] %v7998_v55  ;;  %v632_v54 = vpop.f32.mrf.mxu0 }
 0x1ad   : > { %15611 = vst [vmem:[#allocation75_spill] sm:$0xff] %v8001_v16  ;;  %v14520_v62 = vmax.f32 %v8001_v16, 0.0  ;;  %v8009_v47 = vadd.f32 %v7490_v59, %v632_v54 }
 0x1ae   : > { %v8006_v4 = vpop.f32.mrf.mxu1 }
 0x1af   : > { %679 = vmatmul.f32.gmra.mxu0 %v407_v51  ;;  %892 = vmatmul.f32.gmra.mxu2 %v478_v36  ;;  %15612 = vst [vmem:[#allocation76_spill] sm:$0xff] %v8009_v47  ;;  %v14522_v20 = vmax.f32 %v8009_v47, 0.0  ;;  %v408_v51 = vld [vmem:[%s7376_s11 + $0x178] sm:$0xff]  ;;  %v479_v36 = vld [vmem:[%s7376_s11 + $0x3b0] sm:$0xff] }
 0x1b0   : > { %5997 = vmatmul.msk.f32.gmra.mxu3 %vm1126_vm0, %v14520_v62 }
 0x1b1   : > { %5927 = vmatmul.msk.f32.gmra.mxu1 %vm1126_vm0, %v14522_v20 }
 0x1b2   : > { %v845_v42 = vpop.f32.mrf.mxu2 }
 0x1b3   : > { %v8016_v29 = vadd.f32 %v7490_v59, %v845_v42  ;;  %v8018_v44 = vpop.f32.mrf.mxu3 }
 0x1b4   : > { %15614 = vst [vmem:[#allocation78_spill] sm:$0xff] %v8018_v44  ;;  %v635_v54 = vpop.f32.mrf.mxu0 }
 0x1b5   : > { %15613 = vst [vmem:[#allocation77_spill] sm:$0xff] %v8016_v29  ;;  %v14527_v16 = vmax.f32 %v8016_v29, 0.0  ;;  %v8027_v62 = vadd.f32 %v7490_v59, %v635_v54 }
 0x1b6   : > { %v8029_v38 = vpop.f32.mrf.mxu1 }
 0x1b7   : > { %15615 = vst [vmem:[#allocation79_spill] sm:$0xff] %v8027_v62  ;;  %682 = vmatmul.f32.gmra.mxu0 %v408_v51  ;;  %895 = vmatmul.f32.gmra.mxu2 %v479_v36  ;;  %v14529_v42 = vmax.f32 %v8027_v62, 0.0 }
 0x1b8   : > { %5998 = vmatmul.msk.f32.gmra.mxu3 %vm1126_vm0, %v14527_v16 }
 0x1b9   : > { %5928 = vmatmul.msk.f32.gmra.mxu1 %vm1126_vm0, %v14529_v42 }
 0x1ba   : > { %v848_v20 = vpop.f32.mrf.mxu2 }
 0x1bb   : > { %v8035_v47 = vpop.f32.mrf.mxu3  ;;  %v8043_v51 = vadd.f32 %v7490_v59, %v848_v20 }
 0x1bc   : > { %15616 = vst [vmem:[#allocation80_spill] sm:$0xff] %v8035_v47  ;;  %v638_v54 = vpop.f32.mrf.mxu0 }
 0x1bd   : > { %15617 = vst [vmem:[#allocation81_spill] sm:$0xff] %v8043_v51  ;;  %v14533_v29 = vmax.f32 %v8043_v51, 0.0  ;;  %v8049_v16 = vadd.f32 %v7490_v59, %v638_v54  ;;  %v481_v54 = vld [vmem:[%s7376_s11 + $0x3c0] sm:$0xff] }
 0x1be   : > { %v8045_v36 = vpop.f32.mrf.mxu1 }
 0x1bf   : > { %15618 = vst [vmem:[#allocation82_spill] sm:$0xff] %v8049_v16  ;;  %685 = vmatmul.f32.gmra.mxu0 %v409_v14  ;;  %898 = vmatmul.f32.gmra.mxu2 %v480_v61  ;;  %v14535_v62 = vmax.f32 %v8049_v16, 0.0 }
 0x1c0   : > { %5999 = vmatmul.msk.f32.gmra.mxu3 %vm1126_vm0, %v14533_v29 }
 0x1c1   : > { %5929 = vmatmul.msk.f32.gmra.mxu1 %vm1126_vm0, %v14535_v62 }
 0x1c2   : > { %v851_v42 = vpop.f32.mrf.mxu2 }
 0x1c3   : > { %v8055_v22 = vpop.f32.mrf.mxu3  ;;  %v8063_v14 = vadd.f32 %v7490_v59, %v851_v42 }
 0x1c4   : > { %15619 = vst [vmem:[#allocation83_spill] sm:$0xff] %v8055_v22  ;;  %v641_v20 = vpop.f32.mrf.mxu0 }
 0x1c5   : > { %15620 = vst [vmem:[#allocation84_spill] sm:$0xff] %v8063_v14  ;;  %v8066_v61 = vadd.f32 %v7490_v59, %v641_v20  ;;  %v14538_v29 = vmax.f32 %v8063_v14, 0.0 }
 0x1c6   : > { %v8068_v51 = vpop.f32.mrf.mxu1 }
 0x1c7   : > { %15621 = vst [vmem:[#allocation85_spill] sm:$0xff] %v8066_v61  ;;  %688 = vmatmul.f32.gmra.mxu0 %v410_v10  ;;  %901 = vmatmul.f32.gmra.mxu2 %v481_v54  ;;  %v14541_v8 = vmax.f32 %v8066_v61, 0.0  ;;  %v411_v10 = vld [vmem:[%s7376_s11 + $0x190] sm:$0xff]  ;;  %v482_v54 = vld [vmem:[%s7376_s11 + $0x3c8] sm:$0xff] }
 0x1c8   : > { %6000 = vmatmul.msk.f32.gmra.mxu3 %vm1126_vm0, %v14538_v29 }
 0x1c9   : > { %5930 = vmatmul.msk.f32.gmra.mxu1 %vm1126_vm0, %v14541_v8 }
 0x1ca   : > { %v854_v62 = vpop.f32.mrf.mxu2 }
 0x1cb   : > { %v8075_v31 = vpop.f32.mrf.mxu3  ;;  %v8081_v42 = vadd.f32 %v7490_v59, %v854_v62 }
 0x1cc   : > { %15622 = vst [vmem:[#allocation86_spill] sm:$0xff] %v8075_v31  ;;  %v644_v20 = vpop.f32.mrf.mxu0  ;;  %v492_v31 = vld [vmem:[%s7376_s11 + $0x418] sm:$0xff] }
 0x1cd   : > { %15623 = vst [vmem:[#allocation87_spill] sm:$0xff] %v8081_v42  ;;  %v8086_v57 = vadd.f32 %v7490_v59, %v644_v20  ;;  %v14544_v29 = vmax.f32 %v8081_v42, 0.0 }
 0x1ce   : > { %v8089_v14 = vpop.f32.mrf.mxu1 }
 0x1cf   : > { %15624 = vst [vmem:[#allocation88_spill] sm:$0xff] %v8086_v57  ;;  %691 = vmatmul.f32.gmra.mxu0 %v411_v10  ;;  %904 = vmatmul.f32.gmra.mxu2 %v482_v54  ;;  %v14547_v52 = vmax.f32 %v8086_v57, 0.0  ;;  %v412_v54 = vld [vmem:[%s7376_s11 + $0x198] sm:$0xff] }
 0x1d0   : > { %6001 = vmatmul.msk.f32.gmra.mxu3 %vm1126_vm0, %v14544_v29 }
 0x1d1   : > { %5931 = vmatmul.msk.f32.gmra.mxu1 %vm1126_vm0, %v14547_v52 }
 0x1d2   : > { %v857_v62 = vpop.f32.mrf.mxu2 }
 0x1d3   : > { %v8095_v8 = vpop.f32.mrf.mxu3  ;;  %v8101_v20 = vadd.f32 %v7490_v59, %v857_v62 }
 0x1d4   : > { %15625 = vst [vmem:[#allocation89_spill] sm:$0xff] %v8095_v8  ;;  %v647_v10 = vpop.f32.mrf.mxu0  ;;  %v421_v8 = vld [vmem:[%s7376_s11 + $0x1e0] sm:$0xff] }
 0x1d5   : > { %15626 = vst [vmem:[#allocation90_spill] sm:$0xff] %v8101_v20  ;;  %v8106_v6 = vadd.f32 %v7490_v59, %v647_v10  ;;  %v14551_v29 = vmax.f32 %v8101_v20, 0.0  ;;  %v413_v10 = vld [vmem:[%s7376_s11 + $0x1a0] sm:$0xff] }
 0x1d6   : > { %v8109_v42 = vpop.f32.mrf.mxu1 }
 0x1d7   : > { %15627 = vst [vmem:[#allocation91_spill] sm:$0xff] %v8106_v6  ;;  %694 = vmatmul.f32.gmra.mxu0 %v412_v54  ;;  %907 = vmatmul.f32.gmra.mxu2 %v483_v49  ;;  %v14552_v41 = vmax.f32 %v8106_v6, 0.0 }
 0x1d8   : > { %6002 = vmatmul.msk.f32.gmra.mxu3 %vm1126_vm0, %v14551_v29 }
 0x1d9   : > { %5932 = vmatmul.msk.f32.gmra.mxu1 %vm1126_vm0, %v14552_v41 }
 0x1da   : > { %v860_v62 = vpop.f32.mrf.mxu2 }
 0x1db   : > { %v8121_v33 = vadd.f32 %v7490_v59, %v860_v62  ;;  %v8123_v49 = vpop.f32.mrf.mxu3 }
 0x1dc   : > { %v650_v52 = vpop.f32.mrf.mxu0  ;;  %15629 = vst [vmem:[#allocation93_spill] sm:$0xff] %v8123_v49 }
 0x1dd   : > { %15628 = vst [vmem:[#allocation92_spill] sm:$0xff] %v8121_v33  ;;  %v8126_v54 = vadd.f32 %v7490_v59, %v650_v52  ;;  %v14557_v29 = vmax.f32 %v8121_v33, 0.0 }
 0x1de   : > { %v8128_v20 = vpop.f32.mrf.mxu1 }
 0x1df   : > { %15630 = vst [vmem:[#allocation94_spill] sm:$0xff] %v8126_v54  ;;  %697 = vmatmul.f32.gmra.mxu0 %v413_v10  ;;  %910 = vmatmul.f32.gmra.mxu2 %v484_v18  ;;  %v14558_v41 = vmax.f32 %v8126_v54, 0.0  ;;  %v485_v10 = vld [vmem:[%s7376_s11 + $0x3e0] sm:$0xff] }
 0x1e0   : > { %6003 = vmatmul.msk.f32.gmra.mxu3 %vm1126_vm0, %v14557_v29 }
 0x1e1   : > { %5933 = vmatmul.msk.f32.gmra.mxu1 %vm1126_vm0, %v14558_v41 }
 0x1e2   : > { %v863_v50 = vpop.f32.mrf.mxu2 }
 0x1e3   : > { %v8136_v62 = vadd.f32 %v7490_v59, %v863_v50  ;;  %v8149_v29 = vpop.f32.mrf.mxu3 }
 0x1e4   : > { %v653_v52 = vpop.f32.mrf.mxu0  ;;  %15633 = vst [vmem:[#allocation97_spill] sm:$0xff] %v8149_v29 }
 0x1e5   : > { %15631 = vst [vmem:[#allocation95_spill] sm:$0xff] %v8136_v62  ;;  %v14562_v18 = vmax.f32 %v8136_v62, 0.0  ;;  %v8145_v6 = vadd.f32 %v7490_v59, %v653_v52 }
 0x1e6   : > { %v8147_v33 = vpop.f32.mrf.mxu1 }
 0x1e7   : > { %15632 = vst [vmem:[#allocation96_spill] sm:$0xff] %v8145_v6  ;;  %700 = vmatmul.f32.gmra.mxu0 %v414_v25  ;;  %913 = vmatmul.f32.gmra.mxu2 %v485_v10  ;;  %v14563_v50 = vmax.f32 %v8145_v6, 0.0  ;;  %v486_v25 = vld [vmem:[%s7376_s11 + $0x3e8] sm:$0xff] }
 0x1e8   : > { %6004 = vmatmul.msk.f32.gmra.mxu3 %vm1126_vm0, %v14562_v18 }
 0x1e9   : > { %5934 = vmatmul.msk.f32.gmra.mxu1 %vm1126_vm0, %v14563_v50 }
 0x1ea   : > { %v866_v41 = vpop.f32.mrf.mxu2 }
 0x1eb   : > { %v8156_v54 = vadd.f32 %v7490_v59, %v866_v41  ;;  %v8169_v41 = vpop.f32.mrf.mxu3 }
 0x1ec   : > { %v656_v52 = vpop.f32.mrf.mxu0  ;;  %15636 = vst [vmem:[#allocation100_spill] sm:$0xff] %v8169_v41  ;;  %v490_v41 = vld [vmem:[%s7376_s11 + $0x408] sm:$0xff] }
 0x1ed   : > { %15634 = vst [vmem:[#allocation98_spill] sm:$0xff] %v8156_v54  ;;  %v14568_v10 = vmax.f32 %v8156_v54, 0.0  ;;  %v8167_v18 = vadd.f32 %v7490_v59, %v656_v52  ;;  %v416_v52 = vld [vmem:[%s7376_s11 + $0x1b8] sm:$0xff] }
 0x1ee   : > { %v8164_v17 = vpop.f32.mrf.mxu1 }
 0x1ef   : > { %703 = vmatmul.f32.gmra.mxu0 %v415_v19  ;;  %916 = vmatmul.f32.gmra.mxu2 %v486_v25  ;;  %15635 = vst [vmem:[#allocation99_spill] sm:$0xff] %v8167_v18  ;;  %v14569_v50 = vmax.f32 %v8167_v18, 0.0  ;;  %v487_v25 = vld [vmem:[%s7376_s11 + $0x3f0] sm:$0xff] }
 0x1f0   : > { %6005 = vmatmul.msk.f32.gmra.mxu3 %vm1126_vm0, %v14568_v10 }
 0x1f1   : > { %5935 = vmatmul.msk.f32.gmra.mxu1 %vm1126_vm0, %v14569_v50 }
 0x1f2   : > { %v869_v62 = vpop.f32.mrf.mxu2 }
 0x1f3   : > { %v8176_v6 = vadd.f32 %v7490_v59, %v869_v62  ;;  %v8193_v18 = vpop.f32.mrf.mxu3 }
 0x1f4   : > { %v659_v19 = vpop.f32.mrf.mxu0  ;;  %15639 = vst [vmem:[#allocation103_spill] sm:$0xff] %v8193_v18 }
 0x1f5   : > { %15637 = vst [vmem:[#allocation101_spill] sm:$0xff] %v8176_v6  ;;  %v14572_v57 = vmax.f32 %v8176_v6, 0.0  ;;  %v8185_v54 = vadd.f32 %v7490_v59, %v659_v19  ;;  %v417_v59 = vld [vmem:[%s7376_s11 + $0x1c0] sm:$0xff]  ;;  %v488_v19 = vld [vmem:[%s7376_s11 + $0x3f8] sm:$0xff] }
 0x1f6   : > { %v8187_v10 = vpop.f32.mrf.mxu1 }
 0x1f7   : > { %15638 = vst [vmem:[#allocation102_spill] sm:$0xff] %v8185_v54  ;;  %706 = vmatmul.f32.gmra.mxu0 %v416_v52  ;;  %919 = vmatmul.f32.gmra.mxu2 %v487_v25  ;;  %v14575_v62 = vmax.f32 %v8185_v54, 0.0  ;;  %v8203_v52 = vld [vmem:[%s14426_s4] ss:$0 sm:$0xff] }
 0x1f8   : > { %6006 = vmatmul.msk.f32.gmra.mxu3 %vm1126_vm0, %v14572_v57  ;;  %v8208_v57 = vld [vmem:[#allocation5] ss:$0 sm:$0xff] }
 0x1f9   : > { %5936 = vmatmul.msk.f32.gmra.mxu1 %vm1126_vm0, %v14575_v62  ;;  %v8216_v62 = vadd.f32 %v8208_v57, %v7753_v46  ;;  %v8397_v44 = vadd.f32 %v8208_v57, %v7886_v32 }
 0x1fa   : > { %v872_v50 = vpop.f32.mrf.mxu2 }
 0x1fb   : > { %v8206_v25 = vadd.f32 %v8203_v52, %v872_v50  ;;  %15642 = vst [vmem:[#allocation106_spill] sm:$0xff] %v8216_v62 }
 0x1fc   : > { %v662_v43 = vpop.f32.mrf.mxu0  ;;  %15678 = vst [vmem:[#allocation141_spill] sm:$0xff] %v8397_v44 }
 0x1fd   : > { %15640 = vst [vmem:[#allocation104_spill] sm:$0xff] %v8206_v25  ;;  %v14581_v6 = vmax.f32 %v8206_v25, 0.0  ;;  %v8212_v54 = vadd.f32 %v8203_v52, %v662_v43  ;;  %v8229_v43 = vadd.f32 %v8208_v57, %v7735_v40  ;;  %v8237_v25 = vpop.f32.mrf.mxu3 }
 0x1fe   : > { %v8218_v11 = vpop.f32.mrf.mxu1  ;;  %15645 = vst [vmem:[#allocation109_spill] sm:$0xff] %v8237_v25 }
 0x1ff   : > { %15641 = vst [vmem:[#allocation105_spill] sm:$0xff] %v8212_v54  ;;  %709 = vmatmul.f32.gmra.mxu0 %v417_v59  ;;  %922 = vmatmul.f32.gmra.mxu2 %v488_v19  ;;  %v14582_v50 = vmax.f32 %v8212_v54, 0.0  ;;  %v2297_v59 = vand.u32 2147483647, %v8216_v62  ;;  %v418_v19 = vld [vmem:[%s7376_s11 + $0x1c8] sm:$0xff] }
 0x200   : > { %6007 = vmatmul.msk.f32.gmra.mxu3 %vm1126_vm0, %v14581_v6  ;;  %15644 = vst [vmem:[#allocation108_spill] sm:$0xff] %v8229_v43 }
 0x201   : > { %5937 = vmatmul.msk.f32.gmra.mxu1 %vm1126_vm0, %v14582_v50  ;;  %v2296_v50 = vand.u32 2147483647, %v8229_v43  ;;  %v2441_v54 = vsub.f32 0.0, %v2297_v59 }
 0x202   : > { %v875_v61 = vpop.f32.mrf.mxu2 }
 0x203   : > { %v8225_v48 = vadd.f32 %v8203_v52, %v875_v61  ;;  %v8242_v61 = vadd.f32 %v8208_v57, %v7771_v53  ;;  %v2440_v25 = vsub.f32 0.0, %v2296_v50  ;;  %v2586_v18 = vmul.f32 1.442695, %v2441_v54 }
 0x204   : > { %v665_v46 = vpop.f32.mrf.mxu0 }
 0x205   : > { %15643 = vst [vmem:[#allocation107_spill] sm:$0xff] %v8225_v48  ;;  %v14587_v6 = vmax.f32 %v8225_v48, 0.0  ;;  %v8245_v40 = vadd.f32 %v8203_v52, %v665_v46  ;;  %v2298_v27 = vand.u32 2147483647, %v8242_v61  ;;  %v8266_v48 = vadd.f32 %v8208_v57, %v7789_v21  ;;  %v8268_v29 = vpop.f32.mrf.mxu3 }
 0x206   : > { %15646 = vst [vmem:[#allocation110_spill] sm:$0xff] %v8242_v61  ;;  %v8248_v16 = vpop.f32.mrf.mxu1  ;;  %6189 = vpow2.f32 %v2586_v18  ;;  %v8285_v18 = vadd.f32 %v8208_v57, %v7809_v15 }
 0x207   : > { %15647 = vst [vmem:[#allocation111_spill] sm:$0xff] %v8245_v40  ;;  %712 = vmatmul.f32.gmra.mxu0 %v418_v19  ;;  %925 = vmatmul.f32.gmra.mxu2 %v489_v5  ;;  %v14589_v53 = vmax.f32 %v8245_v40, 0.0  ;;  %v419_v19 = vld [vmem:[%s7376_s11 + $0x1d0] sm:$0xff]  ;;  %v2442_v59 = vsub.f32 0.0, %v2298_v27 }
 0x208   : > { %6008 = vmatmul.msk.f32.gmra.mxu3 %vm1126_vm0, %v14587_v6  ;;  %15649 = vst [vmem:[#allocation113_spill] sm:$0xff] %v8266_v48  ;;  %v2300_v15 = vand.u32 2147483647, %v8285_v18 }
 0x209   : > { %5938 = vmatmul.msk.f32.gmra.mxu1 %vm1126_vm0, %v14589_v53  ;;  %15650 = vst [vmem:[#allocation114_spill] sm:$0xff] %v8268_v29  ;;  %v2588_v27 = vmul.f32 1.442695, %v2442_v59  ;;  %v2299_v53 = vand.u32 2147483647, %v8266_v48 }
 0x20a   : > { %v878_v63 = vpop.f32.mrf.mxu2  ;;  %15653 = vst [vmem:[#allocation117_spill] sm:$0xff] %v8285_v18  ;;  %v2444_v49 = vsub.f32 0.0, %v2300_v15 }
 0x20b   : > { %v8256_v46 = vadd.f32 %v8203_v52, %v878_v63  ;;  %v2584_v63 = vmul.f32 1.442695, %v2440_v25  ;;  %v420_v25 = vld [vmem:[%s7376_s11 + $0x1d8] sm:$0xff] }
 0x20c   : > { %v668_v5 = vpop.f32.mrf.mxu0  ;;  %v2592_v15 = vmul.f32 1.442695, %v2444_v49 }
 0x20d   : > { %15648 = vst [vmem:[#allocation112_spill] sm:$0xff] %v8256_v46  ;;  %v14591_v6 = vmax.f32 %v8256_v46, 0.0  ;;  %v8273_v50 = vadd.f32 %v8203_v52, %v668_v5  ;;  %6191 = vpow2.f32 %v2584_v63  ;;  %v491_v5 = vld [vmem:[%s7376_s11 + $0x410] sm:$0xff]  ;;  %v2443_v46 = vsub.f32 0.0, %v2299_v53 }
 0x20e   : > { %v8270_v54 = vpop.f32.mrf.mxu1  ;;  %6193 = vpow2.f32 %v2588_v27  ;;  %v8308_v27 = vpop.f32.mrf.mxu3 }
 0x20f   : > { %715 = vmatmul.f32.gmra.mxu0 %v419_v19  ;;  %928 = vmatmul.f32.gmra.mxu2 %v490_v41  ;;  %15651 = vst [vmem:[#allocation115_spill] sm:$0xff] %v8273_v50  ;;  %v14594_v40 = vmax.f32 %v8273_v50, 0.0 }
 0x210   : > { %6009 = vmatmul.msk.f32.gmra.mxu3 %vm1126_vm0, %v14591_v6  ;;  %v8293_v6 = vpop.eup %6189  ;;  %15658 = vst [vmem:[#allocation122_spill] sm:$0xff] %v8308_v27 }
 0x211   : > { %5939 = vmatmul.msk.f32.gmra.mxu1 %vm1126_vm0, %v14594_v40  ;;  %15654 = vst [vmem:[#allocation118_spill] sm:$0xff] %v8293_v6  ;;  %v8302_v50 = vadd.f32 1.0, %v8293_v6  ;;  %v8306_v40 = vadd.f32 %v8208_v57, %v7829_v39 }
 0x212   : > { %v881_v21 = vpop.f32.mrf.mxu2 }
 0x213   : > { %v8281_v19 = vadd.f32 %v8203_v52, %v881_v21  ;;  %15656 = vst [vmem:[#allocation120_spill] sm:$0xff] %v8302_v50  ;;  %6195 = vlog2.f32 %v8302_v50 }
 0x214   : > { %v671_v41 = vpop.f32.mrf.mxu0  ;;  %15657 = vst [vmem:[#allocation121_spill] sm:$0xff] %v8306_v40 }
 0x215   : > { %15652 = vst [vmem:[#allocation116_spill] sm:$0xff] %v8281_v19  ;;  %v14596_v59 = vmax.f32 %v8281_v19, 0.0  ;;  %v8296_v21 = vadd.f32 %v8203_v52, %v671_v41  ;;  %v8314_v41 = vpop.eup %6191 }
 0x216   : > { %v8299_v63 = vpop.f32.mrf.mxu1  ;;  %15659 = vst [vmem:[#allocation123_spill] sm:$0xff] %v8314_v41  ;;  %v8319_v6 = vpop.eup %6193  ;;  %v8324_v27 = vadd.f32 1.0, %v8314_v41 }
 0x217   : > { %15655 = vst [vmem:[#allocation119_spill] sm:$0xff] %v8296_v21  ;;  %718 = vmatmul.f32.gmra.mxu0 %v420_v25  ;;  %931 = vmatmul.f32.gmra.mxu2 %v491_v5  ;;  %v14601_v53 = vmax.f32 %v8296_v21, 0.0  ;;  %v2590_v5 = vmul.f32 1.442695, %v2443_v46 }
 0x218   : > { %6010 = vmatmul.msk.f32.gmra.mxu3 %vm1126_vm0, %v14596_v59  ;;  %15661 = vst [vmem:[#allocation125_spill] sm:$0xff] %v8319_v6  ;;  %v2301_v59 = vand.u32 2147483647, %v8306_v40 }
 0x219   : > { %15662 = vst [vmem:[#allocation126_spill] sm:$0xff] %v8324_v27  ;;  %5940 = vmatmul.msk.f32.gmra.mxu1 %vm1126_vm0, %v14601_v53  ;;  %6197 = vpow2.f32 %v2590_v5  ;;  %v8346_v5 = vadd.f32 %v8208_v57, %v7821_v9  ;;  %v6196_v49 = vpop.eup %6195  ;;  %v8362_v9 = vadd.f32 %v8203_v52, %v7512_v7  ;;  %v8376_v7 = vld [vmem:[%s7381_s14] sm:$0xff] }
 0x21a   : > { %v884_v25 = vpop.f32.mrf.mxu2  ;;  %6199 = vlog2.f32 %v8324_v27  ;;  %v2445_v50 = vsub.f32 0.0, %v2301_v59  ;;  %v8354_v59 = vpop.f32.mrf.mxu3  ;;  %15673 = vst [vmem:[#allocation136_spill] sm:$0xff] %v8376_v7  ;;  %v8411_v32 = vmul.f32 %v8376_v7, %v8229_v43 }
 0x21b   : > { %v8317_v29 = vadd.f32 %v8203_v52, %v884_v25  ;;  %v8333_v25 = vadd.f32 1.0, %v8319_v6  ;;  %15665 = vst [vmem:[#allocation129_spill] sm:$0xff] %v8346_v5  ;;  %v2370_v21 = vand.u32 2147483647, %v8346_v5 }
 0x21c   : > { %v674_v39 = vpop.f32.mrf.mxu0  ;;  %15667 = vst [vmem:[#allocation131_spill] sm:$0xff] %v8354_v59 }
 0x21d   : > { %15660 = vst [vmem:[#allocation124_spill] sm:$0xff] %v8317_v29  ;;  %v14600_v46 = vmax.f32 %v8317_v29, 0.0  ;;  %v8336_v19 = vadd.f32 %v8203_v52, %v674_v39  ;;  %6201 = vlog2.f32 %v8333_v25  ;;  %v8352_v39 = vadd.f32 %v8208_v57, %v7849_v37  ;;  %v493_v29 = vld [vmem:[%s7376_s11 + $0x420] sm:$0xff] }
 0x21e   : > { %15663 = vst [vmem:[#allocation127_spill] sm:$0xff] %v8333_v25  ;;  %v8338_v41 = vpop.f32.mrf.mxu1  ;;  %6203 = vpow2.f32 %v2592_v15  ;;  %v2594_v25 = vmul.f32 1.442695, %v2445_v50  ;;  %v8379_v15 = vld [vmem:[%s7381_s14 + $0x8] sm:$0xff]  ;;  %v8384_v50 = vadd.f32 %v8208_v57, %v7869_v58 }
 0x21f   : > { %721 = vmatmul.f32.gmra.mxu0 %v421_v8  ;;  %934 = vmatmul.f32.gmra.mxu2 %v492_v31  ;;  %15664 = vst [vmem:[#allocation128_spill] sm:$0xff] %v8336_v19  ;;  %v422_v8 = vld [vmem:[%s7376_s11 + $0x1e8] sm:$0xff]  ;;  %v8366_v6 = vpop.eup %6197  ;;  %v15671_v37 = vmax.f32 %v8336_v19, 0.0  ;;  %v2302_v22 = vand.u32 2147483647, %v8352_v39  ;;  %v8415_v55 = vmul.f32 %v8379_v15, %v8216_v62 }
 0x220   : > { %6011 = vmatmul.msk.f32.gmra.mxu3 %vm1126_vm0, %v14600_v46  ;;  %15666 = vst [vmem:[#allocation130_spill] sm:$0xff] %v8352_v39  ;;  %v8358_v46 = vadd.f32 %v8203_v52, %v7501_v1  ;;  %v3163_v1 = vmul.f32 0.6931472, %v6196_v49  ;;  %v6200_v59 = vpop.eup %6199  ;;  %v8393_v47 = vadd.f32 1.0, %v8366_v6  ;;  %6205 = vpow2.f32 %v2594_v25  ;;  %v8418_v25 = vld [vmem:[%s7381_s14 + $0x10] sm:$0xff] }
 0x221   : > { %15669 = vst [vmem:[#allocation133_spill] sm:$0xff] %v8362_v9  ;;  %5941 = vmatmul.msk.f32.gmra.mxu1 %vm1126_vm0, %v15671_v37  ;;  %v2446_v5 = vsub.f32 0.0, %v2302_v22  ;;  %v2874_v22 = vmax.f32 %v8242_v61, 0.0 }
 0x222   : > { %v887_v31 = vpop.f32.mrf.mxu2  ;;  %15668 = vst [vmem:[#allocation132_spill] sm:$0xff] %v8358_v46  ;;  %6207 = vlog2.f32 %v8393_v47 }
 0x223   : > { %15670 = vst [vmem:[#allocation134_spill] sm:$0xff] %v8366_v6  ;;  %v8372_v27 = vadd.f32 %v8203_v52, %v887_v31  ;;  %v6202_v19 = vpop.eup %6201  ;;  %v3161_v6 = vmul.f32 0.6931472, %v6200_v59  ;;  %v2303_v59 = vand.u32 2147483647, %v8384_v50 }
 0x224   : > { %v677_v53 = vpop.f32.mrf.mxu0  ;;  %15674 = vst [vmem:[#allocation137_spill] sm:$0xff] %v8379_v15  ;;  %v8407_v31 = vpop.eup %6203  ;;  %v3165_v7 = vmul.f32 0.6931472, %v6202_v19  ;;  %v2304_v15 = vand.u32 2147483647, %v8397_v44 }
 0x225   : > { %15672 = vst [vmem:[#allocation135_spill] sm:$0xff] %v8372_v27  ;;  %v8388_v37 = vadd.f32 %v8203_v52, %v677_v53  ;;  %v2872_v53 = vmax.f32 %v8229_v43, 0.0  ;;  %v15679_v49 = vmax.f32 %v8372_v27, 0.0  ;;  %v8431_v43 = vadd.f32 %v8208_v57, %v7909_v3  ;;  %v8450_v3 = vpop.f32.mrf.mxu3 }
 0x226   : > { %15675 = vst [vmem:[#allocation138_spill] sm:$0xff] %v8384_v50  ;;  %v8399_v58 = vpop.f32.mrf.mxu1  ;;  %v8444_v19 = vadd.f32 1.0, %v8407_v31  ;;  %v2447_v24 = vsub.f32 0.0, %v2303_v59 }
 0x227   : > { %15676 = vst [vmem:[#allocation139_spill] sm:$0xff] %v8388_v37  ;;  %724 = vmatmul.f32.gmra.mxu0 %v422_v8  ;;  %937 = vmatmul.f32.gmra.mxu2 %v493_v29  ;;  %v2873_v29 = vmax.f32 %v8216_v62, 0.0  ;;  %v2514_v8 = vsub.f32 0.0, %v2370_v21  ;;  %v8436_v62 = vld [vmem:[%s7386_s17 + $0x8] sm:$0xff]  ;;  %v15689_v30 = vmax.f32 %v8388_v37, 0.0  ;;  %v3448_v60 = vadd.f32 %v3161_v6, %v2872_v53 }
 0x228   : > { %15677 = vst [vmem:[#allocation140_spill] sm:$0xff] %v8393_v47  ;;  %6012 = vmatmul.msk.f32.gmra.mxu3 %vm1126_vm0, %v15679_v49  ;;  %v8421_v49 = vld [vmem:[%s7381_s14 + $0x18] sm:$0xff]  ;;  %v8448_v47 = vadd.f32 %v8208_v57, %v7841_v26  ;;  %v2448_v53 = vsub.f32 0.0, %v2304_v15  ;;  %6209 = vlog2.f32 %v8444_v19 }
 0x229   : > { %15680 = vst [vmem:[#allocation142_spill] sm:$0xff] %v8407_v31  ;;  %v3449_v9 = vadd.f32 %v3163_v1, %v2873_v29  ;;  %v423_v1 = vld [vmem:[%s7376_s11 + $0x1f0] sm:$0xff]  ;;  %v494_v29 = vld [vmem:[%s7376_s11 + $0x428] sm:$0xff]  ;;  %5942 = vmatmul.msk.f32.gmra.mxu1 %vm1126_vm0, %v15689_v30  ;;  %v2732_v35 = vmul.f32 1.442695, %v2514_v8  ;;  %v8460_v31 = vld [vmem:[%s7386_s17] sm:$0xff]  ;;  %v8464_v26 = vmul.f32 %v8421_v49, %v8266_v48  ;;  %v3450_v30 = vadd.f32 %v3165_v7, %v2874_v22 }
 0x22a   : > { %15681 = vst [vmem:[#allocation143_spill] sm:$0xff] %v8418_v25  ;;  %v890_v27 = vpop.f32.mrf.mxu2  ;;  %v2305_v8 = vand.u32 2147483647, %v8431_v43  ;;  %v3592_v15 = vmul.f32 %v3448_v60, %v8460_v31  ;;  %v8496_v22 = vadd.f32 %v8208_v57, %v7861_v12 }
 0x22b   : > { %15682 = vst [vmem:[#allocation144_spill] sm:$0xff] %v8421_v49  ;;  %v8425_v46 = vadd.f32 %v8203_v52, %v890_v27  ;;  %v8441_v27 = vmul.f32 %v8418_v25, %v8242_v61  ;;  %v8457_v61 = vpop.eup %6205  ;;  %v3593_v6 = vmul.f32 %v3449_v9, %v8436_v62  ;;  %v2371_v25 = vand.u32 2147483647, %v8448_v47 }
 0x22c   : > { %15684 = vst [vmem:[#allocation146_spill] sm:$0xff] %v8431_v43  ;;  %v680_v21 = vpop.f32.mrf.mxu0  ;;  %v6208_v7 = vpop.eup %6207  ;;  %6211 = vpow2.f32 %v2732_v35  ;;  %v3594_v35 = vmul.f32 %v3450_v30, %v8472_v13  ;;  %v2600_v49 = vmul.f32 1.442695, %v2448_v53  ;;  %v8518_v30 = vadd.f32 %v8208_v57, %v7969_v56 }
 0x22d   : > { %15683 = vst [vmem:[#allocation145_spill] sm:$0xff] %v8425_v46  ;;  %v8467_v37 = vadd.f32 %v8203_v52, %v680_v21  ;;  %v15695_v9 = vmax.f32 %v8425_v46, 0.0  ;;  %v3881_v60 = vsub.f32 %v3593_v6, %v8415_v55  ;;  %v8504_v46 = vld [vmem:[%s7381_s14 + $0x20] sm:$0xff]  ;;  %v3880_v55 = vsub.f32 %v3592_v15, %v8411_v32 }
 0x22e   : > { %15685 = vst [vmem:[#allocation147_spill] sm:$0xff] %v8436_v62  ;;  %v8481_v21 = vpop.f32.mrf.mxu1  ;;  %v495_v62 = vld [vmem:[%s7376_s11 + $0x430] sm:$0xff]  ;;  %v2876_v53 = vmax.f32 %v8285_v18, 0.0  ;;  %v8531_v56 = vmul.f32 %v8504_v46, %v8285_v18 }
 0x22f   : > { %15686 = vst [vmem:[#allocation148_spill] sm:$0xff] %v8444_v19  ;;  %727 = vmatmul.f32.gmra.mxu0 %v423_v1  ;;  %940 = vmatmul.f32.gmra.mxu2 %v494_v29  ;;  %v8488_v1 = vadd.f32 1.0, %v8457_v61  ;;  %v2515_v19 = vsub.f32 0.0, %v2371_v25  ;;  %v6210_v25 = vpop.eup %6209  ;;  %v4024_v15 = vadd.f32 %v3881_v60, %v3880_v55 }
 0x230   : > { %15687 = vst [vmem:[#allocation149_spill] sm:$0xff] %v8448_v47  ;;  %6013 = vmatmul.msk.f32.gmra.mxu3 %vm1126_vm0, %v15695_v9  ;;  %v2598_v9 = vmul.f32 1.442695, %v2447_v24  ;;  %v15701_v24 = vmax.f32 %v8467_v37, 0.0 }
 0x231   : > { %15688 = vst [vmem:[#allocation150_spill] sm:$0xff] %v8450_v3  ;;  %v2596_v3 = vmul.f32 1.442695, %v2446_v5  ;;  %v8478_v5 = vadd.f32 %v8208_v57, %v7929_v34  ;;  %v8492_v34 = vadd.f32 %v8208_v57, %v7949_v2 }
 0x232   : > { %15690 = vst [vmem:[#allocation151_spill] sm:$0xff] %v8457_v61  ;;  %v893_v29 = vpop.f32.mrf.mxu2  ;;  %v2449_v61 = vsub.f32 0.0, %v2305_v8  ;;  %5943 = vmatmul.msk.f32.gmra.mxu1 %vm1126_vm0, %v15701_v24  ;;  %v2372_v8 = vand.u32 2147483647, %v8496_v22  ;;  %v8527_v32 = vpop.eup %6211 }
 0x233   : > { %15691 = vst [vmem:[#allocation152_spill] sm:$0xff] %v8460_v31  ;;  %6213 = vpow2.f32 %v2596_v3  ;;  %v8499_v59 = vadd.f32 %v8203_v52, %v893_v29  ;;  %v424_v31 = vld [vmem:[%s7376_s11 + $0x1f8] sm:$0xff]  ;;  %v3167_v3 = vmul.f32 0.6931472, %v6208_v7  ;;  %v2306_v12 = vand.u32 2147483647, %v8478_v5  ;;  %v8522_v7 = vpop.f32.mrf.mxu3 }
 0x234   : > { %15692 = vst [vmem:[#allocation153_spill] sm:$0xff] %v8467_v37  ;;  %v683_v2 = vpop.f32.mrf.mxu0  ;;  %6215 = vlog2.f32 %v8488_v1  ;;  %v2307_v6 = vand.u32 2147483647, %v8492_v34  ;;  %v8534_v29 = vld [vmem:[%s7381_s14 + $0x28] sm:$0xff]  ;;  %v2602_v13 = vmul.f32 1.442695, %v2449_v61 }
 0x235   : > { %15694 = vst [vmem:[#allocation155_spill] sm:$0xff] %v8478_v5  ;;  %6217 = vpow2.f32 %v2598_v9  ;;  %v8525_v24 = vadd.f32 %v8203_v52, %v683_v2  ;;  %v3882_v9 = vsub.f32 %v3594_v35, %v8441_v27  ;;  %v8540_v37 = vld [vmem:[%s7386_s17 + $0x18] sm:$0xff]  ;;  %v2734_v2 = vmul.f32 1.442695, %v2515_v19 }
 0x236   : > { %15696 = vst [vmem:[#allocation156_spill] sm:$0xff] %v8488_v1  ;;  %6219 = vpow2.f32 %v2600_v49  ;;  %v8544_v60 = vpop.f32.mrf.mxu1  ;;  %v15710_v55 = vmax.f32 %v8499_v59, 0.0  ;;  %v3169_v49 = vmul.f32 0.6931472, %v6210_v25  ;;  %v2308_v27 = vand.u32 2147483647, %v8518_v30 }
 0x237   : > { %15697 = vst [vmem:[#allocation157_spill] sm:$0xff] %v8492_v34  ;;  %730 = vmatmul.f32.gmra.mxu0 %v424_v31  ;;  %943 = vmatmul.f32.gmra.mxu2 %v495_v62  ;;  %v15709_v31 = vmax.f32 %v8266_v48, 0.0  ;;  %v8552_v18 = vadd.f32 1.0, %v8527_v32  ;;  %v8556_v19 = vmul.f32 %v8534_v29, %v8306_v40  ;;  %6221 = vpow2.f32 %v2602_v13 }
 0x238   : > { %15698 = vst [vmem:[#allocation158_spill] sm:$0xff] %v8496_v22  ;;  %6014 = vmatmul.msk.f32.gmra.mxu3 %vm1126_vm0, %v15710_v55  ;;  %6223 = vpow2.f32 %v2734_v2  ;;  %v15716_v13 = vmax.f32 %v8525_v24, 0.0  ;;  %v3452_v48 = vadd.f32 %v3169_v49, %v2876_v53  ;;  %v2452_v22 = vsub.f32 0.0, %v2308_v27  ;;  %v8593_v53 = vld [vmem:[%s7381_s14 + $0x30] sm:$0xff] }
 0x239   : > { %15699 = vst [vmem:[#allocation159_spill] sm:$0xff] %v8499_v59  ;;  %v8536_v1 = vpop.eup %6213  ;;  %v3451_v62 = vadd.f32 %v3167_v3, %v15709_v31  ;;  %v2516_v3 = vsub.f32 0.0, %v2372_v8  ;;  %v496_v59 = vld [vmem:[%s7376_s11 + $0x438] sm:$0xff]  ;;  %v4025_v8 = vadd.f32 %v4024_v15, %v3882_v9  ;;  %6225 = vlog2.f32 %v8552_v18 }
 0x23a   : > { %15700 = vst [vmem:[#allocation160_spill] sm:$0xff] %v8504_v46  ;;  %v2451_v46 = vsub.f32 0.0, %v2307_v6  ;;  %v896_v35 = vpop.f32.mrf.mxu2  ;;  %v6216_v31 = vpop.eup %6215  ;;  %v8560_v25 = vadd.f32 1.0, %v8536_v1  ;;  %v8564_v6 = vadd.f32 %v8208_v57, %v7989_v45  ;;  %5944 = vmatmul.msk.f32.gmra.mxu1 %vm1126_vm0, %v15716_v13  ;;  %v8586_v9 = vadd.f32 %v8208_v57, %v7881_v0 }
 0x23b   : > { %15702 = vst [vmem:[#allocation161_spill] sm:$0xff] %v8518_v30  ;;  %v8567_v55 = vadd.f32 %v8203_v52, %v896_v35  ;;  %v2736_v15 = vmul.f32 1.442695, %v2516_v3  ;;  %v3171_v49 = vmul.f32 0.6931472, %v6216_v31  ;;  %v3596_v3 = vmul.f32 %v3452_v48, %v8581_v23 }
 0x23c   : > { %15703 = vst [vmem:[#allocation162_spill] sm:$0xff] %v8522_v7  ;;  %v2450_v7 = vsub.f32 0.0, %v2306_v12  ;;  %v686_v61 = vpop.f32.mrf.mxu0  ;;  %v3595_v12 = vmul.f32 %v3451_v62, %v8540_v37  ;;  %v2606_v35 = vmul.f32 1.442695, %v2451_v46  ;;  %6227 = vlog2.f32 %v8560_v25 }
 0x23d   : > { %15704 = vst [vmem:[#allocation163_spill] sm:$0xff] %v8525_v24  ;;  %v14644_v47 = vmax.f32 %v8567_v55, 0.0  ;;  %v2309_v2 = vand.u32 2147483647, %v8564_v6  ;;  %v8622_v13 = vmul.f32 %v8593_v53, %v8352_v39 }
 0x23e   : > { %15705 = vst [vmem:[#allocation164_spill] sm:$0xff] %v8527_v32  ;;  %v425_v32 = vld [vmem:[%s7376_s11 + $0x200] sm:$0xff]  ;;  %v3883_v0 = vsub.f32 %v3595_v12, %v8464_v26  ;;  %v2608_v26 = vmul.f32 1.442695, %v2452_v22  ;;  %v8616_v12 = vadd.f32 %v8203_v52, %v686_v61  ;;  %v8629_v22 = vadd.f32 %v8208_v57, %v8029_v38 }
 0x23f   : > { %15706 = vst [vmem:[#allocation165_spill] sm:$0xff] %v8534_v29  ;;  %v8571_v29 = vpop.eup %6217  ;;  %733 = vmatmul.f32.gmra.mxu0 %v425_v32  ;;  %946 = vmatmul.f32.gmra.mxu2 %v496_v59  ;;  %v8607_v59 = vpop.f32.mrf.mxu1  ;;  %v2453_v48 = vsub.f32 0.0, %v2309_v2  ;;  %v3884_v38 = vsub.f32 %v3596_v3, %v8531_v56 }
 0x240   : > { %15707 = vst [vmem:[#allocation166_spill] sm:$0xff] %v8536_v1  ;;  %v2604_v1 = vmul.f32 1.442695, %v2450_v7  ;;  %v8577_v45 = vpop.eup %6219  ;;  %v8590_v7 = vadd.f32 %v8208_v57, %v8006_v4  ;;  %v8598_v62 = vadd.f32 1.0, %v8571_v29  ;;  %v8605_v4 = vpop.f32.mrf.mxu3  ;;  %6015 = vmatmul.msk.f32.gmra.mxu3 %vm1126_vm0, %v14644_v47  ;;  %v2373_v47 = vand.u32 2147483647, %v8586_v9 }
 0x241   : > { %15708 = vst [vmem:[#allocation167_spill] sm:$0xff] %v8540_v37  ;;  %v8603_v27 = vadd.f32 1.0, %v8577_v45  ;;  %v8612_v32 = vpop.eup %6221  ;;  %v8644_v37 = vld [vmem:[%s7386_s17 + $0x28] sm:$0xff] }
 0x242   : > { %15711 = vst [vmem:[#allocation168_spill] sm:$0xff] %v8552_v18  ;;  %6229 = vpow2.f32 %v2604_v1  ;;  %v899_v1 = vpop.f32.mrf.mxu2  ;;  %v8618_v31 = vpop.eup %6223  ;;  %v2310_v46 = vand.u32 2147483647, %v8590_v7  ;;  %v426_v18 = vld [vmem:[%s7376_s11 + $0x208] sm:$0xff]  ;;  %v8640_v23 = vadd.f32 1.0, %v8612_v32  ;;  %v2517_v56 = vsub.f32 0.0, %v2373_v47 }
 0x243   : > { %15712 = vst [vmem:[#allocation169_spill] sm:$0xff] %v8560_v25  ;;  %6231 = vpow2.f32 %v2606_v35  ;;  %v8647_v61 = vadd.f32 1.0, %v8618_v31  ;;  %v498_v25 = vld [vmem:[%s7376_s11 + $0x448] sm:$0xff] }
 0x244   : > { %15713 = vst [vmem:[#allocation170_spill] sm:$0xff] %v8564_v6  ;;  %6233 = vpow2.f32 %v2736_v15  ;;  %v689_v35 = vpop.f32.mrf.mxu0  ;;  %v4026_v15 = vadd.f32 %v4025_v8, %v3883_v0  ;;  %v15734_v8 = vmax.f32 %v8616_v12, 0.0  ;;  %v2454_v3 = vsub.f32 0.0, %v2310_v46 }
 0x245   : > { %15714 = vst [vmem:[#allocation171_spill] sm:$0xff] %v8567_v55  ;;  %6235 = vlog2.f32 %v8598_v62  ;;  %v497_v55 = vld [vmem:[%s7376_s11 + $0x440] sm:$0xff] }
 0x246   : > { %15715 = vst [vmem:[#allocation172_spill] sm:$0xff] %v8571_v29  ;;  %6237 = vlog2.f32 %v8603_v27  ;;  %5945 = vmatmul.msk.f32.gmra.mxu1 %vm1126_vm0, %v15734_v8 }
 0x247   : > { %15717 = vst [vmem:[#allocation173_spill] sm:$0xff] %v8577_v45  ;;  %v15729_v45 = vmax.f32 %v8306_v40, 0.0  ;;  %6239 = vpow2.f32 %v2608_v26  ;;  %736 = vmatmul.f32.gmra.mxu0 %v426_v18  ;;  %949 = vmatmul.f32.gmra.mxu2 %v497_v55  ;;  %v2610_v26 = vmul.f32 1.442695, %v2453_v48  ;;  %v8683_v55 = vadd.f32 %v8208_v57, %v7901_v28  ;;  %v8686_v46 = vpop.f32.mrf.mxu1 }
 0x248   : > { %15719 = vst [vmem:[#allocation175_spill] sm:$0xff] %v8586_v9  ;;  %6241 = vlog2.f32 %v8640_v23  ;;  %v4027_v48 = vadd.f32 %v4026_v15, %v3884_v38  ;;  %v8698_v15 = vpop.f32.mrf.mxu3 }
 0x249   : > { %15720 = vst [vmem:[#allocation176_spill] sm:$0xff] %v8590_v7  ;;  %v3453_v29 = vadd.f32 %v3171_v49, %v15729_v45  ;;  %v8656_v45 = vadd.f32 %v8203_v52, %v899_v1  ;;  %v2879_v49 = vmax.f32 %v8384_v50, 0.0  ;;  %v8669_v1 = vadd.f32 %v8208_v57, %v8045_v36 }
 0x24a   : > { %15721 = vst [vmem:[#allocation177_spill] sm:$0xff] %v8593_v53  ;;  %v8634_v53 = vpop.eup %6225  ;;  %6243 = vlog2.f32 %v8647_v61  ;;  %v902_v28 = vpop.f32.mrf.mxu2 }
 0x24b   : > { %15722 = vst [vmem:[#allocation178_spill] sm:$0xff] %v8598_v62  ;;  %v6228_v2 = vpop.eup %6227  ;;  %v8650_v62 = vld [vmem:[%s7381_s14 + $0x38] sm:$0xff]  ;;  %v14663_v8 = vmax.f32 %v8656_v45, 0.0  ;;  %v8675_v47 = vmul.f32 %v3453_v29, %v8644_v37  ;;  %6245 = vpow2.f32 %v2610_v26  ;;  %v8716_v26 = vld [vmem:[%s7381_s14 + $0x40] sm:$0xff] }
 0x24c   : > { %15723 = vst [vmem:[#allocation179_spill] sm:$0xff] %v8603_v27  ;;  %v8658_v0 = vpop.eup %6229  ;;  %v2311_v27 = vand.u32 2147483647, %v8629_v22  ;;  %v8679_v18 = vmul.f32 %v8650_v62, %v8384_v50 }
 0x24d   : > { %15724 = vst [vmem:[#allocation180_spill] sm:$0xff] %v8605_v4  ;;  %v8690_v29 = vadd.f32 1.0, %v8658_v0  ;;  %6016 = vmatmul.msk.f32.gmra.mxu3 %vm1126_vm0, %v14663_v8  ;;  %v2312_v8 = vand.u32 2147483647, %v8669_v1 }
 0x24e   : > { %15725 = vst [vmem:[#allocation181_spill] sm:$0xff] %v8612_v32  ;;  %v8662_v32 = vadd.f32 %v8203_v52, %v689_v35  ;;  %v3173_v35 = vmul.f32 0.6931472, %v6228_v2  ;;  %v2374_v2 = vand.u32 2147483647, %v8683_v55 }
 0x24f   : > { %15726 = vst [vmem:[#allocation182_spill] sm:$0xff] %v8616_v12  ;;  %v15747_v12 = vmax.f32 %v8352_v39, 0.0  ;;  %6247 = vlog2.f32 %v8690_v29  ;;  %952 = vmatmul.f32.gmra.mxu2 %v498_v25 }
 0x250   : > { %15727 = vst [vmem:[#allocation183_spill] sm:$0xff] %v8618_v31  ;;  %v8664_v31 = vpop.eup %6231  ;;  %v15750_v4 = vmax.f32 %v8662_v32, 0.0 }
 0x251   : > { %15728 = vst [vmem:[#allocation184_spill] sm:$0xff] %v8629_v22  ;;  %v8672_v40 = vpop.eup %6233  ;;  %v8696_v50 = vadd.f32 1.0, %v8664_v31 }
 0x252   : > { %15730 = vst [vmem:[#allocation185_spill] sm:$0xff] %v8640_v23  ;;  %v6236_v36 = vpop.eup %6235  ;;  %v2612_v23 = vmul.f32 1.442695, %v2454_v3  ;;  %v3885_v3 = vsub.f32 %v8675_v47, %v8556_v19  ;;  %5946 = vmatmul.msk.f32.gmra.mxu1 %vm1126_vm0, %v15750_v4  ;;  %v8727_v19 = vadd.f32 %v8203_v52, %v902_v28 }
 0x253   : > { %15731 = vst [vmem:[#allocation186_spill] sm:$0xff] %v8644_v37  ;;  %v2738_v37 = vmul.f32 1.442695, %v2517_v56  ;;  %v427_v56 = vld [vmem:[%s7376_s11 + $0x210] sm:$0xff]  ;;  %v3175_v24 = vmul.f32 0.6931472, %v6236_v36  ;;  %6249 = vlog2.f32 %v8696_v50 }
 0x254   : > { %15732 = vst [vmem:[#allocation187_spill] sm:$0xff] %v8647_v61  ;;  %v2880_v61 = vmax.f32 %v8397_v44, 0.0  ;;  %v8730_v36 = vld [vmem:[%s7386_s17 + $0x30] sm:$0xff]  ;;  %739 = vmatmul.f32.gmra.mxu0 %v427_v56  ;;  %6251 = vpow2.f32 %v2612_v23 }
 0x255   : > { %15733 = vst [vmem:[#allocation188_spill] sm:$0xff] %v8650_v62  ;;  %v6238_v62 = vpop.eup %6237  ;;  %v3455_v39 = vadd.f32 %v3175_v24, %v2879_v49  ;;  %6253 = vpow2.f32 %v2738_v37  ;;  %v905_v49 = vpop.f32.mrf.mxu2  ;;  %v2881_v24 = vmax.f32 %v8431_v43, 0.0 }
 0x256   : > { %15735 = vst [vmem:[#allocation189_spill] sm:$0xff] %v8656_v45  ;;  %v8701_v38 = vpop.eup %6239  ;;  %v2455_v45 = vsub.f32 0.0, %v2311_v27  ;;  %v8721_v27 = vadd.f32 %v8208_v57, %v8068_v51  ;;  %v8768_v56 = vadd.f32 %v8203_v52, %v905_v49 }
 0x257   : > { %15736 = vst [vmem:[#allocation190_spill] sm:$0xff] %v8658_v0  ;;  %v692_v0 = vpop.f32.mrf.mxu0  ;;  %v6242_v47 = vpop.eup %6241 }
 0x258   : > { %15737 = vst [vmem:[#allocation191_spill] sm:$0xff] %v8662_v32  ;;  %v8737_v51 = vadd.f32 %v8203_v52, %v692_v0  ;;  %v8739_v4 = vpop.eup %6243  ;;  %v2614_v28 = vmul.f32 1.442695, %v2455_v45  ;;  %v8749_v0 = vpop.f32.mrf.mxu1  ;;  %v8755_v45 = vld [vmem:[%s7386_s17 + $0x38] sm:$0xff]  ;;  %v2313_v37 = vand.u32 2147483647, %v8721_v27 }
 0x259   : > { %15738 = vst [vmem:[#allocation192_spill] sm:$0xff] %v8664_v31  ;;  %v8710_v31 = vadd.f32 1.0, %v8672_v40  ;;  %v8751_v25 = vpop.eup %6245 }
 0x25a   : > { %15739 = vst [vmem:[#allocation193_spill] sm:$0xff] %v8669_v1 }
 0x25b   : > { %15740 = vst [vmem:[#allocation194_spill] sm:$0xff] %v8672_v40  ;;  %v2456_v40 = vsub.f32 0.0, %v2312_v8  ;;  %v3179_v8 = vmul.f32 0.6931472, %v6242_v47  ;;  %v6248_v47 = vpop.eup %6247 }
 0x25c   : > { %15741 = vst [vmem:[#allocation195_spill] sm:$0xff] %v8683_v55  ;;  %v2457_v55 = vsub.f32 0.0, %v2313_v37 }
 0x25d   : > { %15742 = vst [vmem:[#allocation196_spill] sm:$0xff] %v8690_v29  ;;  %v14677_v29 = vmax.f32 %v8727_v19, 0.0  ;;  %v3457_v32 = vadd.f32 %v3179_v8, %v2881_v24 }
 0x25e   : > { %15743 = vst [vmem:[#allocation197_spill] sm:$0xff] %v8696_v50  ;;  %v8747_v50 = vld [vmem:[%s7381_s14 + $0x48] sm:$0xff] }
 0x25f   : > { %15744 = vst [vmem:[#allocation198_spill] sm:$0xff] %v8698_v15  ;;  %v3454_v15 = vadd.f32 %v3173_v35, %v15747_v12  ;;  %v3177_v12 = vmul.f32 0.6931472, %v6238_v62  ;;  %v8734_v35 = vadd.f32 1.0, %v8701_v38  ;;  %v8744_v62 = vmul.f32 %v8716_v26, %v8397_v44  ;;  %6017 = vmatmul.msk.f32.gmra.mxu3 %vm1126_vm0, %v14677_v29  ;;  %v695_v29 = vpop.f32.mrf.mxu0  ;;  %v428_v44 = vld [vmem:[%s7376_s11 + $0x218] sm:$0xff] }
 0x260   : > { %15745 = vst [vmem:[#allocation199_spill] sm:$0xff] %v8701_v38  ;;  %v2518_v38 = vsub.f32 0.0, %v2374_v2  ;;  %v8781_v49 = vmul.f32 %v8747_v50, %v8431_v43  ;;  %v3181_v43 = vmul.f32 0.6931472, %v6248_v47  ;;  %742 = vmatmul.f32.gmra.mxu0 %v428_v44  ;;  %v8808_v8 = vadd.f32 %v8203_v52, %v695_v29  ;;  %v8816_v44 = vpop.f32.mrf.mxu1  ;;  %v8822_v29 = vld [vmem:[%s7381_s14 + $0x50] sm:$0xff] }
 0x261   : > { %15746 = vst [vmem:[#allocation200_spill] sm:$0xff] %v8710_v31  ;;  %v3598_v23 = vmul.f32 %v3454_v15, %v8730_v36  ;;  %v3456_v2 = vadd.f32 %v3177_v12, %v2880_v61  ;;  %6255 = vlog2.f32 %v8734_v35  ;;  %v8765_v15 = vadd.f32 %v8208_v57, %v8089_v14  ;;  %v499_v61 = vld [vmem:[%s7376_s11 + $0x450] sm:$0xff]  ;;  %v6250_v12 = vpop.eup %6249 }
 0x262   : > { %15748 = vst [vmem:[#allocation201_spill] sm:$0xff] %v8716_v26  ;;  %v4028_v26 = vadd.f32 %v4027_v48, %v3885_v3  ;;  %6257 = vpow2.f32 %v2614_v28  ;;  %v8777_v14 = vmul.f32 1.442695, %v2518_v38  ;;  %v8784_v48 = vadd.f32 1.0, %v8751_v25  ;;  %v8786_v3 = vpop.f32.mrf.mxu3  ;;  %v8788_v28 = vpop.eup %6251  ;;  %955 = vmatmul.f32.gmra.mxu2 %v499_v61 }
 0x263   : > { %15749 = vst [vmem:[#allocation202_spill] sm:$0xff] %v8721_v27  ;;  %v15766_v38 = vmax.f32 %v8737_v51, 0.0  ;;  %v8814_v47 = vadd.f32 1.0, %v8788_v28 }
 0x264   : > { %15751 = vst [vmem:[#allocation203_spill] sm:$0xff] %v8727_v19  ;;  %v2616_v19 = vmul.f32 1.442695, %v2456_v40  ;;  %v3886_v40 = vsub.f32 %v3598_v23, %v8622_v13  ;;  %v14696_v13 = vmax.f32 %v8768_v56, 0.0  ;;  %v3183_v23 = vmul.f32 0.6931472, %v6250_v12 }
 0x265   : > { %15752 = vst [vmem:[#allocation204_spill] sm:$0xff] %v8730_v36  ;;  %v8771_v36 = vld [vmem:[%s7386_s17 + $0x40] sm:$0xff]  ;;  %5947 = vmatmul.msk.f32.gmra.mxu1 %vm1126_vm0, %v15766_v38  ;;  %v2618_v12 = vmul.f32 1.442695, %v2457_v55  ;;  %v908_v38 = vpop.f32.mrf.mxu2  ;;  %v8834_v55 = vld [vmem:[%s7386_s17 + $0x50] sm:$0xff] }
 0x266   : > { %15753 = vst [vmem:[#allocation205_spill] sm:$0xff] %v8734_v35  ;;  %v3599_v35 = vmul.f32 %v3455_v39, %v8755_v45  ;;  %v8793_v39 = vadd.f32 %v8208_v57, %v8109_v42  ;;  %v2882_v42 = vmax.f32 %v8478_v5, 0.0  ;;  %6259 = vpow2.f32 %v2616_v19 }
 0x267   : > { %15754 = vst [vmem:[#allocation206_spill] sm:$0xff] %v8737_v51  ;;  %6261 = vlog2.f32 %v8784_v48  ;;  %6018 = vmatmul.msk.f32.gmra.mxu3 %vm1126_vm0, %v14696_v13  ;;  %v698_v13 = vpop.f32.mrf.mxu0 }
 0x268   : > { %15755 = vst [vmem:[#allocation207_spill] sm:$0xff] %v8739_v4  ;;  %v3887_v24 = vsub.f32 %v3599_v35, %v8679_v18  ;;  %v2315_v18 = vand.u32 2147483647, %v8793_v39  ;;  %v8838_v35 = vadd.f32 %v8208_v57, %v8128_v20  ;;  %v429_v4 = vld [vmem:[%s7376_s11 + $0x220] sm:$0xff]  ;;  %6263 = vlog2.f32 %v8814_v47 }
 0x269   : > { %15756 = vst [vmem:[#allocation208_spill] sm:$0xff] %v8747_v50  ;;  %v8798_v50 = vpop.eup %6253  ;;  %6265 = vpow2.f32 %v2618_v12  ;;  %745 = vmatmul.f32.gmra.mxu0 %v429_v4  ;;  %v8883_v4 = vpop.f32.mrf.mxu1 }
 0x26a   : > { %15757 = vst [vmem:[#allocation209_spill] sm:$0xff] %v8751_v25  ;;  %v3600_v25 = vmul.f32 %v3456_v2, %v8771_v36  ;;  %v6256_v37 = vpop.eup %6255  ;;  %v2883_v2 = vmax.f32 %v8492_v34, 0.0 }
 0x26b   : > { %15758 = vst [vmem:[#allocation210_spill] sm:$0xff] %v8755_v45  ;;  %v8802_v45 = vld [vmem:[%s7386_s17 + $0x48] sm:$0xff]  ;;  %v8818_v61 = vpop.eup %6257  ;;  %v3185_v9 = vmul.f32 0.6931472, %v6256_v37 }
 0x26c   : > { %15759 = vst [vmem:[#allocation211_spill] sm:$0xff] %v8765_v15  ;;  %v3601_v19 = vmul.f32 %v3457_v32, %v8802_v45  ;;  %v8831_v32 = vld [vmem:[%s7381_s14 + $0x58] sm:$0xff]  ;;  %v3459_v51 = vadd.f32 %v3183_v23, %v2883_v2  ;;  %v8854_v20 = vpop.eup %6259  ;;  %v2459_v23 = vsub.f32 0.0, %v2315_v18 }
 0x26d   : > { %15760 = vst [vmem:[#allocation212_spill] sm:$0xff] %v8768_v56  ;;  %v8841_v56 = vadd.f32 %v8203_v52, %v908_v38  ;;  %v6262_v37 = vpop.eup %6261  ;;  %v3747_v2 = vmul.f32 %v8831_v32, %v8492_v34  ;;  %v8865_v38 = vld [vmem:[%s7381_s14 + $0x60] sm:$0xff] }
 0x26e   : > { %15761 = vst [vmem:[#allocation213_spill] sm:$0xff] %v8771_v36  ;;  %v3458_v36 = vadd.f32 %v3181_v43, %v2882_v42  ;;  %v3746_v43 = vmul.f32 %v8822_v29, %v8478_v5  ;;  %v2884_v42 = vmax.f32 %v8518_v30, 0.0 }
 0x26f   : > { %15762 = vst [vmem:[#allocation214_spill] sm:$0xff] %v8784_v48  ;;  %v3888_v48 = vsub.f32 %v3600_v25, %v8744_v62  ;;  %v8848_v25 = vld [vmem:[%s7386_s17 + $0x58] sm:$0xff] }
 0x270   : > { %15763 = vst [vmem:[#allocation215_spill] sm:$0xff] %v8786_v3  ;;  %v2314_v3 = vand.u32 2147483647, %v8765_v15  ;;  %v3603_v12 = vmul.f32 %v3459_v51, %v8848_v25  ;;  %v3460_v18 = vadd.f32 %v3185_v9, %v2884_v42  ;;  %v8890_v9 = vmul.f32 %v8865_v38, %v8518_v30 }
 0x271   : > { %15764 = vst [vmem:[#allocation216_spill] sm:$0xff] %v8788_v28  ;;  %v4029_v28 = vadd.f32 %v4028_v26, %v3886_v40  ;;  %v500_v26 = vld [vmem:[%s7376_s11 + $0x458] sm:$0xff]  ;;  %v3889_v40 = vsub.f32 %v3601_v19, %v8781_v49  ;;  %v14703_v49 = vmax.f32 %v8841_v56, 0.0  ;;  %v3187_v51 = vmul.f32 0.6931472, %v6262_v37 }
 0x272   : > { %15765 = vst [vmem:[#allocation217_spill] sm:$0xff] %v8793_v39  ;;  %958 = vmatmul.f32.gmra.mxu2 %v500_v26  ;;  %v8886_v26 = vld [vmem:[%s7386_s17 + $0x60] sm:$0xff]  ;;  %v2885_v37 = vmax.f32 %v8564_v6, 0.0 }
 0x273   : > { %15767 = vst [vmem:[#allocation218_spill] sm:$0xff] %v8798_v50  ;;  %v4030_v62 = vadd.f32 %v4029_v28, %v3887_v24  ;;  %v15780_v28 = vmax.f32 %v8808_v8, 0.0  ;;  %v3602_v24 = vmul.f32 %v3458_v36, %v8834_v55  ;;  %v8874_v36 = vadd.f32 1.0, %v8854_v20  ;;  %6019 = vmatmul.msk.f32.gmra.mxu3 %vm1126_vm0, %v14703_v49  ;;  %v701_v49 = vpop.f32.mrf.mxu0 }
 0x274   : > { %15768 = vst [vmem:[#allocation219_spill] sm:$0xff] %v8802_v45  ;;  %v2458_v45 = vsub.f32 0.0, %v2314_v3  ;;  %v8852_v3 = vadd.f32 1.0, %v8818_v61 }
 0x275   : > { %15769 = vst [vmem:[#allocation220_spill] sm:$0xff] %v8808_v8  ;;  %5948 = vmatmul.msk.f32.gmra.mxu1 %vm1126_vm0, %v15780_v28  ;;  %v4031_v19 = vadd.f32 %v4030_v62, %v3888_v48  ;;  %v2316_v28 = vand.u32 2147483647, %v8838_v35  ;;  %v2622_v62 = vmul.f32 1.442695, %v2459_v23  ;;  %v3890_v42 = vsub.f32 %v3602_v24, %v3746_v43  ;;  %v501_v43 = vld [vmem:[%s7376_s11 + $0x460] sm:$0xff] }
 0x276   : > { %15770 = vst [vmem:[#allocation221_spill] sm:$0xff] %v8814_v47  ;;  %6267 = vlog2.f32 %v8852_v3  ;;  %v8910_v24 = vld [vmem:[%s7381_s14 + $0x68] sm:$0xff]  ;;  %v8991_v8 = vld [vmem:[%s7386_s17 + $0x78] sm:$0xff] }
 0x277   : > { %15771 = vst [vmem:[#allocation222_spill] sm:$0xff] %v8818_v61  ;;  %v2620_v61 = vmul.f32 1.442695, %v2458_v45  ;;  %v8878_v45 = vadd.f32 %v8208_v57, %v8147_v33  ;;  %v4032_v48 = vadd.f32 %v4031_v19, %v3889_v40  ;;  %v911_v33 = vpop.f32.mrf.mxu2  ;;  %v2460_v23 = vsub.f32 0.0, %v2316_v28 }
 0x278   : > { %15772 = vst [vmem:[#allocation223_spill] sm:$0xff] %v8822_v29  ;;  %v8867_v29 = vpop.f32.mrf.mxu3  ;;  %v8897_v19 = vadd.f32 %v8203_v52, %v911_v33 }
 0x279   : > { %15773 = vst [vmem:[#allocation224_spill] sm:$0xff] %v8831_v32  ;;  %v8881_v32 = vadd.f32 %v8203_v52, %v698_v13  ;;  %v6264_v13 = vpop.eup %6263  ;;  %6269 = vpow2.f32 %v2620_v61  ;;  %v3604_v61 = vmul.f32 %v3460_v18, %v8886_v26  ;;  %v2317_v52 = vand.u32 2147483647, %v8878_v45 }
 0x27a   : > { %15774 = vst [vmem:[#allocation225_spill] sm:$0xff] %v8834_v55  ;;  %6271 = vlog2.f32 %v8874_v36  ;;  %v3189_v28 = vmul.f32 0.6931472, %v6264_v13  ;;  %v4033_v33 = vadd.f32 %v4032_v48, %v3890_v42  ;;  %v8928_v55 = vld [vmem:[#allocation5] ss:$0 sm:$0xff]  ;;  %961 = vmatmul.f32.gmra.mxu2 %v501_v43  ;;  %v3749_v48 = vmul.f32 %v8910_v24, %v8564_v6 }
 0x27b   : > { %15775 = vst [vmem:[#allocation226_spill] sm:$0xff] %v8838_v35  ;;  %v14708_v40 = vmax.f32 %v8881_v32, 0.0  ;;  %6273 = vpow2.f32 %v2622_v62  ;;  %v2886_v62 = vmax.f32 %v8590_v7, 0.0  ;;  %v2624_v13 = vmul.f32 1.442695, %v2460_v23 }
 0x27c   : > { %15776 = vst [vmem:[#allocation227_spill] sm:$0xff] %v8841_v56  ;;  %v8904_v56 = vadd.f32 %v8208_v57, %v8164_v17  ;;  %v2461_v17 = vsub.f32 0.0, %v2317_v52  ;;  %v8963_v52 = vld [vmem:[%s7386_s17 + $0x70] sm:$0xff] }
 0x27d   : > { %15777 = vst [vmem:[#allocation228_spill] sm:$0xff] %v8848_v25  ;;  %v430_v25 = vld [vmem:[%s7376_s11 + $0x228] sm:$0xff]  ;;  %5949 = vmatmul.msk.f32.gmra.mxu1 %vm1126_vm0, %v14708_v40  ;;  %v3892_v40 = vsub.f32 %v3604_v61, %v8890_v9  ;;  %v3462_v23 = vadd.f32 %v3189_v28, %v2886_v62  ;;  %v8969_v28 = vadd.f32 %v8928_v55, %v8248_v16  ;;  %v2887_v62 = vmax.f32 %v8629_v22, 0.0 }
 0x27e   : > { %15778 = vst [vmem:[#allocation229_spill] sm:$0xff] %v8852_v3  ;;  %748 = vmatmul.f32.gmra.mxu0 %v430_v25  ;;  %v8952_v25 = vpop.f32.mrf.mxu1 }
 0x27f   : > { %15779 = vst [vmem:[#allocation230_spill] sm:$0xff] %v8854_v20  ;;  %v8899_v20 = vpop.eup %6265  ;;  %v914_v9 = vpop.f32.mrf.mxu2  ;;  %v3606_v5 = vmul.f32 %v3462_v23, %v8963_v52 }
 0x280   : > { %15781 = vst [vmem:[#allocation231_spill] sm:$0xff] %v8865_v38  ;;  %v3891_v38 = vsub.f32 %v3603_v12, %v3747_v2  ;;  %v8916_v2 = vadd.f32 %v8208_v57, %v8187_v10  ;;  %v3461_v12 = vadd.f32 %v3187_v51, %v2885_v37  ;;  %v6268_v18 = vpop.eup %6267  ;;  %v8932_v57 = vadd.f32 %v8928_v55, %v8218_v11  ;;  %v8937_v10 = vld [vmem:[%s14426_s4] ss:$0 sm:$0xff] }
 0x281   : > { %15782 = vst [vmem:[#allocation232_spill] sm:$0xff] %v8874_v36  ;;  %v8926_v36 = vadd.f32 1.0, %v8899_v20  ;;  %v8940_v51 = vadd.f32 %v8937_v10, %v701_v49  ;;  %v2318_v11 = vand.u32 2147483647, %v8904_v56  ;;  %v8946_v42 = vpop.eup %6269  ;;  %v3191_v6 = vmul.f32 0.6931472, %v6268_v18 }
 0x282   : > { %15783 = vst [vmem:[#allocation233_spill] sm:$0xff] %v8878_v45  ;;  %v4034_v37 = vadd.f32 %v4033_v33, %v3891_v38  ;;  %v2319_v49 = vand.u32 2147483647, %v8916_v2  ;;  %v15797_v38 = vmax.f32 %v8897_v19, 0.0  ;;  %v6272_v61 = vpop.eup %6271  ;;  %v8972_v18 = vadd.f32 %v8937_v10, %v914_v9 }
 0x283   : > { %15784 = vst [vmem:[#allocation234_spill] sm:$0xff] %v8881_v32  ;;  %6275 = vlog2.f32 %v8926_v36  ;;  %v8974_v33 = vpop.eup %6273  ;;  %v2462_v3 = vsub.f32 0.0, %v2318_v11  ;;  %v2626_v9 = vmul.f32 1.442695, %v2461_v17  ;;  %v8988_v32 = vld [vmem:[%s7381_s14 + $0x78] sm:$0xff]  ;;  %v15806_v11 = vmax.f32 %v8940_v51, 0.0 }
 0x284   : > { %15785 = vst [vmem:[#allocation235_spill] sm:$0xff] %v8886_v26  ;;  %v8923_v26 = vld [vmem:[%s7386_s17 + $0x68] sm:$0xff]  ;;  %6020 = vmatmul.msk.f32.gmra.mxu3 %vm1126_vm0, %v15797_v38  ;;  %v8978_v38 = vadd.f32 1.0, %v8946_v42  ;;  %6277 = vpow2.f32 %v2624_v13  ;;  %v4035_v16 = vadd.f32 %v4034_v37, %v3892_v40  ;;  %v2463_v47 = vsub.f32 0.0, %v2319_v49  ;;  %v8994_v13 = vld [vmem:[%s7381_s14 + $0x80] sm:$0xff] }
 0x285   : > { %15786 = vst [vmem:[#allocation236_spill] sm:$0xff] %v8897_v19  ;;  %v3605_v43 = vmul.f32 %v3461_v12, %v8923_v26  ;;  %v2320_v12 = vand.u32 2147483647, %v8932_v57  ;;  %v704_v19 = vpop.f32.mrf.mxu0  ;;  %5950 = vmatmul.msk.f32.gmra.mxu1 %vm1126_vm0, %v15806_v11  ;;  %v3193_v37 = vmul.f32 0.6931472, %v6272_v61  ;;  %v9001_v17 = vadd.f32 1.0, %v8974_v33 }
 0x286   : > { %15787 = vst [vmem:[#allocation237_spill] sm:$0xff] %v8899_v20  ;;  %v8950_v20 = vpop.f32.mrf.mxu3  ;;  %v2321_v49 = vand.u32 2147483647, %v8969_v28  ;;  %6279 = vlog2.f32 %v8978_v38  ;;  %v9010_v23 = vadd.f32 %v8937_v10, %v704_v19  ;;  %v9022_v19 = vmul.f32 %v8994_v13, %v8669_v1 }
 0x287   : > { %15788 = vst [vmem:[#allocation238_spill] sm:$0xff] %v8904_v56  ;;  %v3893_v34 = vsub.f32 %v3605_v43, %v3749_v48  ;;  %v2464_v48 = vsub.f32 0.0, %v2320_v12  ;;  %v9007_v43 = vadd.f32 %v8928_v55, %v8270_v54  ;;  %v2888_v12 = vmax.f32 %v8669_v1, 0.0  ;;  %v9036_v1 = vld [vmem:[%s7386_s17 + $0x80] sm:$0xff] }
 0x288   : > { %15789 = vst [vmem:[#allocation239_spill] sm:$0xff] %v8910_v24  ;;  %v8956_v24 = vld [vmem:[%s7381_s14 + $0x70] sm:$0xff]  ;;  %6281 = vpow2.f32 %v2626_v9 }
 0x289   : > { %15790 = vst [vmem:[#allocation240_spill] sm:$0xff] %v8916_v2  ;;  %v8984_v30 = vmul.f32 %v8956_v24, %v8590_v7  ;;  %v6276_v61 = vpop.eup %6275  ;;  %v4036_v11 = vadd.f32 %v4035_v16, %v3893_v34  ;;  %v3464_v9 = vadd.f32 %v3193_v37, %v2888_v12  ;;  %6283 = vlog2.f32 %v9001_v17  ;;  %v503_v12 = vld [vmem:[%s7376_s11 + $0x470] sm:$0xff] }
 0x28a   : > { %15791 = vst [vmem:[#allocation241_spill] sm:$0xff] %v8923_v26  ;;  %v502_v26 = vld [vmem:[%s7376_s11 + $0x468] sm:$0xff]  ;;  %v2632_v34 = vmul.f32 1.442695, %v2464_v48  ;;  %v2465_v16 = vsub.f32 0.0, %v2321_v49  ;;  %v9048_v48 = vadd.f32 %v8928_v55, %v8299_v63  ;;  %v2889_v49 = vmax.f32 %v8721_v27, 0.0 }
 0x28b   : > { %15792 = vst [vmem:[#allocation242_spill] sm:$0xff] %v8926_v36  ;;  %v431_v36 = vld [vmem:[%s7376_s11 + $0x230] sm:$0xff]  ;;  %964 = vmatmul.f32.gmra.mxu2 %v502_v26  ;;  %v9015_v26 = vpop.f32.mrf.mxu1  ;;  %v2322_v40 = vand.u32 2147483647, %v9007_v43  ;;  %v3608_v63 = vmul.f32 %v3464_v9, %v9036_v1 }
 0x28c   : > { %15793 = vst [vmem:[#allocation243_spill] sm:$0xff] %v8932_v57  ;;  %751 = vmatmul.f32.gmra.mxu0 %v431_v36  ;;  %v2630_v36 = vmul.f32 1.442695, %v2463_v47  ;;  %v917_v47 = vpop.f32.mrf.mxu2 }
 0x28d   : > { %15794 = vst [vmem:[#allocation244_spill] sm:$0xff] %v8940_v51  ;;  %v707_v37 = vpop.f32.mrf.mxu0 }
 0x28e   : > { %15795 = vst [vmem:[#allocation245_spill] sm:$0xff] %v8946_v42  ;;  %v3463_v42 = vadd.f32 %v3191_v6, %v2887_v62  ;;  %v2628_v6 = vmul.f32 1.442695, %v2462_v3  ;;  %v3751_v62 = vmul.f32 %v8988_v32, %v8629_v22  ;;  %v9017_v3 = vpop.eup %6277 }
 0x28f   : > { %15796 = vst [vmem:[#allocation246_spill] sm:$0xff] %v8956_v24  ;;  %v9029_v24 = vld [vmem:[%s7381_s14 + $0x88] sm:$0xff] }
 0x290   : > { %15798 = vst [vmem:[#allocation247_spill] sm:$0xff] %v8963_v52  ;;  %v3607_v54 = vmul.f32 %v3463_v42, %v8991_v8  ;;  %v9032_v42 = vpop.f32.mrf.mxu3  ;;  %6285 = vpow2.f32 %v2628_v6  ;;  %v9053_v6 = vmul.f32 %v9029_v24, %v8721_v27  ;;  %v2890_v27 = vmax.f32 %v8765_v15, 0.0 }
 0x291   : > { %15799 = vst [vmem:[#allocation248_spill] sm:$0xff] %v8969_v28  ;;  %6287 = vpow2.f32 %v2630_v36 }
 0x292   : > { %15800 = vst [vmem:[#allocation249_spill] sm:$0xff] %v8972_v18  ;;  %6289 = vpow2.f32 %v2632_v34  ;;  %v9078_v34 = vld [vmem:[%s7381_s14 + $0x98] sm:$0xff] }
 0x293   : > { %15801 = vst [vmem:[#allocation250_spill] sm:$0xff] %v8974_v33  ;;  %v15811_v33 = vmax.f32 %v8972_v18, 0.0  ;;  %v3195_v18 = vmul.f32 0.6931472, %v6276_v61  ;;  %v15818_v61 = vmax.f32 %v9010_v23, 0.0  ;;  %967 = vmatmul.f32.gmra.mxu2 %v503_v12 }
 0x294   : > { %15802 = vst [vmem:[#allocation251_spill] sm:$0xff] %v8978_v38 }
 0x295   : > { %15803 = vst [vmem:[#allocation252_spill] sm:$0xff] %v8988_v32  ;;  %6021 = vmatmul.msk.f32.gmra.mxu3 %vm1126_vm0, %v15811_v33  ;;  %v9040_v33 = vadd.f32 %v8937_v10, %v917_v47  ;;  %v9056_v47 = vld [vmem:[%s7381_s14 + $0x90] sm:$0xff]  ;;  %5951 = vmatmul.msk.f32.gmra.mxu1 %vm1126_vm0, %v15818_v61  ;;  %v2466_v32 = vsub.f32 0.0, %v2322_v40  ;;  %v9071_v61 = vadd.f32 %v8937_v10, %v707_v37 }
 0x296   : > { %15804 = vst [vmem:[#allocation253_spill] sm:$0xff] %v8991_v8  ;;  %v3465_v38 = vadd.f32 %v3195_v18, %v2889_v49  ;;  %v9075_v9 = vmul.f32 %v9056_v47, %v8765_v15  ;;  %v2891_v18 = vmax.f32 %v8793_v39, 0.0  ;;  %v3896_v15 = vsub.f32 %v3608_v63, %v9022_v19  ;;  %v9144_v8 = vld [vmem:[%s7386_s17 + $0x98] sm:$0xff] }
 0x297   : > { %15805 = vst [vmem:[#allocation254_spill] sm:$0xff] %v8994_v13  ;;  %v3894_v13 = vsub.f32 %v3606_v5, %v8984_v30  ;;  %v6280_v5 = vpop.eup %6279  ;;  %v3895_v30 = vsub.f32 %v3607_v54, %v3751_v62  ;;  %v2634_v62 = vmul.f32 1.442695, %v2465_v16  ;;  %v9067_v54 = vadd.f32 %v8928_v55, %v8338_v41  ;;  %v9082_v16 = vpop.f32.mrf.mxu1 }
 0x298   : > { %15807 = vst [vmem:[#allocation255_spill] sm:$0xff] %v9001_v17  ;;  %v9044_v17 = vadd.f32 1.0, %v9017_v3  ;;  %v2323_v41 = vand.u32 2147483647, %v9048_v48  ;;  %v3197_v37 = vmul.f32 0.6931472, %v6280_v5  ;;  %v9102_v5 = vadd.f32 %v8928_v55, %v8399_v58  ;;  %v9115_v58 = vpop.f32.mrf.mxu3 }
 0x299   : > { %15808 = vst [vmem:[#allocation256_spill] sm:$0xff] %v9007_v43  ;;  %v15826_v49 = vmax.f32 %v9040_v33, 0.0 }
 0x29a   : > { %15809 = vst [vmem:[#allocation257_spill] sm:$0xff] %v9010_v23  ;;  %6291 = vlog2.f32 %v9044_v17 }
 0x29b   : > { %15810 = vst [vmem:[#allocation258_spill] sm:$0xff] %v9017_v3  ;;  %v9062_v3 = vpop.eup %6281  ;;  %6293 = vpow2.f32 %v2634_v62  ;;  %v2467_v62 = vsub.f32 0.0, %v2323_v41 }
 0x29c   : > { %15812 = vst [vmem:[#allocation259_spill] sm:$0xff] %v9029_v24  ;;  %v4037_v24 = vadd.f32 %v4036_v11, %v3894_v13  ;;  %v6284_v36 = vpop.eup %6283  ;;  %v9087_v11 = vld [vmem:[%s7386_s17 + $0x88] sm:$0xff]  ;;  %v9091_v12 = vadd.f32 1.0, %v9062_v3 }
 0x29d   : > { %15813 = vst [vmem:[#allocation260_spill] sm:$0xff] %v9036_v1  ;;  %v9084_v13 = vpop.eup %6285  ;;  %6022 = vmatmul.msk.f32.gmra.mxu3 %vm1126_vm0, %v15826_v49  ;;  %v14748_v49 = vmax.f32 %v9071_v61, 0.0  ;;  %v3609_v19 = vmul.f32 %v3465_v38, %v9087_v11  ;;  %v9126_v38 = vadd.f32 %v8928_v55, %v8481_v21 }
 0x29e   : > { %15814 = vst [vmem:[#allocation261_spill] sm:$0xff] %v9040_v33  ;;  %v4038_v40 = vadd.f32 %v4037_v24, %v3895_v30  ;;  %v9096_v1 = vpop.eup %6287  ;;  %v2324_v24 = vand.u32 2147483647, %v9067_v54  ;;  %v3199_v30 = vmul.f32 0.6931472, %v6284_v36  ;;  %v9113_v63 = vadd.f32 1.0, %v9084_v13 }
 0x29f   : > { %15815 = vst [vmem:[#allocation262_spill] sm:$0xff] %v9044_v17  ;;  %v2636_v33 = vmul.f32 1.442695, %v2466_v32  ;;  %v710_v17 = vpop.f32.mrf.mxu0  ;;  %v9109_v52 = vpop.eup %6289  ;;  %6295 = vlog2.f32 %v9091_v12  ;;  %v9122_v32 = vadd.f32 1.0, %v9096_v1  ;;  %5952 = vmatmul.msk.f32.gmra.mxu1 %vm1126_vm0, %v14748_v49  ;;  %v3897_v49 = vsub.f32 %v3609_v19, %v9053_v6 }
 0x2a0   : > { %15816 = vst [vmem:[#allocation263_spill] sm:$0xff] %v9048_v48  ;;  %v6292_v41 = vpop.eup %6291  ;;  %v2326_v6 = vand.u32 2147483647, %v9126_v38  ;;  %v9189_v22 = vpop.f32.mrf.mxu3 }
 0x2a1   : > { %15817 = vst [vmem:[#allocation264_spill] sm:$0xff] %v9056_v47  ;;  %v920_v47 = vpop.f32.mrf.mxu2  ;;  %6297 = vpow2.f32 %v2636_v33  ;;  %v9140_v21 = vpop.eup %6293  ;;  %v3201_v33 = vmul.f32 0.6931472, %v6292_v41 }
 0x2a2   : > { %15819 = vst [vmem:[#allocation265_spill] sm:$0xff] %v9062_v3  ;;  %v9106_v3 = vmul.f32 %v9078_v34, %v8793_v39  ;;  %v9118_v36 = vadd.f32 %v8937_v10, %v920_v47  ;;  %v9132_v47 = vld [vmem:[%s7386_s17 + $0x90] sm:$0xff]  ;;  %v2892_v39 = vmax.f32 %v8838_v35, 0.0  ;;  %6299 = vlog2.f32 %v9113_v63 }
 0x2a3   : > { %15820 = vst [vmem:[#allocation266_spill] sm:$0xff] %v9067_v54  ;;  %6301 = vlog2.f32 %v9122_v32 }
 0x2a4   : > { %15821 = vst [vmem:[#allocation267_spill] sm:$0xff] %v9071_v61  ;;  %v9312_v61 = vld [vmem:[%s7381_s14 + $0xc8] sm:$0xff] }
 0x2a5   : > { %15822 = vst [vmem:[#allocation268_spill] sm:$0xff] %v9078_v34  ;;  %v3466_v34 = vadd.f32 %v3197_v37, %v2890_v27  ;;  %v2468_v27 = vsub.f32 0.0, %v2324_v24  ;;  %v2325_v37 = vand.u32 2147483647, %v9102_v5  ;;  %v9154_v24 = vpop.f32.mrf.mxu1 }
 0x2a6   : > { %15823 = vst [vmem:[#allocation269_spill] sm:$0xff] %v9084_v13  ;;  %v4039_v13 = vadd.f32 %v4038_v40, %v3896_v15  ;;  %v9147_v15 = vld [vmem:[%s7381_s14 + $0xa0] sm:$0xff]  ;;  %v2638_v40 = vmul.f32 1.442695, %v2467_v62 }
 0x2a7   : > { %15824 = vst [vmem:[#allocation270_spill] sm:$0xff] %v9087_v11  ;;  %v14753_v11 = vmax.f32 %v9118_v36, 0.0  ;;  %v2469_v62 = vsub.f32 0.0, %v2325_v37  ;;  %v9180_v37 = vadd.f32 %v8928_v55, %v8607_v59 }
 0x2a8   : > { %15825 = vst [vmem:[#allocation271_spill] sm:$0xff] %v9091_v12  ;;  %v9138_v12 = vadd.f32 1.0, %v9109_v52 }
 0x2a9   : > { %15827 = vst [vmem:[#allocation272_spill] sm:$0xff] %v9096_v1  ;;  %v3467_v1 = vadd.f32 %v3199_v30, %v2891_v18  ;;  %v9152_v18 = vadd.f32 %v8928_v55, %v8544_v60  ;;  %v3610_v30 = vmul.f32 %v3466_v34, %v9132_v47  ;;  %6023 = vmatmul.msk.f32.gmra.mxu3 %vm1126_vm0, %v14753_v11  ;;  %v923_v19 = vpop.f32.mrf.mxu2  ;;  %v6296_v34 = vpop.eup %6295  ;;  %v9175_v11 = vadd.f32 1.0, %v9140_v21 }
 0x2aa   : > { %15828 = vst [vmem:[#allocation273_spill] sm:$0xff] %v9102_v5  ;;  %v9166_v60 = vadd.f32 %v8937_v10, %v923_v19  ;;  %6303 = vlog2.f32 %v9138_v12 }
 0x2ab   : > { %15829 = vst [vmem:[#allocation274_spill] sm:$0xff] %v9109_v52  ;;  %v2640_v52 = vmul.f32 1.442695, %v2468_v27  ;;  %v3611_v41 = vmul.f32 %v3467_v1, %v9144_v8  ;;  %v713_v27 = vpop.f32.mrf.mxu0  ;;  %6305 = vpow2.f32 %v2638_v40  ;;  %v9183_v1 = vpop.eup %6297 }
 0x2ac   : > { %15830 = vst [vmem:[#allocation275_spill] sm:$0xff] %v9113_v63  ;;  %v9163_v63 = vadd.f32 %v8937_v10, %v710_v17  ;;  %v2327_v17 = vand.u32 2147483647, %v9152_v18  ;;  %v6300_v40 = vpop.eup %6299 }
 0x2ad   : > { %15831 = vst [vmem:[#allocation276_spill] sm:$0xff] %v9118_v36  ;;  %v4040_v36 = vadd.f32 %v4039_v13, %v3897_v49  ;;  %6307 = vpow2.f32 %v2640_v52  ;;  %v6302_v13 = vpop.eup %6301  ;;  %v2893_v49 = vmax.f32 %v8878_v45, 0.0  ;;  %v9202_v52 = vadd.f32 %v8937_v10, %v713_v27 }
 0x2ae   : > { %15832 = vst [vmem:[#allocation277_spill] sm:$0xff] %v9122_v32  ;;  %v14763_v19 = vmax.f32 %v9163_v63, 0.0  ;;  %v2642_v32 = vmul.f32 1.442695, %v2469_v62  ;;  %6309 = vlog2.f32 %v9175_v11  ;;  %v2471_v62 = vsub.f32 0.0, %v2327_v17 }
 0x2af   : > { %15833 = vst [vmem:[#allocation278_spill] sm:$0xff] %v9126_v38  ;;  %v3205_v59 = vmul.f32 0.6931472, %v6300_v40 }
 0x2b0   : > { %15834 = vst [vmem:[#allocation279_spill] sm:$0xff] %v9132_v47  ;;  %v9171_v47 = vmul.f32 %v9147_v15, %v8838_v35  ;;  %v9187_v35 = vld [vmem:[%s7381_s14 + $0xa8] sm:$0xff]  ;;  %5953 = vmatmul.msk.f32.gmra.mxu1 %vm1126_vm0, %v14763_v19  ;;  %v2894_v19 = vmax.f32 %v8904_v56, 0.0  ;;  %6311 = vpow2.f32 %v2642_v32  ;;  %v3207_v32 = vmul.f32 0.6931472, %v6302_v13 }
 0x2b1   : > { %15835 = vst [vmem:[#allocation280_spill] sm:$0xff] %v9138_v12  ;;  %v3203_v12 = vmul.f32 0.6931472, %v6296_v34  ;;  %v6304_v34 = vpop.eup %6303  ;;  %v2895_v13 = vmax.f32 %v8916_v2, 0.0 }
 0x2b2   : > { %15836 = vst [vmem:[#allocation281_spill] sm:$0xff] %v9140_v21  ;;  %v2470_v21 = vsub.f32 0.0, %v2326_v6  ;;  %v9212_v6 = vadd.f32 1.0, %v9183_v1  ;;  %v9221_v7 = vpop.eup %6305 }
 0x2b3   : > { %15837 = vst [vmem:[#allocation282_spill] sm:$0xff] %v9144_v8  ;;  %v3468_v8 = vadd.f32 %v3201_v33, %v2892_v39  ;;  %v9197_v39 = vld [vmem:[%s7386_s17 + $0xa0] sm:$0xff]  ;;  %v9209_v33 = vld [vmem:[%s7381_s14 + $0xb0] sm:$0xff] }
 0x2b4   : > { %15838 = vst [vmem:[#allocation283_spill] sm:$0xff] %v9147_v15  ;;  %v3898_v15 = vsub.f32 %v3610_v30, %v9075_v9  ;;  %v3899_v9 = vsub.f32 %v3611_v41, %v9106_v3  ;;  %v9206_v30 = vmul.f32 %v9187_v35, %v8878_v45  ;;  %v2328_v3 = vand.u32 2147483647, %v9180_v37  ;;  %v926_v45 = vpop.f32.mrf.mxu2 }
 0x2b5   : > { %15839 = vst [vmem:[#allocation284_spill] sm:$0xff] %v9152_v18  ;;  %v2644_v27 = vmul.f32 1.442695, %v2470_v21  ;;  %v3612_v17 = vmul.f32 %v3468_v8, %v9197_v39  ;;  %v9230_v21 = vmul.f32 %v9209_v33, %v8904_v56  ;;  %v9237_v40 = vadd.f32 %v8937_v10, %v926_v45  ;;  %v716_v8 = vpop.f32.mrf.mxu0  ;;  %v9251_v56 = vld [vmem:[%s7381_s14 + $0xb8] sm:$0xff] }
 0x2b6   : > { %15840 = vst [vmem:[#allocation285_spill] sm:$0xff] %v9163_v63  ;;  %v4041_v41 = vadd.f32 %v4040_v36, %v3898_v15  ;;  %v9226_v15 = vld [vmem:[%s7386_s17 + $0xa8] sm:$0xff]  ;;  %6313 = vlog2.f32 %v9212_v6  ;;  %v3470_v63 = vadd.f32 %v3205_v59, %v2894_v19  ;;  %v2896_v59 = vmax.f32 %v8932_v57, 0.0 }
 0x2b7   : > { %15841 = vst [vmem:[#allocation286_spill] sm:$0xff] %v9166_v60  ;;  %6315 = vpow2.f32 %v2644_v27  ;;  %v3471_v27 = vadd.f32 %v3207_v32, %v2895_v13  ;;  %v15864_v32 = vmax.f32 %v9237_v40, 0.0  ;;  %v9289_v13 = vld [vmem:[%s7386_s17 + $0xc0] sm:$0xff] }
 0x2b8   : > { %15842 = vst [vmem:[#allocation287_spill] sm:$0xff] %v9175_v11  ;;  %v9216_v11 = vpop.f32.mrf.mxu1  ;;  %v4042_v36 = vadd.f32 %v4041_v41, %v3899_v9  ;;  %v2646_v9 = vmul.f32 1.442695, %v2471_v62  ;;  %v15859_v62 = vmax.f32 %v9202_v52, 0.0 }
 0x2b9   : > { %15843 = vst [vmem:[#allocation288_spill] sm:$0xff] %v9180_v37 }
 0x2ba   : > { %15844 = vst [vmem:[#allocation289_spill] sm:$0xff] %v9183_v1  ;;  %v3469_v1 = vadd.f32 %v3203_v12, %v2893_v49  ;;  %v9239_v12 = vpop.eup %6307  ;;  %v2472_v49 = vsub.f32 0.0, %v2328_v3  ;;  %5954 = vmatmul.msk.f32.gmra.mxu1 %vm1126_vm0, %v15859_v62  ;;  %6317 = vpow2.f32 %v2646_v9 }
 0x2bb   : > { %15845 = vst [vmem:[#allocation290_spill] sm:$0xff] %v9187_v35  ;;  %v15850_v35 = vmax.f32 %v9166_v60, 0.0  ;;  %v6310_v41 = vpop.eup %6309  ;;  %v3209_v60 = vmul.f32 0.6931472, %v6304_v34  ;;  %v9260_v3 = vadd.f32 1.0, %v9239_v12 }
 0x2bc   : > { %15846 = vst [vmem:[#allocation291_spill] sm:$0xff] %v9197_v39  ;;  %v3613_v45 = vmul.f32 %v3469_v1, %v9226_v15  ;;  %v9248_v39 = vld [vmem:[%s7386_s17 + $0xb0] sm:$0xff]  ;;  %v9264_v1 = vadd.f32 %v8937_v10, %v716_v8  ;;  %v9266_v34 = vpop.eup %6311  ;;  %v2648_v62 = vmul.f32 1.442695, %v2472_v49  ;;  %v929_v9 = vpop.f32.mrf.mxu2 }
 0x2bd   : > { %15847 = vst [vmem:[#allocation292_spill] sm:$0xff] %v9202_v52  ;;  %6024 = vmatmul.msk.f32.gmra.mxu3 %vm1126_vm0, %v15850_v35  ;;  %v9234_v35 = vadd.f32 %v8928_v55, %v8686_v46  ;;  %v3900_v46 = vsub.f32 %v3612_v17, %v9171_v47  ;;  %v3211_v17 = vmul.f32 0.6931472, %v6310_v41  ;;  %v3614_v19 = vmul.f32 %v3470_v63, %v9248_v39  ;;  %v6314_v49 = vpop.eup %6313  ;;  %v9286_v63 = vld [vmem:[%s7381_s14 + $0xc0] sm:$0xff] }
 0x2be   : > { %15848 = vst [vmem:[#allocation293_spill] sm:$0xff] %v9209_v33  ;;  %v9243_v33 = vadd.f32 1.0, %v9221_v7  ;;  %v3472_v8 = vadd.f32 %v3209_v60, %v2896_v59  ;;  %v3901_v41 = vsub.f32 %v3613_v45, %v9206_v30  ;;  %v9294_v60 = vadd.f32 %v8928_v55, %v8749_v0 }
 0x2bf   : > { %15849 = vst [vmem:[#allocation294_spill] sm:$0xff] %v9212_v6  ;;  %v2329_v47 = vand.u32 2147483647, %v9234_v35  ;;  %v9301_v30 = vadd.f32 1.0, %v9266_v34  ;;  %v3902_v52 = vsub.f32 %v3614_v19, %v9230_v21 }
 0x2c0   : > { %15851 = vst [vmem:[#allocation295_spill] sm:$0xff] %v9221_v7  ;;  %v9272_v7 = vld [vmem:[%s7386_s17 + $0xb8] sm:$0xff]  ;;  %6319 = vlog2.f32 %v9243_v33  ;;  %v9279_v6 = vpop.f32.mrf.mxu1  ;;  %v3616_v59 = vmul.f32 %v3472_v8, %v9289_v13  ;;  %v2330_v21 = vand.u32 2147483647, %v9294_v60 }
 0x2c1   : > { %15852 = vst [vmem:[#allocation296_spill] sm:$0xff] %v9226_v15  ;;  %v9268_v15 = vpop.f32.mrf.mxu3  ;;  %6321 = vlog2.f32 %v9260_v3  ;;  %v2473_v45 = vsub.f32 0.0, %v2329_v47  ;;  %v3213_v47 = vmul.f32 0.6931472, %v6314_v49  ;;  %v3761_v49 = vmul.f32 %v9312_v61, %v8969_v28 }
 0x2c2   : > { %15853 = vst [vmem:[#allocation297_spill] sm:$0xff] %v9234_v35  ;;  %6323 = vpow2.f32 %v2648_v62 }
 0x2c3   : > { %15854 = vst [vmem:[#allocation298_spill] sm:$0xff] %v9237_v40  ;;  %v3615_v40 = vmul.f32 %v3471_v27, %v9272_v7  ;;  %6325 = vlog2.f32 %v9301_v30  ;;  %v2650_v27 = vmul.f32 1.442695, %v2473_v45 }
 0x2c4   : > { %15855 = vst [vmem:[#allocation299_spill] sm:$0xff] %v9239_v12  ;;  %v9276_v12 = vmul.f32 %v9251_v56, %v8916_v2  ;;  %v4043_v2 = vadd.f32 %v4042_v36, %v3900_v46  ;;  %v2898_v36 = vmax.f32 %v9007_v43, 0.0  ;;  %v15875_v46 = vmax.f32 %v9264_v1, 0.0 }
 0x2c5   : > { %15856 = vst [vmem:[#allocation300_spill] sm:$0xff] %v9243_v33  ;;  %6025 = vmatmul.msk.f32.gmra.mxu3 %vm1126_vm0, %v15864_v32  ;;  %v9304_v32 = vadd.f32 %v8937_v10, %v929_v9  ;;  %v719_v33 = vpop.f32.mrf.mxu0 }
 0x2c6   : > { %15857 = vst [vmem:[#allocation301_spill] sm:$0xff] %v9248_v39  ;;  %v9297_v39 = vpop.eup %6315  ;;  %v4044_v23 = vadd.f32 %v4043_v2, %v3901_v41  ;;  %5955 = vmatmul.msk.f32.gmra.mxu1 %vm1126_vm0, %v15875_v46  ;;  %v3903_v62 = vsub.f32 %v3615_v40, %v9276_v12  ;;  %v9338_v41 = vadd.f32 %v8937_v10, %v719_v33  ;;  %v932_v40 = vpop.f32.mrf.mxu2 }
 0x2c7   : > { %15858 = vst [vmem:[#allocation302_spill] sm:$0xff] %v9251_v56  ;;  %v2897_v56 = vmax.f32 %v8969_v28, 0.0  ;;  %v9317_v9 = vpop.eup %6317  ;;  %v14794_v2 = vmax.f32 %v9304_v32, 0.0  ;;  %v2899_v28 = vmax.f32 %v9048_v48, 0.0 }
 0x2c8   : > { %15860 = vst [vmem:[#allocation303_spill] sm:$0xff] %v9260_v3  ;;  %v3760_v3 = vmul.f32 %v9286_v63, %v8932_v57  ;;  %v6320_v19 = vpop.eup %6319  ;;  %v4045_v45 = vadd.f32 %v4044_v23, %v3902_v52  ;;  %v2474_v23 = vsub.f32 0.0, %v2330_v21  ;;  %v9375_v57 = vld [vmem:[%s7381_s14 + $0xd8] sm:$0xff] }
 0x2c9   : > { %15861 = vst [vmem:[#allocation304_spill] sm:$0xff] %v9264_v1  ;;  %v3473_v0 = vadd.f32 %v3211_v17, %v2897_v56  ;;  %v9321_v56 = vadd.f32 1.0, %v9297_v39  ;;  %v9330_v17 = vadd.f32 %v8928_v55, %v8816_v44  ;;  %v6322_v46 = vpop.eup %6321  ;;  %v9341_v44 = vadd.f32 1.0, %v9317_v9  ;;  %v9354_v52 = vpop.f32.mrf.mxu3 }
 0x2ca   : > { %15862 = vst [vmem:[#allocation305_spill] sm:$0xff] %v9266_v34  ;;  %v9315_v34 = vld [vmem:[%s7386_s17 + $0xc8] sm:$0xff]  ;;  %v9348_v12 = vpop.eup %6323  ;;  %v3215_v33 = vmul.f32 0.6931472, %v6320_v19  ;;  %v9367_v19 = vadd.f32 %v8928_v55, %v8883_v4  ;;  %v4046_v21 = vadd.f32 %v4045_v45, %v3903_v62  ;;  %v15888_v45 = vmax.f32 %v9338_v41, 0.0 }
 0x2cb   : > { %15863 = vst [vmem:[#allocation306_spill] sm:$0xff] %v9272_v7  ;;  %v3617_v8 = vmul.f32 %v3473_v0, %v9315_v34  ;;  %v3474_v7 = vadd.f32 %v3213_v47, %v2898_v36  ;;  %v9351_v0 = vld [vmem:[%s7386_s17 + $0xd0] sm:$0xff]  ;;  %6327 = vlog2.f32 %v9321_v56  ;;  %v9379_v4 = vadd.f32 1.0, %v9348_v12 }
 0x2cc   : > { %15865 = vst [vmem:[#allocation307_spill] sm:$0xff] %v9286_v63  ;;  %v3904_v63 = vsub.f32 %v3616_v59, %v3760_v3  ;;  %v15881_v59 = vld [vmem:[#allocation62_spill] sm:$0xff]  ;;  %6329 = vpow2.f32 %v2650_v27  ;;  %v9371_v3 = vadd.f32 %v8937_v10, %v932_v40  ;;  %v3217_v27 = vmul.f32 0.6931472, %v6322_v46 }
 0x2cd   : > { %15866 = vst [vmem:[#allocation308_spill] sm:$0xff] %v9289_v13  ;;  %v9343_v13 = vpop.f32.mrf.mxu1  ;;  %6026 = vmatmul.msk.f32.gmra.mxu3 %vm1126_vm0, %v14794_v2  ;;  %v9359_v47 = vadd.f32 %v8928_v55, %v15881_v59  ;;  %v9362_v36 = vld [vmem:[%s7381_s14 + $0xd0] sm:$0xff]  ;;  %v2331_v2 = vand.u32 2147483647, %v9330_v17  ;;  %v6326_v59 = vpop.eup %6325  ;;  %6331 = vlog2.f32 %v9341_v44  ;;  %v2900_v46 = vmax.f32 %v9067_v54, 0.0 }
 0x2ce   : > { %15867 = vst [vmem:[#allocation309_spill] sm:$0xff] %v9294_v60  ;;  %v3762_v62 = vmul.f32 %v9362_v36, %v9007_v43  ;;  %5956 = vmatmul.msk.f32.gmra.mxu1 %vm1126_vm0, %v15888_v45  ;;  %v9398_v43 = vld [vmem:[%s7381_s14 + $0xe0] sm:$0xff]  ;;  %6333 = vlog2.f32 %v9379_v4 }
 0x2cf   : > { %15868 = vst [vmem:[#allocation310_spill] sm:$0xff] %v9297_v39  ;;  %v3618_v39 = vmul.f32 %v3474_v7, %v9351_v0  ;;  %v9387_v7 = vld [vmem:[%s7386_s17 + $0xd8] sm:$0xff]  ;;  %v2475_v40 = vsub.f32 0.0, %v2331_v2 }
 0x2d0   : > { %15869 = vst [vmem:[#allocation311_spill] sm:$0xff] %v9301_v30  ;;  %v3476_v30 = vadd.f32 %v3217_v27, %v2900_v46  ;;  %v9416_v27 = vadd.f32 %v8928_v55, %v8952_v25 }
 0x2d1   : > { %15870 = vst [vmem:[#allocation312_spill] sm:$0xff] %v9304_v32  ;;  %v3906_v45 = vsub.f32 %v3618_v39, %v3762_v62  ;;  %v2901_v39 = vmax.f32 %v9102_v5, 0.0  ;;  %v2654_v62 = vmul.f32 1.442695, %v2475_v40  ;;  %v9427_v25 = vpop.f32.mrf.mxu3 }
 0x2d2   : > { %15871 = vst [vmem:[#allocation313_spill] sm:$0xff] %v9312_v61  ;;  %v722_v61 = vpop.f32.mrf.mxu0 }
 0x2d3   : > { %15872 = vst [vmem:[#allocation314_spill] sm:$0xff] %v9315_v34  ;;  %v3905_v34 = vsub.f32 %v3617_v8, %v3761_v49  ;;  %v3475_v8 = vadd.f32 %v3215_v33, %v2899_v28  ;;  %v2652_v49 = vmul.f32 1.442695, %v2474_v23  ;;  %v3763_v28 = vmul.f32 %v9375_v57, %v9048_v48 }
 0x2d4   : > { %15873 = vst [vmem:[#allocation315_spill] sm:$0xff] %v9317_v9  ;;  %v4047_v9 = vadd.f32 %v4046_v21, %v3904_v63  ;;  %v6328_v63 = vpop.eup %6327  ;;  %v3219_v33 = vmul.f32 0.6931472, %v6326_v59  ;;  %v9402_v2 = vadd.f32 %v8937_v10, %v722_v61  ;;  %v15893_v21 = vmax.f32 %v9371_v3, 0.0  ;;  %v9411_v59 = vld [vmem:[%s7386_s17 + $0xe0] sm:$0xff] }
 0x2d5   : > { %15874 = vst [vmem:[#allocation316_spill] sm:$0xff] %v9321_v56  ;;  %v9395_v23 = vpop.eup %6329  ;;  %6335 = vpow2.f32 %v2652_v49  ;;  %v3221_v48 = vmul.f32 0.6931472, %v6328_v63  ;;  %v3620_v40 = vmul.f32 %v3476_v30, %v9411_v59  ;;  %v2902_v63 = vmax.f32 %v9126_v38, 0.0 }
 0x2d6   : > { %15876 = vst [vmem:[#allocation317_spill] sm:$0xff] %v9330_v17  ;;  %6027 = vmatmul.msk.f32.gmra.mxu3 %vm1126_vm0, %v15893_v21  ;;  %v6332_v61 = vpop.eup %6331  ;;  %v9425_v49 = vadd.f32 1.0, %v9395_v23  ;;  %v15901_v30 = vmax.f32 %v9402_v2, 0.0  ;;  %6337 = vpow2.f32 %v2654_v62 }
 0x2d7   : > { %15877 = vst [vmem:[#allocation318_spill] sm:$0xff] %v9338_v41  ;;  %v10303_v41 = vld [vmem:[%s7381_s14 + $0x1b8] sm:$0xff] }
 0x2d8   : > { %15878 = vst [vmem:[#allocation319_spill] sm:$0xff] %v9341_v44  ;;  %5957 = vmatmul.msk.f32.gmra.mxu1 %vm1126_vm0, %v15901_v30  ;;  %6339 = vlog2.f32 %v9425_v49 }
 0x2d9   : > { %15879 = vst [vmem:[#allocation320_spill] sm:$0xff] %v9348_v12  ;;  %v9404_v12 = vpop.f32.mrf.mxu1 }
 0x2da   : > { %15880 = vst [vmem:[#allocation321_spill] sm:$0xff] %v9351_v0  ;;  %v2332_v0 = vand.u32 2147483647, %v9367_v19 }
 0x2db   : > { %15882 = vst [vmem:[#allocation62_spill] sm:$0xff] %v9359_v47 }
 0x2dc   : > { %15883 = vst [vmem:[#allocation322_spill] sm:$0xff] %v9362_v36  ;;  %v4048_v36 = vadd.f32 %v4047_v9, %v3905_v34  ;;  %v935_v34 = vpop.f32.mrf.mxu2  ;;  %v3619_v9 = vmul.f32 %v3475_v8, %v9387_v7  ;;  %v2476_v46 = vsub.f32 0.0, %v2332_v0  ;;  %v725_v8 = vpop.f32.mrf.mxu0  ;;  %v9431_v0 = vld [vmem:[%s7386_s17 + $0xe8] sm:$0xff] }
 0x2dd   : > { %15884 = vst [vmem:[#allocation323_spill] sm:$0xff] %v9367_v19  ;;  %v9420_v21 = vadd.f32 %v8937_v10, %v935_v34  ;;  %v9435_v34 = vadd.f32 %v8928_v55, %v9015_v26 }
 0x2de   : > { %15885 = vst [vmem:[#allocation324_spill] sm:$0xff] %v9371_v3  ;;  %v4049_v56 = vadd.f32 %v4048_v36, %v3906_v45  ;;  %v3907_v44 = vsub.f32 %v3619_v9, %v3763_v28  ;;  %v2333_v36 = vand.u32 2147483647, %v9416_v27  ;;  %v6334_v45 = vpop.eup %6333  ;;  %v2656_v26 = vmul.f32 1.442695, %v2476_v46  ;;  %v9461_v46 = vld [vmem:[%s7381_s14 + $0xf0] sm:$0xff] }
 0x2df   : > { %15886 = vst [vmem:[#allocation325_spill] sm:$0xff] %v9375_v57  ;;  %v3764_v57 = vmul.f32 %v9398_v43, %v9067_v54  ;;  %v9451_v28 = vadd.f32 %v8937_v10, %v725_v8  ;;  %v9453_v9 = vpop.eup %6335  ;;  %v2334_v8 = vand.u32 2147483647, %v9435_v34 }
 0x2e0   : > { %15887 = vst [vmem:[#allocation326_spill] sm:$0xff] %v9379_v4  ;;  %v3478_v4 = vadd.f32 %v3221_v48, %v2902_v63  ;;  %v15908_v48 = vmax.f32 %v9420_v21, 0.0  ;;  %v9477_v63 = vld [vmem:[%s7381_s14 + $0xf8] sm:$0xff]  ;;  %v9481_v54 = vadd.f32 1.0, %v9453_v9  ;;  %6341 = vpow2.f32 %v2656_v26 }
 0x2e1   : > { %15889 = vst [vmem:[#allocation327_spill] sm:$0xff] %v9387_v7  ;;  %v3477_v7 = vadd.f32 %v3219_v33, %v2901_v39  ;;  %v3223_v33 = vmul.f32 0.6931472, %v6332_v61  ;;  %v9448_v39 = vadd.f32 %v8928_v55, %v9082_v16  ;;  %v3908_v30 = vsub.f32 %v3620_v40, %v3764_v57  ;;  %v9464_v16 = vld [vmem:[%s7386_s17 + $0xf0] sm:$0xff] }
 0x2e2   : > { %15890 = vst [vmem:[#allocation328_spill] sm:$0xff] %v9395_v23  ;;  %v2903_v23 = vmax.f32 %v9152_v18, 0.0  ;;  %6028 = vmatmul.msk.f32.gmra.mxu3 %vm1126_vm0, %v15908_v48  ;;  %v4050_v40 = vadd.f32 %v4049_v56, %v3907_v44  ;;  %v3622_v3 = vmul.f32 %v3478_v4, %v9464_v16  ;;  %v3766_v56 = vmul.f32 %v9461_v46, %v9126_v38  ;;  %v9491_v44 = vld [vmem:[%s7386_s17 + $0xf8] sm:$0xff] }
 0x2e3   : > { %15891 = vst [vmem:[#allocation329_spill] sm:$0xff] %v9398_v43  ;;  %v9439_v43 = vld [vmem:[%s7381_s14 + $0xe8] sm:$0xff]  ;;  %v3621_v61 = vmul.f32 %v3477_v7, %v9431_v0  ;;  %v9471_v7 = vpop.f32.mrf.mxu1  ;;  %6343 = vlog2.f32 %v9481_v54 }
 0x2e4   : > { %15892 = vst [vmem:[#allocation330_spill] sm:$0xff] %v9402_v2  ;;  %v3765_v62 = vmul.f32 %v9439_v43, %v9102_v5  ;;  %v938_v57 = vpop.f32.mrf.mxu2  ;;  %v4051_v26 = vadd.f32 %v4050_v40, %v3908_v30  ;;  %v15916_v30 = vmax.f32 %v9451_v28, 0.0  ;;  %v3910_v38 = vsub.f32 %v3622_v3, %v3766_v56 }
 0x2e5   : > { %15894 = vst [vmem:[#allocation331_spill] sm:$0xff] %v9411_v59  ;;  %v9469_v59 = vadd.f32 %v8928_v55, %v9154_v24  ;;  %v2335_v24 = vand.u32 2147483647, %v9448_v39  ;;  %v9485_v5 = vadd.f32 %v8937_v10, %v938_v57  ;;  %v2478_v57 = vsub.f32 0.0, %v2334_v8  ;;  %v9529_v8 = vld [vmem:[%s7386_s17 + $0x100] sm:$0xff] }
 0x2e6   : > { %15895 = vst [vmem:[#allocation332_spill] sm:$0xff] %v9416_v27  ;;  %v3909_v48 = vsub.f32 %v3621_v61, %v3765_v62  ;;  %v2904_v62 = vmax.f32 %v9180_v37, 0.0  ;;  %5958 = vmatmul.msk.f32.gmra.mxu1 %vm1126_vm0, %v15916_v30 }
 0x2e7   : > { %15896 = vst [vmem:[#allocation333_spill] sm:$0xff] %v9420_v21  ;;  %v728_v21 = vpop.f32.mrf.mxu0  ;;  %v2336_v61 = vand.u32 2147483647, %v9469_v59  ;;  %v15922_v3 = vmax.f32 %v9485_v5, 0.0 }
 0x2e8   : > { %15897 = vst [vmem:[#allocation334_spill] sm:$0xff] %v9425_v49  ;;  %v3479_v49 = vadd.f32 %v3223_v33, %v2903_v23  ;;  %v9494_v23 = vld [vmem:[%s7381_s14 + $0x100] sm:$0xff]  ;;  %v3225_v33 = vmul.f32 0.6931472, %v6334_v45  ;;  %v9508_v45 = vadd.f32 %v8928_v55, %v9216_v11  ;;  %v9521_v11 = vld [vmem:[%s7381_s14 + $0x108] sm:$0xff] }
 0x2e9   : > { %15898 = vst [vmem:[#allocation335_spill] sm:$0xff] %v9431_v0  ;;  %v9500_v0 = vmul.f32 %v9477_v63, %v9152_v18 }
 0x2ea   : > { %15899 = vst [vmem:[#allocation336_spill] sm:$0xff] %v9435_v34  ;;  %v3623_v40 = vmul.f32 %v3479_v49, %v9491_v44  ;;  %v3480_v18 = vadd.f32 %v3225_v33, %v2904_v62  ;;  %6029 = vmatmul.msk.f32.gmra.mxu3 %vm1126_vm0, %v15922_v3  ;;  %v2337_v56 = vand.u32 2147483647, %v9508_v45  ;;  %v9540_v33 = vadd.f32 %v8937_v10, %v728_v21 }
 0x2eb   : > { %15900 = vst [vmem:[#allocation337_spill] sm:$0xff] %v9439_v43  ;;  %v2477_v43 = vsub.f32 0.0, %v2333_v36  ;;  %v9496_v36 = vpop.eup %6337 }
 0x2ec   : > { %15902 = vst [vmem:[#allocation338_spill] sm:$0xff] %v9448_v39  ;;  %v6340_v4 = vpop.eup %6339  ;;  %v9524_v32 = vadd.f32 1.0, %v9496_v36  ;;  %v14838_v3 = vmax.f32 %v9540_v33, 0.0 }
 0x2ed   : > { %15903 = vst [vmem:[#allocation339_spill] sm:$0xff] %v9451_v28  ;;  %v9526_v30 = vpop.eup %6341  ;;  %v3227_v49 = vmul.f32 0.6931472, %v6340_v4  ;;  %v2480_v28 = vsub.f32 0.0, %v2336_v61  ;;  %v9549_v61 = vmul.f32 %v9521_v11, %v9234_v35 }
 0x2ee   : > { %15904 = vst [vmem:[#allocation340_spill] sm:$0xff] %v9453_v9  ;;  %v2658_v9 = vmul.f32 1.442695, %v2477_v43  ;;  %v2479_v43 = vsub.f32 0.0, %v2335_v24  ;;  %v1714_v24 = vpop.f32.mrf.mxu1  ;;  %v9554_v21 = vadd.f32 1.0, %v9526_v30  ;;  %5959 = vmatmul.msk.f32.gmra.mxu1 %vm1126_vm0, %v14838_v3 }
 0x2ef   : > { %15905 = vst [vmem:[#allocation341_spill] sm:$0xff] %v9461_v46  ;;  %v9504_v46 = vpop.f32.mrf.mxu3  ;;  %v731_v62 = vpop.f32.mrf.mxu0 }
 0x2f0   : > { %15906 = vst [vmem:[#allocation342_spill] sm:$0xff] %v9464_v16  ;;  %v9517_v16 = vmul.f32 %v9494_v23, %v9180_v37  ;;  %6345 = vpow2.f32 %v2658_v9  ;;  %v2662_v4 = vmul.f32 1.442695, %v2479_v43  ;;  %v3624_v9 = vmul.f32 %v3480_v18, %v9529_v8 }
 0x2f1   : > { %15907 = vst [vmem:[#allocation343_spill] sm:$0xff] %v9469_v59  ;;  %6347 = vlog2.f32 %v9524_v32  ;;  %v9563_v43 = vadd.f32 %v8928_v55, %v9343_v13  ;;  %v2481_v37 = vsub.f32 0.0, %v2337_v56  ;;  %v9578_v13 = vadd.f32 %v8937_v10, %v731_v62 }
 0x2f2   : > { %15909 = vst [vmem:[#allocation344_spill] sm:$0xff] %v9477_v63  ;;  %v4052_v63 = vadd.f32 %v4051_v26, %v3909_v48  ;;  %v941_v48 = vpop.f32.mrf.mxu2 }
 0x2f3   : > { %15910 = vst [vmem:[#allocation345_spill] sm:$0xff] %v9481_v54  ;;  %v9543_v26 = vadd.f32 %v8937_v10, %v941_v48  ;;  %v6344_v48 = vpop.eup %6343  ;;  %v9570_v54 = vld [vmem:[%s7386_s17 + $0x108] sm:$0xff]  ;;  %v2339_v62 = vand.u32 2147483647, %v9563_v43 }
 0x2f4   : > { %15911 = vst [vmem:[#allocation346_spill] sm:$0xff] %v9485_v5  ;;  %v4053_v18 = vadd.f32 %v4052_v63, %v3910_v38  ;;  %v3912_v63 = vsub.f32 %v3624_v9, %v9517_v16 }
 0x2f5   : > { %15912 = vst [vmem:[#allocation347_spill] sm:$0xff] %v9491_v44  ;;  %v2660_v44 = vmul.f32 1.442695, %v2478_v57  ;;  %v3911_v57 = vsub.f32 %v3623_v40, %v9500_v0  ;;  %v9558_v0 = vld [vmem:[%s7381_s14 + $0x110] sm:$0xff]  ;;  %v2664_v40 = vmul.f32 1.442695, %v2480_v28 }
 0x2f6   : > { %15913 = vst [vmem:[#allocation348_spill] sm:$0xff] %v9494_v23  ;;  %v9533_v23 = vadd.f32 %v8928_v55, %v9279_v6  ;;  %v2905_v6 = vmax.f32 %v9234_v35, 0.0  ;;  %v2906_v28 = vmax.f32 %v9294_v60, 0.0  ;;  %v9580_v38 = vpop.eup %6345  ;;  %v9585_v56 = vmul.f32 %v9558_v0, %v9294_v60  ;;  %v1717_v35 = vpop.f32.mrf.mxu1 }
 0x2f7   : > { %15914 = vst [vmem:[#allocation349_spill] sm:$0xff] %v9496_v36  ;;  %6349 = vpow2.f32 %v2660_v44  ;;  %v9575_v44 = vadd.f32 %v8928_v55, %v9404_v12  ;;  %v4054_v12 = vadd.f32 %v4053_v18, %v3911_v57  ;;  %v15933_v36 = vmax.f32 %v9543_v26, 0.0  ;;  %v6348_v9 = vpop.eup %6347 }
 0x2f8   : > { %15915 = vst [vmem:[#allocation350_spill] sm:$0xff] %v9508_v45  ;;  %6351 = vpow2.f32 %v2662_v4  ;;  %v9591_v4 = vpop.f32.mrf.mxu3  ;;  %v2666_v60 = vmul.f32 1.442695, %v2481_v37  ;;  %v9603_v57 = vadd.f32 %v8928_v55, %v9471_v7  ;;  %v9618_v7 = vadd.f32 %v8928_v55, %v1714_v24 }
 0x2f9   : > { %15917 = vst [vmem:[#allocation351_spill] sm:$0xff] %v9521_v11  ;;  %v2338_v11 = vand.u32 2147483647, %v9533_v23  ;;  %6353 = vlog2.f32 %v9554_v21  ;;  %6030 = vmatmul.msk.f32.gmra.mxu3 %vm1126_vm0, %v15933_v36  ;;  %v9612_v36 = vadd.f32 1.0, %v9580_v38  ;;  %v2340_v18 = vand.u32 2147483647, %v9575_v44 }
 0x2fa   : > { %15918 = vst [vmem:[#allocation352_spill] sm:$0xff] %v9524_v32  ;;  %6355 = vpow2.f32 %v2664_v40  ;;  %v944_v16 = vpop.f32.mrf.mxu2  ;;  %v4055_v32 = vadd.f32 %v4054_v12, %v3912_v63  ;;  %v2341_v55 = vand.u32 2147483647, %v9603_v57 }
 0x2fb   : > { %15919 = vst [vmem:[#allocation353_spill] sm:$0xff] %v9526_v30  ;;  %v2482_v3 = vsub.f32 0.0, %v2338_v11  ;;  %v2908_v30 = vmax.f32 %v9367_v19, 0.0  ;;  %v9626_v5 = vadd.f32 %v8937_v10, %v944_v16  ;;  %6357 = vpow2.f32 %v2666_v60  ;;  %v9654_v16 = vld [vmem:[%s14426_s4] ss:$0 sm:$0xff] }
 0x2fc   : > { %15920 = vst [vmem:[#allocation354_spill] sm:$0xff] %v9529_v8  ;;  %v3481_v8 = vadd.f32 %v3227_v49, %v2905_v6  ;;  %v3229_v49 = vmul.f32 0.6931472, %v6344_v48  ;;  %v9588_v6 = vld [vmem:[%s7381_s14 + $0x118] sm:$0xff]  ;;  %6359 = vlog2.f32 %v9612_v36  ;;  %v2484_v10 = vsub.f32 0.0, %v2340_v18 }
 0x2fd   : > { %15921 = vst [vmem:[#allocation355_spill] sm:$0xff] %v9533_v23  ;;  %v9605_v11 = vpop.eup %6349  ;;  %v9609_v40 = vmul.f32 %v9588_v6, %v9330_v17 }
 0x2fe   : > { %15923 = vst [vmem:[#allocation356_spill] sm:$0xff] %v9540_v33  ;;  %v9598_v48 = vmul.f32 %v3481_v8, %v9570_v54  ;;  %v14853_v8 = vmax.f32 %v9578_v13, 0.0  ;;  %v3482_v37 = vadd.f32 %v3229_v49, %v2906_v28  ;;  %v9631_v28 = vadd.f32 1.0, %v9605_v11 }
 0x2ff   : > { %15924 = vst [vmem:[#allocation357_spill] sm:$0xff] %v9543_v26  ;;  %v9623_v26 = vld [vmem:[%s7386_s17 + $0x110] sm:$0xff]  ;;  %v14856_v49 = vmax.f32 %v9626_v5, 0.0 }
 0x300   : > { %15925 = vst [vmem:[#allocation358_spill] sm:$0xff] %v9554_v21  ;;  %v9620_v21 = vpop.eup %6351  ;;  %v3913_v63 = vsub.f32 %v9598_v48, %v9549_v61  ;;  %5960 = vmatmul.msk.f32.gmra.mxu1 %vm1126_vm0, %v14853_v8  ;;  %v3626_v60 = vmul.f32 %v3482_v37, %v9623_v26 }
 0x301   : > { %15926 = vst [vmem:[#allocation359_spill] sm:$0xff] %v9558_v0  ;;  %v2907_v0 = vmax.f32 %v9330_v17, 0.0  ;;  %v2668_v17 = vmul.f32 1.442695, %v2482_v3  ;;  %v6354_v33 = vpop.eup %6353  ;;  %v9640_v3 = vld [vmem:[#allocation5] ss:$0 sm:$0xff]  ;;  %6031 = vmatmul.msk.f32.gmra.mxu3 %vm1126_vm0, %v14856_v49 }
 0x302   : > { %15927 = vst [vmem:[#allocation360_spill] sm:$0xff] %v9563_v43  ;;  %v9637_v24 = vpop.eup %6355  ;;  %v9643_v61 = vadd.f32 %v9640_v3, %v1717_v35  ;;  %v9648_v12 = vadd.f32 1.0, %v9620_v21  ;;  %v9660_v35 = vld [vmem:[%s7381_s14 + $0x120] sm:$0xff]  ;;  %v3233_v18 = vmul.f32 0.6931472, %v6354_v33  ;;  %v947_v37 = vpop.f32.mrf.mxu2 }
 0x303   : > { %15928 = vst [vmem:[#allocation361_spill] sm:$0xff] %v9570_v54  ;;  %v734_v54 = vpop.f32.mrf.mxu0  ;;  %6361 = vpow2.f32 %v2668_v17  ;;  %v9673_v33 = vpop.f32.mrf.mxu3  ;;  %v2672_v17 = vmul.f32 1.442695, %v2484_v10 }
 0x304   : > { %15929 = vst [vmem:[#allocation362_spill] sm:$0xff] %v9575_v44  ;;  %6363 = vlog2.f32 %v9631_v28  ;;  %v3484_v2 = vadd.f32 %v3233_v18, %v2908_v30 }
 0x305   : > { %15930 = vst [vmem:[#allocation363_spill] sm:$0xff] %v9578_v13  ;;  %6365 = vlog2.f32 %v9648_v12  ;;  %v9692_v13 = vld [vmem:[%s7381_s14 + $0x128] sm:$0xff] }
 0x306   : > { %15931 = vst [vmem:[#allocation364_spill] sm:$0xff] %v9580_v38  ;;  %v2483_v38 = vsub.f32 0.0, %v2339_v62  ;;  %v2342_v62 = vand.u32 2147483647, %v9618_v7 }
 0x307   : > { %15932 = vst [vmem:[#allocation365_spill] sm:$0xff] %v9588_v6  ;;  %v3231_v6 = vmul.f32 0.6931472, %v6348_v9  ;;  %v9657_v9 = vadd.f32 %v9654_v16, %v734_v54  ;;  %v2485_v54 = vsub.f32 0.0, %v2341_v55  ;;  %v3914_v55 = vsub.f32 %v3626_v60, %v9585_v56  ;;  %v9697_v60 = vld [vmem:[%s7381_s14 + $0x130] sm:$0xff] }
 0x308   : > { %15934 = vst [vmem:[#allocation366_spill] sm:$0xff] %v9603_v57  ;;  %v2670_v8 = vmul.f32 1.442695, %v2483_v38  ;;  %v2343_v38 = vand.u32 2147483647, %v9643_v61  ;;  %v2486_v10 = vsub.f32 0.0, %v2342_v62 }
 0x309   : > { %15935 = vst [vmem:[#allocation367_spill] sm:$0xff] %v9605_v11  ;;  %v3483_v48 = vadd.f32 %v3231_v6, %v2907_v0  ;;  %v1720_v6 = vpop.f32.mrf.mxu1  ;;  %v9680_v11 = vadd.f32 %v9654_v16, %v947_v37  ;;  %v9687_v0 = vmul.f32 %v9660_v35, %v9367_v19  ;;  %v2909_v56 = vmax.f32 %v9416_v27, 0.0 }
 0x30a   : > { %15936 = vst [vmem:[#allocation368_spill] sm:$0xff] %v9612_v36  ;;  %v9670_v36 = vadd.f32 1.0, %v9637_v24  ;;  %v9677_v49 = vadd.f32 %v9640_v3, %v1720_v6  ;;  %v4056_v6 = vadd.f32 %v4055_v32, %v3913_v63  ;;  %6367 = vpow2.f32 %v2670_v8  ;;  %v9706_v63 = vld [vmem:[%s7386_s17 + $0x120] sm:$0xff] }
 0x30b   : > { %15937 = vst [vmem:[#allocation369_spill] sm:$0xff] %v9618_v7  ;;  %v15954_v19 = vmax.f32 %v9657_v9, 0.0  ;;  %v2487_v30 = vsub.f32 0.0, %v2343_v38  ;;  %v14870_v62 = vmax.f32 %v9680_v11, 0.0 }
 0x30c   : > { %15938 = vst [vmem:[#allocation370_spill] sm:$0xff] %v9620_v21  ;;  %v9682_v21 = vpop.eup %6357  ;;  %v2344_v37 = vand.u32 2147483647, %v9677_v49  ;;  %6369 = vlog2.f32 %v9670_v36  ;;  %v4057_v18 = vadd.f32 %v4056_v6, %v3914_v55  ;;  %v3628_v55 = vmul.f32 %v3484_v2, %v9706_v63 }
 0x30d   : > { %15939 = vst [vmem:[#allocation371_spill] sm:$0xff] %v9623_v26  ;;  %v9666_v26 = vld [vmem:[%s7386_s17 + $0x118] sm:$0xff]  ;;  %5961 = vmatmul.msk.f32.gmra.mxu1 %vm1126_vm0, %v15954_v19  ;;  %v9709_v8 = vadd.f32 1.0, %v9682_v21  ;;  %6371 = vpow2.f32 %v2672_v17  ;;  %6032 = vmatmul.msk.f32.gmra.mxu3 %vm1126_vm0, %v14870_v62 }
 0x30e   : > { %15940 = vst [vmem:[#allocation372_spill] sm:$0xff] %v9626_v5  ;;  %v3627_v5 = vmul.f32 %v3483_v48, %v9666_v26 }
 0x30f   : > { %15941 = vst [vmem:[#allocation373_spill] sm:$0xff] %v9631_v28  ;;  %v737_v28 = vpop.f32.mrf.mxu0 }
 0x310   : > { %15942 = vst [vmem:[#allocation374_spill] sm:$0xff] %v9637_v24  ;;  %v6360_v24 = vpop.eup %6359  ;;  %v3915_v19 = vsub.f32 %v3627_v5, %v9609_v40  ;;  %v9722_v17 = vadd.f32 %v9654_v16, %v737_v28 }
 0x311   : > { %15943 = vst [vmem:[#allocation375_spill] sm:$0xff] %v9643_v61  ;;  %v9703_v32 = vpop.eup %6361  ;;  %v1723_v5 = vpop.f32.mrf.mxu1 }
 0x312   : > { %15944 = vst [vmem:[#allocation376_spill] sm:$0xff] %v9648_v12  ;;  %v6364_v48 = vpop.eup %6363  ;;  %v2676_v12 = vmul.f32 1.442695, %v2486_v10  ;;  %v9729_v10 = vadd.f32 1.0, %v9703_v32 }
 0x313   : > { %15945 = vst [vmem:[#allocation377_spill] sm:$0xff] %v9657_v9  ;;  %v6366_v38 = vpop.eup %6365  ;;  %v3237_v28 = vmul.f32 0.6931472, %v6364_v48  ;;  %v16121_v9 = vld [vmem:[#allocation80_spill] sm:$0xff] }
 0x314   : > { %15946 = vst [vmem:[#allocation378_spill] sm:$0xff] %v9660_v35  ;;  %v2674_v35 = vmul.f32 1.442695, %v2485_v54  ;;  %v9714_v54 = vmul.f32 %v9692_v13, %v9416_v27  ;;  %v9734_v6 = vpop.eup %6367  ;;  %v4058_v27 = vadd.f32 %v4057_v18, %v3915_v19  ;;  %v3239_v48 = vmul.f32 0.6931472, %v6366_v38 }
 0x315   : > { %15947 = vst [vmem:[#allocation379_spill] sm:$0xff] %v9666_v26  ;;  %v3235_v26 = vmul.f32 0.6931472, %v6360_v24  ;;  %v950_v24 = vpop.f32.mrf.mxu2  ;;  %v6370_v2 = vpop.eup %6369  ;;  %v2911_v38 = vmax.f32 %v9448_v39, 0.0  ;;  %v10338_v1 = vadd.f32 %v9640_v3, %v16121_v9 }
 0x316   : > { %15948 = vst [vmem:[#allocation380_spill] sm:$0xff] %v9670_v36  ;;  %v9719_v36 = vmul.f32 %v9697_v60, %v9435_v34  ;;  %6373 = vpow2.f32 %v2674_v35  ;;  %v9732_v40 = vadd.f32 %v9654_v16, %v950_v24  ;;  %v9740_v35 = vadd.f32 %v9640_v3, %v1723_v5  ;;  %v9742_v24 = vpop.eup %6371 }
 0x317   : > { %15949 = vst [vmem:[#allocation381_spill] sm:$0xff] %v9677_v49  ;;  %6375 = vlog2.f32 %v9709_v8 }
 0x318   : > { %15950 = vst [vmem:[#allocation382_spill] sm:$0xff] %v9680_v11  ;;  %6377 = vpow2.f32 %v2676_v12  ;;  %v9751_v11 = vld [vmem:[%s7381_s14 + $0x138] sm:$0xff]  ;;  %v2345_v12 = vand.u32 2147483647, %v9740_v35 }
 0x319   : > { %15951 = vst [vmem:[#allocation383_spill] sm:$0xff] %v9682_v21  ;;  %v2488_v21 = vsub.f32 0.0, %v2344_v37  ;;  %v2678_v37 = vmul.f32 1.442695, %v2487_v30  ;;  %6379 = vlog2.f32 %v9729_v10 }
 0x31a   : > { %15952 = vst [vmem:[#allocation384_spill] sm:$0xff] %v9692_v13  ;;  %v740_v13 = vpop.f32.mrf.mxu0 }
 0x31b   : > { %15953 = vst [vmem:[#allocation385_spill] sm:$0xff] %v9697_v60  ;;  %v2910_v60 = vmax.f32 %v9435_v34, 0.0  ;;  %v2680_v30 = vmul.f32 1.442695, %v2488_v21  ;;  %v9762_v18 = vadd.f32 %v9654_v16, %v740_v13  ;;  %v3916_v21 = vsub.f32 %v3628_v55, %v9687_v0  ;;  %v9770_v34 = vld [vmem:[%s7386_s17 + $0x130] sm:$0xff] }
 0x31c   : > { %15955 = vst [vmem:[#allocation386_spill] sm:$0xff] %v9703_v32  ;;  %v9745_v32 = vld [vmem:[%s7386_s17 + $0x128] sm:$0xff]  ;;  %6381 = vpow2.f32 %v2678_v37  ;;  %v9766_v5 = vpop.eup %6373  ;;  %v9777_v0 = vmul.f32 %v9751_v11, %v9448_v39 }
 0x31d   : > { %15956 = vst [vmem:[#allocation387_spill] sm:$0xff] %v9706_v63  ;;  %v3485_v63 = vadd.f32 %v3235_v26, %v2909_v56  ;;  %v9755_v26 = vadd.f32 1.0, %v9734_v6  ;;  %v15967_v56 = vmax.f32 %v9722_v17, 0.0  ;;  %v3486_v19 = vadd.f32 %v3237_v28, %v2910_v60  ;;  %v6376_v13 = vpop.eup %6375  ;;  %v953_v55 = vpop.f32.mrf.mxu2 }
 0x31e   : > { %15957 = vst [vmem:[#allocation388_spill] sm:$0xff] %v9709_v8  ;;  %v9747_v8 = vpop.f32.mrf.mxu3  ;;  %v2912_v60 = vmax.f32 %v9469_v59, 0.0  ;;  %6383 = vpow2.f32 %v2680_v30  ;;  %v9783_v28 = vpop.eup %6377 }
 0x31f   : > { %15958 = vst [vmem:[#allocation389_spill] sm:$0xff] %v9722_v17  ;;  %5962 = vmatmul.msk.f32.gmra.mxu1 %vm1126_vm0, %v15967_v56  ;;  %v3629_v62 = vmul.f32 %v3485_v63, %v9745_v32  ;;  %v2489_v56 = vsub.f32 0.0, %v2345_v12  ;;  %v3487_v17 = vadd.f32 %v3239_v48, %v2911_v38  ;;  %v15972_v63 = vmax.f32 %v9732_v40, 0.0  ;;  %v1726_v48 = vpop.f32.mrf.mxu1  ;;  %v6380_v39 = vpop.eup %6379 }
 0x320   : > { %15959 = vst [vmem:[#allocation390_spill] sm:$0xff] %v9729_v10  ;;  %v3241_v10 = vmul.f32 0.6931472, %v6370_v2  ;;  %6385 = vlog2.f32 %v9755_v26  ;;  %v9788_v12 = vadd.f32 %v9654_v16, %v953_v55  ;;  %v4059_v38 = vadd.f32 %v4058_v27, %v3916_v21  ;;  %v9808_v21 = vld [vmem:[%s7381_s14 + $0x148] sm:$0xff] }
 0x321   : > { %15960 = vst [vmem:[#allocation391_spill] sm:$0xff] %v9732_v40  ;;  %6033 = vmatmul.msk.f32.gmra.mxu3 %vm1126_vm0, %v15972_v63  ;;  %v2682_v37 = vmul.f32 1.442695, %v2489_v56  ;;  %v3630_v30 = vmul.f32 %v3486_v19, %v9770_v34  ;;  %v9798_v63 = vadd.f32 1.0, %v9766_v5  ;;  %v9801_v56 = vadd.f32 %v9640_v3, %v1726_v48 }
 0x322   : > { %15961 = vst [vmem:[#allocation392_spill] sm:$0xff] %v9734_v6  ;;  %v9773_v6 = vadd.f32 1.0, %v9742_v24  ;;  %v743_v2 = vpop.f32.mrf.mxu0  ;;  %v3488_v55 = vadd.f32 %v3241_v10, %v2912_v60  ;;  %v3243_v40 = vmul.f32 0.6931472, %v6376_v13  ;;  %v9805_v27 = vpop.eup %6381  ;;  %v9811_v19 = vadd.f32 1.0, %v9783_v28 }
 0x323   : > { %15962 = vst [vmem:[#allocation393_spill] sm:$0xff] %v9740_v35  ;;  %v15983_v10 = vmax.f32 %v9762_v18, 0.0  ;;  %v9828_v13 = vadd.f32 %v9654_v16, %v743_v2  ;;  %v2914_v2 = vmax.f32 %v9533_v23, 0.0 }
 0x324   : > { %15963 = vst [vmem:[#allocation394_spill] sm:$0xff] %v9742_v24  ;;  %v3917_v24 = vsub.f32 %v3629_v62, %v9714_v54  ;;  %6387 = vlog2.f32 %v9773_v6  ;;  %v2913_v54 = vmax.f32 %v9508_v45, 0.0  ;;  %v9830_v60 = vpop.eup %6383 }
 0x325   : > { %15964 = vst [vmem:[#allocation395_spill] sm:$0xff] %v9745_v32  ;;  %v9792_v32 = vld [vmem:[%s7386_s17 + $0x138] sm:$0xff]  ;;  %6389 = vpow2.f32 %v2682_v37  ;;  %v3918_v37 = vsub.f32 %v3630_v30, %v9719_v36 }
 0x326   : > { %15965 = vst [vmem:[#allocation396_spill] sm:$0xff] %v9751_v11  ;;  %v9795_v11 = vld [vmem:[%s7381_s14 + $0x140] sm:$0xff]  ;;  %v9833_v48 = vpop.f32.mrf.mxu3  ;;  %6391 = vlog2.f32 %v9798_v63  ;;  %v3489_v36 = vadd.f32 %v3243_v40, %v2913_v54 }
 0x327   : > { %15966 = vst [vmem:[#allocation397_spill] sm:$0xff] %v9755_v26  ;;  %v9817_v26 = vld [vmem:[%s7386_s17 + $0x140] sm:$0xff]  ;;  %v9821_v62 = vmul.f32 %v9795_v11, %v9469_v59  ;;  %5963 = vmatmul.msk.f32.gmra.mxu1 %vm1126_vm0, %v15983_v10  ;;  %v4060_v59 = vadd.f32 %v4059_v38, %v3917_v24  ;;  %v9842_v10 = vadd.f32 1.0, %v9805_v27  ;;  %6393 = vlog2.f32 %v9811_v19  ;;  %v956_v24 = vpop.f32.mrf.mxu2 }
 0x328   : > { %15968 = vst [vmem:[#allocation398_spill] sm:$0xff] %v9762_v18  ;;  %v10300_v18 = vld [vmem:[%s7381_s14 + $0x280] sm:$0xff] }
 0x329   : > { %15969 = vst [vmem:[#allocation399_spill] sm:$0xff] %v9766_v5  ;;  %v3631_v5 = vmul.f32 %v3487_v17, %v9792_v32  ;;  %v3245_v17 = vmul.f32 0.6931472, %v6380_v39  ;;  %v3632_v39 = vmul.f32 %v3488_v55, %v9817_v26  ;;  %v1729_v55 = vpop.f32.mrf.mxu1 }
 0x32a   : > { %15970 = vst [vmem:[#allocation400_spill] sm:$0xff] %v9770_v34  ;;  %v2346_v34 = vand.u32 2147483647, %v9801_v56  ;;  %v9877_v40 = vadd.f32 %v9640_v3, %v1729_v55  ;;  %v15997_v55 = vmax.f32 %v9828_v13, 0.0 }
 0x32b   : > { %15971 = vst [vmem:[#allocation401_spill] sm:$0xff] %v9773_v6  ;;  %v9854_v6 = vadd.f32 1.0, %v9830_v60 }
 0x32c   : > { %15973 = vst [vmem:[#allocation402_spill] sm:$0xff] %v9783_v28  ;;  %v9838_v28 = vmul.f32 %v9808_v21, %v9508_v45  ;;  %v9851_v45 = vld [vmem:[%s7386_s17 + $0x148] sm:$0xff] }
 0x32d   : > { %15974 = vst [vmem:[#allocation403_spill] sm:$0xff] %v9788_v12 }
 0x32e   : > { %15975 = vst [vmem:[#allocation404_spill] sm:$0xff] %v9792_v32  ;;  %v2490_v32 = vsub.f32 0.0, %v2346_v34  ;;  %v15987_v34 = vmax.f32 %v9788_v12, 0.0  ;;  %v3490_v12 = vadd.f32 %v3245_v17, %v2914_v2 }
 0x32f   : > { %15976 = vst [vmem:[#allocation405_spill] sm:$0xff] %v9795_v11  ;;  %v6386_v11 = vpop.eup %6385  ;;  %5964 = vmatmul.msk.f32.gmra.mxu1 %vm1126_vm0, %v15997_v55 }
 0x330   : > { %15977 = vst [vmem:[#allocation406_spill] sm:$0xff] %v9798_v63  ;;  %v2684_v30 = vmul.f32 1.442695, %v2490_v32  ;;  %6034 = vmatmul.msk.f32.gmra.mxu3 %vm1126_vm0, %v15987_v34  ;;  %v6388_v38 = vpop.eup %6387  ;;  %v9858_v32 = vadd.f32 %v9654_v16, %v956_v24  ;;  %v4061_v34 = vadd.f32 %v4060_v59, %v3918_v37  ;;  %v9869_v63 = vld [vmem:[%s7381_s14 + $0x158] sm:$0xff]  ;;  %v3633_v37 = vmul.f32 %v3489_v36, %v9851_v45 }
 0x331   : > { %15978 = vst [vmem:[#allocation407_spill] sm:$0xff] %v9801_v56  ;;  %v9860_v54 = vpop.eup %6389  ;;  %v3249_v17 = vmul.f32 0.6931472, %v6388_v38  ;;  %v9892_v36 = vmul.f32 %v9869_v63, %v9563_v43  ;;  %v9896_v38 = vld [vmem:[%s7381_s14 + $0x160] sm:$0xff] }
 0x332   : > { %15979 = vst [vmem:[#allocation408_spill] sm:$0xff] %v9805_v27  ;;  %v3247_v27 = vmul.f32 0.6931472, %v6386_v11  ;;  %6395 = vpow2.f32 %v2684_v30  ;;  %v9874_v24 = vadd.f32 1.0, %v9860_v54  ;;  %v6392_v59 = vpop.eup %6391  ;;  %v3920_v11 = vsub.f32 %v3632_v39, %v9821_v62 }
 0x333   : > { %15980 = vst [vmem:[#allocation409_spill] sm:$0xff] %v9808_v21  ;;  %v3919_v21 = vsub.f32 %v3631_v5, %v9777_v0  ;;  %v746_v5 = vpop.f32.mrf.mxu0  ;;  %v9866_v0 = vld [vmem:[%s7386_s17 + $0x150] sm:$0xff]  ;;  %6397 = vlog2.f32 %v9842_v10 }
 0x334   : > { %15981 = vst [vmem:[#allocation410_spill] sm:$0xff] %v9811_v19  ;;  %6399 = vlog2.f32 %v9854_v6  ;;  %v3634_v62 = vmul.f32 %v3490_v12, %v9866_v0 }
 0x335   : > { %15982 = vst [vmem:[#allocation411_spill] sm:$0xff] %v9817_v26  ;;  %v9863_v26 = vld [vmem:[%s7381_s14 + $0x150] sm:$0xff]  ;;  %v4062_v30 = vadd.f32 %v4061_v34, %v3919_v21  ;;  %v2916_v21 = vmax.f32 %v9575_v44, 0.0  ;;  %v3251_v34 = vmul.f32 0.6931472, %v6392_v59  ;;  %6401 = vlog2.f32 %v9874_v24 }
 0x336   : > { %15984 = vst [vmem:[#allocation412_spill] sm:$0xff] %v9828_v13  ;;  %v3778_v19 = vmul.f32 %v9863_v26, %v9533_v23  ;;  %v16002_v59 = vmax.f32 %v9858_v32, 0.0  ;;  %v9931_v23 = vld [vmem:[%s7381_s14 + $0x168] sm:$0xff] }
 0x337   : > { %15985 = vst [vmem:[#allocation413_spill] sm:$0xff] %v9830_v60  ;;  %v2915_v60 = vmax.f32 %v9563_v43, 0.0  ;;  %v4063_v12 = vadd.f32 %v4062_v30, %v3920_v11  ;;  %v9919_v30 = vld [vmem:[%s7386_s17 + $0x160] sm:$0xff] }
 0x338   : > { %15986 = vst [vmem:[#allocation414_spill] sm:$0xff] %v9842_v10  ;;  %v6394_v10 = vpop.eup %6393  ;;  %6035 = vmatmul.msk.f32.gmra.mxu3 %vm1126_vm0, %v16002_v59 }
 0x339   : > { %15988 = vst [vmem:[#allocation415_spill] sm:$0xff] %v9851_v45  ;;  %v3491_v39 = vadd.f32 %v3247_v27, %v2915_v60  ;;  %v9902_v55 = vpop.eup %6395  ;;  %v3921_v27 = vsub.f32 %v3633_v37, %v9838_v28  ;;  %v9906_v60 = vld [vmem:[%s7386_s17 + $0x158] sm:$0xff]  ;;  %v3492_v45 = vadd.f32 %v3249_v17, %v2916_v21  ;;  %v1732_v37 = vpop.f32.mrf.mxu1  ;;  %v3922_v17 = vsub.f32 %v3634_v62, %v3778_v19 }
 0x33a   : > { %15989 = vst [vmem:[#allocation416_spill] sm:$0xff] %v9854_v6  ;;  %v9900_v6 = vadd.f32 %v9654_v16, %v746_v5  ;;  %v6398_v5 = vpop.eup %6397  ;;  %v3780_v21 = vmul.f32 %v9896_v38, %v9575_v44  ;;  %v9924_v59 = vadd.f32 %v9640_v3, %v1732_v37  ;;  %v2918_v19 = vmax.f32 %v9618_v7, 0.0  ;;  %v9939_v37 = vld [vmem:[%s7381_s14 + $0x170] sm:$0xff] }
 0x33b   : > { %15990 = vst [vmem:[#allocation417_spill] sm:$0xff] %v9858_v32  ;;  %v6400_v32 = vpop.eup %6399  ;;  %v4064_v62 = vadd.f32 %v4063_v12, %v3921_v27  ;;  %v3255_v43 = vmul.f32 0.6931472, %v6398_v5  ;;  %v3781_v27 = vmul.f32 %v9931_v23, %v9603_v57  ;;  %v9953_v5 = vld [vmem:[%s7386_s17 + $0x170] sm:$0xff] }
 0x33c   : > { %15991 = vst [vmem:[#allocation418_spill] sm:$0xff] %v9860_v54  ;;  %v2347_v54 = vand.u32 2147483647, %v9877_v40  ;;  %v6402_v44 = vpop.eup %6401 }
 0x33d   : > { %15992 = vst [vmem:[#allocation419_spill] sm:$0xff] %v9863_v26  ;;  %v2917_v26 = vmax.f32 %v9603_v57, 0.0 }
 0x33e   : > { %15993 = vst [vmem:[#allocation420_spill] sm:$0xff] %v9866_v0  ;;  %v2491_v2 = vsub.f32 0.0, %v2347_v54  ;;  %v9909_v0 = vpop.f32.mrf.mxu3  ;;  %v959_v54 = vpop.f32.mrf.mxu2 }
 0x33f   : > { %15994 = vst [vmem:[#allocation421_spill] sm:$0xff] %v9869_v63  ;;  %v9915_v63 = vadd.f32 1.0, %v9902_v55  ;;  %v3493_v28 = vadd.f32 %v3251_v34, %v2917_v26  ;;  %v16010_v26 = vmax.f32 %v9900_v6, 0.0  ;;  %v3782_v34 = vmul.f32 %v9939_v37, %v9618_v7  ;;  %v16073_v7 = vld [vmem:[#allocation158_spill] sm:$0xff] }
 0x340   : > { %15995 = vst [vmem:[#allocation422_spill] sm:$0xff] %v9874_v24  ;;  %v3253_v24 = vmul.f32 0.6931472, %v6394_v10  ;;  %v2686_v11 = vmul.f32 1.442695, %v2491_v2  ;;  %v9927_v10 = vadd.f32 %v9654_v16, %v959_v54  ;;  %v3635_v2 = vmul.f32 %v3491_v39, %v9906_v60 }
 0x341   : > { %15996 = vst [vmem:[#allocation423_spill] sm:$0xff] %v9877_v40  ;;  %6403 = vlog2.f32 %v9915_v63  ;;  %v2348_v54 = vand.u32 2147483647, %v9924_v59  ;;  %v3636_v39 = vmul.f32 %v3492_v45, %v9919_v30  ;;  %5965 = vmatmul.msk.f32.gmra.mxu1 %vm1126_vm0, %v16010_v26 }
 0x342   : > { %15998 = vst [vmem:[#allocation424_spill] sm:$0xff] %v9896_v38  ;;  %v9936_v38 = vld [vmem:[%s7386_s17 + $0x168] sm:$0xff]  ;;  %6405 = vpow2.f32 %v2686_v11  ;;  %v2919_v11 = vmax.f32 %v9643_v61, 0.0 }
 0x343   : > { %15999 = vst [vmem:[#allocation425_spill] sm:$0xff] %v9900_v6  ;;  %v2492_v45 = vsub.f32 0.0, %v2348_v54  ;;  %v3637_v26 = vmul.f32 %v3493_v28, %v9936_v38  ;;  %v16013_v6 = vmax.f32 %v9927_v10, 0.0  ;;  %v9966_v28 = vld [vmem:[%s7386_s17 + $0x178] sm:$0xff] }
 0x344   : > { %16000 = vst [vmem:[#allocation426_spill] sm:$0xff] %v9902_v55  ;;  %v749_v55 = vpop.f32.mrf.mxu0 }
 0x345   : > { %16001 = vst [vmem:[#allocation427_spill] sm:$0xff] %v9906_v60  ;;  %v3494_v60 = vadd.f32 %v3253_v24, %v2918_v19  ;;  %v9948_v12 = vadd.f32 %v9654_v16, %v749_v55  ;;  %v4065_v24 = vadd.f32 %v4064_v62, %v3922_v17  ;;  %v3923_v19 = vsub.f32 %v3635_v2, %v9892_v36  ;;  %v1735_v62 = vpop.f32.mrf.mxu1 }
 0x346   : > { %16003 = vst [vmem:[#allocation428_spill] sm:$0xff] %v9915_v63  ;;  %v3257_v63 = vmul.f32 0.6931472, %v6400_v32  ;;  %v3495_v55 = vadd.f32 %v3255_v43, %v2919_v11  ;;  %v2688_v57 = vmul.f32 1.442695, %v2492_v45  ;;  %6036 = vmatmul.msk.f32.gmra.mxu3 %vm1126_vm0, %v16013_v6  ;;  %v962_v32 = vpop.f32.mrf.mxu2  ;;  %v3924_v17 = vsub.f32 %v3636_v39, %v3780_v21  ;;  %v9975_v45 = vld [vmem:[%s7381_s14 + $0x178] sm:$0xff] }
 0x347   : > { %16004 = vst [vmem:[#allocation429_spill] sm:$0xff] %v9919_v30  ;;  %v2920_v30 = vmax.f32 %v9677_v49, 0.0  ;;  %v6404_v54 = vpop.eup %6403  ;;  %v3638_v36 = vmul.f32 %v3494_v60, %v9953_v5  ;;  %v2921_v2 = vmax.f32 %v9740_v35, 0.0  ;;  %v9978_v60 = vadd.f32 %v9640_v3, %v1735_v62 }
 0x348   : > { %16005 = vst [vmem:[#allocation430_spill] sm:$0xff] %v9924_v59  ;;  %v9970_v11 = vpop.eup %6405  ;;  %6407 = vpow2.f32 %v2688_v57  ;;  %v4066_v21 = vadd.f32 %v4065_v24, %v3923_v19  ;;  %v3925_v39 = vsub.f32 %v3637_v26, %v3781_v27  ;;  %v2922_v57 = vmax.f32 %v9801_v56, 0.0  ;;  %v9995_v26 = vld [vmem:[%s7381_s14 + $0x180] sm:$0xff] }
 0x349   : > { %16006 = vst [vmem:[#allocation431_spill] sm:$0xff] %v9927_v10  ;;  %v3496_v6 = vadd.f32 %v3257_v63, %v2920_v30  ;;  %v3261_v10 = vmul.f32 0.6931472, %v6404_v54  ;;  %v9984_v43 = vadd.f32 1.0, %v9970_v11  ;;  %v3639_v63 = vmul.f32 %v3495_v55, %v9966_v28 }
 0x34a   : > { %16007 = vst [vmem:[#allocation432_spill] sm:$0xff] %v9931_v23  ;;  %v3259_v23 = vmul.f32 0.6931472, %v6402_v44  ;;  %v9972_v44 = vpop.f32.mrf.mxu3  ;;  %v2349_v54 = vand.u32 2147483647, %v9978_v60  ;;  %v4067_v24 = vadd.f32 %v4066_v21, %v3924_v17  ;;  %v3926_v27 = vsub.f32 %v3638_v36, %v3782_v34 }
 0x34b   : > { %16008 = vst [vmem:[#allocation433_spill] sm:$0xff] %v9936_v38  ;;  %v9981_v38 = vld [vmem:[%s7386_s17 + $0x180] sm:$0xff]  ;;  %v3783_v19 = vmul.f32 %v9975_v45, %v9643_v61  ;;  %6409 = vlog2.f32 %v9984_v43  ;;  %v16023_v55 = vmax.f32 %v9948_v12, 0.0  ;;  %v3498_v17 = vadd.f32 %v3261_v10, %v2922_v57  ;;  %v10174_v61 = vld [vmem:[%s7381_s14 + $0x268] sm:$0xff] }
 0x34c   : > { %16009 = vst [vmem:[#allocation434_spill] sm:$0xff] %v9939_v37  ;;  %v9987_v37 = vadd.f32 %v9654_v16, %v962_v32  ;;  %v3497_v30 = vadd.f32 %v3259_v23, %v2921_v2  ;;  %v752_v62 = vpop.f32.mrf.mxu0  ;;  %v3640_v23 = vmul.f32 %v3496_v6, %v9981_v38  ;;  %v10006_v32 = vld [vmem:[%s7381_s14 + $0x188] sm:$0xff]  ;;  %v2493_v34 = vsub.f32 0.0, %v2349_v54  ;;  %v10027_v54 = vld [vmem:[%s7381_s14 + $0x190] sm:$0xff] }
 0x34d   : > { %16011 = vst [vmem:[#allocation435_spill] sm:$0xff] %v9948_v12  ;;  %5966 = vmatmul.msk.f32.gmra.mxu1 %vm1126_vm0, %v16023_v55  ;;  %v16025_v2 = vand.u32 2147483647, %v9359_v47  ;;  %v10019_v55 = vadd.f32 %v9654_v16, %v752_v62  ;;  %v3784_v10 = vmul.f32 %v9995_v26, %v9677_v49 }
 0x34e   : > { %16012 = vst [vmem:[#allocation436_spill] sm:$0xff] %v9953_v5  ;;  %v14935_v36 = vmax.f32 %v9987_v37, 0.0  ;;  %v16026_v5 = vld [vmem:[#allocation66_spill] sm:$0xff]  ;;  %v10021_v6 = vpop.eup %6407 }
 0x34f   : > { %16014 = vst [vmem:[#allocation437_spill] sm:$0xff] %v9966_v28  ;;  %v2519_v21 = vsub.f32 0.0, %v16025_v2  ;;  %v10016_v28 = vld [vmem:[%s7386_s17 + $0x190] sm:$0xff]  ;;  %v2690_v2 = vmul.f32 1.442695, %v2493_v34 }
 0x350   : > { %16015 = vst [vmem:[#allocation438_spill] sm:$0xff] %v9970_v11  ;;  %v9998_v11 = vld [vmem:[%s7386_s17 + $0x188] sm:$0xff]  ;;  %6037 = vmatmul.msk.f32.gmra.mxu3 %vm1126_vm0, %v14935_v36  ;;  %v3642_v34 = vmul.f32 %v3498_v17, %v10016_v28 }
 0x351   : > { %16016 = vst [vmem:[#allocation439_spill] sm:$0xff] %v9975_v45  ;;  %v10013_v45 = vadd.f32 %v9640_v3, %v16026_v5  ;;  %v3641_v57 = vmul.f32 %v3497_v30, %v9998_v11  ;;  %v965_v5 = vpop.f32.mrf.mxu2  ;;  %v1738_v30 = vpop.f32.mrf.mxu1  ;;  %6411 = vpow2.f32 %v2690_v2  ;;  %v2923_v2 = vmax.f32 %v9877_v40, 0.0 }
 0x352   : > { %16017 = vst [vmem:[#allocation440_spill] sm:$0xff] %v9978_v60 }
 0x353   : > { %16018 = vst [vmem:[#allocation441_spill] sm:$0xff] %v9981_v38  ;;  %v3927_v38 = vsub.f32 %v3639_v63, %v3783_v19  ;;  %v3785_v63 = vmul.f32 %v10006_v32, %v9740_v35  ;;  %v10039_v19 = vadd.f32 1.0, %v10021_v6  ;;  %v2376_v36 = vand.u32 2147483647, %v10013_v45  ;;  %v10061_v35 = vld [vmem:[%s7386_s17 + $0x198] sm:$0xff] }
 0x354   : > { %16019 = vst [vmem:[#allocation442_spill] sm:$0xff] %v9984_v43  ;;  %v4068_v43 = vadd.f32 %v4067_v24, %v3925_v39  ;;  %v16032_v39 = vld [vmem:[#allocation68_spill] sm:$0xff] }
 0x355   : > { %16020 = vst [vmem:[#allocation443_spill] sm:$0xff] %v9987_v37  ;;  %v10034_v62 = vadd.f32 %v9640_v3, %v16032_v39  ;;  %v3786_v39 = vmul.f32 %v10027_v54, %v9801_v56  ;;  %6413 = vlog2.f32 %v10039_v19  ;;  %v3929_v17 = vsub.f32 %v3641_v57, %v3785_v63 }
 0x356   : > { %16021 = vst [vmem:[#allocation444_spill] sm:$0xff] %v9995_v26  ;;  %v4069_v24 = vadd.f32 %v4068_v43, %v3926_v27  ;;  %v3928_v26 = vsub.f32 %v3640_v23, %v3784_v10  ;;  %v10047_v43 = vadd.f32 %v9640_v3, %v1738_v30  ;;  %v10050_v27 = vadd.f32 %v9654_v16, %v965_v5  ;;  %v10052_v10 = vpop.f32.mrf.mxu3 }
 0x357   : > { %16022 = vst [vmem:[#allocation445_spill] sm:$0xff] %v9998_v11  ;;  %v6410_v11 = vpop.eup %6409  ;;  %6415 = vlog2.f32 %v8710_v31  ;;  %v16040_v5 = vmax.f32 %v10019_v55, 0.0 }
 0x358   : > { %16024 = vst [vmem:[#allocation446_spill] sm:$0xff] %v10006_v32  ;;  %v4070_v23 = vadd.f32 %v4069_v24, %v3927_v38  ;;  %v3263_v32 = vmul.f32 0.6931472, %v6410_v11  ;;  %v2350_v30 = vand.u32 2147483647, %v10047_v43  ;;  %v3930_v24 = vsub.f32 %v3642_v34, %v3786_v39  ;;  %v16041_v11 = vld [vmem:[#allocation15_spill] sm:$0xff] }
 0x359   : > { %16027 = vst [vmem:[#allocation66_spill] sm:$0xff] %v10013_v45  ;;  %5967 = vmatmul.msk.f32.gmra.mxu1 %vm1126_vm0, %v16040_v5  ;;  %v14948_v63 = vmax.f32 %v10050_v27, 0.0  ;;  %v10070_v49 = vadd.f32 %v9654_v16, %v16041_v11  ;;  %6417 = vpow2.f32 %v8777_v14  ;;  %v2924_v34 = vmax.f32 %v9924_v59, 0.0 }
 0x35a   : > { %16028 = vst [vmem:[#allocation447_spill] sm:$0xff] %v10016_v28  ;;  %v4071_v38 = vadd.f32 %v4070_v23, %v3928_v26  ;;  %v3499_v57 = vadd.f32 %v3263_v32, %v2923_v2  ;;  %v2742_v28 = vmul.f32 1.442695, %v2519_v21  ;;  %v2494_v56 = vsub.f32 0.0, %v2350_v30  ;;  %v968_v32 = vpop.f32.mrf.mxu2 }
 0x35b   : > { %16029 = vst [vmem:[#allocation448_spill] sm:$0xff] %v10019_v55  ;;  %6038 = vmatmul.msk.f32.gmra.mxu3 %vm1126_vm0, %v14948_v63  ;;  %v2520_v21 = vsub.f32 0.0, %v2376_v36  ;;  %v16046_v63 = vld [vmem:[#allocation49_spill] sm:$0xff]  ;;  %v10096_v36 = vadd.f32 1.0, %v8798_v50 }
 0x35c   : > { %16030 = vst [vmem:[#allocation449_spill] sm:$0xff] %v10021_v6  ;;  %v10073_v6 = vpop.eup %6411  ;;  %v4072_v31 = vadd.f32 %v4071_v38, %v3929_v17  ;;  %v3643_v5 = vmul.f32 %v3499_v57, %v10061_v35  ;;  %v2692_v23 = vmul.f32 1.442695, %v2494_v56  ;;  %v1741_v17 = vpop.f32.mrf.mxu1  ;;  %v10188_v55 = vld [vmem:[%s7386_s17 + $0x250] sm:$0xff] }
 0x35d   : > { %16031 = vst [vmem:[#allocation450_spill] sm:$0xff] %v10027_v54  ;;  %v10058_v54 = vld [vmem:[%s7381_s14 + $0x198] sm:$0xff]  ;;  %v6414_v14 = vpop.eup %6413  ;;  %v10084_v39 = vadd.f32 1.0, %v10073_v6  ;;  %v10087_v57 = vadd.f32 %v9640_v3, %v1741_v17 }
 0x35e   : > { %16033 = vst [vmem:[#allocation68_spill] sm:$0xff] %v10034_v62  ;;  %v3787_v26 = vmul.f32 %v10058_v54, %v9877_v40  ;;  %v4073_v2 = vadd.f32 %v4072_v31, %v3930_v24  ;;  %v3265_v38 = vmul.f32 0.6931472, %v6414_v14  ;;  %v10089_v11 = vpop.eup %6415  ;;  %v10102_v40 = vld [vmem:[%s7386_s17 + $0x1a0] sm:$0xff]  ;;  %v10106_v31 = vadd.f32 %v9654_v16, %v968_v32  ;;  %v10119_v32 = vpop.f32.mrf.mxu3 }
 0x35f   : > { %16034 = vst [vmem:[#allocation451_spill] sm:$0xff] %v10039_v19  ;;  %v2377_v19 = vand.u32 2147483647, %v10034_v62  ;;  %6419 = vlog2.f32 %v10084_v39  ;;  %v16053_v14 = vld [vmem:[#allocation72_spill] sm:$0xff] }
 0x360   : > { %16035 = vst [vmem:[#allocation452_spill] sm:$0xff] %v10047_v43  ;;  %v3931_v30 = vsub.f32 %v3643_v5, %v3787_v26  ;;  %v3500_v5 = vadd.f32 %v3265_v38, %v2924_v34  ;;  %6421 = vpow2.f32 %v2692_v23  ;;  %v10108_v26 = vpop.eup %6417  ;;  %v10113_v17 = vadd.f32 %v9640_v3, %v16053_v14  ;;  %v16059_v14 = vld [vmem:[#allocation149_spill] sm:$0xff] }
 0x361   : > { %16036 = vst [vmem:[#allocation453_spill] sm:$0xff] %v10050_v27  ;;  %v2521_v56 = vsub.f32 0.0, %v2377_v19  ;;  %6423 = vpow2.f32 %v2742_v28  ;;  %v2744_v19 = vmul.f32 1.442695, %v2520_v21  ;;  %v14963_v28 = vmax.f32 %v10106_v31, 0.0 }
 0x362   : > { %16037 = vst [vmem:[#allocation454_spill] sm:$0xff] %v10052_v10  ;;  %v4074_v24 = vadd.f32 %v4073_v2, %v3931_v30  ;;  %v3644_v34 = vmul.f32 %v3500_v5, %v10102_v40  ;;  %v16058_v30 = vld [vmem:[#allocation129_spill] sm:$0xff]  ;;  %v3309_v21 = vmul.f32 0.6931472, %v8634_v53  ;;  %6425 = vlog2.f32 %v10096_v36  ;;  %v10595_v10 = vld [vmem:[%s7381_s14 + $0x1e0] sm:$0xff] }
 0x363   : > { %16038 = vst [vmem:[#allocation455_spill] sm:$0xff] %v10058_v54  ;;  %v10093_v54 = vadd.f32 %v9654_v16, %v16046_v63  ;;  %v2946_v38 = vmax.f32 %v16058_v30, 0.0  ;;  %v2947_v63 = vmax.f32 %v16059_v14, 0.0  ;;  %v2746_v5 = vmul.f32 1.442695, %v2521_v56  ;;  %6039 = vmatmul.msk.f32.gmra.mxu3 %vm1126_vm0, %v14963_v28 }
 0x364   : > { %16039 = vst [vmem:[#allocation456_spill] sm:$0xff] %v10061_v35  ;;  %v10099_v35 = vld [vmem:[%s7381_s14 + $0x1a0] sm:$0xff]  ;;  %6427 = vpow2.f32 %v2744_v19  ;;  %v10147_v28 = vadd.f32 1.0, %v10108_v26  ;;  %v2954_v51 = vmax.f32 %v10113_v17, 0.0 }
 0x365   : > { %16042 = vst [vmem:[#allocation15_spill] sm:$0xff] %v10070_v49  ;;  %v3788_v23 = vmul.f32 %v10099_v35, %v9924_v59  ;;  %v6420_v2 = vpop.eup %6419 }
 0x366   : > { %16043 = vst [vmem:[#allocation457_spill] sm:$0xff] %v10073_v6  ;;  %v2351_v6 = vand.u32 2147483647, %v10087_v57  ;;  %v10141_v50 = vpop.eup %6421  ;;  %v3267_v56 = vmul.f32 0.6931472, %v6420_v2 }
 0x367   : > { %16044 = vst [vmem:[#allocation458_spill] sm:$0xff] %v10084_v39  ;;  %v16055_v39 = vld [vmem:[#allocation132_spill] sm:$0xff] }
 0x368   : > { %16045 = vst [vmem:[#allocation459_spill] sm:$0xff] %v10087_v57  ;;  %v16056_v16 = vmax.f32 %v16055_v39, 0.0  ;;  %v2495_v27 = vsub.f32 0.0, %v2351_v6  ;;  %v10129_v39 = vld [vmem:[%s7381_s14 + $0x250] sm:$0xff]  ;;  %v2378_v6 = vand.u32 2147483647, %v10113_v17 }
 0x369   : > { %16047 = vst [vmem:[#allocation49_spill] sm:$0xff] %v10093_v54 }
 0x36a   : > { %16048 = vst [vmem:[#allocation460_spill] sm:$0xff] %v10096_v36  ;;  %5968 = vmatmul.msk.f32.gmra.mxu1 %vm1126_vm0, %v16056_v16  ;;  %v10133_v16 = vld [vmem:[%s7381_s14 + $0x258] sm:$0xff]  ;;  %v2694_v37 = vmul.f32 1.442695, %v2495_v27  ;;  %v2925_v36 = vmax.f32 %v9978_v60, 0.0  ;;  %v10156_v27 = vadd.f32 1.0, %v10141_v50 }
 0x36b   : > { %16049 = vst [vmem:[#allocation461_spill] sm:$0xff] %v10099_v35  ;;  %v3932_v35 = vsub.f32 %v3644_v34, %v3788_v23  ;;  %v1744_v34 = vpop.f32.mrf.mxu1  ;;  %v10144_v23 = vpop.eup %6423  ;;  %v10167_v19 = vmul.f32 %v10133_v16, %v16059_v14 }
 0x36c   : > { %16050 = vst [vmem:[#allocation462_spill] sm:$0xff] %v10102_v40  ;;  %v16062_v40 = vld [vmem:[#allocation207_spill] sm:$0xff]  ;;  %6429 = vpow2.f32 %v2694_v37  ;;  %v3501_v2 = vadd.f32 %v3267_v56, %v2925_v36  ;;  %v2522_v37 = vsub.f32 0.0, %v2378_v6  ;;  %v6426_v14 = vpop.eup %6425  ;;  %v10182_v36 = vadd.f32 1.0, %v10144_v23 }
 0x36d   : > { %16051 = vst [vmem:[#allocation463_spill] sm:$0xff] %v10106_v31  ;;  %v3311_v59 = vmul.f32 0.6931472, %v16062_v40  ;;  %v4075_v53 = vadd.f32 %v4074_v24, %v3932_v35  ;;  %v10150_v31 = vld [vmem:[%s7381_s14 + $0x1a8] sm:$0xff]  ;;  %v10159_v35 = vadd.f32 %v9640_v3, %v1744_v34  ;;  %v10163_v24 = vmul.f32 %v10129_v39, %v16058_v30  ;;  %v10192_v12 = vpop.eup %6427 }
 0x36e   : > { %16052 = vst [vmem:[#allocation464_spill] sm:$0xff] %v10108_v26  ;;  %v10153_v40 = vld [vmem:[%s7386_s17 + $0x1a8] sm:$0xff]  ;;  %6431 = vpow2.f32 %v2746_v5  ;;  %v10170_v26 = vld [vmem:[%s7381_s14 + $0x260] sm:$0xff]  ;;  %v3789_v56 = vmul.f32 %v10150_v31, %v9978_v60  ;;  %v16087_v60 = vld [vmem:[#allocation74_spill] sm:$0xff] }
 0x36f   : > { %16054 = vst [vmem:[#allocation72_spill] sm:$0xff] %v10113_v17  ;;  %6433 = vlog2.f32 %v10156_v27  ;;  %v2352_v30 = vand.u32 2147483647, %v10159_v35  ;;  %v16075_v34 = vld [vmem:[#allocation133_spill] sm:$0xff]  ;;  %v3645_v5 = vmul.f32 %v3501_v2, %v10153_v40  ;;  %v3523_v6 = vadd.f32 %v3311_v59, %v2947_v63  ;;  %v10206_v59 = vpop.f32.mrf.mxu3 }
 0x370   : > { %16057 = vst [vmem:[#allocation465_spill] sm:$0xff] %v10119_v32  ;;  %6435 = vlog2.f32 %v10147_v28  ;;  %v16085_v63 = vmax.f32 %v10093_v54, 0.0  ;;  %v10236_v54 = vld [vmem:[%s7381_s14 + $0x270] sm:$0xff] }
 0x371   : > { %16060 = vst [vmem:[#allocation466_spill] sm:$0xff] %v10129_v39  ;;  %v16076_v39 = vmax.f32 %v16075_v34, 0.0  ;;  %v2496_v34 = vsub.f32 0.0, %v2352_v30  ;;  %6437 = vlog2.f32 %v10182_v36 }
 0x372   : > { %16061 = vst [vmem:[#allocation467_spill] sm:$0xff] %v10133_v16  ;;  %v3522_v16 = vadd.f32 %v3309_v21, %v2946_v38  ;;  %v10199_v38 = vmul.f32 %v10170_v26, %v16073_v7  ;;  %v16082_v21 = vld [vmem:[#allocation175_spill] sm:$0xff]  ;;  %6040 = vmatmul.msk.f32.gmra.mxu3 %vm1126_vm0, %v16085_v63  ;;  %v10211_v30 = vpop.eup %6429 }
 0x373   : > { %16063 = vst [vmem:[#allocation207_spill] sm:$0xff] %v10141_v50  ;;  %v2948_v50 = vmax.f32 %v16073_v7, 0.0  ;;  %5969 = vmatmul.msk.f32.gmra.mxu1 %vm1126_vm0, %v16076_v39  ;;  %v10195_v39 = vld [vmem:[%s7386_s17 + $0x258] sm:$0xff]  ;;  %v2949_v2 = vmax.f32 %v16082_v21, 0.0  ;;  %v2748_v7 = vmul.f32 1.442695, %v2522_v37  ;;  %v1747_v63 = vpop.f32.mrf.mxu1 }
 0x374   : > { %16064 = vst [vmem:[#allocation468_spill] sm:$0xff] %v10144_v23  ;;  %v10227_v37 = vmul.f32 %v3523_v6, %v10195_v39 }
 0x375   : > { %16065 = vst [vmem:[#allocation469_spill] sm:$0xff] %v10147_v28  ;;  %v2696_v28 = vmul.f32 1.442695, %v2496_v34  ;;  %v10230_v34 = vadd.f32 %v9640_v3, %v1747_v63 }
 0x376   : > { %16066 = vst [vmem:[#allocation470_spill] sm:$0xff] %v10150_v31  ;;  %v10204_v31 = vmul.f32 %v10174_v61, %v16082_v21  ;;  %v10217_v21 = vpop.eup %6431 }
 0x377   : > { %16067 = vst [vmem:[#allocation471_spill] sm:$0xff] %v10153_v40  ;;  %v3315_v40 = vmul.f32 0.6931472, %v6426_v14  ;;  %v6434_v14 = vpop.eup %6433  ;;  %6439 = vpow2.f32 %v2696_v28  ;;  %v10245_v28 = vld [vmem:[%s7381_s14 + $0x1b0] sm:$0xff]  ;;  %v2353_v63 = vand.u32 2147483647, %v10230_v34 }
 0x378   : > { %16068 = vst [vmem:[#allocation472_spill] sm:$0xff] %v10156_v27  ;;  %v3313_v27 = vmul.f32 0.6931472, %v10089_v11  ;;  %v3933_v11 = vsub.f32 %v3645_v5, %v3789_v56  ;;  %v10224_v56 = vadd.f32 1.0, %v10211_v30  ;;  %v6436_v6 = vpop.eup %6435 }
 0x379   : > { %16069 = vst [vmem:[#allocation473_spill] sm:$0xff] %v10159_v35  ;;  %v3317_v13 = vmul.f32 0.6931472, %v6436_v6  ;;  %v10283_v6 = vld [vmem:[%s7381_s14 + $0x278] sm:$0xff] }
 0x37a   : > { %16070 = vst [vmem:[#allocation474_spill] sm:$0xff] %v10163_v24  ;;  %v4076_v5 = vadd.f32 %v4075_v53, %v3933_v11  ;;  %v10239_v53 = vadd.f32 1.0, %v10192_v12  ;;  %v2926_v11 = vmax.f32 %v10047_v43, 0.0  ;;  %6441 = vlog2.f32 %v10224_v56  ;;  %v10598_v24 = vld [vmem:[%s7386_s17 + $0x1e0] sm:$0xff] }
 0x37b   : > { %16071 = vst [vmem:[#allocation475_spill] sm:$0xff] %v10167_v19  ;;  %6443 = vpow2.f32 %v2748_v7 }
 0x37c   : > { %16072 = vst [vmem:[#allocation476_spill] sm:$0xff] %v10170_v26  ;;  %v10215_v26 = vadd.f32 %v9640_v3, %v16087_v60  ;;  %v3524_v60 = vadd.f32 %v3313_v27, %v2948_v50  ;;  %v10248_v27 = vld [vmem:[%s7386_s17 + $0x1b0] sm:$0xff]  ;;  %6445 = vlog2.f32 %v10239_v53 }
 0x37d   : > { %16074 = vst [vmem:[#allocation477_spill] sm:$0xff] %v10174_v61  ;;  %v10220_v61 = vmul.f32 %v3522_v16, %v10188_v55  ;;  %v10233_v16 = vld [vmem:[%s7386_s17 + $0x260] sm:$0xff] }
 0x37e   : > { %16077 = vst [vmem:[#allocation478_spill] sm:$0xff] %v10182_v36  ;;  %v2379_v50 = vand.u32 2147483647, %v10215_v26  ;;  %v10266_v36 = vmul.f32 %v3524_v60, %v10233_v16  ;;  %v2951_v60 = vmax.f32 %v9359_v47, 0.0 }
 0x37f   : > { %16078 = vst [vmem:[#allocation479_spill] sm:$0xff] %v10188_v55  ;;  %v3269_v55 = vmul.f32 0.6931472, %v6434_v14  ;;  %v2497_v14 = vsub.f32 0.0, %v2353_v63 }
 0x380   : > { %16079 = vst [vmem:[#allocation480_spill] sm:$0xff] %v10192_v12  ;;  %v10257_v12 = vld [vmem:[%s7386_s17 + $0x268] sm:$0xff] }
 0x381   : > { %16080 = vst [vmem:[#allocation481_spill] sm:$0xff] %v10195_v39  ;;  %v3525_v39 = vadd.f32 %v3315_v40, %v2949_v2  ;;  %v10261_v2 = vadd.f32 1.0, %v10217_v21  ;;  %v3502_v7 = vadd.f32 %v3269_v55, %v2926_v11  ;;  %v3790_v55 = vmul.f32 %v10245_v28, %v10047_v43 }
 0x382   : > { %16081 = vst [vmem:[#allocation482_spill] sm:$0xff] %v10199_v38 }
 0x383   : > { %16083 = vst [vmem:[#allocation483_spill] sm:$0xff] %v10204_v31  ;;  %v10279_v23 = vmul.f32 %v3525_v39, %v10257_v12  ;;  %6447 = vlog2.f32 %v10261_v2 }
 0x384   : > { %16084 = vst [vmem:[#allocation484_spill] sm:$0xff] %v10206_v59 }
 0x385   : > { %16086 = vst [vmem:[#allocation485_spill] sm:$0xff] %v10211_v30  ;;  %v16099_v30 = vmax.f32 %v10070_v49, 0.0  ;;  %v6438_v49 = vpop.eup %6437 }
 0x386   : > { %16088 = vst [vmem:[#allocation74_spill] sm:$0xff] %v10215_v26  ;;  %v10276_v11 = vpop.eup %6439 }
 0x387   : > { %16089 = vst [vmem:[#allocation486_spill] sm:$0xff] %v10217_v21  ;;  %5970 = vmatmul.msk.f32.gmra.mxu1 %vm1126_vm0, %v16099_v30  ;;  %v3646_v21 = vmul.f32 %v3502_v7, %v10248_v27  ;;  %v6442_v63 = vpop.eup %6441  ;;  %v16108_v7 = vld [vmem:[#allocation78_spill] sm:$0xff]  ;;  %v10291_v39 = vadd.f32 1.0, %v10276_v11 }
 0x388   : > { %16090 = vst [vmem:[#allocation487_spill] sm:$0xff] %v10220_v61  ;;  %v3271_v43 = vmul.f32 0.6931472, %v6442_v63  ;;  %v10314_v63 = vmul.f32 %v10283_v6, %v9359_v47 }
 0x389   : > { %16091 = vst [vmem:[#allocation488_spill] sm:$0xff] %v10224_v56  ;;  %v16101_v56 = vld [vmem:[#allocation195_spill] sm:$0xff] }
 0x38a   : > { %16092 = vst [vmem:[#allocation489_spill] sm:$0xff] %v10227_v37  ;;  %v2950_v40 = vmax.f32 %v16101_v56, 0.0  ;;  %v10270_v30 = vmul.f32 %v10236_v54, %v16101_v56  ;;  %v2698_v56 = vmul.f32 1.442695, %v2497_v14  ;;  %v2927_v14 = vmax.f32 %v10087_v57, 0.0 }
 0x38b   : > { %16093 = vst [vmem:[#allocation490_spill] sm:$0xff] %v10230_v34 }
 0x38c   : > { %16094 = vst [vmem:[#allocation491_spill] sm:$0xff] %v10233_v16  ;;  %v2523_v16 = vsub.f32 0.0, %v2379_v50  ;;  %v10293_v50 = vpop.eup %6443  ;;  %6449 = vpow2.f32 %v2698_v56 }
 0x38d   : > { %16095 = vst [vmem:[#allocation492_spill] sm:$0xff] %v10236_v54  ;;  %v3319_v54 = vmul.f32 0.6931472, %v6438_v49  ;;  %6451 = vlog2.f32 %v10291_v39  ;;  %v6446_v49 = vpop.eup %6445 }
 0x38e   : > { %16096 = vst [vmem:[#allocation493_spill] sm:$0xff] %v10239_v53  ;;  %v10288_v53 = vadd.f32 %v9640_v3, %v16108_v7  ;;  %v2750_v56 = vmul.f32 1.442695, %v2523_v16  ;;  %v3791_v16 = vmul.f32 %v10303_v41, %v10087_v57  ;;  %v10367_v57 = vld [vmem:[%s7386_s17 + $0x1c0] sm:$0xff] }
 0x38f   : > { %16097 = vst [vmem:[#allocation494_spill] sm:$0xff] %v10245_v28  ;;  %v3934_v28 = vsub.f32 %v3646_v21, %v3790_v55  ;;  %v10306_v21 = vld [vmem:[%s7386_s17 + $0x1b8] sm:$0xff]  ;;  %v10310_v55 = vld [vmem:[%s7386_s17 + $0x270] sm:$0xff]  ;;  %v3527_v47 = vadd.f32 %v3319_v54, %v2951_v60  ;;  %v2953_v54 = vmax.f32 %v10034_v62, 0.0  ;;  %v10353_v60 = vpop.f32.mrf.mxu3 }
 0x390   : > { %16098 = vst [vmem:[#allocation495_spill] sm:$0xff] %v10248_v27  ;;  %v1750_v27 = vpop.f32.mrf.mxu1  ;;  %6453 = vpow2.f32 %v2750_v56 }
 0x391   : > { %16100 = vst [vmem:[#allocation496_spill] sm:$0xff] %v10257_v12  ;;  %v10297_v12 = vadd.f32 %v9640_v3, %v1750_v27  ;;  %v4077_v7 = vadd.f32 %v4076_v5, %v3934_v28  ;;  %v3503_v27 = vadd.f32 %v3271_v43, %v2927_v14  ;;  %v2952_v28 = vmax.f32 %v10013_v45, 0.0  ;;  %v10346_v5 = vld [vmem:[%s7381_s14 + $0x288] sm:$0xff] }
 0x392   : > { %16102 = vst [vmem:[#allocation497_spill] sm:$0xff] %v10261_v2  ;;  %v3526_v2 = vadd.f32 %v3317_v13, %v2950_v40  ;;  %v10321_v40 = vadd.f32 1.0, %v10293_v50 }
 0x393   : > { %16103 = vst [vmem:[#allocation498_spill] sm:$0xff] %v10266_v36  ;;  %v2354_v13 = vand.u32 2147483647, %v10297_v12  ;;  %v3647_v43 = vmul.f32 %v3503_v27, %v10306_v21  ;;  %v3321_v27 = vmul.f32 0.6931472, %v6446_v49  ;;  %v2928_v49 = vmax.f32 %v10159_v35, 0.0 }
 0x394   : > { %16104 = vst [vmem:[#allocation499_spill] sm:$0xff] %v10270_v30  ;;  %6455 = vlog2.f32 %v10321_v40 }
 0x395   : > { %16105 = vst [vmem:[#allocation500_spill] sm:$0xff] %v10276_v11  ;;  %v2380_v11 = vand.u32 2147483647, %v10288_v53  ;;  %v2498_v14 = vsub.f32 0.0, %v2354_v13  ;;  %v3935_v13 = vsub.f32 %v3647_v43, %v3791_v16 }
 0x396   : > { %16106 = vst [vmem:[#allocation501_spill] sm:$0xff] %v10279_v23 }
 0x397   : > { %16107 = vst [vmem:[#allocation502_spill] sm:$0xff] %v10283_v6  ;;  %v6448_v6 = vpop.eup %6447  ;;  %v2524_v3 = vsub.f32 0.0, %v2380_v11  ;;  %v4078_v56 = vadd.f32 %v4077_v7, %v3935_v13  ;;  %v10364_v11 = vld [vmem:[%s7381_s14 + $0x1c0] sm:$0xff] }
 0x398   : > { %16109 = vst [vmem:[#allocation78_spill] sm:$0xff] %v10288_v53 }
 0x399   : > { %16110 = vst [vmem:[#allocation503_spill] sm:$0xff] %v10291_v39  ;;  %v10326_v39 = vmul.f32 %v10300_v18, %v10013_v45  ;;  %v10343_v45 = vld [vmem:[%s7386_s17 + $0x278] sm:$0xff] }
 0x39a   : > { %16111 = vst [vmem:[#allocation504_spill] sm:$0xff] %v10293_v50  ;;  %v10334_v50 = vmul.f32 %v3526_v2, %v10310_v55  ;;  %v1753_v2 = vpop.f32.mrf.mxu1  ;;  %v10357_v16 = vmul.f32 %v3527_v47, %v10343_v45  ;;  %v10377_v47 = vmul.f32 %v10346_v5, %v10034_v62 }
 0x39b   : > { %16112 = vst [vmem:[#allocation505_spill] sm:$0xff] %v10297_v12 }
 0x39c   : > { %16113 = vst [vmem:[#allocation506_spill] sm:$0xff] %v10300_v18  ;;  %v10340_v18 = vpop.eup %6449 }
 0x39d   : > { %16114 = vst [vmem:[#allocation507_spill] sm:$0xff] %v10303_v41  ;;  %v2700_v41 = vmul.f32 1.442695, %v2498_v14  ;;  %v10351_v9 = vadd.f32 1.0, %v10340_v18  ;;  %v10360_v14 = vld [vmem:[%s7381_s14 + $0x290] sm:$0xff] }
 0x39e   : > { %16115 = vst [vmem:[#allocation508_spill] sm:$0xff] %v10306_v21  ;;  %v6452_v21 = vpop.eup %6451 }
 0x39f   : > { %16116 = vst [vmem:[#allocation509_spill] sm:$0xff] %v10310_v55  ;;  %v3273_v43 = vmul.f32 0.6931472, %v6452_v21  ;;  %6457 = vpow2.f32 %v2700_v41  ;;  %v10370_v55 = vld [vmem:[#allocation5] ss:$0 sm:$0xff]  ;;  %v3528_v21 = vadd.f32 %v3321_v27, %v2952_v28 }
 0x3a0   : > { %16117 = vst [vmem:[#allocation510_spill] sm:$0xff] %v10314_v63  ;;  %6459 = vlog2.f32 %v10351_v9  ;;  %v10373_v7 = vadd.f32 %v10370_v55, %v1753_v2  ;;  %v3323_v41 = vmul.f32 0.6931472, %v6448_v6  ;;  %v10386_v2 = vpop.eup %6453  ;;  %v10390_v6 = vmul.f32 %v10360_v14, %v10113_v17  ;;  %v16137_v28 = vld [vmem:[#allocation83_spill] sm:$0xff] }
 0x3a1   : > { %16118 = vst [vmem:[#allocation511_spill] sm:$0xff] %v10321_v40  ;;  %v2381_v40 = vand.u32 2147483647, %v10338_v1  ;;  %v3504_v13 = vadd.f32 %v3273_v43, %v2928_v49  ;;  %v10394_v27 = vadd.f32 %v10370_v55, %v16137_v28  ;;  %v3792_v43 = vmul.f32 %v10364_v11, %v10159_v35  ;;  %v10448_v63 = vld [vmem:[%s7381_s14 + $0x2a0] sm:$0xff] }
 0x3a2   : > { %16119 = vst [vmem:[#allocation512_spill] sm:$0xff] %v10326_v39  ;;  %v3529_v28 = vadd.f32 %v3323_v41, %v2953_v54  ;;  %v10421_v54 = vld [vmem:[%s7386_s17 + $0x288] sm:$0xff]  ;;  %v10482_v39 = vld [vmem:[%s7381_s14 + $0x1d0] sm:$0xff] }
 0x3a3   : > { %16120 = vst [vmem:[#allocation513_spill] sm:$0xff] %v10334_v50  ;;  %v3648_v49 = vmul.f32 %v3504_v13, %v10367_v57  ;;  %v2525_v62 = vsub.f32 0.0, %v2381_v40  ;;  %v10408_v50 = vld [vmem:[%s7381_s14 + $0x298] sm:$0xff]  ;;  %v2382_v41 = vand.u32 2147483647, %v10394_v27 }
 0x3a4   : > { %16122 = vst [vmem:[#allocation80_spill] sm:$0xff] %v10338_v1  ;;  %v16142_v13 = vld [vmem:[#allocation86_spill] sm:$0xff] }
 0x3a5   : > { %16123 = vst [vmem:[#allocation514_spill] sm:$0xff] %v10340_v18  ;;  %v6456_v18 = vpop.eup %6455 }
 0x3a6   : > { %16124 = vst [vmem:[#allocation515_spill] sm:$0xff] %v10343_v45  ;;  %v10382_v45 = vld [vmem:[%s7386_s17 + $0x280] sm:$0xff] }
 0x3a7   : > { %16125 = vst [vmem:[#allocation516_spill] sm:$0xff] %v10346_v5  ;;  %v10405_v17 = vmul.f32 %v3528_v21, %v10382_v45  ;;  %v10415_v5 = vadd.f32 1.0, %v10386_v2  ;;  %v1756_v21 = vpop.f32.mrf.mxu1 }
 0x3a8   : > { %16126 = vst [vmem:[#allocation517_spill] sm:$0xff] %v10351_v9  ;;  %v2752_v9 = vmul.f32 1.442695, %v2524_v3  ;;  %v3936_v3 = vsub.f32 %v3648_v49, %v3792_v43  ;;  %v10427_v49 = vmul.f32 %v10408_v50, %v10215_v26  ;;  %v2754_v43 = vmul.f32 1.442695, %v2525_v62 }
 0x3a9   : > { %16127 = vst [vmem:[#allocation518_spill] sm:$0xff] %v10353_v60  ;;  %v2355_v60 = vand.u32 2147483647, %v10373_v7  ;;  %v10445_v62 = vmul.f32 %v3529_v28, %v10421_v54  ;;  %v10473_v28 = vld [vmem:[%s7386_s17 + $0x290] sm:$0xff] }
 0x3aa   : > { %16128 = vst [vmem:[#allocation519_spill] sm:$0xff] %v10357_v16  ;;  %6461 = vpow2.f32 %v2752_v9  ;;  %v10430_v9 = vld [vmem:[%s7381_s14 + $0x1c8] sm:$0xff] }
 0x3ab   : > { %16129 = vst [vmem:[#allocation520_spill] sm:$0xff] %v10360_v14  ;;  %v2499_v30 = vsub.f32 0.0, %v2355_v60  ;;  %v10402_v14 = vpop.eup %6457  ;;  %v16154_v16 = vld [vmem:[#allocation89_spill] sm:$0xff] }
 0x3ac   : > { %16130 = vst [vmem:[#allocation521_spill] sm:$0xff] %v10364_v11  ;;  %v10412_v11 = vadd.f32 %v10370_v55, %v16142_v13  ;;  %v10418_v40 = vadd.f32 1.0, %v10402_v14  ;;  %v2929_v13 = vmax.f32 %v10230_v34, 0.0 }
 0x3ad   : > { %16131 = vst [vmem:[#allocation522_spill] sm:$0xff] %v10367_v57  ;;  %v6460_v57 = vpop.eup %6459  ;;  %v2702_v60 = vmul.f32 1.442695, %v2499_v30  ;;  %v10437_v30 = vadd.f32 %v10370_v55, %v1756_v21  ;;  %v2526_v21 = vsub.f32 0.0, %v2382_v41 }
 0x3ae   : > { %16132 = vst [vmem:[#allocation523_spill] sm:$0xff] %v10373_v7  ;;  %v3275_v35 = vmul.f32 0.6931472, %v6460_v57  ;;  %6463 = vlog2.f32 %v10418_v40 }
 0x3af   : > { %16133 = vst [vmem:[#allocation524_spill] sm:$0xff] %v10377_v47  ;;  %6465 = vpow2.f32 %v2702_v60  ;;  %v3793_v60 = vmul.f32 %v10430_v9, %v10230_v34 }
 0x3b0   : > { %16134 = vst [vmem:[#allocation525_spill] sm:$0xff] %v10382_v45  ;;  %v4079_v45 = vadd.f32 %v4078_v56, %v3936_v3  ;;  %v2383_v56 = vand.u32 2147483647, %v10412_v11  ;;  %v10440_v3 = vpop.f32.mrf.mxu3  ;;  %v3505_v57 = vadd.f32 %v3275_v35, %v2929_v13  ;;  %6467 = vlog2.f32 %v10415_v5  ;;  %v10459_v13 = vpop.eup %6461 }
 0x3b1   : > { %16135 = vst [vmem:[#allocation526_spill] sm:$0xff] %v10386_v2  ;;  %v10433_v2 = vld [vmem:[%s7386_s17 + $0x1c8] sm:$0xff]  ;;  %6469 = vpow2.f32 %v2754_v43 }
 0x3b2   : > { %16136 = vst [vmem:[#allocation527_spill] sm:$0xff] %v10390_v6  ;;  %v3649_v35 = vmul.f32 %v3505_v57, %v10433_v2  ;;  %v2527_v41 = vsub.f32 0.0, %v2383_v56  ;;  %v2930_v56 = vmax.f32 %v10297_v12, 0.0 }
 0x3b3   : > { %16138 = vst [vmem:[#allocation83_spill] sm:$0xff] %v10394_v27 }
 0x3b4   : > { %16139 = vst [vmem:[#allocation528_spill] sm:$0xff] %v10402_v14  ;;  %v3325_v14 = vmul.f32 0.6931472, %v6456_v18  ;;  %v2356_v18 = vand.u32 2147483647, %v10437_v30  ;;  %v3937_v57 = vsub.f32 %v3649_v35, %v3793_v60 }
 0x3b5   : > { %16140 = vst [vmem:[#allocation529_spill] sm:$0xff] %v10405_v17 }
 0x3b6   : > { %16141 = vst [vmem:[#allocation530_spill] sm:$0xff] %v10408_v50  ;;  %v16157_v50 = vld [vmem:[#allocation93_spill] sm:$0xff]  ;;  %v4080_v34 = vadd.f32 %v4079_v45, %v3937_v57  ;;  %v10497_v45 = vadd.f32 1.0, %v10459_v13  ;;  %v2758_v57 = vmul.f32 1.442695, %v2527_v41 }
 0x3b7   : > { %16143 = vst [vmem:[#allocation86_spill] sm:$0xff] %v10412_v11 }
 0x3b8   : > { %16144 = vst [vmem:[#allocation531_spill] sm:$0xff] %v10415_v5  ;;  %v10468_v5 = vmul.f32 %v10448_v63, %v10288_v53 }
 0x3b9   : > { %16145 = vst [vmem:[#allocation532_spill] sm:$0xff] %v10418_v40  ;;  %v10452_v40 = vadd.f32 %v10370_v55, %v16154_v16  ;;  %v10464_v16 = vadd.f32 %v10370_v55, %v16157_v50 }
 0x3ba   : > { %16146 = vst [vmem:[#allocation533_spill] sm:$0xff] %v10421_v54  ;;  %v2500_v54 = vsub.f32 0.0, %v2356_v18 }
 0x3bb   : > { %16147 = vst [vmem:[#allocation534_spill] sm:$0xff] %v10427_v49  ;;  %v2384_v50 = vand.u32 2147483647, %v10452_v40  ;;  %v2385_v60 = vand.u32 2147483647, %v10464_v16 }
 0x3bc   : > { %16148 = vst [vmem:[#allocation535_spill] sm:$0xff] %v10430_v9  ;;  %v6464_v9 = vpop.eup %6463  ;;  %v2704_v18 = vmul.f32 1.442695, %v2500_v54 }
 0x3bd   : > { %16149 = vst [vmem:[#allocation536_spill] sm:$0xff] %v10433_v2  ;;  %v3277_v35 = vmul.f32 0.6931472, %v6464_v9  ;;  %v10485_v2 = vld [vmem:[%s7386_s17 + $0x1d0] sm:$0xff]  ;;  %v10500_v9 = vld [vmem:[%s7381_s14 + $0x2a8] sm:$0xff]  ;;  %v2528_v59 = vsub.f32 0.0, %v2384_v50  ;;  %v3794_v50 = vmul.f32 %v10482_v39, %v10297_v12 }
 0x3be   : > { %16150 = vst [vmem:[#allocation537_spill] sm:$0xff] %v10437_v30  ;;  %6471 = vpow2.f32 %v2704_v18 }
 0x3bf   : > { %16151 = vst [vmem:[#allocation538_spill] sm:$0xff] %v10440_v3  ;;  %v3530_v3 = vadd.f32 %v3325_v14, %v2954_v51  ;;  %v1759_v51 = vpop.f32.mrf.mxu1  ;;  %v10477_v14 = vpop.eup %6465 }
 0x3c0   : > { %16152 = vst [vmem:[#allocation539_spill] sm:$0xff] %v10445_v62  ;;  %v10488_v43 = vadd.f32 1.0, %v10477_v14  ;;  %v10491_v54 = vadd.f32 %v10370_v55, %v1759_v51  ;;  %v6468_v47 = vpop.eup %6467  ;;  %v3506_v62 = vadd.f32 %v3277_v35, %v2930_v56  ;;  %v2529_v35 = vsub.f32 0.0, %v2385_v60 }
 0x3c1   : > { %16153 = vst [vmem:[#allocation540_spill] sm:$0xff] %v10448_v63  ;;  %v2756_v63 = vmul.f32 1.442695, %v2526_v21  ;;  %v10494_v21 = vmul.f32 %v3530_v3, %v10473_v28  ;;  %v10502_v17 = vpop.eup %6469  ;;  %v16172_v3 = vld [vmem:[#allocation100_spill] sm:$0xff]  ;;  %v3327_v56 = vmul.f32 0.6931472, %v6468_v47 }
 0x3c2   : > { %16155 = vst [vmem:[#allocation89_spill] sm:$0xff] %v10452_v40  ;;  %6473 = vlog2.f32 %v10488_v43  ;;  %v2357_v51 = vand.u32 2147483647, %v10491_v54  ;;  %v3650_v41 = vmul.f32 %v3506_v62, %v10485_v2  ;;  %v2760_v47 = vmul.f32 1.442695, %v2528_v59 }
 0x3c3   : > { %16156 = vst [vmem:[#allocation541_spill] sm:$0xff] %v10459_v13  ;;  %6475 = vpow2.f32 %v2756_v63  ;;  %v10514_v13 = vpop.f32.mrf.mxu3  ;;  %v10525_v63 = vadd.f32 1.0, %v10502_v17 }
 0x3c4   : > { %16158 = vst [vmem:[#allocation93_spill] sm:$0xff] %v10464_v16  ;;  %6477 = vlog2.f32 %v10497_v45  ;;  %v3938_v62 = vsub.f32 %v3650_v41, %v3794_v50  ;;  %v2762_v50 = vmul.f32 1.442695, %v2529_v35 }
 0x3c5   : > { %16159 = vst [vmem:[#allocation542_spill] sm:$0xff] %v10468_v5  ;;  %6479 = vpow2.f32 %v2758_v57  ;;  %v16183_v57 = vld [vmem:[#allocation114_spill] sm:$0xff] }
 0x3c6   : > { %16160 = vst [vmem:[#allocation543_spill] sm:$0xff] %v10473_v28  ;;  %v10512_v28 = vadd.f32 %v10370_v55, %v16172_v3  ;;  %v16177_v3 = vld [vmem:[#allocation103_spill] sm:$0xff]  ;;  %v10544_v59 = vadd.f32 %v10370_v55, %v16183_v57 }
 0x3c7   : > { %16161 = vst [vmem:[#allocation544_spill] sm:$0xff] %v10477_v14  ;;  %v16170_v14 = vld [vmem:[#allocation97_spill] sm:$0xff]  ;;  %v1762_v12 = vpop.f32.mrf.mxu1 }
 0x3c8   : > { %16162 = vst [vmem:[#allocation545_spill] sm:$0xff] %v10482_v39  ;;  %v10506_v18 = vadd.f32 %v10370_v55, %v16170_v14  ;;  %v10521_v14 = vmul.f32 %v10500_v9, %v10338_v1  ;;  %v2387_v60 = vand.u32 2147483647, %v10512_v28 }
 0x3c9   : > { %16163 = vst [vmem:[#allocation546_spill] sm:$0xff] %v10485_v2  ;;  %v10531_v2 = vpop.eup %6471 }
 0x3ca   : > { %16164 = vst [vmem:[#allocation547_spill] sm:$0xff] %v10488_v43  ;;  %v2501_v43 = vsub.f32 0.0, %v2357_v51  ;;  %v2386_v39 = vand.u32 2147483647, %v10506_v18  ;;  %v16180_v51 = vld [vmem:[#allocation109_spill] sm:$0xff]  ;;  %v6474_v41 = vpop.eup %6473  ;;  %v2531_v19 = vsub.f32 0.0, %v2387_v60 }
 0x3cb   : > { %16165 = vst [vmem:[#allocation548_spill] sm:$0xff] %v10491_v54  ;;  %v10549_v31 = vpop.eup %6475 }
 0x3cc   : > { %16166 = vst [vmem:[#allocation549_spill] sm:$0xff] %v10494_v21  ;;  %v2530_v23 = vsub.f32 0.0, %v2386_v39  ;;  %v6478_v38 = vpop.eup %6477  ;;  %v2390_v39 = vand.u32 2147483647, %v10544_v59 }
 0x3cd   : > { %16167 = vst [vmem:[#allocation550_spill] sm:$0xff] %v10497_v45  ;;  %v10537_v45 = vadd.f32 %v10370_v55, %v16180_v51  ;;  %v10567_v37 = vpop.eup %6479  ;;  %v3329_v6 = vmul.f32 0.6931472, %v6478_v38 }
 0x3ce   : > { %16168 = vst [vmem:[#allocation551_spill] sm:$0xff] %v10500_v9  ;;  %v2706_v9 = vmul.f32 1.442695, %v2501_v43  ;;  %v10547_v43 = vadd.f32 %v10370_v55, %v1762_v12  ;;  %v10562_v12 = vld [vmem:[%s7386_s17 + $0x1d8] sm:$0xff]  ;;  %v2764_v36 = vmul.f32 1.442695, %v2530_v23 }
 0x3cf   : > { %16169 = vst [vmem:[#allocation552_spill] sm:$0xff] %v10502_v17  ;;  %v4081_v17 = vadd.f32 %v4080_v34, %v3938_v62  ;;  %v2931_v34 = vmax.f32 %v10373_v7, 0.0  ;;  %v3279_v62 = vmul.f32 0.6931472, %v6474_v41  ;;  %v2389_v41 = vand.u32 2147483647, %v10537_v45 }
 0x3d0   : > { %16171 = vst [vmem:[#allocation97_spill] sm:$0xff] %v10506_v18  ;;  %6481 = vpow2.f32 %v2706_v9  ;;  %v10559_v9 = vld [vmem:[%s7381_s14 + $0x1d8] sm:$0xff]  ;;  %v2358_v32 = vand.u32 2147483647, %v10547_v43  ;;  %v2534_v23 = vsub.f32 0.0, %v2390_v39  ;;  %v10606_v39 = vadd.f32 1.0, %v10567_v37 }
 0x3d1   : > { %16173 = vst [vmem:[#allocation100_spill] sm:$0xff] %v10512_v28 }
 0x3d2   : > { %16174 = vst [vmem:[#allocation553_spill] sm:$0xff] %v10514_v13  ;;  %v10529_v13 = vadd.f32 %v10370_v55, %v16177_v3  ;;  %v10540_v3 = vadd.f32 1.0, %v10531_v2 }
 0x3d3   : > { %16175 = vst [vmem:[#allocation554_spill] sm:$0xff] %v10521_v14  ;;  %v10765_v14 = vld [vmem:[%s7381_s14 + $0x2c8] sm:$0xff] }
 0x3d4   : > { %16176 = vst [vmem:[#allocation555_spill] sm:$0xff] %v10525_v63  ;;  %v2388_v51 = vand.u32 2147483647, %v10529_v13  ;;  %6483 = vlog2.f32 %v10540_v3 }
 0x3d5   : > { %16178 = vst [vmem:[#allocation103_spill] sm:$0xff] %v10529_v13  ;;  %6485 = vlog2.f32 %v10525_v63  ;;  %v16194_v63 = vld [vmem:[#allocation122_spill] sm:$0xff] }
 0x3d6   : > { %16179 = vst [vmem:[#allocation556_spill] sm:$0xff] %v10531_v2  ;;  %v16187_v2 = vmax.f32 %v10215_v26, 0.0  ;;  %6487 = vpow2.f32 %v2760_v47  ;;  %v2532_v35 = vsub.f32 0.0, %v2388_v51  ;;  %v10574_v26 = vpop.f32.mrf.mxu3  ;;  %v10585_v47 = vpop.f32.mrf.mxu1 }
 0x3d7   : > { %16181 = vst [vmem:[#allocation109_spill] sm:$0xff] %v10537_v45  ;;  %6489 = vpow2.f32 %v2762_v50  ;;  %v2932_v50 = vmax.f32 %v10437_v30, 0.0 }
 0x3d8   : > { %16182 = vst [vmem:[#allocation557_spill] sm:$0xff] %v10540_v3  ;;  %v3531_v57 = vadd.f32 %v3327_v56, %v16187_v2  ;;  %v3507_v3 = vadd.f32 %v3279_v62, %v2931_v34  ;;  %v10571_v2 = vadd.f32 1.0, %v10549_v31  ;;  %v2502_v56 = vsub.f32 0.0, %v2358_v32  ;;  %v10579_v62 = vpop.eup %6481 }
 0x3d9   : > { %16184 = vst [vmem:[#allocation114_spill] sm:$0xff] %v10544_v59  ;;  %v3795_v34 = vmul.f32 %v10559_v9, %v10373_v7  ;;  %v10591_v7 = vld [vmem:[%s7386_s17 + $0x298] sm:$0xff] }
 0x3da   : > { %16185 = vst [vmem:[#allocation558_spill] sm:$0xff] %v10547_v43  ;;  %v3651_v60 = vmul.f32 %v3507_v3, %v10562_v12  ;;  %v2708_v32 = vmul.f32 1.442695, %v2502_v56  ;;  %v6484_v51 = vpop.eup %6483  ;;  %v2533_v3 = vsub.f32 0.0, %v2389_v41  ;;  %v2768_v56 = vmul.f32 1.442695, %v2532_v35 }
 0x3db   : > { %16186 = vst [vmem:[#allocation559_spill] sm:$0xff] %v10549_v31  ;;  %v10583_v31 = vadd.f32 %v10370_v55, %v16194_v63  ;;  %v3281_v63 = vmul.f32 0.6931472, %v6484_v51  ;;  %v10602_v41 = vld [vmem:[%s7381_s14 + $0x2b0] sm:$0xff] }
 0x3dc   : > { %16188 = vst [vmem:[#allocation560_spill] sm:$0xff] %v10559_v9  ;;  %v10588_v9 = vadd.f32 1.0, %v10579_v62  ;;  %6491 = vpow2.f32 %v2708_v32  ;;  %v2770_v35 = vmul.f32 1.442695, %v2533_v3 }
 0x3dd   : > { %16189 = vst [vmem:[#allocation561_spill] sm:$0xff] %v10562_v12  ;;  %v3939_v12 = vsub.f32 %v3651_v60, %v3795_v34  ;;  %v2391_v60 = vand.u32 2147483647, %v10583_v31  ;;  %v3508_v34 = vadd.f32 %v3281_v63, %v2932_v50  ;;  %v3796_v50 = vmul.f32 %v10595_v10, %v10437_v30  ;;  %v10665_v30 = vld [vmem:[%s7381_s14 + $0x1e8] sm:$0xff] }
 0x3de   : > { %16190 = vst [vmem:[#allocation562_spill] sm:$0xff] %v10567_v37  ;;  %6493 = vlog2.f32 %v10588_v9  ;;  %v16207_v63 = vmax.f32 %v10288_v53, 0.0  ;;  %v10645_v53 = vpop.f32.mrf.mxu3 }
 0x3df   : > { %16191 = vst [vmem:[#allocation563_spill] sm:$0xff] %v10571_v2  ;;  %v4082_v21 = vadd.f32 %v4081_v17, %v3939_v12  ;;  %6495 = vlog2.f32 %v10571_v2  ;;  %v10612_v17 = vmul.f32 %v3531_v57, %v10591_v7  ;;  %v16204_v12 = vld [vmem:[#allocation131_spill] sm:$0xff]  ;;  %v2772_v2 = vmul.f32 1.442695, %v2534_v23 }
 0x3e0   : > { %16192 = vst [vmem:[#allocation564_spill] sm:$0xff] %v10574_v26  ;;  %v2766_v26 = vmul.f32 1.442695, %v2531_v19  ;;  %v6486_v19 = vpop.eup %6485  ;;  %6497 = vpow2.f32 %v2764_v36  ;;  %v10616_v32 = vadd.f32 %v10370_v55, %v16204_v12  ;;  %v3652_v37 = vmul.f32 %v3508_v34, %v10598_v24  ;;  %v10632_v12 = vld [vmem:[%s7386_s17 + $0x2a0] sm:$0xff] }
 0x3e1   : > { %16193 = vst [vmem:[#allocation565_spill] sm:$0xff] %v10579_v62  ;;  %v10609_v38 = vpop.eup %6487  ;;  %v3532_v62 = vadd.f32 %v3329_v6, %v16207_v63  ;;  %v3331_v57 = vmul.f32 0.6931472, %v6486_v19  ;;  %v10627_v36 = vmul.f32 %v10602_v41, %v10394_v27  ;;  %v2535_v23 = vsub.f32 0.0, %v2391_v60  ;;  %v10651_v60 = vld [vmem:[%s7381_s14 + $0x2b8] sm:$0xff] }
 0x3e2   : > { %16195 = vst [vmem:[#allocation122_spill] sm:$0xff] %v10583_v31  ;;  %v10618_v51 = vpop.eup %6489  ;;  %6499 = vpow2.f32 %v2766_v26  ;;  %v10636_v26 = vadd.f32 1.0, %v10609_v38  ;;  %v3940_v34 = vsub.f32 %v3652_v37, %v3796_v50  ;;  %v2392_v19 = vand.u32 2147483647, %v10616_v32 }
 0x3e3   : > { %16196 = vst [vmem:[#allocation566_spill] sm:$0xff] %v10588_v9  ;;  %6501 = vpow2.f32 %v2768_v56  ;;  %v10629_v3 = vpop.eup %6491  ;;  %v16212_v56 = vld [vmem:[#allocation150_spill] sm:$0xff] }
 0x3e4   : > { %16197 = vst [vmem:[#allocation567_spill] sm:$0xff] %v10591_v7  ;;  %6503 = vlog2.f32 %v10606_v39  ;;  %v10638_v7 = vpop.f32.mrf.mxu1  ;;  %v6494_v6 = vpop.eup %6493  ;;  %v10643_v63 = vadd.f32 %v10370_v55, %v16212_v56  ;;  %v4083_v37 = vadd.f32 %v4082_v21, %v3940_v34  ;;  %v2774_v56 = vmul.f32 1.442695, %v2535_v23 }
 0x3e5   : > { %16198 = vst [vmem:[#allocation568_spill] sm:$0xff] %v10595_v10  ;;  %6505 = vpow2.f32 %v2770_v35  ;;  %v2933_v35 = vmax.f32 %v10491_v54, 0.0  ;;  %v3283_v50 = vmul.f32 0.6931472, %v6494_v6  ;;  %v10659_v10 = vmul.f32 %v3532_v62, %v10632_v12 }
 0x3e6   : > { %16199 = vst [vmem:[#allocation569_spill] sm:$0xff] %v10598_v24  ;;  %6507 = vpow2.f32 %v2772_v2  ;;  %v10662_v24 = vadd.f32 1.0, %v10618_v51  ;;  %v16223_v2 = vmax.f32 %v10338_v1, 0.0  ;;  %v2959_v6 = vmax.f32 %v10412_v11, 0.0 }
 0x3e7   : > { %16200 = vst [vmem:[#allocation570_spill] sm:$0xff] %v10602_v41  ;;  %v10648_v41 = vadd.f32 1.0, %v10629_v3  ;;  %v3509_v9 = vadd.f32 %v3283_v50, %v2933_v35  ;;  %v2536_v49 = vsub.f32 0.0, %v2392_v19  ;;  %v3797_v35 = vmul.f32 %v10665_v30, %v10491_v54  ;;  %v10718_v54 = vld [vmem:[%s7386_s17 + $0x2b0] sm:$0xff] }
 0x3e8   : > { %16201 = vst [vmem:[#allocation571_spill] sm:$0xff] %v10606_v39  ;;  %v6496_v39 = vpop.eup %6495  ;;  %v3533_v34 = vadd.f32 %v3331_v57, %v16223_v2  ;;  %v16230_v2 = vld [vmem:[#allocation162_spill] sm:$0xff] }
 0x3e9   : > { %16202 = vst [vmem:[#allocation572_spill] sm:$0xff] %v10609_v38  ;;  %v10654_v38 = vpop.eup %6497  ;;  %6509 = vlog2.f32 %v10648_v41  ;;  %v10703_v1 = vadd.f32 %v10370_v55, %v16230_v2 }
 0x3ea   : > { %16203 = vst [vmem:[#allocation573_spill] sm:$0xff] %v10612_v17  ;;  %v10671_v21 = vpop.eup %6499  ;;  %6511 = vlog2.f32 %v10636_v26  ;;  %v10688_v57 = vadd.f32 1.0, %v10654_v38 }
 0x3eb   : > { %16205 = vst [vmem:[#allocation131_spill] sm:$0xff] %v10616_v32  ;;  %v10676_v62 = vpop.eup %6501  ;;  %6513 = vlog2.f32 %v10662_v24  ;;  %v10699_v19 = vadd.f32 1.0, %v10671_v21 }
 0x3ec   : > { %16206 = vst [vmem:[#allocation574_spill] sm:$0xff] %v10618_v51  ;;  %v3333_v51 = vmul.f32 0.6931472, %v6496_v39  ;;  %v6504_v17 = vpop.eup %6503  ;;  %6515 = vpow2.f32 %v2774_v56  ;;  %v2934_v56 = vmax.f32 %v10547_v43, 0.0 }
 0x3ed   : > { %16208 = vst [vmem:[#allocation575_spill] sm:$0xff] %v10627_v36  ;;  %v10693_v50 = vpop.eup %6505  ;;  %v3335_v2 = vmul.f32 0.6931472, %v6504_v17  ;;  %6517 = vlog2.f32 %v10688_v57  ;;  %v10734_v17 = vld [vmem:[%s7381_s14 + $0x1f0] sm:$0xff] }
 0x3ee   : > { %16209 = vst [vmem:[#allocation576_spill] sm:$0xff] %v10629_v3  ;;  %v10668_v3 = vld [vmem:[%s7386_s17 + $0x1e8] sm:$0xff]  ;;  %6519 = vlog2.f32 %v10699_v19 }
 0x3ef   : > { %16210 = vst [vmem:[#allocation577_spill] sm:$0xff] %v10632_v12  ;;  %v10679_v12 = vld [vmem:[%s7386_s17 + $0x2a8] sm:$0xff]  ;;  %v3653_v23 = vmul.f32 %v3509_v9, %v10668_v3  ;;  %v10705_v9 = vpop.eup %6507  ;;  %v3535_v5 = vadd.f32 %v3335_v2, %v2959_v6 }
 0x3f0   : > { %16211 = vst [vmem:[#allocation578_spill] sm:$0xff] %v10636_v26  ;;  %v10713_v26 = vpop.f32.mrf.mxu1 }
 0x3f1   : > { %16213 = vst [vmem:[#allocation150_spill] sm:$0xff] %v10643_v63  ;;  %v3941_v39 = vsub.f32 %v3653_v23, %v3797_v35  ;;  %v2960_v35 = vmax.f32 %v10452_v40, 0.0 }
 0x3f2   : > { %16214 = vst [vmem:[#allocation579_spill] sm:$0xff] %v10645_v53  ;;  %v10683_v53 = vmul.f32 %v10651_v60, %v10412_v11  ;;  %v10711_v11 = vadd.f32 1.0, %v10676_v62 }
 0x3f3   : > { %16215 = vst [vmem:[#allocation580_spill] sm:$0xff] %v10648_v41  ;;  %v2393_v41 = vand.u32 2147483647, %v10643_v63 }
 0x3f4   : > { %16216 = vst [vmem:[#allocation581_spill] sm:$0xff] %v10651_v60  ;;  %v10708_v60 = vmul.f32 %v3533_v34, %v10679_v12  ;;  %v10721_v34 = vld [vmem:[%s7381_s14 + $0x2c0] sm:$0xff]  ;;  %6521 = vlog2.f32 %v10711_v11 }
 0x3f5   : > { %16217 = vst [vmem:[#allocation582_spill] sm:$0xff] %v10654_v38  ;;  %v16235_v38 = vmax.f32 %v10394_v27, 0.0 }
 0x3f6   : > { %16218 = vst [vmem:[#allocation583_spill] sm:$0xff] %v10659_v10 }
 0x3f7   : > { %16219 = vst [vmem:[#allocation584_spill] sm:$0xff] %v10662_v24  ;;  %v6510_v24 = vpop.eup %6509 }
 0x3f8   : > { %16220 = vst [vmem:[#allocation585_spill] sm:$0xff] %v10665_v30  ;;  %v2776_v30 = vmul.f32 1.442695, %v2536_v49  ;;  %v3285_v23 = vmul.f32 0.6931472, %v6510_v24  ;;  %v10741_v24 = vadd.f32 1.0, %v10705_v9 }
 0x3f9   : > { %16221 = vst [vmem:[#allocation586_spill] sm:$0xff] %v10668_v3  ;;  %v2537_v3 = vsub.f32 0.0, %v2393_v41  ;;  %v2394_v49 = vand.u32 2147483647, %v10703_v1  ;;  %v10731_v41 = vpop.f32.mrf.mxu3 }
 0x3fa   : > { %16222 = vst [vmem:[#allocation587_spill] sm:$0xff] %v10671_v21  ;;  %v3534_v21 = vadd.f32 %v3333_v51, %v16235_v38  ;;  %v10728_v38 = vadd.f32 1.0, %v10693_v50  ;;  %v10737_v51 = vld [vmem:[%s7386_s17 + $0x1f0] sm:$0xff]  ;;  %6523 = vpow2.f32 %v2776_v30 }
 0x3fb   : > { %16224 = vst [vmem:[#allocation588_spill] sm:$0xff] %v10676_v62  ;;  %v2538_v30 = vsub.f32 0.0, %v2394_v49 }
 0x3fc   : > { %16225 = vst [vmem:[#allocation589_spill] sm:$0xff] %v10679_v12  ;;  %v4084_v12 = vadd.f32 %v4083_v37, %v3941_v39  ;;  %v6512_v37 = vpop.eup %6511  ;;  %v16243_v39 = vld [vmem:[#allocation180_spill] sm:$0xff]  ;;  %6525 = vlog2.f32 %v10728_v38 }
 0x3fd   : > { %16226 = vst [vmem:[#allocation590_spill] sm:$0xff] %v10683_v53  ;;  %v10745_v27 = vadd.f32 %v10370_v55, %v16243_v39  ;;  %v3337_v62 = vmul.f32 0.6931472, %v6512_v37  ;;  %6527 = vlog2.f32 %v10741_v24  ;;  %v10778_v37 = vpop.f32.mrf.mxu1  ;;  %v2965_v53 = vmax.f32 %v10537_v45, 0.0 }
 0x3fe   : > { %16227 = vst [vmem:[#allocation591_spill] sm:$0xff] %v10688_v57  ;;  %v3510_v57 = vadd.f32 %v3285_v23, %v2934_v56  ;;  %v3798_v56 = vmul.f32 %v10734_v17, %v10547_v43  ;;  %v10762_v23 = vld [vmem:[%s7386_s17 + $0x2b8] sm:$0xff] }
 0x3ff   : > { %16228 = vst [vmem:[#allocation592_spill] sm:$0xff] %v10693_v50  ;;  %v10751_v50 = vmul.f32 %v10721_v34, %v10452_v40  ;;  %v2395_v6 = vand.u32 2147483647, %v10745_v27 }
 0x400   : > { %16229 = vst [vmem:[#allocation593_spill] sm:$0xff] %v10699_v19  ;;  %v6514_v19 = vpop.eup %6513  ;;  %v3654_v39 = vmul.f32 %v3510_v57, %v10737_v51  ;;  %v16251_v57 = vld [vmem:[#allocation215_spill] sm:$0xff] }
 0x401   : > { %16231 = vst [vmem:[#allocation162_spill] sm:$0xff] %v10703_v1  ;;  %v10776_v2 = vadd.f32 %v10370_v55, %v16251_v57  ;;  %v3339_v49 = vmul.f32 0.6931472, %v6514_v19  ;;  %v3536_v19 = vadd.f32 %v3337_v62, %v2960_v35  ;;  %v2963_v35 = vmax.f32 %v10512_v28, 0.0 }
 0x402   : > { %16232 = vst [vmem:[#allocation594_spill] sm:$0xff] %v10705_v9  ;;  %v10756_v9 = vmul.f32 %v3534_v21, %v10718_v54 }
 0x403   : > { %16233 = vst [vmem:[#allocation595_spill] sm:$0xff] %v10708_v60 }
 0x404   : > { %16234 = vst [vmem:[#allocation596_spill] sm:$0xff] %v10711_v11  ;;  %v10753_v11 = vpop.eup %6515 }
 0x405   : > { %16236 = vst [vmem:[#allocation597_spill] sm:$0xff] %v10718_v54  ;;  %v6518_v21 = vpop.eup %6517  ;;  %v3942_v54 = vsub.f32 %v3654_v39, %v3798_v56  ;;  %v10792_v39 = vmul.f32 %v10765_v14, %v10464_v16  ;;  %v2962_v56 = vmax.f32 %v10506_v18, 0.0  ;;  %v10835_v10 = vpop.f32.mrf.mxu1 }
 0x406   : > { %16237 = vst [vmem:[#allocation598_spill] sm:$0xff] %v10721_v34  ;;  %v6520_v40 = vpop.eup %6519  ;;  %v3341_v60 = vmul.f32 0.6931472, %v6518_v21  ;;  %v10812_v21 = vpop.f32.mrf.mxu3 }
 0x407   : > { %16238 = vst [vmem:[#allocation599_spill] sm:$0xff] %v10728_v38  ;;  %v2961_v38 = vmax.f32 %v10464_v16, 0.0  ;;  %v10795_v57 = vadd.f32 %v4084_v12, %v3942_v54  ;;  %v2539_v16 = vsub.f32 0.0, %v2395_v6  ;;  %v2397_v54 = vand.u32 2147483647, %v10776_v2 }
 0x408   : > { %16239 = vst [vmem:[#allocation600_spill] sm:$0xff] %v10731_v41  ;;  %v2778_v41 = vmul.f32 1.442695, %v2537_v3  ;;  %v16249_v3 = vld [vmem:[#allocation198_spill] sm:$0xff]  ;;  %v2964_v6 = vmax.f32 %v10529_v13, 0.0 }
 0x409   : > { %16240 = vst [vmem:[#allocation601_spill] sm:$0xff] %v10734_v17  ;;  %v10770_v34 = vadd.f32 %v10370_v55, %v16249_v3  ;;  %v10782_v17 = vld [vmem:[%s7381_s14 + $0x2d0] sm:$0xff]  ;;  %v10785_v3 = vadd.f32 1.0, %v10753_v11  ;;  %v3537_v62 = vadd.f32 %v3339_v49, %v2961_v38 }
 0x40a   : > { %16241 = vst [vmem:[#allocation602_spill] sm:$0xff] %v10737_v51  ;;  %6529 = vpow2.f32 %v2778_v41  ;;  %v10788_v51 = vmul.f32 %v3535_v5, %v10762_v23  ;;  %v10829_v49 = vld [vmem:[%s7386_s17 + $0x2d0] sm:$0xff] }
 0x40b   : > { %16242 = vst [vmem:[#allocation603_spill] sm:$0xff] %v10741_v24  ;;  %v6522_v24 = vpop.eup %6521  ;;  %v2396_v41 = vand.u32 2147483647, %v10770_v34  ;;  %6531 = vlog2.f32 %v10785_v3 }
 0x40c   : > { %16244 = vst [vmem:[#allocation180_spill] sm:$0xff] %v10745_v27  ;;  %v10797_v43 = vpop.eup %6523 }
 0x40d   : > { %16245 = vst [vmem:[#allocation604_spill] sm:$0xff] %v10753_v11  ;;  %v2780_v11 = vmul.f32 1.442695, %v2538_v30  ;;  %v6526_v12 = vpop.eup %6525  ;;  %v3343_v30 = vmul.f32 0.6931472, %v6520_v40  ;;  %v2540_v36 = vsub.f32 0.0, %v2396_v41 }
 0x40e   : > { %16246 = vst [vmem:[#allocation605_spill] sm:$0xff] %v10756_v9  ;;  %v6528_v5 = vpop.eup %6527  ;;  %v10821_v9 = vadd.f32 1.0, %v10797_v43 }
 0x40f   : > { %16247 = vst [vmem:[#allocation606_spill] sm:$0xff] %v10762_v23  ;;  %v10803_v23 = vld [vmem:[%s7386_s17 + $0x2c0] sm:$0xff]  ;;  %6533 = vpow2.f32 %v2780_v11  ;;  %v10845_v11 = vld [vmem:[%s7386_s17 + $0x2d8] sm:$0xff] }
 0x410   : > { %16248 = vst [vmem:[#allocation607_spill] sm:$0xff] %v10765_v14  ;;  %v10807_v14 = vmul.f32 %v10782_v17, %v10506_v18  ;;  %v3345_v18 = vmul.f32 0.6931472, %v6522_v24  ;;  %v10823_v38 = vpop.eup %6529  ;;  %v10826_v40 = vmul.f32 %v3536_v19, %v10803_v23  ;;  %v3347_v24 = vmul.f32 0.6931472, %v6526_v12 }
 0x411   : > { %16250 = vst [vmem:[#allocation198_spill] sm:$0xff] %v10770_v34  ;;  %v3539_v19 = vadd.f32 %v3343_v30, %v2963_v35  ;;  %6535 = vlog2.f32 %v10821_v9  ;;  %v6532_v12 = vpop.eup %6531  ;;  %v2784_v30 = vmul.f32 1.442695, %v2540_v36 }
 0x412   : > { %16252 = vst [vmem:[#allocation215_spill] sm:$0xff] %v10776_v2 }
 0x413   : > { %16253 = vst [vmem:[#allocation608_spill] sm:$0xff] %v10782_v17  ;;  %v10817_v17 = vld [vmem:[%s7386_s17 + $0x2c8] sm:$0xff]  ;;  %v10879_v36 = vmul.f32 %v3539_v19, %v10845_v11  ;;  %v10900_v19 = vadd.f32 %v10370_v55, %v10585_v47  ;;  %v10915_v47 = vld [vmem:[%s7381_s14 + $0x300] sm:$0xff] }
 0x414   : > { %16254 = vst [vmem:[#allocation609_spill] sm:$0xff] %v10785_v3  ;;  %v3538_v3 = vadd.f32 %v3341_v60, %v2962_v56  ;;  %v10838_v61 = vmul.f32 %v3537_v62, %v10817_v17  ;;  %v2966_v60 = vmax.f32 %v10544_v59, 0.0  ;;  %v3349_v56 = vmul.f32 0.6931472, %v6528_v5  ;;  %v10861_v5 = vld [vmem:[%s7386_s17 + $0x2e0] sm:$0xff] }
 0x415   : > { %16255 = vst [vmem:[#allocation610_spill] sm:$0xff] %v10788_v51  ;;  %v2782_v51 = vmul.f32 1.442695, %v2539_v16  ;;  %v3540_v16 = vadd.f32 %v3345_v18, %v2964_v6  ;;  %v10865_v18 = vadd.f32 %v10370_v55, %v8867_v29  ;;  %v3541_v62 = vadd.f32 %v3347_v24, %v2965_v53  ;;  %v10889_v53 = vld [vmem:[%s7381_s14 + $0x2f0] sm:$0xff] }
 0x416   : > { %16256 = vst [vmem:[#allocation611_spill] sm:$0xff] %v10792_v39  ;;  %v10858_v35 = vmul.f32 %v3538_v3, %v10829_v49  ;;  %v3542_v29 = vadd.f32 %v3349_v56, %v2966_v60  ;;  %v3351_v24 = vmul.f32 0.6931472, %v6532_v12  ;;  %v10922_v60 = vadd.f32 %v10370_v55, %v10638_v7 }
 0x417   : > { %16257 = vst [vmem:[#allocation612_spill] sm:$0xff] %v10797_v43  ;;  %v2541_v43 = vsub.f32 0.0, %v2397_v54  ;;  %v10853_v54 = vadd.f32 1.0, %v10823_v38  ;;  %6537 = vpow2.f32 %v2782_v51  ;;  %v10895_v51 = vld [vmem:[%s7381_s14 + $0x2f8] sm:$0xff]  ;;  %v2969_v7 = vmax.f32 %v10643_v63, 0.0 }
 0x418   : > { %16258 = vst [vmem:[#allocation613_spill] sm:$0xff] %v10803_v23  ;;  %v10841_v23 = vld [vmem:[%s7381_s14 + $0x2e0] sm:$0xff] }
 0x419   : > { %16259 = vst [vmem:[#allocation614_spill] sm:$0xff] %v10807_v14  ;;  %v10869_v6 = vmul.f32 %v10841_v23, %v10529_v13  ;;  %v2786_v3 = vmul.f32 1.442695, %v2541_v43  ;;  %v10892_v43 = vld [vmem:[%s7386_s17 + $0x2f0] sm:$0xff]  ;;  %6539 = vlog2.f32 %v10853_v54  ;;  %v10947_v13 = vld [vmem:[%s7386_s17 + $0x2f8] sm:$0xff]  ;;  %v11086_v14 = vld [vmem:[%s7381_s14 + $0x328] sm:$0xff] }
 0x41a   : > { %16260 = vst [vmem:[#allocation615_spill] sm:$0xff] %v10812_v21  ;;  %v10832_v21 = vld [vmem:[%s7381_s14 + $0x2d8] sm:$0xff]  ;;  %6541 = vpow2.f32 %v2784_v30  ;;  %v1780_v30 = vpop.f32.mrf.mxu1 }
 0x41b   : > { %16261 = vst [vmem:[#allocation616_spill] sm:$0xff] %v10817_v17  ;;  %v10849_v41 = vmul.f32 %v10832_v21, %v10512_v28  ;;  %v10909_v17 = vpop.f32.mrf.mxu3  ;;  %6543 = vpow2.f32 %v2786_v3  ;;  %v10927_v28 = vmul.f32 %v3542_v29, %v10892_v43  ;;  %v2359_v29 = vand.u32 2147483647, %v10900_v19 }
 0x41c   : > { %16262 = vst [vmem:[#allocation617_spill] sm:$0xff] %v10821_v9  ;;  %v10872_v9 = vld [vmem:[%s7381_s14 + $0x2e8] sm:$0xff] }
 0x41d   : > { %16263 = vst [vmem:[#allocation618_spill] sm:$0xff] %v10823_v38  ;;  %v10874_v38 = vpop.eup %6533  ;;  %v10906_v56 = vmul.f32 %v10872_v9, %v10537_v45 }
 0x41e   : > { %16264 = vst [vmem:[#allocation619_spill] sm:$0xff] %v10829_v49  ;;  %v10882_v49 = vld [vmem:[%s7386_s17 + $0x2e8] sm:$0xff]  ;;  %v6536_v12 = vpop.eup %6535 }
 0x41f   : > { %16265 = vst [vmem:[#allocation620_spill] sm:$0xff] %v10832_v21  ;;  %v2967_v21 = vmax.f32 %v10583_v31, 0.0  ;;  %v10937_v3 = vpop.eup %6537 }
 0x420   : > { %16266 = vst [vmem:[#allocation621_spill] sm:$0xff] %v10841_v23  ;;  %v10886_v23 = vmul.f32 %v3540_v16, %v10861_v5  ;;  %v2398_v16 = vand.u32 2147483647, %v10865_v18 }
 0x421   : > { %16267 = vst [vmem:[#allocation622_spill] sm:$0xff] %v10845_v11  ;;  %v10918_v11 = vadd.f32 1.0, %v10874_v38 }
 0x422   : > { %16268 = vst [vmem:[#allocation623_spill] sm:$0xff] %v10849_v41  ;;  %v2542_v45 = vsub.f32 0.0, %v2398_v16  ;;  %v2970_v16 = vmax.f32 %v10703_v1, 0.0 }
 0x423   : > { %16269 = vst [vmem:[#allocation624_spill] sm:$0xff] %v10853_v54  ;;  %v10912_v54 = vmul.f32 %v3541_v62, %v10882_v49  ;;  %v10931_v62 = vmul.f32 %v10889_v53, %v10544_v59  ;;  %6545 = vlog2.f32 %v10918_v11  ;;  %v2360_v59 = vand.u32 2147483647, %v10922_v60 }
 0x424   : > { %16270 = vst [vmem:[#allocation625_spill] sm:$0xff] %v10858_v35 }
 0x425   : > { %16271 = vst [vmem:[#allocation626_spill] sm:$0xff] %v10861_v5  ;;  %v10943_v5 = vld [vmem:[%s7381_s14 + $0x308] sm:$0xff] }
 0x426   : > { %16272 = vst [vmem:[#allocation627_spill] sm:$0xff] %v10865_v18 }
 0x427   : > { %16273 = vst [vmem:[#allocation628_spill] sm:$0xff] %v10869_v6 }
 0x428   : > { %16274 = vst [vmem:[#allocation629_spill] sm:$0xff] %v10872_v9  ;;  %v3543_v9 = vadd.f32 %v3351_v24, %v2967_v21  ;;  %v6540_v21 = vpop.eup %6539  ;;  %v10974_v24 = vadd.f32 1.0, %v10937_v3 }
 0x429   : > { %16275 = vst [vmem:[#allocation630_spill] sm:$0xff] %v10874_v38  ;;  %v10935_v38 = vmul.f32 %v10895_v51, %v10583_v31 }
 0x42a   : > { %16276 = vst [vmem:[#allocation631_spill] sm:$0xff] %v10879_v36  ;;  %v10983_v31 = vmul.f32 %v3543_v9, %v10947_v13  ;;  %6547 = vlog2.f32 %v10974_v24 }
 0x42b   : > { %16277 = vst [vmem:[#allocation632_spill] sm:$0xff] %v10882_v49  ;;  %v2968_v49 = vmax.f32 %v10616_v32, 0.0 }
 0x42c   : > { %16278 = vst [vmem:[#allocation633_spill] sm:$0xff] %v10886_v23 }
 0x42d   : > { %16279 = vst [vmem:[#allocation634_spill] sm:$0xff] %v10889_v53  ;;  %v3353_v53 = vmul.f32 0.6931472, %v6536_v12  ;;  %v10962_v12 = vpop.eup %6541 }
 0x42e   : > { %16280 = vst [vmem:[#allocation635_spill] sm:$0xff] %v10892_v43  ;;  %v10951_v43 = vmul.f32 %v10915_v47, %v10616_v32  ;;  %v10978_v32 = vadd.f32 %v10370_v55, %v10778_v37  ;;  %v10993_v37 = vadd.f32 %v10370_v55, %v10835_v10  ;;  %v11011_v10 = vadd.f32 %v10370_v55, %v9032_v42 }
 0x42f   : > { %16281 = vst [vmem:[#allocation636_spill] sm:$0xff] %v10895_v51  ;;  %v10955_v51 = vadd.f32 %v10370_v55, %v10713_v26  ;;  %v10968_v26 = vmul.f32 %v10943_v5, %v10643_v63  ;;  %v2503_v63 = vsub.f32 0.0, %v2359_v29  ;;  %v1783_v29 = vpop.f32.mrf.mxu1 }
 0x430   : > { %16282 = vst [vmem:[#allocation637_spill] sm:$0xff] %v10900_v19 }
 0x431   : > { %16283 = vst [vmem:[#allocation638_spill] sm:$0xff] %v10906_v56  ;;  %v3355_v56 = vmul.f32 0.6931472, %v6540_v21 }
 0x432   : > { %16284 = vst [vmem:[#allocation639_spill] sm:$0xff] %v10909_v17  ;;  %v3544_v17 = vadd.f32 %v3353_v53, %v2968_v49  ;;  %v11013_v49 = vpop.f32.mrf.mxu3  ;;  %v2362_v53 = vand.u32 2147483647, %v10978_v32 }
 0x433   : > { %16285 = vst [vmem:[#allocation640_spill] sm:$0xff] %v10912_v54  ;;  %v11027_v54 = vld [vmem:[%s7381_s14 + $0x318] sm:$0xff] }
 0x434   : > { %16286 = vst [vmem:[#allocation641_spill] sm:$0xff] %v10915_v47  ;;  %v10971_v47 = vld [vmem:[%s7381_s14 + $0x310] sm:$0xff] }
 0x435   : > { %16287 = vst [vmem:[#allocation642_spill] sm:$0xff] %v10918_v11  ;;  %v10980_v11 = vpop.eup %6543  ;;  %v11000_v9 = vmul.f32 %v10971_v47, %v10703_v1  ;;  %v2710_v1 = vmul.f32 1.442695, %v2503_v63  ;;  %v11034_v63 = vld [vmem:[%s7386_s17 + $0x308] sm:$0xff] }
 0x436   : > { %16288 = vst [vmem:[#allocation643_spill] sm:$0xff] %v10922_v60  ;;  %v6546_v21 = vpop.eup %6545 }
 0x437   : > { %16289 = vst [vmem:[#allocation644_spill] sm:$0xff] %v10927_v28  ;;  %v10996_v28 = vld [vmem:[%s7386_s17 + $0x300] sm:$0xff] }
 0x438   : > { %16290 = vst [vmem:[#allocation645_spill] sm:$0xff] %v10931_v62  ;;  %v2788_v62 = vmul.f32 1.442695, %v2542_v45  ;;  %v11007_v45 = vadd.f32 1.0, %v10980_v11 }
 0x439   : > { %16291 = vst [vmem:[#allocation646_spill] sm:$0xff] %v10935_v38 }
 0x43a   : > { %16292 = vst [vmem:[#allocation647_spill] sm:$0xff] %v10937_v3  ;;  %v2361_v3 = vand.u32 2147483647, %v10955_v51  ;;  %6549 = vpow2.f32 %v2788_v62  ;;  %v2506_v62 = vsub.f32 0.0, %v2362_v53  ;;  %v11067_v41 = vpop.f32.mrf.mxu3 }
 0x43b   : > { %16293 = vst [vmem:[#allocation648_spill] sm:$0xff] %v10943_v5  ;;  %v10988_v5 = vadd.f32 %v10370_v55, %v8950_v20  ;;  %v2504_v20 = vsub.f32 0.0, %v2360_v59  ;;  %v11031_v59 = vadd.f32 %v10370_v55, %v1783_v29  ;;  %v11042_v29 = vmul.f32 %v11027_v54, %v10745_v27 }
 0x43c   : > { %16294 = vst [vmem:[#allocation649_spill] sm:$0xff] %v10947_v13  ;;  %v11003_v13 = vadd.f32 1.0, %v10962_v12  ;;  %v2505_v42 = vsub.f32 0.0, %v2361_v3  ;;  %v2971_v3 = vmax.f32 %v10745_v27, 0.0 }
 0x43d   : > { %16295 = vst [vmem:[#allocation650_spill] sm:$0xff] %v10951_v43  ;;  %v2712_v6 = vmul.f32 1.442695, %v2504_v20  ;;  %v6548_v20 = vpop.eup %6547 }
 0x43e   : > { %16296 = vst [vmem:[#allocation651_spill] sm:$0xff] %v10955_v51  ;;  %6551 = vlog2.f32 %v11003_v13  ;;  %v3359_v43 = vmul.f32 0.6931472, %v6548_v20 }
 0x43f   : > { %16297 = vst [vmem:[#allocation652_spill] sm:$0xff] %v10962_v12  ;;  %v11023_v12 = vmul.f32 %v3544_v17, %v10996_v28  ;;  %6553 = vlog2.f32 %v11007_v45  ;;  %v2400_v17 = vand.u32 2147483647, %v11011_v10 }
 0x440   : > { %16298 = vst [vmem:[#allocation653_spill] sm:$0xff] %v10968_v26  ;;  %6555 = vpow2.f32 %v2710_v1  ;;  %v2365_v1 = vand.u32 2147483647, %v11031_v59  ;;  %v11054_v38 = vpop.eup %6549  ;;  %v3547_v36 = vadd.f32 %v3359_v43, %v2971_v3  ;;  %v11099_v43 = vadd.f32 %v10370_v55, %v9189_v22  ;;  %v11116_v22 = vld [vmem:[%s7381_s14 + $0x330] sm:$0xff] }
 0x441   : > { %16299 = vst [vmem:[#allocation654_spill] sm:$0xff] %v10971_v47  ;;  %v2399_v47 = vand.u32 2147483647, %v10988_v5  ;;  %6557 = vpow2.f32 %v2712_v6 }
 0x442   : > { %16300 = vst [vmem:[#allocation655_spill] sm:$0xff] %v10974_v24  ;;  %v11020_v24 = vadd.f32 %v10370_v55, %v1780_v30  ;;  %v3357_v30 = vmul.f32 0.6931472, %v6546_v21  ;;  %v11046_v21 = vadd.f32 %v10370_v55, %v9115_v58  ;;  %v2544_v58 = vsub.f32 0.0, %v2400_v17 }
 0x443   : > { %16301 = vst [vmem:[#allocation656_spill] sm:$0xff] %v10978_v32 }
 0x444   : > { %16302 = vst [vmem:[#allocation657_spill] sm:$0xff] %v10980_v11  ;;  %v2363_v11 = vand.u32 2147483647, %v10993_v37  ;;  %v3546_v27 = vadd.f32 %v3357_v30, %v2970_v16  ;;  %v6552_v53 = vpop.eup %6551  ;;  %v2401_v23 = vand.u32 2147483647, %v11046_v21 }
 0x445   : > { %16303 = vst [vmem:[#allocation658_spill] sm:$0xff] %v10983_v31  ;;  %v11060_v31 = vld [vmem:[%s7381_s14 + $0x320] sm:$0xff] }
 0x446   : > { %16304 = vst [vmem:[#allocation659_spill] sm:$0xff] %v10988_v5 }
 0x447   : > { %16305 = vst [vmem:[#allocation660_spill] sm:$0xff] %v10993_v37 }
 0x448   : > { %16306 = vst [vmem:[#allocation661_spill] sm:$0xff] %v10996_v28  ;;  %v2714_v28 = vmul.f32 1.442695, %v2505_v42  ;;  %v2716_v42 = vmul.f32 1.442695, %v2506_v62  ;;  %v2973_v62 = vmax.f32 %v10776_v2, 0.0 }
 0x449   : > { %16307 = vst [vmem:[#allocation662_spill] sm:$0xff] %v11000_v9 }
 0x44a   : > { %16308 = vst [vmem:[#allocation663_spill] sm:$0xff] %v11003_v13  ;;  %v2507_v13 = vsub.f32 0.0, %v2363_v11  ;;  %6559 = vpow2.f32 %v2714_v28  ;;  %v3361_v28 = vmul.f32 0.6931472, %v6552_v53  ;;  %v11094_v53 = vld [vmem:[%s7386_s17 + $0x318] sm:$0xff] }
 0x44b   : > { %16309 = vst [vmem:[#allocation664_spill] sm:$0xff] %v11007_v45  ;;  %v1786_v45 = vpop.f32.mrf.mxu1  ;;  %6561 = vpow2.f32 %v2716_v42 }
 0x44c   : > { %16310 = vst [vmem:[#allocation665_spill] sm:$0xff] %v11011_v10  ;;  %v11063_v11 = vadd.f32 %v10370_v55, %v1786_v45  ;;  %v2718_v16 = vmul.f32 1.442695, %v2507_v13  ;;  %v11074_v45 = vmul.f32 %v11060_v31, %v10770_v34  ;;  %v2792_v13 = vmul.f32 1.442695, %v2544_v58 }
 0x44d   : > { %16311 = vst [vmem:[#allocation666_spill] sm:$0xff] %v11013_v49  ;;  %v3545_v49 = vadd.f32 %v3355_v56, %v2969_v7  ;;  %v2543_v56 = vsub.f32 0.0, %v2399_v47  ;;  %v2364_v7 = vand.u32 2147483647, %v11020_v24  ;;  %v11105_v58 = vmul.f32 %v11086_v14, %v10776_v2 }
 0x44e   : > { %16312 = vst [vmem:[#allocation667_spill] sm:$0xff] %v11020_v24  ;;  %v2366_v30 = vand.u32 2147483647, %v11063_v11 }
 0x44f   : > { %16313 = vst [vmem:[#allocation668_spill] sm:$0xff] %v11023_v12  ;;  %v11051_v47 = vmul.f32 %v3545_v49, %v11034_v63  ;;  %v2972_v49 = vmax.f32 %v10770_v34, 0.0  ;;  %v2790_v6 = vmul.f32 1.442695, %v2543_v56  ;;  %v6554_v12 = vpop.eup %6553  ;;  %v11078_v56 = vadd.f32 1.0, %v11054_v38 }
 0x450   : > { %16314 = vst [vmem:[#allocation669_spill] sm:$0xff] %v11027_v54  ;;  %v11057_v54 = vld [vmem:[%s7386_s17 + $0x310] sm:$0xff]  ;;  %v11070_v17 = vpop.eup %6555  ;;  %v2510_v34 = vsub.f32 0.0, %v2366_v30  ;;  %v3363_v35 = vmul.f32 0.6931472, %v6554_v12 }
 0x451   : > { %16315 = vst [vmem:[#allocation670_spill] sm:$0xff] %v11031_v59  ;;  %v11081_v20 = vmul.f32 %v3546_v27, %v11057_v54  ;;  %6563 = vpow2.f32 %v2790_v6  ;;  %v11118_v30 = vld [vmem:[#allocation5] ss:$0 sm:$0xff] }
 0x452   : > { %16316 = vst [vmem:[#allocation671_spill] sm:$0xff] %v11034_v63  ;;  %v2508_v63 = vsub.f32 0.0, %v2364_v7  ;;  %v2509_v7 = vsub.f32 0.0, %v2365_v1  ;;  %v11089_v1 = vadd.f32 1.0, %v11070_v17  ;;  %6565 = vpow2.f32 %v2718_v16  ;;  %v11113_v16 = vld [vmem:[%s7386_s17 + $0x320] sm:$0xff] }
 0x453   : > { %16317 = vst [vmem:[#allocation672_spill] sm:$0xff] %v11042_v29  ;;  %6567 = vlog2.f32 %v11078_v56  ;;  %v1789_v12 = vpop.f32.mrf.mxu1  ;;  %v2724_v55 = vmul.f32 1.442695, %v2510_v34  ;;  %v11157_v2 = vadd.f32 %v11118_v30, %v9268_v15  ;;  %v11173_v15 = vld [vmem:[%s7381_s14 + $0x340] sm:$0xff] }
 0x454   : > { %16318 = vst [vmem:[#allocation673_spill] sm:$0xff] %v11046_v21  ;;  %6569 = vpow2.f32 %v2792_v13  ;;  %v3549_v13 = vadd.f32 %v3363_v35, %v2973_v62  ;;  %v11149_v62 = vpop.f32.mrf.mxu3 }
 0x455   : > { %16319 = vst [vmem:[#allocation674_spill] sm:$0xff] %v11051_v47 }
 0x456   : > { %16320 = vst [vmem:[#allocation675_spill] sm:$0xff] %v11054_v38  ;;  %v2545_v38 = vsub.f32 0.0, %v2401_v23  ;;  %v3548_v23 = vadd.f32 %v3361_v28, %v2972_v49  ;;  %v11121_v49 = vadd.f32 %v11118_v30, %v1789_v12  ;;  %v11126_v28 = vmul.f32 %v3547_v36, %v11094_v53 }
 0x457   : > { %16321 = vst [vmem:[#allocation676_spill] sm:$0xff] %v11057_v54  ;;  %v11132_v54 = vld [vmem:[%s7386_s17 + $0x328] sm:$0xff]  ;;  %v11147_v36 = vmul.f32 %v11116_v22, %v10865_v18 }
 0x458   : > { %16322 = vst [vmem:[#allocation677_spill] sm:$0xff] %v11060_v31  ;;  %v2720_v31 = vmul.f32 1.442695, %v2508_v63  ;;  %v2722_v63 = vmul.f32 1.442695, %v2509_v7  ;;  %v11142_v35 = vmul.f32 %v3548_v23, %v11113_v16 }
 0x459   : > { %16323 = vst [vmem:[#allocation678_spill] sm:$0xff] %v11063_v11  ;;  %v2794_v27 = vmul.f32 1.442695, %v2545_v38  ;;  %v2367_v12 = vand.u32 2147483647, %v11121_v49  ;;  %v2974_v38 = vmax.f32 %v10865_v18, 0.0  ;;  %v11167_v18 = vmul.f32 %v3549_v13, %v11132_v54 }
 0x45a   : > { %16324 = vst [vmem:[#allocation679_spill] sm:$0xff] %v11067_v41  ;;  %v11083_v41 = vpop.eup %6557  ;;  %6571 = vpow2.f32 %v2720_v31  ;;  %v2402_v31 = vand.u32 2147483647, %v11099_v43 }
 0x45b   : > { %16325 = vst [vmem:[#allocation680_spill] sm:$0xff] %v11070_v17  ;;  %v11101_v3 = vpop.eup %6559  ;;  %v11108_v42 = vadd.f32 1.0, %v11083_v41  ;;  %6573 = vlog2.f32 %v11089_v1 }
 0x45c   : > { %16326 = vst [vmem:[#allocation681_spill] sm:$0xff] %v11074_v45  ;;  %v11123_v7 = vpop.eup %6561  ;;  %v11136_v34 = vadd.f32 1.0, %v11101_v3  ;;  %6575 = vpow2.f32 %v2722_v63  ;;  %v11153_v63 = vld [vmem:[%s7381_s14 + $0x338] sm:$0xff] }
 0x45d   : > { %16327 = vst [vmem:[#allocation682_spill] sm:$0xff] %v11078_v56  ;;  %v11129_v6 = vpop.eup %6563  ;;  %6577 = vlog2.f32 %v11108_v42  ;;  %v11160_v23 = vadd.f32 1.0, %v11123_v7 }
 0x45e   : > { %16328 = vst [vmem:[#allocation683_spill] sm:$0xff] %v11081_v20  ;;  %6579 = vpow2.f32 %v2724_v55 }
 0x45f   : > { %16329 = vst [vmem:[#allocation684_spill] sm:$0xff] %v11083_v41  ;;  %6581 = vpow2.f32 %v2794_v27  ;;  %v11182_v41 = vadd.f32 1.0, %v11129_v6  ;;  %v11186_v27 = vmul.f32 %v11153_v63, %v10988_v5 }
 0x460   : > { %16330 = vst [vmem:[#allocation685_spill] sm:$0xff] %v11086_v14  ;;  %v11139_v14 = vpop.eup %6565  ;;  %6583 = vlog2.f32 %v11136_v34 }
 0x461   : > { %16331 = vst [vmem:[#allocation686_spill] sm:$0xff] %v11089_v1  ;;  %v11177_v55 = vadd.f32 1.0, %v11139_v14  ;;  %6585 = vlog2.f32 %v11160_v23 }
 0x462   : > { %16332 = vst [vmem:[#allocation687_spill] sm:$0xff] %v11094_v53  ;;  %v6568_v53 = vpop.eup %6567 }
 0x463   : > { %16333 = vst [vmem:[#allocation688_spill] sm:$0xff] %v11099_v43  ;;  %v11162_v56 = vpop.eup %6569 }
 0x464   : > { %16334 = vst [vmem:[#allocation689_spill] sm:$0xff] %v11101_v3  ;;  %v2546_v3 = vsub.f32 0.0, %v2402_v31 }
 0x465   : > { %16335 = vst [vmem:[#allocation690_spill] sm:$0xff] %v11105_v58  ;;  %v2935_v58 = vmax.f32 %v10900_v19, 0.0 }
 0x466   : > { %16336 = vst [vmem:[#allocation691_spill] sm:$0xff] %v11108_v42  ;;  %v11170_v42 = vpop.eup %6571 }
 0x467   : > { %16337 = vst [vmem:[#allocation692_spill] sm:$0xff] %v11113_v16  ;;  %v2511_v16 = vsub.f32 0.0, %v2367_v12  ;;  %v6574_v17 = vpop.eup %6573 }
 0x468   : > { %16338 = vst [vmem:[#allocation693_spill] sm:$0xff] %v11116_v22  ;;  %v3365_v22 = vmul.f32 0.6931472, %v6568_v53  ;;  %v11188_v31 = vpop.eup %6575 }
 0x469   : > { %16339 = vst [vmem:[#allocation694_spill] sm:$0xff] %v11121_v49  ;;  %v2726_v12 = vmul.f32 1.442695, %v2511_v16  ;;  %v2403_v16 = vand.u32 2147483647, %v11157_v2  ;;  %v6578_v53 = vpop.eup %6577 }
 0x46a   : > { %16340 = vst [vmem:[#allocation695_spill] sm:$0xff] %v11123_v7  ;;  %v1792_v7 = vpop.f32.mrf.mxu1 }
 0x46b   : > { %16341 = vst [vmem:[#allocation696_spill] sm:$0xff] %v11126_v28  ;;  %v11196_v13 = vadd.f32 %v11118_v30, %v1792_v7  ;;  %6587 = vpow2.f32 %v2726_v12  ;;  %v11220_v12 = vadd.f32 1.0, %v11188_v31 }
 0x46c   : > { %16342 = vst [vmem:[#allocation697_spill] sm:$0xff] %v11129_v6  ;;  %6589 = vlog2.f32 %v11177_v55  ;;  %v11216_v6 = vld [vmem:[%s7381_s14 + $0x348] sm:$0xff] }
 0x46d   : > { %16343 = vst [vmem:[#allocation698_spill] sm:$0xff] %v11132_v54  ;;  %v11191_v54 = vadd.f32 1.0, %v11162_v56  ;;  %v2368_v7 = vand.u32 2147483647, %v11196_v13  ;;  %6591 = vlog2.f32 %v11182_v41 }
 0x46e   : > { %16344 = vst [vmem:[#allocation699_spill] sm:$0xff] %v11136_v34  ;;  %v11204_v34 = vadd.f32 1.0, %v11170_v42 }
 0x46f   : > { %16345 = vst [vmem:[#allocation700_spill] sm:$0xff] %v11139_v14  ;;  %6593 = vlog2.f32 %v11191_v54  ;;  %v2512_v14 = vsub.f32 0.0, %v2368_v7 }
 0x470   : > { %16346 = vst [vmem:[#allocation701_spill] sm:$0xff] %v11142_v35  ;;  %v3550_v35 = vadd.f32 %v3365_v22, %v2974_v38  ;;  %6595 = vlog2.f32 %v11204_v34  ;;  %v11235_v22 = vmul.f32 %v11216_v6, %v11046_v21 }
 0x471   : > { %16347 = vst [vmem:[#allocation702_spill] sm:$0xff] %v11149_v62  ;;  %v2728_v38 = vmul.f32 1.442695, %v2512_v14  ;;  %v11274_v62 = vld [vmem:[%s7381_s14 + $0x200] sm:$0xff] }
 0x472   : > { %16348 = vst [vmem:[#allocation703_spill] sm:$0xff] %v11153_v63  ;;  %v11201_v63 = vmul.f32 %v11173_v15, %v11011_v10 }
 0x473   : > { %16349 = vst [vmem:[#allocation704_spill] sm:$0xff] %v11157_v2 }
 0x474   : > { %16350 = vst [vmem:[#allocation705_spill] sm:$0xff] %v11160_v23  ;;  %v2796_v23 = vmul.f32 1.442695, %v2546_v3  ;;  %v2547_v3 = vsub.f32 0.0, %v2403_v16  ;;  %v1795_v16 = vpop.f32.mrf.mxu1 }
 0x475   : > { %16351 = vst [vmem:[#allocation706_spill] sm:$0xff] %v11162_v56  ;;  %v11206_v56 = vpop.eup %6579  ;;  %v11251_v14 = vadd.f32 %v11118_v30, %v1795_v16  ;;  %v11269_v16 = vld [vmem:[%s7386_s17 + $0x200] sm:$0xff] }
 0x476   : > { %16352 = vst [vmem:[#allocation707_spill] sm:$0xff] %v11167_v18  ;;  %v11212_v1 = vpop.eup %6581  ;;  %6597 = vpow2.f32 %v2796_v23  ;;  %v11245_v18 = vld [vmem:[%s7386_s17 + $0x1f8] sm:$0xff] }
 0x477   : > { %16353 = vst [vmem:[#allocation708_spill] sm:$0xff] %v11170_v42  ;;  %v3287_v42 = vmul.f32 0.6931472, %v6574_v17  ;;  %v6584_v45 = vpop.eup %6583  ;;  %v11228_v17 = vadd.f32 1.0, %v11206_v56  ;;  %6599 = vlog2.f32 %v11220_v12 }
 0x478   : > { %16354 = vst [vmem:[#allocation709_spill] sm:$0xff] %v11173_v15  ;;  %v6586_v15 = vpop.eup %6585  ;;  %6601 = vpow2.f32 %v2728_v38  ;;  %v11266_v38 = vld [vmem:[%s7381_s14 + $0x1f8] sm:$0xff] }
 0x479   : > { %16355 = vst [vmem:[#allocation710_spill] sm:$0xff] %v11177_v55  ;;  %v11223_v55 = vpop.f32.mrf.mxu3  ;;  %v11237_v7 = vpop.eup %6587  ;;  %6603 = vlog2.f32 %v11228_v17 }
 0x47a   : > { %16356 = vst [vmem:[#allocation711_spill] sm:$0xff] %v11182_v41  ;;  %v3289_v41 = vmul.f32 0.6931472, %v6578_v53  ;;  %v11240_v53 = vld [vmem:[%s7386_s17 + $0x330] sm:$0xff]  ;;  %v11248_v23 = vadd.f32 1.0, %v11237_v7 }
 0x47b   : > { %16357 = vst [vmem:[#allocation712_spill] sm:$0xff] %v11188_v31  ;;  %v11231_v31 = vadd.f32 1.0, %v11212_v1 }
 0x47c   : > { %16358 = vst [vmem:[#allocation713_spill] sm:$0xff] %v11191_v54  ;;  %v3511_v54 = vadd.f32 %v3287_v42, %v2935_v58 }
 0x47d   : > { %16359 = vst [vmem:[#allocation714_spill] sm:$0xff] %v11196_v13  ;;  %6605 = vlog2.f32 %v11231_v31 }
 0x47e   : > { %16360 = vst [vmem:[#allocation715_spill] sm:$0xff] %v11204_v34  ;;  %v2936_v34 = vmax.f32 %v10922_v60, 0.0  ;;  %6607 = vlog2.f32 %v11248_v23 }
 0x47f   : > { %16361 = vst [vmem:[#allocation716_spill] sm:$0xff] %v11206_v56  ;;  %v3291_v56 = vmul.f32 0.6931472, %v6584_v45  ;;  %v11255_v45 = vadd.f32 %v11118_v30, %v9354_v52  ;;  %v2369_v52 = vand.u32 2147483647, %v11251_v14 }
 0x480   : > { %16362 = vst [vmem:[#allocation717_spill] sm:$0xff] %v11212_v1  ;;  %v6590_v1 = vpop.eup %6589  ;;  %v3512_v42 = vadd.f32 %v3289_v41, %v2936_v34  ;;  %v3655_v34 = vmul.f32 %v3511_v54, %v11245_v18 }
 0x481   : > { %16363 = vst [vmem:[#allocation718_spill] sm:$0xff] %v11216_v6  ;;  %v6592_v58 = vpop.eup %6591  ;;  %v2937_v6 = vmax.f32 %v10955_v51, 0.0  ;;  %v3295_v29 = vmul.f32 0.6931472, %v6590_v1  ;;  %v2513_v28 = vsub.f32 0.0, %v2369_v52  ;;  %v11297_v47 = vpop.f32.mrf.mxu3 }
 0x482   : > { %16364 = vst [vmem:[#allocation719_spill] sm:$0xff] %v11220_v12  ;;  %v11262_v12 = vmul.f32 %v3550_v35, %v11240_v53  ;;  %v2404_v54 = vand.u32 2147483647, %v11255_v45  ;;  %v3656_v1 = vmul.f32 %v3512_v42, %v11269_v16 }
 0x483   : > { %16365 = vst [vmem:[#allocation720_spill] sm:$0xff] %v11223_v55  ;;  %v2798_v55 = vmul.f32 1.442695, %v2547_v3  ;;  %v11259_v3 = vpop.eup %6593  ;;  %v2730_v20 = vmul.f32 1.442695, %v2513_v28  ;;  %v11312_v28 = vld [vmem:[%s7386_s17 + $0x218] sm:$0xff] }
 0x484   : > { %16366 = vst [vmem:[#allocation721_spill] sm:$0xff] %v11228_v17  ;;  %v6596_v41 = vpop.eup %6595  ;;  %v3513_v17 = vadd.f32 %v3291_v56, %v2937_v6  ;;  %v3799_v56 = vmul.f32 %v11266_v38, %v10900_v19  ;;  %v2939_v6 = vmax.f32 %v10993_v37, 0.0 }
 0x485   : > { %16367 = vst [vmem:[#allocation722_spill] sm:$0xff] %v11231_v31  ;;  %v11277_v35 = vpop.eup %6597  ;;  %6609 = vpow2.f32 %v2798_v55  ;;  %v11282_v31 = vld [vmem:[%s7386_s17 + $0x208] sm:$0xff]  ;;  %v3800_v55 = vmul.f32 %v11274_v62, %v10922_v60  ;;  %v2941_v60 = vmax.f32 %v11031_v59, 0.0 }
 0x486   : > { %16368 = vst [vmem:[#allocation723_spill] sm:$0xff] %v11237_v7  ;;  %v3293_v7 = vmul.f32 0.6931472, %v6586_v15  ;;  %v2938_v15 = vmax.f32 %v10978_v32, 0.0  ;;  %v6600_v9 = vpop.eup %6599  ;;  %v3657_v42 = vmul.f32 %v3513_v17, %v11282_v31  ;;  %v3515_v19 = vadd.f32 %v3295_v29, %v2939_v6  ;;  %v11322_v6 = vld [vmem:[%s7381_s14 + $0x210] sm:$0xff] }
 0x487   : > { %16369 = vst [vmem:[#allocation724_spill] sm:$0xff] %v11240_v53  ;;  %v11279_v53 = vmul.f32 0.6931472, %v6592_v58  ;;  %v11290_v58 = vpop.eup %6601  ;;  %6611 = vpow2.f32 %v2730_v20  ;;  %v11317_v29 = vadd.f32 %v11118_v30, %v9427_v25  ;;  %v3944_v17 = vsub.f32 %v3656_v1, %v3800_v55  ;;  %v11329_v20 = vld [vmem:[%s7381_s14 + $0x218] sm:$0xff] }
 0x488   : > { %16370 = vst [vmem:[#allocation725_spill] sm:$0xff] %v11245_v18  ;;  %v3514_v52 = vadd.f32 %v3293_v7, %v2938_v15  ;;  %v3297_v18 = vmul.f32 0.6931472, %v6596_v41  ;;  %v6604_v26 = vpop.eup %6603  ;;  %v11304_v39 = vadd.f32 1.0, %v11290_v58  ;;  %v11309_v7 = vadd.f32 1.0, %v11277_v35 }
 0x489   : > { %16371 = vst [vmem:[#allocation726_spill] sm:$0xff] %v11248_v23  ;;  %v11295_v23 = vld [vmem:[%s7381_s14 + $0x208] sm:$0xff]  ;;  %v2940_v41 = vmax.f32 %v11020_v24, 0.0  ;;  %v3299_v15 = vmul.f32 0.6931472, %v6600_v9  ;;  %v2548_v1 = vsub.f32 0.0, %v2404_v54 }
 0x48a   : > { %16372 = vst [vmem:[#allocation727_spill] sm:$0xff] %v11251_v14  ;;  %6613 = vlog2.f32 %v11304_v39  ;;  %v3301_v25 = vmul.f32 0.6931472, %v6604_v26  ;;  %v2405_v26 = vand.u32 2147483647, %v11317_v29  ;;  %v11351_v54 = vld [vmem:[%s7386_s17 + $0x228] sm:$0xff] }
 0x48b   : > { %16373 = vst [vmem:[#allocation728_spill] sm:$0xff] %v11255_v45 }
 0x48c   : > { %16374 = vst [vmem:[#allocation729_spill] sm:$0xff] %v11266_v38  ;;  %v3943_v38 = vsub.f32 %v3655_v34, %v3799_v56  ;;  %v3801_v56 = vmul.f32 %v11295_v23, %v10955_v51  ;;  %v11335_v51 = vld [vmem:[%s7386_s17 + $0x220] sm:$0xff] }
 0x48d   : > { %16375 = vst [vmem:[#allocation730_spill] sm:$0xff] %v11269_v16  ;;  %v11301_v16 = vld [vmem:[%s7386_s17 + $0x210] sm:$0xff] }
 0x48e   : > { %16376 = vst [vmem:[#allocation731_spill] sm:$0xff] %v11274_v62  ;;  %v11306_v62 = vpop.eup %6605  ;;  %v3658_v9 = vmul.f32 %v3514_v52, %v11301_v16  ;;  %v4086_v55 = vadd.f32 %v10795_v57, %v3943_v38  ;;  %v11340_v52 = vld [vmem:[%s7381_s14 + $0x220] sm:$0xff]  ;;  %v11346_v57 = vadd.f32 %v11118_v30, %v9504_v46 }
 0x48f   : > { %16377 = vst [vmem:[#allocation732_spill] sm:$0xff] %v11277_v35  ;;  %v6608_v34 = vpop.eup %6607 }
 0x490   : > { %16378 = vst [vmem:[#allocation733_spill] sm:$0xff] %v11282_v31  ;;  %v11325_v35 = vpop.eup %6609  ;;  %v3516_v31 = vadd.f32 %v3297_v18, %v2940_v41  ;;  %v2942_v18 = vmax.f32 %v11063_v11, 0.0  ;;  %v3303_v41 = vmul.f32 0.6931472, %v6608_v34  ;;  %v4087_v38 = vadd.f32 %v4086_v55, %v3944_v17 }
 0x491   : > { %16379 = vst [vmem:[#allocation734_spill] sm:$0xff] %v11290_v58  ;;  %v3945_v58 = vsub.f32 %v3657_v42, %v3801_v56  ;;  %v11353_v42 = vpop.eup %6611  ;;  %v3804_v55 = vmul.f32 %v11340_v52, %v11020_v24 }
 0x492   : > { %16380 = vst [vmem:[#allocation735_spill] sm:$0xff] %v11295_v23  ;;  %v3659_v23 = vmul.f32 %v3515_v19, %v11312_v28  ;;  %v3803_v19 = vmul.f32 %v11329_v20, %v10993_v37  ;;  %v3518_v34 = vadd.f32 %v3301_v25, %v2942_v18  ;;  %v6614_v46 = vpop.eup %6613  ;;  %v2800_v18 = vmul.f32 1.442695, %v2548_v1 }
 0x493   : > { %16381 = vst [vmem:[#allocation736_spill] sm:$0xff] %v11301_v16  ;;  %v3517_v16 = vadd.f32 %v3299_v15, %v2941_v60  ;;  %v3660_v60 = vmul.f32 %v3516_v31, %v11335_v51  ;;  %v11357_v15 = vld [vmem:[%s7381_s14 + $0x228] sm:$0xff]  ;;  %v3305_v25 = vmul.f32 0.6931472, %v6614_v46  ;;  %v16399_v1 = vmax.f32 %v10988_v5, 0.0 }
 0x494   : > { %16382 = vst [vmem:[#allocation737_spill] sm:$0xff] %v11304_v39  ;;  %v3802_v39 = vmul.f32 %v11322_v6, %v10978_v32  ;;  %v3947_v17 = vsub.f32 %v3659_v23, %v3803_v19  ;;  %v11366_v32 = vadd.f32 1.0, %v11353_v42  ;;  %v3805_v23 = vmul.f32 %v11357_v15, %v11031_v59  ;;  %v11378_v19 = vld [vmem:[%s7386_s17 + $0x238] sm:$0xff]  ;;  %v11431_v5 = vld [vmem:[%s7381_s14 + $0x248] sm:$0xff]  ;;  %v11448_v59 = vld [vmem:[%s7381_s14 + $0x350] sm:$0xff] }
 0x495   : > { %16383 = vst [vmem:[#allocation738_spill] sm:$0xff] %v11309_v7  ;;  %v11389_v37 = vadd.f32 %v11118_v30, %v9591_v4  ;;  %v11406_v4 = vadd.f32 %v11118_v30, %v9673_v33 }
 0x496   : > { %16384 = vst [vmem:[#allocation739_spill] sm:$0xff] %v11312_v28  ;;  %v3946_v56 = vsub.f32 %v3658_v9, %v3802_v39  ;;  %v4088_v28 = vadd.f32 %v4087_v38, %v3945_v58  ;;  %v3661_v39 = vmul.f32 %v3517_v16, %v11351_v54  ;;  %v2944_v9 = vmax.f32 %v11196_v13, 0.0  ;;  %v11370_v58 = vpop.f32.mrf.mxu3  ;;  %v11375_v38 = vld [vmem:[%s7381_s14 + $0x230] sm:$0xff] }
 0x497   : > { %16385 = vst [vmem:[#allocation740_spill] sm:$0xff] %v11317_v29  ;;  %6615 = vlog2.f32 %v11366_v32 }
 0x498   : > { %16386 = vst [vmem:[#allocation741_spill] sm:$0xff] %v11322_v6  ;;  %v2943_v6 = vmax.f32 %v11121_v49, 0.0  ;;  %v4089_v16 = vadd.f32 %v4088_v28, %v3946_v56  ;;  %v3520_v46 = vadd.f32 %v3305_v25, %v2944_v9  ;;  %6617 = vlog2.f32 %v11309_v7  ;;  %v11434_v7 = vld [vmem:[%s7386_s17 + $0x248] sm:$0xff] }
 0x499   : > { %16387 = vst [vmem:[#allocation742_spill] sm:$0xff] %v11325_v35  ;;  %v3949_v56 = vsub.f32 %v3661_v39, %v3805_v23  ;;  %6619 = vpow2.f32 %v2800_v18 }
 0x49a   : > { %16388 = vst [vmem:[#allocation743_spill] sm:$0xff] %v11329_v20  ;;  %v11363_v20 = vld [vmem:[%s7386_s17 + $0x230] sm:$0xff]  ;;  %v3519_v31 = vadd.f32 %v3303_v41, %v2943_v6  ;;  %v3948_v6 = vsub.f32 %v3660_v60, %v3804_v55  ;;  %v4090_v28 = vadd.f32 %v4089_v16, %v3947_v17  ;;  %v3806_v60 = vmul.f32 %v11375_v38, %v11063_v11 }
 0x49b   : > { %16389 = vst [vmem:[#allocation744_spill] sm:$0xff] %v11335_v51  ;;  %v2549_v51 = vsub.f32 0.0, %v2405_v26  ;;  %v3662_v41 = vmul.f32 %v3518_v34, %v11363_v20  ;;  %v3551_v26 = vadd.f32 %v11279_v53, %v16399_v1  ;;  %v11401_v34 = vld [vmem:[%s7381_s14 + $0x240] sm:$0xff]  ;;  %v3369_v55 = vmul.f32 0.6931472, %v11259_v3  ;;  %v11419_v3 = vld [vmem:[%s7386_s17 + $0x338] sm:$0xff] }
 0x49c   : > { %16390 = vst [vmem:[#allocation745_spill] sm:$0xff] %v11340_v52  ;;  %v2406_v52 = vand.u32 2147483647, %v11346_v57  ;;  %v3663_v53 = vmul.f32 %v3519_v31, %v11378_v19  ;;  %v4091_v25 = vadd.f32 %v4090_v28, %v3948_v6  ;;  %v2407_v16 = vand.u32 2147483647, %v11389_v37 }
 0x49d   : > { %16391 = vst [vmem:[#allocation746_spill] sm:$0xff] %v11346_v57  ;;  %v2802_v9 = vmul.f32 1.442695, %v2549_v51  ;;  %v3950_v1 = vsub.f32 %v3662_v41, %v3806_v60  ;;  %v6616_v23 = vpop.eup %6615  ;;  %v11414_v51 = vadd.f32 %v11118_v30, %v9747_v8  ;;  %v3808_v33 = vmul.f32 %v11401_v34, %v11196_v13 }
 0x49e   : > { %16392 = vst [vmem:[#allocation747_spill] sm:$0xff] %v11351_v54  ;;  %v11395_v54 = vld [vmem:[%s7386_s17 + $0x240] sm:$0xff]  ;;  %v2550_v31 = vsub.f32 0.0, %v2406_v52  ;;  %v4092_v18 = vadd.f32 %v4091_v25, %v3949_v56  ;;  %v2945_v41 = vmax.f32 %v11251_v14, 0.0  ;;  %v6618_v28 = vpop.eup %6617  ;;  %v11423_v60 = vadd.f32 1.0, %v11325_v35 }
 0x49f   : > { %16393 = vst [vmem:[#allocation748_spill] sm:$0xff] %v11353_v42  ;;  %v3664_v39 = vmul.f32 %v3520_v46, %v11395_v54  ;;  %v3307_v46 = vmul.f32 0.6931472, %v6616_v23  ;;  %6621 = vpow2.f32 %v2802_v9  ;;  %v2408_v52 = vand.u32 2147483647, %v11406_v4  ;;  %v11438_v23 = vpop.eup %6619  ;;  %v16489_v42 = vld [vmem:[#allocation542_spill] sm:$0xff] }
 0x4a0   : > { %16394 = vst [vmem:[#allocation749_spill] sm:$0xff] %v11357_v15  ;;  %v11392_v15 = vld [vmem:[%s7381_s14 + $0x238] sm:$0xff]  ;;  %v11428_v8 = vadd.f32 %v11118_v30, %v9833_v48  ;;  %v11441_v9 = vmul.f32 %v3551_v26, %v11419_v3  ;;  %v2978_v35 = vmax.f32 %v11099_v43, 0.0  ;;  %v2551_v48 = vsub.f32 0.0, %v2407_v16 }
 0x4a1   : > { %16395 = vst [vmem:[#allocation750_spill] sm:$0xff] %v11363_v20  ;;  %v3807_v17 = vmul.f32 %v11392_v15, %v11121_v49  ;;  %v3952_v25 = vsub.f32 %v3664_v39, %v3808_v33  ;;  %v2409_v24 = vand.u32 2147483647, %v11414_v51  ;;  %v2804_v20 = vmul.f32 1.442695, %v2550_v31 }
 0x4a2   : > { %16396 = vst [vmem:[#allocation751_spill] sm:$0xff] %v11366_v32  ;;  %v3809_v39 = vmul.f32 %v11431_v5, %v11251_v14  ;;  %v16413_v33 = vmax.f32 %v11011_v10, 0.0  ;;  %6623 = vlog2.f32 %v11423_v60  ;;  %v2410_v16 = vand.u32 2147483647, %v11428_v8 }
 0x4a3   : > { %16397 = vst [vmem:[#allocation752_spill] sm:$0xff] %v11375_v38  ;;  %v3951_v6 = vsub.f32 %v3663_v53, %v3807_v17  ;;  %v4093_v53 = vadd.f32 %v4092_v18, %v3950_v1  ;;  %v3521_v17 = vadd.f32 %v3307_v46, %v2945_v41  ;;  %v11445_v38 = vpop.f32.mrf.mxu3  ;;  %v2552_v18 = vsub.f32 0.0, %v2408_v52  ;;  %v11458_v41 = vld [vmem:[%s7386_s17 + $0x340] sm:$0xff] }
 0x4a4   : > { %16398 = vst [vmem:[#allocation753_spill] sm:$0xff] %v11378_v19  ;;  %v3552_v26 = vadd.f32 %v3369_v55, %v16413_v33  ;;  %v3371_v46 = vmul.f32 0.6931472, %v11306_v62  ;;  %v11462_v31 = vadd.f32 1.0, %v11438_v23  ;;  %v11468_v55 = vmul.f32 %v11448_v59, %v11099_v43  ;;  %v16448_v19 = vld [vmem:[#allocation513_spill] sm:$0xff] }
 0x4a5   : > { %16400 = vst [vmem:[#allocation754_spill] sm:$0xff] %v11389_v37  ;;  %v4094_v56 = vadd.f32 %v4093_v53, %v3951_v6  ;;  %v3665_v1 = vmul.f32 %v3521_v17, %v11434_v7  ;;  %v11464_v17 = vpop.eup %6621  ;;  %v2806_v33 = vmul.f32 1.442695, %v2551_v48  ;;  %v2553_v52 = vsub.f32 0.0, %v2409_v24 }
 0x4a6   : > { %16401 = vst [vmem:[#allocation755_spill] sm:$0xff] %v11392_v15  ;;  %v3373_v10 = vmul.f32 0.6931472, %v6618_v28  ;;  %6625 = vpow2.f32 %v2804_v20  ;;  %v11484_v24 = vadd.f32 %v11118_v30, %v9972_v44  ;;  %v11490_v20 = vadd.f32 1.0, %v11464_v17  ;;  %v16422_v28 = vld [vmem:[#allocation487_spill] sm:$0xff] }
 0x4a7   : > { %16402 = vst [vmem:[#allocation756_spill] sm:$0xff] %v11395_v54  ;;  %v4095_v6 = vadd.f32 %v4094_v56, %v3952_v25  ;;  %v3953_v53 = vsub.f32 %v3665_v1, %v3809_v39  ;;  %v11477_v25 = vmul.f32 %v3552_v26, %v11458_v41  ;;  %v11480_v1 = vld [vmem:[%s7381_s14 + $0x358] sm:$0xff]  ;;  %v2808_v39 = vmul.f32 1.442695, %v2552_v18 }
 0x4a8   : > { %16403 = vst [vmem:[#allocation757_spill] sm:$0xff] %v11401_v34  ;;  %6627 = vlog2.f32 %v11462_v31  ;;  %v16423_v26 = vld [vmem:[#allocation474_spill] sm:$0xff]  ;;  %v6624_v18 = vpop.eup %6623  ;;  %v2810_v44 = vmul.f32 1.442695, %v2553_v52  ;;  %v11506_v43 = vmul.f32 %v11480_v1, %v11157_v2  ;;  %v2981_v15 = vmax.f32 %v11317_v29, 0.0 }
 0x4a9   : > { %16404 = vst [vmem:[#allocation758_spill] sm:$0xff] %v11406_v4  ;;  %v4096_v56 = vadd.f32 %v4095_v6, %v3953_v53  ;;  %v16424_v6 = vsub.f32 %v16422_v28, %v16423_v26  ;;  %6629 = vpow2.f32 %v2806_v33  ;;  %v16428_v28 = vld [vmem:[#allocation489_spill] sm:$0xff] }
 0x4aa   : > { %16405 = vst [vmem:[#allocation759_spill] sm:$0xff] %v11414_v51  ;;  %v11514_v52 = vld [vmem:[%s7386_s17 + $0x350] sm:$0xff]  ;;  %6631 = vpow2.f32 %v2808_v39 }
 0x4ab   : > { %16406 = vst [vmem:[#allocation760_spill] sm:$0xff] %v11419_v3  ;;  %v11472_v3 = vadd.f32 %v11118_v30, %v9909_v0  ;;  %v16420_v0 = vmax.f32 %v11046_v21, 0.0  ;;  %v4097_v53 = vadd.f32 %v4096_v56, %v16424_v6  ;;  %v2979_v21 = vmax.f32 %v11157_v2, 0.0  ;;  %v16429_v56 = vld [vmem:[#allocation475_spill] sm:$0xff] }
 0x4ac   : > { %16407 = vst [vmem:[#allocation761_spill] sm:$0xff] %v11423_v60  ;;  %v16430_v26 = vsub.f32 %v16428_v28, %v16429_v56  ;;  %v11517_v60 = vld [vmem:[%s7381_s14 + $0x360] sm:$0xff]  ;;  %6633 = vlog2.f32 %v11490_v20  ;;  %v16434_v28 = vld [vmem:[#allocation498_spill] sm:$0xff] }
 0x4ad   : > { %16408 = vst [vmem:[#allocation762_spill] sm:$0xff] %v11428_v8  ;;  %v3553_v48 = vadd.f32 %v3371_v46, %v16420_v0  ;;  %v2411_v62 = vand.u32 2147483647, %v11472_v3  ;;  %v3554_v0 = vadd.f32 %v3373_v10, %v2978_v35  ;;  %v2412_v10 = vand.u32 2147483647, %v11484_v24  ;;  %v11520_v35 = vpop.f32.mrf.mxu3  ;;  %v16435_v56 = vld [vmem:[#allocation482_spill] sm:$0xff] }
 0x4ae   : > { %16409 = vst [vmem:[#allocation763_spill] sm:$0xff] %v11431_v5  ;;  %v4098_v6 = vadd.f32 %v4097_v53, %v16430_v26  ;;  %v3375_v53 = vmul.f32 0.6931472, %v6624_v18  ;;  %v16436_v26 = vsub.f32 %v16434_v28, %v16435_v56  ;;  %6635 = vpow2.f32 %v2810_v44  ;;  %v16442_v44 = vld [vmem:[#allocation483_spill] sm:$0xff]  ;;  %v11604_v5 = vld [vmem:[%s7381_s14 + $0x370] sm:$0xff] }
 0x4af   : > { %16410 = vst [vmem:[#allocation764_spill] sm:$0xff] %v11434_v7  ;;  %v2555_v39 = vsub.f32 0.0, %v2411_v62  ;;  %v2980_v18 = vmax.f32 %v11255_v45, 0.0  ;;  %v16441_v62 = vld [vmem:[#allocation501_spill] sm:$0xff] }
 0x4b0   : > { %16411 = vst [vmem:[#allocation765_spill] sm:$0xff] %v11438_v23  ;;  %v4099_v33 = vadd.f32 %v4098_v6, %v16436_v26  ;;  %v16437_v23 = vld [vmem:[#allocation465_spill] sm:$0xff]  ;;  %v16443_v28 = vsub.f32 %v16441_v62, %v16442_v44  ;;  %v16449_v62 = vld [vmem:[#allocation499_spill] sm:$0xff] }
 0x4b1   : > { %16412 = vst [vmem:[#allocation766_spill] sm:$0xff] %v11448_v59  ;;  %v2554_v59 = vsub.f32 0.0, %v2410_v16  ;;  %v11496_v16 = vld [vmem:[%s7386_s17 + $0x348] sm:$0xff] }
 0x4b2   : > { %16414 = vst [vmem:[#allocation767_spill] sm:$0xff] %v11458_v41  ;;  %v16426_v41 = vld [vmem:[#allocation454_spill] sm:$0xff]  ;;  %v11525_v2 = vmul.f32 %v3553_v48, %v11496_v16  ;;  %v11537_v48 = vmul.f32 %v3554_v0, %v11514_v52  ;;  %v11545_v6 = vld [vmem:[%s7381_s14 + $0x368] sm:$0xff]  ;;  %v4100_v56 = vadd.f32 %v4099_v33, %v16443_v28  ;;  %v2556_v0 = vsub.f32 0.0, %v2412_v10 }
 0x4b3   : > { %16415 = vst [vmem:[#allocation768_spill] sm:$0xff] %v11462_v31  ;;  %v11501_v46 = vadd.f32 %v11118_v30, %v16426_v41  ;;  %v2812_v41 = vmul.f32 1.442695, %v2554_v59  ;;  %v11534_v31 = vadd.f32 %v11118_v30, %v16437_v23  ;;  %v16450_v33 = vsub.f32 %v16448_v19, %v16449_v62  ;;  %v16456_v62 = vld [vmem:[#allocation510_spill] sm:$0xff] }
 0x4b4   : > { %16416 = vst [vmem:[#allocation769_spill] sm:$0xff] %v11464_v17 }
 0x4b5   : > { %16417 = vst [vmem:[#allocation770_spill] sm:$0xff] %v11472_v3  ;;  %v2413_v59 = vand.u32 2147483647, %v11501_v46  ;;  %6637 = vpow2.f32 %v2812_v41  ;;  %v4101_v44 = vadd.f32 %v4100_v56, %v16450_v33  ;;  %v11572_v41 = vmul.f32 %v11545_v6, %v11317_v29  ;;  %v16455_v56 = vld [vmem:[#allocation519_spill] sm:$0xff]  ;;  %v11606_v7 = vpop.f32.mrf.mxu3 }
 0x4b6   : > { %16418 = vst [vmem:[#allocation771_spill] sm:$0xff] %v11480_v1  ;;  %v11522_v1 = vpop.eup %6625  ;;  %v2414_v11 = vand.u32 2147483647, %v11534_v31  ;;  %v16457_v33 = vsub.f32 %v16455_v56, %v16456_v62  ;;  %v16463_v62 = vld [vmem:[#allocation512_spill] sm:$0xff] }
 0x4b7   : > { %16419 = vst [vmem:[#allocation772_spill] sm:$0xff] %v11484_v24  ;;  %v6628_v17 = vpop.eup %6627  ;;  %v11553_v23 = vadd.f32 1.0, %v11522_v1  ;;  %v2557_v10 = vsub.f32 0.0, %v2413_v59 }
 0x4b8   : > { %16421 = vst [vmem:[#allocation773_spill] sm:$0xff] %v11490_v20  ;;  %v11550_v26 = vpop.eup %6629  ;;  %v4102_v34 = vadd.f32 %v4101_v44, %v16457_v33  ;;  %v16462_v44 = vld [vmem:[#allocation529_spill] sm:$0xff]  ;;  %v2558_v49 = vsub.f32 0.0, %v2414_v11 }
 0x4b9   : > { %16425 = vst [vmem:[#allocation487_spill] sm:$0xff] %v11496_v16  ;;  %v11542_v16 = vmul.f32 %v11517_v60, %v11255_v45  ;;  %v3555_v45 = vadd.f32 %v3375_v53, %v2979_v21  ;;  %v11565_v28 = vpop.eup %6631  ;;  %v3377_v53 = vmul.f32 0.6931472, %v6628_v17  ;;  %v11578_v19 = vadd.f32 1.0, %v11550_v26 }
 0x4ba   : > { %16427 = vst [vmem:[#allocation474_spill] sm:$0xff] %v11501_v46  ;;  %6639 = vlog2.f32 %v11553_v23  ;;  %v2982_v21 = vmax.f32 %v11346_v57, 0.0  ;;  %v11596_v56 = vadd.f32 1.0, %v11565_v28  ;;  %v16464_v33 = vsub.f32 %v16462_v44, %v16463_v62  ;;  %v16470_v44 = vld [vmem:[#allocation524_spill] sm:$0xff] }
 0x4bb   : > { %16431 = vst [vmem:[#allocation454_spill] sm:$0xff] %v11514_v52  ;;  %v16446_v52 = vld [vmem:[#allocation484_spill] sm:$0xff] }
 0x4bc   : > { %16432 = vst [vmem:[#allocation489_spill] sm:$0xff] %v11517_v60  ;;  %v11557_v20 = vadd.f32 %v11118_v30, %v16446_v52  ;;  %v2814_v52 = vmul.f32 1.442695, %v2555_v39  ;;  %v6634_v60 = vpop.eup %6633  ;;  %v2816_v39 = vmul.f32 1.442695, %v2556_v0 }
 0x4bd   : > { %16433 = vst [vmem:[#allocation475_spill] sm:$0xff] %v11522_v1  ;;  %v11568_v1 = vld [vmem:[%s7386_s17 + $0x358] sm:$0xff]  ;;  %v11583_v54 = vpop.eup %6635  ;;  %v11689_v14 = vpop.f32.mrf.mxu3 }
 0x4be   : > { %16438 = vst [vmem:[#allocation498_spill] sm:$0xff] %v11534_v31  ;;  %v2415_v59 = vand.u32 2147483647, %v11557_v20  ;;  %v11592_v17 = vmul.f32 %v3555_v45, %v11568_v1  ;;  %v11601_v0 = vpop.eup %6637  ;;  %6641 = vpow2.f32 %v2814_v52  ;;  %v3556_v45 = vadd.f32 %v3377_v53, %v2980_v18  ;;  %v16473_v52 = vld [vmem:[#allocation538_spill] sm:$0xff]  ;;  %v16477_v53 = vld [vmem:[#allocation527_spill] sm:$0xff] }
 0x4bf   : > { %16439 = vst [vmem:[#allocation482_spill] sm:$0xff] %v11542_v16  ;;  %6643 = vlog2.f32 %v11578_v19  ;;  %v11625_v18 = vmul.f32 %v11604_v5, %v11346_v57  ;;  %v16488_v57 = vld [vmem:[#allocation583_spill] sm:$0xff]  ;;  %v16503_v16 = vld [vmem:[#allocation605_spill] sm:$0xff] }
 0x4c0   : > { %16440 = vst [vmem:[#allocation465_spill] sm:$0xff] %v11545_v6  ;;  %v16459_v6 = vld [vmem:[#allocation518_spill] sm:$0xff]  ;;  %6645 = vpow2.f32 %v2816_v39 }
 0x4c1   : > { %16444 = vst [vmem:[#allocation501_spill] sm:$0xff] %v11550_v26  ;;  %v11589_v29 = vadd.f32 %v11118_v30, %v16459_v6  ;;  %v3379_v26 = vmul.f32 0.6931472, %v6634_v60  ;;  %v2818_v6 = vmul.f32 1.442695, %v2557_v10  ;;  %v2559_v60 = vsub.f32 0.0, %v2415_v59  ;;  %v6640_v59 = vpop.eup %6639 }
 0x4c2   : > { %16445 = vst [vmem:[#allocation483_spill] sm:$0xff] %v11553_v23  ;;  %v4103_v23 = vadd.f32 %v4102_v34, %v16464_v33  ;;  %v11616_v33 = vld [vmem:[%s7386_s17 + $0x360] sm:$0xff]  ;;  %v11621_v10 = vadd.f32 %v11118_v30, %v16473_v52  ;;  %6647 = vlog2.f32 %v11596_v56  ;;  %v2820_v52 = vmul.f32 1.442695, %v2558_v49 }
 0x4c3   : > { %16447 = vst [vmem:[#allocation484_spill] sm:$0xff] %v11557_v20  ;;  %v2416_v11 = vand.u32 2147483647, %v11589_v29  ;;  %6649 = vpow2.f32 %v2818_v6 }
 0x4c4   : > { %16451 = vst [vmem:[#allocation513_spill] sm:$0xff] %v11565_v28  ;;  %v11610_v28 = vadd.f32 1.0, %v11583_v54  ;;  %v11653_v49 = vpop.eup %6641 }
 0x4c5   : > { %16452 = vst [vmem:[#allocation499_spill] sm:$0xff] %v11568_v1  ;;  %v16469_v1 = vld [vmem:[#allocation539_spill] sm:$0xff] }
 0x4c6   : > { %16453 = vst [vmem:[#allocation774_spill] sm:$0xff] %v11572_v41  ;;  %v16471_v34 = vsub.f32 %v16469_v1, %v16470_v44  ;;  %v11629_v1 = vadd.f32 1.0, %v11601_v0  ;;  %6651 = vlog2.f32 %v11610_v28 }
 0x4c7   : > { %16454 = vst [vmem:[#allocation775_spill] sm:$0xff] %v11578_v19  ;;  %v16480_v19 = vld [vmem:[#allocation553_spill] sm:$0xff] }
 0x4c8   : > { %16458 = vst [vmem:[#allocation519_spill] sm:$0xff] %v11583_v54  ;;  %v4104_v62 = vadd.f32 %v4103_v23, %v16471_v34  ;;  %v16476_v23 = vld [vmem:[#allocation549_spill] sm:$0xff]  ;;  %v3557_v34 = vadd.f32 %v3379_v26, %v2981_v15  ;;  %v11635_v54 = vld [vmem:[%s7381_s14 + $0x378] sm:$0xff]  ;;  %v11639_v13 = vadd.f32 %v11118_v30, %v16480_v19  ;;  %v2822_v19 = vmul.f32 1.442695, %v2559_v60  ;;  %v11671_v60 = vld [vmem:[%s7381_s14 + $0x380] sm:$0xff] }
 0x4c9   : > { %16460 = vst [vmem:[#allocation510_spill] sm:$0xff] %v11589_v29  ;;  %v16478_v39 = vsub.f32 %v16476_v23, %v16477_v53  ;;  %v16484_v15 = vld [vmem:[#allocation573_spill] sm:$0xff]  ;;  %v16485_v26 = vld [vmem:[#allocation534_spill] sm:$0xff]  ;;  %v2560_v53 = vsub.f32 0.0, %v2416_v11  ;;  %6653 = vlog2.f32 %v11629_v1 }
 0x4ca   : > { %16461 = vst [vmem:[#allocation518_spill] sm:$0xff] %v11596_v56  ;;  %v16486_v23 = vsub.f32 %v16484_v15, %v16485_v26  ;;  %v6644_v56 = vpop.eup %6643  ;;  %v16490_v15 = vsub.f32 %v16488_v57, %v16489_v42  ;;  %6655 = vpow2.f32 %v2820_v52  ;;  %v2418_v11 = vand.u32 2147483647, %v11639_v13 }
 0x4cb   : > { %16465 = vst [vmem:[#allocation529_spill] sm:$0xff] %v11601_v0  ;;  %v4105_v44 = vadd.f32 %v4104_v62, %v16478_v39  ;;  %v11644_v0 = vmul.f32 %v3556_v45, %v11616_v33  ;;  %v2983_v62 = vmax.f32 %v11389_v37, 0.0  ;;  %v2417_v39 = vand.u32 2147483647, %v11621_v10  ;;  %v11665_v26 = vpop.eup %6645 }
 0x4cc   : > { %16466 = vst [vmem:[#allocation512_spill] sm:$0xff] %v11604_v5  ;;  %v11647_v5 = vld [vmem:[%s7386_s17 + $0x368] sm:$0xff]  ;;  %v3381_v45 = vmul.f32 0.6931472, %v6640_v59  ;;  %v2984_v57 = vmax.f32 %v11406_v4, 0.0  ;;  %v11682_v42 = vadd.f32 1.0, %v11653_v49  ;;  %6657 = vpow2.f32 %v2822_v19 }
 0x4cd   : > { %16467 = vst [vmem:[#allocation776_spill] sm:$0xff] %v11606_v7  ;;  %v4106_v6 = vadd.f32 %v4105_v44, %v16486_v23  ;;  %v11668_v23 = vmul.f32 %v3557_v34, %v11647_v5  ;;  %v16494_v59 = vld [vmem:[#allocation564_spill] sm:$0xff]  ;;  %v16497_v34 = vld [vmem:[#allocation595_spill] sm:$0xff]  ;;  %v2561_v32 = vsub.f32 0.0, %v2417_v39  ;;  %v11704_v19 = vld [vmem:[%s7386_s17 + $0x370] sm:$0xff] }
 0x4ce   : > { %16468 = vst [vmem:[#allocation777_spill] sm:$0xff] %v11610_v28  ;;  %v11676_v28 = vadd.f32 %v11118_v30, %v16494_v59  ;;  %v2824_v59 = vmul.f32 1.442695, %v2560_v53  ;;  %v3558_v7 = vadd.f32 %v3381_v45, %v2982_v21  ;;  %v2562_v53 = vsub.f32 0.0, %v2418_v11  ;;  %v16512_v11 = vld [vmem:[#allocation579_spill] sm:$0xff] }
 0x4cf   : > { %16472 = vst [vmem:[#allocation539_spill] sm:$0xff] %v11616_v33  ;;  %v11659_v33 = vmul.f32 %v11635_v54, %v11389_v37  ;;  %v4107_v44 = vadd.f32 %v4106_v6, %v16490_v15  ;;  %v16498_v6 = vld [vmem:[#allocation554_spill] sm:$0xff]  ;;  %v3383_v37 = vmul.f32 0.6931472, %v6644_v56  ;;  %6659 = vlog2.f32 %v11682_v42 }
 0x4d0   : > { %16474 = vst [vmem:[#allocation524_spill] sm:$0xff] %v11621_v10  ;;  %v16499_v15 = vsub.f32 %v16497_v34, %v16498_v6  ;;  %v2419_v39 = vand.u32 2147483647, %v11676_v28  ;;  %6661 = vpow2.f32 %v2824_v59 }
 0x4d1   : > { %16475 = vst [vmem:[#allocation538_spill] sm:$0xff] %v11629_v1  ;;  %v11693_v1 = vmul.f32 %v11671_v60, %v11406_v4  ;;  %v3559_v4 = vadd.f32 %v3383_v37, %v2983_v62  ;;  %v16516_v37 = vsub.f32 %v10826_v40, %v10751_v50  ;;  %v11751_v40 = vld [vmem:[%s7386_s17 + $0x380] sm:$0xff] }
 0x4d2   : > { %16479 = vst [vmem:[#allocation549_spill] sm:$0xff] %v11635_v54  ;;  %v6648_v54 = vpop.eup %6647  ;;  %v4108_v52 = vadd.f32 %v4107_v44, %v16499_v15  ;;  %v2985_v15 = vmax.f32 %v11414_v51, 0.0 }
 0x4d3   : > { %16481 = vst [vmem:[#allocation527_spill] sm:$0xff] %v11639_v13  ;;  %v3385_v21 = vmul.f32 0.6931472, %v6648_v54  ;;  %v2826_v54 = vmul.f32 1.442695, %v2561_v32 }
 0x4d4   : > { %16482 = vst [vmem:[#allocation553_spill] sm:$0xff] %v11644_v0  ;;  %v16504_v0 = vld [vmem:[#allocation575_spill] sm:$0xff] }
 0x4d5   : > { %16483 = vst [vmem:[#allocation778_spill] sm:$0xff] %v11647_v5  ;;  %v11687_v5 = vpop.eup %6649  ;;  %v16505_v34 = vsub.f32 %v16503_v16, %v16504_v0  ;;  %v16508_v0 = vld [vmem:[#allocation610_spill] sm:$0xff]  ;;  %v3560_v59 = vadd.f32 %v3385_v21, %v2984_v57 }
 0x4d6   : > { %16487 = vst [vmem:[#allocation573_spill] sm:$0xff] %v11653_v49  ;;  %v11696_v49 = vadd.f32 1.0, %v11665_v26  ;;  %v6652_v6 = vpop.eup %6651  ;;  %v11710_v16 = vadd.f32 1.0, %v11687_v5 }
 0x4d7   : > { %16491 = vst [vmem:[#allocation534_spill] sm:$0xff] %v11665_v26  ;;  %v4109_v44 = vadd.f32 %v4108_v52, %v16505_v34  ;;  %v6654_v45 = vpop.eup %6653  ;;  %v16509_v52 = vld [vmem:[#allocation590_spill] sm:$0xff]  ;;  %v11719_v26 = vadd.f32 %v11118_v30, %v16512_v11 }
 0x4d8   : > { %16492 = vst [vmem:[#allocation583_spill] sm:$0xff] %v11668_v23  ;;  %v16510_v34 = vsub.f32 %v16508_v0, %v16509_v52  ;;  %6663 = vlog2.f32 %v11696_v49  ;;  %v3387_v0 = vmul.f32 0.6931472, %v6652_v6  ;;  %v2828_v52 = vmul.f32 1.442695, %v2562_v53  ;;  %v16528_v53 = vld [vmem:[#allocation614_spill] sm:$0xff] }
 0x4d9   : > { %16493 = vst [vmem:[#allocation542_spill] sm:$0xff] %v11671_v60  ;;  %v11715_v60 = vpop.eup %6655  ;;  %v3389_v11 = vmul.f32 0.6931472, %v6654_v45  ;;  %6665 = vlog2.f32 %v11710_v16  ;;  %v2420_v6 = vand.u32 2147483647, %v11719_v26 }
 0x4da   : > { %16495 = vst [vmem:[#allocation564_spill] sm:$0xff] %v11676_v28  ;;  %v4110_v56 = vadd.f32 %v4109_v44, %v16510_v34  ;;  %v2986_v44 = vmax.f32 %v11428_v8, 0.0  ;;  %v11735_v62 = vpop.eup %6657  ;;  %v11738_v34 = vld [vmem:[%s7381_s14 + $0x390] sm:$0xff]  ;;  %6667 = vpow2.f32 %v2826_v54 }
 0x4db   : > { %16496 = vst [vmem:[#allocation779_spill] sm:$0xff] %v11682_v42  ;;  %v11725_v42 = vld [vmem:[%s7386_s17 + $0x378] sm:$0xff]  ;;  %6669 = vpow2.f32 %v2828_v52  ;;  %v11791_v52 = vld [vmem:[%s7386_s17 + $0x390] sm:$0xff] }
 0x4dc   : > { %16500 = vst [vmem:[#allocation595_spill] sm:$0xff] %v11687_v5  ;;  %v11728_v5 = vld [vmem:[%s7381_s14 + $0x388] sm:$0xff]  ;;  %v4111_v32 = vadd.f32 %v4110_v56, %v16516_v37  ;;  %v11748_v50 = vmul.f32 %v3559_v4, %v11725_v42  ;;  %v6660_v56 = vpop.eup %6659  ;;  %v3561_v37 = vadd.f32 %v3387_v0, %v2985_v15 }
 0x4dd   : > { %16501 = vst [vmem:[#allocation554_spill] sm:$0xff] %v11689_v14  ;;  %v11722_v14 = vmul.f32 %v3558_v7, %v11704_v19  ;;  %v2563_v7 = vsub.f32 0.0, %v2419_v39  ;;  %v11755_v57 = vmul.f32 %v11728_v5, %v11414_v51  ;;  %v11770_v54 = vpop.eup %6661 }
 0x4de   : > { %16502 = vst [vmem:[#allocation780_spill] sm:$0xff] %v11696_v49  ;;  %v16520_v49 = vld [vmem:[#allocation611_spill] sm:$0xff]  ;;  %v6664_v51 = vpop.eup %6663 }
 0x4df   : > { %16506 = vst [vmem:[#allocation605_spill] sm:$0xff] %v11704_v19  ;;  %v11742_v19 = vadd.f32 1.0, %v11715_v60  ;;  %v16521_v41 = vsub.f32 %v10838_v61, %v16520_v49  ;;  %v11761_v61 = vadd.f32 1.0, %v11735_v62  ;;  %v16527_v49 = vld [vmem:[#allocation625_spill] sm:$0xff]  ;;  %v2830_v21 = vmul.f32 1.442695, %v2563_v7 }
 0x4e0   : > { %16507 = vst [vmem:[#allocation575_spill] sm:$0xff] %v11710_v16  ;;  %v16529_v39 = vsub.f32 %v16527_v49, %v16528_v53  ;;  %v11782_v16 = vld [vmem:[%s7386_s17 + $0x388] sm:$0xff]  ;;  %v3562_v49 = vadd.f32 %v3389_v11, %v2986_v44  ;;  %v16534_v53 = vld [vmem:[#allocation623_spill] sm:$0xff]  ;;  %v6666_v44 = vpop.eup %6665  ;;  %v11799_v11 = vadd.f32 1.0, %v11770_v54 }
 0x4e1   : > { %16511 = vst [vmem:[#allocation610_spill] sm:$0xff] %v11715_v60  ;;  %v4112_v23 = vadd.f32 %v4111_v32, %v16521_v41  ;;  %v16525_v41 = vld [vmem:[#allocation600_spill] sm:$0xff]  ;;  %v11774_v32 = vmul.f32 %v11738_v34, %v11428_v8  ;;  %6671 = vlog2.f32 %v11742_v19  ;;  %v11794_v7 = vld [vmem:[%s7381_s14 + $0x398] sm:$0xff]  ;;  %v11805_v8 = vpop.eup %6667  ;;  %v11808_v60 = vmul.f32 %v3561_v37, %v11782_v16 }
 0x4e2   : > { %16513 = vst [vmem:[#allocation590_spill] sm:$0xff] %v11719_v26  ;;  %v11765_v4 = vadd.f32 %v11118_v30, %v16525_v41  ;;  %v11779_v41 = vmul.f32 %v3560_v59, %v11751_v40  ;;  %v3391_v59 = vmul.f32 0.6931472, %v6660_v56  ;;  %6673 = vlog2.f32 %v11761_v61  ;;  %v16547_v37 = vld [vmem:[#allocation640_spill] sm:$0xff] }
 0x4e3   : > { %16514 = vst [vmem:[#allocation579_spill] sm:$0xff] %v11725_v42  ;;  %v4113_v45 = vadd.f32 %v4112_v23, %v16529_v39  ;;  %v16533_v23 = vld [vmem:[#allocation631_spill] sm:$0xff]  ;;  %v3393_v56 = vmul.f32 0.6931472, %v6664_v51  ;;  %6675 = vpow2.f32 %v2830_v21  ;;  %v11829_v51 = vpop.eup %6669 }
 0x4e4   : > { %16515 = vst [vmem:[#allocation781_spill] sm:$0xff] %v11728_v5  ;;  %v11776_v5 = vpop.f32.mrf.mxu3  ;;  %v16535_v15 = vsub.f32 %v16533_v23, %v16534_v53  ;;  %v16539_v23 = vld [vmem:[#allocation633_spill] sm:$0xff]  ;;  %v16540_v53 = vld [vmem:[#allocation628_spill] sm:$0xff]  ;;  %6677 = vlog2.f32 %v11799_v11 }
 0x4e5   : > { %16517 = vst [vmem:[#allocation782_spill] sm:$0xff] %v11735_v62  ;;  %v11814_v62 = vmul.f32 %v3562_v49, %v11791_v52  ;;  %v3395_v49 = vmul.f32 0.6931472, %v6666_v44 }
 0x4e6   : > { %16518 = vst [vmem:[#allocation783_spill] sm:$0xff] %v11738_v34  ;;  %v4114_v0 = vadd.f32 %v4113_v45, %v16535_v15  ;;  %v2987_v34 = vmax.f32 %v11472_v3, 0.0  ;;  %v2421_v45 = vand.u32 2147483647, %v11765_v4  ;;  %v16541_v15 = vsub.f32 %v16539_v23, %v16540_v53  ;;  %v11824_v53 = vld [vmem:[%s7381_s14 + $0x3a8] sm:$0xff] }
 0x4e7   : > { %16519 = vst [vmem:[#allocation784_spill] sm:$0xff] %v11742_v19  ;;  %v11818_v23 = vmul.f32 %v11794_v7, %v11472_v3  ;;  %v2989_v19 = vmax.f32 %v11501_v46, 0.0  ;;  %v11837_v3 = vadd.f32 1.0, %v11805_v8  ;;  %v11850_v44 = vmul.f32 %v11824_v53, %v11501_v46 }
 0x4e8   : > { %16522 = vst [vmem:[#allocation611_spill] sm:$0xff] %v11751_v40  ;;  %v2564_v40 = vsub.f32 0.0, %v2420_v6  ;;  %v4115_v39 = vadd.f32 %v4114_v0, %v16541_v15  ;;  %v2988_v6 = vmax.f32 %v11484_v24, 0.0  ;;  %v11821_v0 = vld [vmem:[%s7381_s14 + $0x3a0] sm:$0xff]  ;;  %v16548_v15 = vld [vmem:[#allocation638_spill] sm:$0xff]  ;;  %v3563_v21 = vadd.f32 %v3391_v59, %v2987_v34 }
 0x4e9   : > { %16523 = vst [vmem:[#allocation785_spill] sm:$0xff] %v11755_v57  ;;  %v2565_v42 = vsub.f32 0.0, %v2421_v45  ;;  %v3565_v45 = vadd.f32 %v3395_v49, %v2989_v19 }
 0x4ea   : > { %16524 = vst [vmem:[#allocation786_spill] sm:$0xff] %v11761_v61  ;;  %v3564_v59 = vadd.f32 %v3393_v56, %v2988_v6  ;;  %v11862_v6 = vadd.f32 1.0, %v11829_v51  ;;  %v16561_v56 = vld [vmem:[#allocation658_spill] sm:$0xff] }
 0x4eb   : > { %16526 = vst [vmem:[#allocation600_spill] sm:$0xff] %v11765_v4 }
 0x4ec   : > { %16530 = vst [vmem:[#allocation625_spill] sm:$0xff] %v11770_v54  ;;  %v6672_v54 = vpop.eup %6671  ;;  %v11872_v46 = vpop.f32.mrf.mxu3 }
 0x4ed   : > { %16531 = vst [vmem:[#allocation614_spill] sm:$0xff] %v11774_v32  ;;  %v11875_v32 = vld [vmem:[%s7386_s17 + $0x3a8] sm:$0xff] }
 0x4ee   : > { %16532 = vst [vmem:[#allocation787_spill] sm:$0xff] %v11782_v16  ;;  %v16549_v16 = vsub.f32 %v16547_v37, %v16548_v15  ;;  %v16553_v37 = vld [vmem:[#allocation644_spill] sm:$0xff] }
 0x4ef   : > { %16536 = vst [vmem:[#allocation631_spill] sm:$0xff] %v11791_v52  ;;  %v2832_v52 = vmul.f32 1.442695, %v2564_v40  ;;  %v11846_v40 = vmul.f32 %v11821_v0, %v11484_v24  ;;  %v3397_v24 = vmul.f32 0.6931472, %v6672_v54 }
 0x4f0   : > { %16537 = vst [vmem:[#allocation623_spill] sm:$0xff] %v11794_v7  ;;  %v4116_v61 = vadd.f32 %v4115_v39, %v16549_v16  ;;  %v11833_v7 = vld [vmem:[%s7386_s17 + $0x398] sm:$0xff]  ;;  %v16554_v16 = vld [vmem:[#allocation645_spill] sm:$0xff] }
 0x4f1   : > { %16538 = vst [vmem:[#allocation788_spill] sm:$0xff] %v11799_v11  ;;  %v16555_v39 = vsub.f32 %v16553_v37, %v16554_v16  ;;  %v6674_v11 = vpop.eup %6673  ;;  %v2990_v37 = vmax.f32 %v11534_v31, 0.0  ;;  %v16562_v16 = vld [vmem:[#allocation646_spill] sm:$0xff]  ;;  %6679 = vpow2.f32 %v2832_v52 }
 0x4f2   : > { %16542 = vst [vmem:[#allocation633_spill] sm:$0xff] %v11805_v8  ;;  %v11855_v8 = vld [vmem:[%s7386_s17 + $0x3a0] sm:$0xff]  ;;  %6681 = vlog2.f32 %v11837_v3  ;;  %v11893_v52 = vld [vmem:[%s7381_s14 + $0x3b8] sm:$0xff] }
 0x4f3   : > { %16543 = vst [vmem:[#allocation628_spill] sm:$0xff] %v11814_v62  ;;  %v4117_v15 = vadd.f32 %v4116_v61, %v16555_v39  ;;  %v11858_v61 = vld [vmem:[%s7381_s14 + $0x3b0] sm:$0xff]  ;;  %v16563_v39 = vsub.f32 %v16561_v56, %v16562_v16  ;;  %v16567_v62 = vld [vmem:[#allocation615_spill] sm:$0xff]  ;;  %v11886_v19 = vmul.f32 %v3564_v59, %v11855_v8  ;;  %6683 = vlog2.f32 %v11862_v6 }
 0x4f4   : > { %16544 = vst [vmem:[#allocation789_spill] sm:$0xff] %v11818_v23  ;;  %v11880_v57 = vadd.f32 %v11118_v30, %v16567_v62  ;;  %v16569_v56 = vld [vmem:[#allocation650_spill] sm:$0xff]  ;;  %v11890_v54 = vmul.f32 %v11858_v61, %v11534_v31  ;;  %v11912_v31 = vld [vmem:[#allocation5] ss:$0 sm:$0xff] }
 0x4f5   : > { %16545 = vst [vmem:[#allocation790_spill] sm:$0xff] %v11821_v0  ;;  %v4118_v34 = vadd.f32 %v4117_v15, %v16563_v39  ;;  %v11867_v0 = vpop.eup %6675  ;;  %v16568_v15 = vld [vmem:[#allocation668_spill] sm:$0xff]  ;;  %v16588_v23 = vld [vmem:[#allocation679_spill] sm:$0xff] }
 0x4f6   : > { %16546 = vst [vmem:[#allocation791_spill] sm:$0xff] %v11824_v53  ;;  %v11870_v53 = vmul.f32 %v3563_v21, %v11833_v7  ;;  %v16570_v16 = vsub.f32 %v16568_v15, %v16569_v56  ;;  %v3399_v21 = vmul.f32 0.6931472, %v6674_v11  ;;  %v6678_v62 = vpop.eup %6677  ;;  %v11898_v49 = vadd.f32 1.0, %v11867_v0  ;;  %v16575_v15 = vld [vmem:[#allocation674_spill] sm:$0xff]  ;;  %v16576_v56 = vld [vmem:[#allocation653_spill] sm:$0xff] }
 0x4f7   : > { %16550 = vst [vmem:[#allocation640_spill] sm:$0xff] %v11829_v51  ;;  %v2834_v51 = vmul.f32 1.442695, %v2565_v42  ;;  %v2991_v42 = vmax.f32 %v11557_v20, 0.0  ;;  %v3566_v11 = vadd.f32 %v3397_v24, %v2990_v37  ;;  %v16584_v24 = vld [vmem:[#allocation662_spill] sm:$0xff] }
 0x4f8   : > { %16551 = vst [vmem:[#allocation638_spill] sm:$0xff] %v11833_v7  ;;  %v4119_v39 = vadd.f32 %v4118_v34, %v16570_v16  ;;  %v16574_v34 = vld [vmem:[#allocation639_spill] sm:$0xff]  ;;  %v16577_v16 = vsub.f32 %v16575_v15, %v16576_v56 }
 0x4f9   : > { %16552 = vst [vmem:[#allocation792_spill] sm:$0xff] %v11837_v3  ;;  %v11902_v59 = vadd.f32 %v11118_v30, %v16574_v34  ;;  %v16579_v3 = vld [vmem:[#allocation666_spill] sm:$0xff]  ;;  %v11923_v34 = vmul.f32 %v11893_v52, %v11557_v20  ;;  %6685 = vpow2.f32 %v2834_v51  ;;  %v16583_v15 = vld [vmem:[#allocation683_spill] sm:$0xff] }
 0x4fa   : > { %16556 = vst [vmem:[#allocation644_spill] sm:$0xff] %v11846_v40  ;;  %v4120_v7 = vadd.f32 %v4119_v39, %v16577_v16  ;;  %v11919_v30 = vld [vmem:[%s7386_s17 + $0x3b0] sm:$0xff]  ;;  %v11926_v39 = vld [vmem:[%s7381_s14 + $0x3c0] sm:$0xff]  ;;  %v16585_v37 = vsub.f32 %v16583_v15, %v16584_v24  ;;  %v11932_v16 = vpop.eup %6679  ;;  %6687 = vlog2.f32 %v11898_v49  ;;  %v11944_v15 = vadd.f32 %v11912_v31, %v16588_v23 }
 0x4fb   : > { %16557 = vst [vmem:[#allocation645_spill] sm:$0xff] %v11850_v44  ;;  %v6682_v20 = vpop.eup %6681  ;;  %v2423_v51 = vand.u32 2147483647, %v11902_v59  ;;  %v16591_v24 = vld [vmem:[#allocation672_spill] sm:$0xff]  ;;  %v2993_v40 = vmax.f32 %v11621_v10, 0.0 }
 0x4fc   : > { %16558 = vst [vmem:[#allocation793_spill] sm:$0xff] %v11855_v8  ;;  %v4121_v56 = vadd.f32 %v4120_v7, %v16585_v37  ;;  %v3567_v8 = vadd.f32 %v3399_v21, %v2991_v42  ;;  %v16590_v7 = vld [vmem:[#allocation696_spill] sm:$0xff]  ;;  %v11952_v21 = vmul.f32 %v3566_v11, %v11919_v30  ;;  %v16597_v11 = vld [vmem:[#allocation701_spill] sm:$0xff] }
 0x4fd   : > { %16559 = vst [vmem:[#allocation794_spill] sm:$0xff] %v11858_v61  ;;  %v11910_v61 = vmul.f32 %v3565_v45, %v11875_v32  ;;  %v2422_v45 = vand.u32 2147483647, %v11880_v57  ;;  %v16592_v37 = vsub.f32 %v16590_v7, %v16591_v24  ;;  %v11963_v7 = vadd.f32 1.0, %v11932_v16  ;;  %v16595_v24 = vld [vmem:[#allocation702_spill] sm:$0xff]  ;;  %v16598_v42 = vld [vmem:[#allocation681_spill] sm:$0xff] }
 0x4fe   : > { %16560 = vst [vmem:[#allocation795_spill] sm:$0xff] %v11862_v6  ;;  %v11916_v6 = vadd.f32 %v11912_v31, %v16579_v3  ;;  %v11959_v3 = vmul.f32 %v11926_v39, %v11589_v29 }
 0x4ff   : > { %16564 = vst [vmem:[#allocation658_spill] sm:$0xff] %v11867_v0  ;;  %v11938_v0 = vld [vmem:[%s7381_s14 + $0x3c8] sm:$0xff]  ;;  %6689 = vlog2.f32 %v11963_v7 }
 0x500   : > { %16565 = vst [vmem:[#allocation646_spill] sm:$0xff] %v11870_v53  ;;  %v4122_v53 = vadd.f32 %v4121_v56, %v16592_v37  ;;  %v2424_v23 = vand.u32 2147483647, %v11916_v6  ;;  %v2566_v56 = vsub.f32 0.0, %v2422_v45  ;;  %v11967_v37 = vadd.f32 %v11912_v31, %v16595_v24  ;;  %v11985_v24 = vld [vmem:[%s7386_s17 + $0x3c0] sm:$0xff] }
 0x501   : > { %16566 = vst [vmem:[#allocation796_spill] sm:$0xff] %v11875_v32  ;;  %v2992_v32 = vmax.f32 %v11589_v29, 0.0  ;;  %v11975_v29 = vmul.f32 %v11938_v0, %v11621_v10 }
 0x502   : > { %16571 = vst [vmem:[#allocation615_spill] sm:$0xff] %v11886_v19  ;;  %v11977_v19 = vpop.f32.mrf.mxu3 }
 0x503   : > { %16572 = vst [vmem:[#allocation668_spill] sm:$0xff] %v11893_v52  ;;  %v3401_v52 = vmul.f32 0.6931472, %v6678_v62  ;;  %v11955_v62 = vld [vmem:[%s7386_s17 + $0x3b8] sm:$0xff] }
 0x504   : > { %16573 = vst [vmem:[#allocation650_spill] sm:$0xff] %v11898_v49  ;;  %v6684_v49 = vpop.eup %6683  ;;  %v11982_v45 = vmul.f32 %v3567_v8, %v11955_v62 }
 0x505   : > { %16578 = vst [vmem:[#allocation639_spill] sm:$0xff] %v11910_v61  ;;  %v3568_v61 = vadd.f32 %v3401_v52, %v2992_v32  ;;  %v2425_v32 = vand.u32 2147483647, %v11944_v15  ;;  %v16604_v52 = vld [vmem:[#allocation707_spill] sm:$0xff]  ;;  %v3405_v8 = vmul.f32 0.6931472, %v6684_v49 }
 0x506   : > { %16580 = vst [vmem:[#allocation674_spill] sm:$0xff] %v11916_v6  ;;  %v11988_v6 = vld [vmem:[%s7381_s14 + $0x3d0] sm:$0xff] }
 0x507   : > { %16581 = vst [vmem:[#allocation653_spill] sm:$0xff] %v11919_v30  ;;  %v16599_v30 = vsub.f32 %v16597_v11, %v16598_v42  ;;  %v12018_v11 = vld [vmem:[%s7381_s14 + $0x3d8] sm:$0xff] }
 0x508   : > { %16582 = vst [vmem:[#allocation666_spill] sm:$0xff] %v11926_v39  ;;  %v3403_v39 = vmul.f32 0.6931472, %v6682_v20  ;;  %v16605_v20 = vld [vmem:[#allocation690_spill] sm:$0xff] }
 0x509   : > { %16586 = vst [vmem:[#allocation683_spill] sm:$0xff] %v11932_v16  ;;  %v4123_v44 = vadd.f32 %v4122_v53, %v16599_v30  ;;  %v11979_v16 = vpop.eup %6685  ;;  %v2567_v53 = vsub.f32 0.0, %v2423_v51  ;;  %v16606_v30 = vsub.f32 %v16604_v52, %v16605_v20  ;;  %v2426_v51 = vand.u32 2147483647, %v11967_v37 }
 0x50a   : > { %16587 = vst [vmem:[#allocation662_spill] sm:$0xff] %v11938_v0  ;;  %v2994_v0 = vmax.f32 %v11639_v13, 0.0  ;;  %v6688_v10 = vpop.eup %6687  ;;  %v3569_v20 = vadd.f32 %v3403_v39, %v2993_v40  ;;  %v12010_v49 = vadd.f32 1.0, %v11979_v16 }
 0x50b   : > { %16589 = vst [vmem:[#allocation679_spill] sm:$0xff] %v11944_v15  ;;  %v4124_v42 = vadd.f32 %v4123_v44, %v16606_v30  ;;  %v16607_v15 = vsub.f32 %v11262_v12, %v11147_v36  ;;  %v12003_v44 = vmul.f32 %v3568_v61, %v11985_v24  ;;  %v12007_v30 = vmul.f32 %v11988_v6, %v11639_v13  ;;  %v16613_v13 = vld [vmem:[#allocation720_spill] sm:$0xff] }
 0x50c   : > { %16593 = vst [vmem:[#allocation696_spill] sm:$0xff] %v11955_v62  ;;  %v2568_v62 = vsub.f32 0.0, %v2424_v23  ;;  %v2838_v36 = vmul.f32 1.442695, %v2567_v53  ;;  %v2569_v12 = vsub.f32 0.0, %v2425_v32  ;;  %v16611_v61 = vsub.f32 %v11441_v9, %v11186_v27 }
 0x50d   : > { %16594 = vst [vmem:[#allocation672_spill] sm:$0xff] %v11963_v7  ;;  %v4125_v52 = vadd.f32 %v4124_v42, %v16607_v15  ;;  %v3570_v39 = vadd.f32 %v3405_v8, %v2994_v0  ;;  %v2995_v15 = vmax.f32 %v11676_v28, 0.0  ;;  %v3407_v42 = vmul.f32 0.6931472, %v6688_v10  ;;  %v12045_v0 = vld [vmem:[%s7381_s14 + $0x3e0] sm:$0xff] }
 0x50e   : > { %16596 = vst [vmem:[#allocation702_spill] sm:$0xff] %v11967_v37  ;;  %v2570_v23 = vsub.f32 0.0, %v2426_v51  ;;  %v12029_v7 = vadd.f32 %v11912_v31, %v16613_v13  ;;  %v16615_v53 = vsub.f32 %v11477_v25, %v11201_v63  ;;  %v12041_v10 = vmul.f32 %v12018_v11, %v11676_v28  ;;  %v6690_v13 = vpop.eup %6689 }
 0x50f   : > { %16600 = vst [vmem:[#allocation701_spill] sm:$0xff] %v11977_v19  ;;  %v2836_v19 = vmul.f32 1.442695, %v2566_v56  ;;  %v12015_v56 = vld [vmem:[%s7386_s17 + $0x3c8] sm:$0xff]  ;;  %v4126_v40 = vadd.f32 %v4125_v52, %v16611_v61  ;;  %v2842_v63 = vmul.f32 1.442695, %v2569_v12  ;;  %v12049_v25 = vadd.f32 %v11912_v31, %v11297_v47 }
 0x510   : > { %16601 = vst [vmem:[#allocation681_spill] sm:$0xff] %v11979_v16  ;;  %v12037_v9 = vmul.f32 %v3569_v20, %v12015_v56  ;;  %v3571_v51 = vadd.f32 %v3407_v42, %v2995_v15  ;;  %v2996_v52 = vmax.f32 %v11719_v26, 0.0  ;;  %v12058_v20 = vpop.f32.mrf.mxu3  ;;  %v12064_v12 = vld [vmem:[%s7381_s14 + $0x3e8] sm:$0xff]  ;;  %v2844_v47 = vmul.f32 1.442695, %v2570_v23 }
 0x511   : > { %16602 = vst [vmem:[#allocation797_spill] sm:$0xff] %v11985_v24  ;;  %v2840_v24 = vmul.f32 1.442695, %v2568_v62  ;;  %6691 = vpow2.f32 %v2836_v19  ;;  %v4127_v32 = vadd.f32 %v4126_v40, %v16615_v53  ;;  %v16618_v19 = vsub.f32 %v11525_v2, %v11235_v22  ;;  %v12084_v53 = vld [vmem:[%s7381_s14 + $0x3f0] sm:$0xff] }
 0x512   : > { %16603 = vst [vmem:[#allocation798_spill] sm:$0xff] %v11988_v6  ;;  %v12025_v6 = vld [vmem:[%s7386_s17 + $0x3d0] sm:$0xff]  ;;  %6693 = vlog2.f32 %v12010_v49  ;;  %v2427_v61 = vand.u32 2147483647, %v12029_v7  ;;  %v12069_v2 = vadd.f32 %v11912_v31, %v11370_v58  ;;  %v16622_v22 = vsub.f32 %v11537_v48, %v11468_v55 }
 0x513   : > { %16608 = vst [vmem:[#allocation707_spill] sm:$0xff] %v12010_v49  ;;  %6695 = vpow2.f32 %v2838_v36  ;;  %v4128_v62 = vadd.f32 %v4127_v32, %v16618_v19  ;;  %v12055_v8 = vmul.f32 %v3570_v39, %v12025_v6  ;;  %v12061_v36 = vld [vmem:[%s7386_s17 + $0x3d8] sm:$0xff]  ;;  %v3409_v39 = vmul.f32 0.6931472, %v6690_v13 }
 0x514   : > { %16609 = vst [vmem:[#allocation690_spill] sm:$0xff] %v12015_v56  ;;  %6697 = vpow2.f32 %v2840_v24  ;;  %v12078_v15 = vmul.f32 %v12045_v0, %v11719_v26  ;;  %v2997_v23 = vmax.f32 %v11765_v4, 0.0  ;;  %v2428_v58 = vand.u32 2147483647, %v12049_v25  ;;  %v16642_v26 = vld [vmem:[#allocation554_spill] sm:$0xff] }
 0x515   : > { %16610 = vst [vmem:[#allocation799_spill] sm:$0xff] %v12018_v11  ;;  %v4129_v40 = vadd.f32 %v4128_v62, %v16622_v22  ;;  %6699 = vpow2.f32 %v2842_v63  ;;  %v12089_v55 = vadd.f32 %v11912_v31, %v11445_v38  ;;  %v16626_v48 = vsub.f32 %v11592_v17, %v11506_v43 }
 0x516   : > { %16612 = vst [vmem:[#allocation800_spill] sm:$0xff] %v12025_v6  ;;  %v12097_v62 = vmul.f32 %v3571_v51, %v12061_v36  ;;  %v12101_v63 = vmul.f32 %v12064_v12, %v11765_v4  ;;  %v12105_v38 = vadd.f32 %v11912_v31, %v11520_v35  ;;  %6701 = vpow2.f32 %v2844_v47  ;;  %v16633_v35 = vld [vmem:[#allocation776_spill] sm:$0xff] }
 0x517   : > { %16614 = vst [vmem:[#allocation720_spill] sm:$0xff] %v12029_v7  ;;  %v12081_v42 = vpop.eup %6691  ;;  %v4130_v32 = vadd.f32 %v4129_v40, %v16626_v48  ;;  %v2571_v43 = vsub.f32 0.0, %v2427_v61  ;;  %v2429_v17 = vand.u32 2147483647, %v12069_v2  ;;  %v16629_v40 = vld [vmem:[#allocation553_spill] sm:$0xff]  ;;  %v16630_v48 = vld [vmem:[#allocation482_spill] sm:$0xff]  ;;  %v3572_v27 = vadd.f32 %v3409_v39, %v2996_v52 }
 0x518   : > { %16616 = vst [vmem:[#allocation801_spill] sm:$0xff] %v12045_v0  ;;  %v6694_v13 = vpop.eup %6693  ;;  %v16631_v19 = vsub.f32 %v16629_v40, %v16630_v48  ;;  %v12118_v6 = vmul.f32 %v12084_v53, %v11880_v57  ;;  %v12122_v11 = vadd.f32 %v11912_v31, %v16633_v35  ;;  %v12125_v47 = vld [vmem:[%s7386_s17 + $0x3e0] sm:$0xff]  ;;  %v12128_v61 = vadd.f32 1.0, %v12081_v42  ;;  %v16638_v52 = vld [vmem:[#allocation774_spill] sm:$0xff] }
 0x519   : > { %16617 = vst [vmem:[#allocation802_spill] sm:$0xff] %v12049_v25  ;;  %v12107_v22 = vpop.eup %6695  ;;  %v2572_v40 = vsub.f32 0.0, %v2428_v58  ;;  %v2431_v0 = vand.u32 2147483647, %v12105_v38  ;;  %v2846_v28 = vmul.f32 1.442695, %v2571_v43  ;;  %v12145_v16 = vadd.f32 %v11912_v31, %v16642_v26  ;;  %v2002_v43 = vpop.f32.mrf.mxu3 }
 0x51a   : > { %16619 = vst [vmem:[#allocation803_spill] sm:$0xff] %v12061_v36  ;;  %v4131_v24 = vadd.f32 %v4130_v32, %v16631_v19  ;;  %v12113_v51 = vpop.eup %6697  ;;  %v2430_v32 = vand.u32 2147483647, %v12089_v55  ;;  %v16637_v19 = vld [vmem:[#allocation583_spill] sm:$0xff]  ;;  %v12138_v35 = vadd.f32 1.0, %v12107_v22  ;;  %v2573_v58 = vsub.f32 0.0, %v2429_v17 }
 0x51b   : > { %16620 = vst [vmem:[#allocation804_spill] sm:$0xff] %v12064_v12  ;;  %v16639_v39 = vsub.f32 %v16637_v19, %v16638_v52  ;;  %v12141_v12 = vpop.eup %6699  ;;  %v12151_v52 = vmul.f32 %v3572_v27, %v12125_v47  ;;  %v12154_v56 = vadd.f32 1.0, %v12113_v51  ;;  %v2432_v36 = vand.u32 2147483647, %v12122_v11 }
 0x51c   : > { %16621 = vst [vmem:[#allocation805_spill] sm:$0xff] %v12069_v2  ;;  %v12157_v17 = vpop.eup %6701  ;;  %6703 = vlog2.f32 %v12128_v61  ;;  %v2848_v26 = vmul.f32 1.442695, %v2572_v40  ;;  %v2574_v49 = vsub.f32 0.0, %v2430_v32  ;;  %v12165_v27 = vadd.f32 1.0, %v12141_v12 }
 0x51d   : > { %16623 = vst [vmem:[#allocation806_spill] sm:$0xff] %v12081_v42  ;;  %v4132_v48 = vadd.f32 %v4131_v24, %v16639_v39  ;;  %v16644_v24 = vsub.f32 %v11722_v14, %v11625_v18  ;;  %v3411_v39 = vmul.f32 0.6931472, %v6694_v13  ;;  %v16647_v14 = vsub.f32 %v11748_v50, %v11659_v33 }
 0x51e   : > { %16624 = vst [vmem:[#allocation807_spill] sm:$0xff] %v12084_v53  ;;  %6705 = vlog2.f32 %v12138_v35  ;;  %v2575_v13 = vsub.f32 0.0, %v2431_v0  ;;  %v2850_v40 = vmul.f32 1.442695, %v2573_v58  ;;  %v2433_v32 = vand.u32 2147483647, %v12145_v16 }
 0x51f   : > { %16625 = vst [vmem:[#allocation808_spill] sm:$0xff] %v12089_v55  ;;  %v4133_v19 = vadd.f32 %v4132_v48, %v16644_v24  ;;  %v12169_v48 = vadd.f32 %v11912_v31, %v11776_v5  ;;  %v12172_v24 = vld [vmem:[%s7381_s14 + $0x3f8] sm:$0xff]  ;;  %6707 = vpow2.f32 %v2846_v28  ;;  %v16651_v33 = vsub.f32 %v11779_v41, %v11693_v1  ;;  %v16655_v58 = vld [vmem:[#allocation785_spill] sm:$0xff] }
 0x520   : > { %16627 = vst [vmem:[#allocation809_spill] sm:$0xff] %v12105_v38  ;;  %6709 = vlog2.f32 %v12154_v56  ;;  %v2576_v0 = vsub.f32 0.0, %v2432_v36  ;;  %v2852_v5 = vmul.f32 1.442695, %v2574_v49  ;;  %v12187_v28 = vadd.f32 %v11912_v31, %v11872_v46  ;;  %v16669_v53 = vld [vmem:[#allocation615_spill] sm:$0xff] }
 0x521   : > { %16628 = vst [vmem:[#allocation810_spill] sm:$0xff] %v12107_v22  ;;  %v4134_v18 = vadd.f32 %v4133_v19, %v16647_v14  ;;  %v3573_v19 = vadd.f32 %v3411_v39, %v2997_v23  ;;  %v12180_v14 = vadd.f32 1.0, %v12157_v17  ;;  %6711 = vpow2.f32 %v2848_v26  ;;  %v16657_v26 = vld [vmem:[#allocation701_spill] sm:$0xff] }
 0x522   : > { %16632 = vst [vmem:[#allocation553_spill] sm:$0xff] %v12113_v51  ;;  %v12183_v51 = vld [vmem:[%s7386_s17 + $0x3e8] sm:$0xff]  ;;  %v12194_v41 = vmul.f32 %v12172_v24, %v11902_v59  ;;  %6713 = vlog2.f32 %v12165_v27  ;;  %v2854_v36 = vmul.f32 1.442695, %v2575_v13  ;;  %v2434_v23 = vand.u32 2147483647, %v12169_v48  ;;  %v6704_v39 = vpop.eup %6703 }
 0x523   : > { %16634 = vst [vmem:[#allocation482_spill] sm:$0xff] %v12122_v11  ;;  %v4135_v50 = vadd.f32 %v4134_v18, %v16651_v33  ;;  %6715 = vpow2.f32 %v2850_v40  ;;  %v2577_v49 = vsub.f32 0.0, %v2433_v32  ;;  %v12200_v46 = vadd.f32 %v11912_v31, %v16657_v26  ;;  %v16659_v18 = vld [vmem:[#allocation628_spill] sm:$0xff] }
 0x524   : > { %16635 = vst [vmem:[#allocation776_spill] sm:$0xff] %v12125_v47  ;;  %6717 = vlog2.f32 %v12180_v14  ;;  %v2856_v13 = vmul.f32 1.442695, %v2576_v0  ;;  %v12214_v32 = vld [vmem:[%s7381_s14 + $0x400] sm:$0xff]  ;;  %v2435_v26 = vand.u32 2147483647, %v12187_v28  ;;  %v2005_v47 = vpop.f32.mrf.mxu3 }
 0x525   : > { %16636 = vst [vmem:[#allocation811_spill] sm:$0xff] %v12128_v61  ;;  %6719 = vpow2.f32 %v2852_v5  ;;  %v2858_v5 = vmul.f32 1.442695, %v2577_v49  ;;  %v2436_v4 = vand.u32 2147483647, %v12200_v46  ;;  %v16678_v42 = vmax.f32 %v11880_v57, 0.0 }
 0x526   : > { %16640 = vst [vmem:[#allocation583_spill] sm:$0xff] %v12138_v35  ;;  %6721 = vpow2.f32 %v2854_v36 }
 0x527   : > { %16641 = vst [vmem:[#allocation774_spill] sm:$0xff] %v12141_v12  ;;  %v16656_v12 = vsub.f32 %v11808_v60, %v16655_v58  ;;  %v16660_v60 = vld [vmem:[#allocation614_spill] sm:$0xff]  ;;  %6723 = vpow2.f32 %v2856_v13 }
 0x528   : > { %16643 = vst [vmem:[#allocation554_spill] sm:$0xff] %v12145_v16  ;;  %6725 = vpow2.f32 %v2858_v5 }
 0x529   : > { %16645 = vst [vmem:[#allocation812_spill] sm:$0xff] %v12154_v56  ;;  %v4136_v1 = vadd.f32 %v4135_v50, %v16656_v12  ;;  %v16661_v12 = vsub.f32 %v16659_v18, %v16660_v60  ;;  %v6706_v50 = vpop.eup %6705  ;;  %v16664_v18 = vld [vmem:[#allocation646_spill] sm:$0xff]  ;;  %v16665_v60 = vld [vmem:[#allocation789_spill] sm:$0xff] }
 0x52a   : > { %16646 = vst [vmem:[#allocation813_spill] sm:$0xff] %v12157_v17  ;;  %v12208_v17 = vmul.f32 %v3573_v19, %v12183_v51  ;;  %v12211_v40 = vpop.eup %6707  ;;  %v16667_v56 = vld [vmem:[#allocation674_spill] sm:$0xff]  ;;  %v3415_v61 = vmul.f32 0.6931472, %v6706_v50 }
 0x52b   : > { %16648 = vst [vmem:[#allocation814_spill] sm:$0xff] %v12165_v27  ;;  %v4137_v33 = vadd.f32 %v4136_v1, %v16661_v12  ;;  %v12219_v1 = vadd.f32 %v11912_v31, %v12058_v20  ;;  %v16666_v12 = vsub.f32 %v16664_v18, %v16665_v60  ;;  %v6710_v19 = vpop.eup %6709  ;;  %v3413_v27 = vmul.f32 0.6931472, %v6704_v39 }
 0x52c   : > { %16649 = vst [vmem:[#allocation815_spill] sm:$0xff] %v12169_v48  ;;  %v12229_v20 = vadd.f32 %v11912_v31, %v2002_v43  ;;  %v12238_v36 = vmul.f32 %v12214_v32, %v16667_v56  ;;  %v12246_v43 = vld [vmem:[%s7381_s14 + $0x408] sm:$0xff] }
 0x52d   : > { %16650 = vst [vmem:[#allocation816_spill] sm:$0xff] %v12172_v24  ;;  %v4138_v58 = vadd.f32 %v4137_v33, %v16666_v12  ;;  %v16670_v24 = vld [vmem:[#allocation644_spill] sm:$0xff]  ;;  %v2579_v12 = vsub.f32 0.0, %v2435_v26  ;;  %v12263_v26 = vld [vmem:[%s7386_s17 + $0x3f0] sm:$0xff] }
 0x52e   : > { %16652 = vst [vmem:[#allocation817_spill] sm:$0xff] %v12180_v14  ;;  %v2578_v14 = vsub.f32 0.0, %v2434_v23  ;;  %v16671_v18 = vsub.f32 %v16669_v53, %v16670_v24  ;;  %v12241_v23 = vadd.f32 1.0, %v12211_v40  ;;  %v2437_v53 = vand.u32 2147483647, %v12219_v1 }
 0x52f   : > { %16653 = vst [vmem:[#allocation818_spill] sm:$0xff] %v12183_v51  ;;  %v12225_v51 = vpop.eup %6711  ;;  %v12250_v24 = vadd.f32 %v11912_v31, %v2005_v47  ;;  %v2580_v31 = vsub.f32 0.0, %v2436_v4  ;;  %v2438_v47 = vand.u32 2147483647, %v12229_v20  ;;  %v2862_v4 = vmul.f32 1.442695, %v2579_v12 }
 0x530   : > { %16654 = vst [vmem:[#allocation819_spill] sm:$0xff] %v12187_v28  ;;  %v4139_v33 = vadd.f32 %v4138_v58, %v16671_v18  ;;  %v6714_v60 = vpop.eup %6713  ;;  %v16675_v58 = vld [vmem:[#allocation639_spill] sm:$0xff]  ;;  %v16676_v18 = vld [vmem:[#allocation645_spill] sm:$0xff]  ;;  %v12258_v13 = vadd.f32 1.0, %v12225_v51  ;;  %v2860_v35 = vmul.f32 1.442695, %v2578_v14  ;;  %6727 = vlog2.f32 %v12241_v23 }
 0x531   : > { %16658 = vst [vmem:[#allocation785_spill] sm:$0xff] %v12200_v46  ;;  %v12243_v49 = vpop.eup %6715  ;;  %v16677_v39 = vsub.f32 %v16675_v58, %v16676_v18  ;;  %v2581_v5 = vsub.f32 0.0, %v2437_v53  ;;  %v2439_v18 = vand.u32 2147483647, %v12250_v24  ;;  %v2864_v12 = vmul.f32 1.442695, %v2580_v31 }
 0x532   : > { %16662 = vst [vmem:[#allocation701_spill] sm:$0xff] %v12211_v40  ;;  %v3574_v40 = vadd.f32 %v3413_v27, %v16678_v42  ;;  %v16683_v42 = vld [vmem:[#allocation679_spill] sm:$0xff]  ;;  %v12278_v14 = vadd.f32 1.0, %v12243_v49  ;;  %6729 = vpow2.f32 %v2860_v35  ;;  %v2582_v53 = vsub.f32 0.0, %v2438_v47 }
 0x533   : > { %16663 = vst [vmem:[#allocation628_spill] sm:$0xff] %v12214_v32  ;;  %v4140_v0 = vadd.f32 %v4139_v33, %v16677_v39  ;;  %v6718_v32 = vpop.eup %6717  ;;  %v16681_v33 = vsub.f32 %v11952_v21, %v11890_v54  ;;  %v3001_v27 = vmax.f32 %v16683_v42, 0.0  ;;  %v12274_v50 = vmul.f32 %v12246_v43, %v16683_v42 }
 0x534   : > { %16668 = vst [vmem:[#allocation614_spill] sm:$0xff] %v12225_v51  ;;  %v12260_v22 = vpop.eup %6719  ;;  %v16685_v54 = vsub.f32 %v11982_v45, %v11923_v34  ;;  %v16687_v42 = vmax.f32 %v11902_v59, 0.0  ;;  %6731 = vlog2.f32 %v12258_v13  ;;  %v16689_v34 = vsub.f32 %v12003_v44, %v11959_v3 }
 0x535   : > { %16672 = vst [vmem:[#allocation646_spill] sm:$0xff] %v12241_v23  ;;  %v4141_v39 = vadd.f32 %v4140_v0, %v16681_v33  ;;  %v12269_v58 = vpop.eup %6721  ;;  %v12287_v33 = vmul.f32 %v3574_v40, %v12263_v26  ;;  %v12292_v51 = vadd.f32 1.0, %v12260_v22  ;;  %v3417_v40 = vmul.f32 0.6931472, %v6710_v19 }
 0x536   : > { %16673 = vst [vmem:[#allocation789_spill] sm:$0xff] %v12243_v49  ;;  %v12284_v0 = vpop.eup %6723  ;;  %6733 = vlog2.f32 %v12278_v14  ;;  %v2866_v35 = vmul.f32 1.442695, %v2581_v5  ;;  %v2583_v31 = vsub.f32 0.0, %v2439_v18  ;;  %v16692_v47 = vsub.f32 %v12037_v9, %v11975_v29 }
 0x537   : > { %16674 = vst [vmem:[#allocation615_spill] sm:$0xff] %v12246_v43  ;;  %v4142_v21 = vadd.f32 %v4141_v39, %v16685_v54  ;;  %v3575_v43 = vadd.f32 %v3415_v61, %v16687_v42  ;;  %v12299_v39 = vld [vmem:[%s7386_s17 + $0x3f8] sm:$0xff]  ;;  %v3419_v54 = vmul.f32 0.6931472, %v6714_v60  ;;  %v12303_v61 = vadd.f32 1.0, %v12269_v58  ;;  %v12305_v42 = vpop.eup %6725 }
 0x538   : > { %16679 = vst [vmem:[#allocation644_spill] sm:$0xff] %v12258_v13  ;;  %6735 = vpow2.f32 %v2862_v4  ;;  %v6728_v44 = vpop.eup %6727  ;;  %v3421_v19 = vmul.f32 0.6931472, %v6718_v32  ;;  %v12313_v60 = vadd.f32 1.0, %v12284_v0  ;;  %v12317_v4 = vld [vmem:[%s7381_s14 + $0x410] sm:$0xff]  ;;  %v16695_v29 = vsub.f32 %v12055_v8, %v12007_v30  ;;  %v12336_v30 = vld [vmem:[%s7386_s17 + $0x408] sm:$0xff] }
 0x539   : > { %16680 = vst [vmem:[#allocation639_spill] sm:$0xff] %v12260_v22  ;;  %v4143_v45 = vadd.f32 %v4142_v21, %v16689_v34  ;;  %v3002_v21 = vmax.f32 %v11967_v37, 0.0  ;;  %6737 = vlog2.f32 %v12292_v51  ;;  %v3719_v34 = vmul.f32 %v3575_v43, %v12299_v39  ;;  %v12322_v18 = vpop.eup %6729 }
 0x53a   : > { %16682 = vst [vmem:[#allocation645_spill] sm:$0xff] %v12269_v58  ;;  %6739 = vpow2.f32 %v2864_v12  ;;  %v2868_v5 = vmul.f32 1.442695, %v2582_v53  ;;  %v16697_v32 = vmax.f32 %v16667_v56, 0.0  ;;  %v12328_v43 = vadd.f32 1.0, %v12305_v42  ;;  %v6732_v13 = vpop.eup %6731  ;;  %v12333_v53 = vld [vmem:[%s7386_s17 + $0x400] sm:$0xff] }
 0x53b   : > { %16684 = vst [vmem:[#allocation820_spill] sm:$0xff] %v12278_v14  ;;  %v4144_v3 = vadd.f32 %v4143_v45, %v16692_v47  ;;  %v3577_v47 = vadd.f32 %v3419_v54, %v3001_v27  ;;  %6741 = vlog2.f32 %v12303_v61  ;;  %v4006_v12 = vsub.f32 %v12287_v33, %v12118_v6  ;;  %v12350_v33 = vld [vmem:[%s7386_s17 + $0x410] sm:$0xff] }
 0x53c   : > { %16686 = vst [vmem:[#allocation821_spill] sm:$0xff] %v12284_v0  ;;  %v3576_v45 = vadd.f32 %v3417_v40, %v16697_v32  ;;  %6743 = vpow2.f32 %v2866_v35  ;;  %v2870_v8 = vmul.f32 1.442695, %v2583_v31  ;;  %v16701_v56 = vsub.f32 %v12097_v62, %v12041_v10  ;;  %v6734_v40 = vpop.eup %6733  ;;  %v12353_v35 = vld [vmem:[%s7381_s14 + $0x418] sm:$0xff] }
 0x53d   : > { %16688 = vst [vmem:[#allocation822_spill] sm:$0xff] %v12292_v51  ;;  %v4145_v9 = vadd.f32 %v4144_v3, %v16695_v29  ;;  %v3578_v54 = vadd.f32 %v3421_v19, %v3002_v21  ;;  %v12343_v3 = vmul.f32 %v12317_v4, %v11967_v37  ;;  %v3003_v29 = vmax.f32 %v12029_v7, 0.0 }
 0x53e   : > { %16690 = vst [vmem:[#allocation823_spill] sm:$0xff] %v12303_v61  ;;  %6745 = vlog2.f32 %v12313_v60  ;;  %v12347_v6 = vpop.eup %6735  ;;  %v3423_v31 = vmul.f32 0.6931472, %v6728_v44  ;;  %v12356_v10 = vadd.f32 1.0, %v12322_v18  ;;  %v16706_v62 = vsub.f32 %v12151_v52, %v12078_v15  ;;  %v12368_v44 = vld [vmem:[%s7381_s14 + $0x420] sm:$0xff] }
 0x53f   : > { %16691 = vst [vmem:[#allocation824_spill] sm:$0xff] %v12305_v42  ;;  %v4146_v27 = vadd.f32 %v4145_v9, %v16701_v56  ;;  %6747 = vpow2.f32 %v2868_v5  ;;  %v6738_v19 = vpop.eup %6737  ;;  %v4007_v9 = vsub.f32 %v3719_v34, %v12194_v41  ;;  %v3720_v32 = vmul.f32 %v3576_v45, %v12333_v53 }
 0x540   : > { %16693 = vst [vmem:[#allocation825_spill] sm:$0xff] %v12313_v60  ;;  %v3721_v56 = vmul.f32 %v3577_v47, %v12336_v30  ;;  %6749 = vlog2.f32 %v12328_v43  ;;  %v3004_v23 = vmax.f32 %v12049_v25, 0.0  ;;  %v3425_v5 = vmul.f32 0.6931472, %v6732_v13 }
 0x541   : > { %16694 = vst [vmem:[#allocation826_spill] sm:$0xff] %v12317_v4  ;;  %v4147_v21 = vadd.f32 %v4146_v27, %v16706_v62  ;;  %v12365_v4 = vpop.eup %6739  ;;  %6751 = vpow2.f32 %v2870_v8  ;;  %v16709_v15 = vsub.f32 %v12208_v17, %v12101_v63  ;;  %v3722_v34 = vmul.f32 %v3578_v54, %v12350_v33 }
 0x542   : > { %16696 = vst [vmem:[#allocation827_spill] sm:$0xff] %v12322_v18  ;;  %v6742_v41 = vpop.eup %6741  ;;  %v12377_v45 = vmul.f32 %v12353_v35, %v12029_v7  ;;  %v3005_v47 = vmax.f32 %v12069_v2, 0.0  ;;  %v12381_v27 = vadd.f32 1.0, %v12347_v6  ;;  %v3579_v13 = vadd.f32 %v3423_v31, %v3003_v29 }
 0x543   : > { %16698 = vst [vmem:[#allocation828_spill] sm:$0xff] %v12328_v43  ;;  %v4148_v52 = vadd.f32 %v4147_v21, %v16709_v15  ;;  %v12383_v62 = vpop.eup %6743  ;;  %v3427_v8 = vmul.f32 0.6931472, %v6734_v40  ;;  %6753 = vlog2.f32 %v12356_v10  ;;  %v4008_v54 = vsub.f32 %v3720_v32, %v12238_v36  ;;  %v12389_v15 = vld [vmem:[%s7386_s17 + $0x418] sm:$0xff] }
 0x544   : > { %16699 = vst [vmem:[#allocation829_spill] sm:$0xff] %v12333_v53  ;;  %v6746_v17 = vpop.eup %6745  ;;  %v4009_v21 = vsub.f32 %v3721_v56, %v12274_v50  ;;  %v12393_v53 = vmul.f32 %v12368_v44, %v12049_v25  ;;  %v3580_v40 = vadd.f32 %v3425_v5, %v3004_v23  ;;  %v3429_v31 = vmul.f32 0.6931472, %v6738_v19  ;;  %v12402_v50 = vld [vmem:[%s7386_s17 + $0x420] sm:$0xff] }
 0x545   : > { %16700 = vst [vmem:[#allocation830_spill] sm:$0xff] %v12336_v30  ;;  %v4149_v63 = vadd.f32 %v4148_v52, %v4006_v12  ;;  %v12398_v29 = vpop.eup %6747  ;;  %v3006_v12 = vmax.f32 %v12089_v55, 0.0  ;;  %v3007_v56 = vmax.f32 %v12105_v38, 0.0  ;;  %v3431_v52 = vmul.f32 0.6931472, %v6742_v41 }
 0x546   : > { %16702 = vst [vmem:[#allocation831_spill] sm:$0xff] %v12347_v6  ;;  %v6750_v32 = vpop.eup %6749  ;;  %6755 = vlog2.f32 %v12381_v27  ;;  %v4010_v23 = vsub.f32 %v3722_v34, %v12343_v3  ;;  %v3723_v19 = vmul.f32 %v3579_v13, %v12389_v15  ;;  %v3008_v41 = vmax.f32 %v12122_v11, 0.0 }
 0x547   : > { %16703 = vst [vmem:[#allocation832_spill] sm:$0xff] %v12350_v33  ;;  %v4150_v36 = vadd.f32 %v4149_v63, %v4007_v9  ;;  %v12409_v30 = vpop.eup %6751  ;;  %v3581_v9 = vadd.f32 %v3427_v8, %v3005_v47  ;;  %v12414_v63 = vld [vmem:[%s7381_s14 + $0x428] sm:$0xff]  ;;  %v3433_v25 = vmul.f32 0.6931472, %v6746_v17  ;;  %v12422_v7 = vadd.f32 1.0, %v12398_v29 }
 0x548   : > { %16704 = vst [vmem:[#allocation833_spill] sm:$0xff] %v12353_v35  ;;  %v12396_v35 = vadd.f32 1.0, %v12365_v4  ;;  %v12417_v33 = vld [vmem:[%s7386_s17 + $0x428] sm:$0xff]  ;;  %v3724_v34 = vmul.f32 %v3580_v40, %v12402_v50  ;;  %v3582_v13 = vadd.f32 %v3429_v31, %v3006_v12  ;;  %v3009_v47 = vmax.f32 %v12145_v16, 0.0  ;;  %v12441_v12 = vld [vmem:[%s7381_s14 + $0x438] sm:$0xff] }
 0x549   : > { %16705 = vst [vmem:[#allocation834_spill] sm:$0xff] %v12356_v10  ;;  %v4151_v5 = vadd.f32 %v4150_v36, %v4008_v54  ;;  %v6754_v3 = vpop.eup %6753  ;;  %v12427_v54 = vld [vmem:[%s7381_s14 + $0x430] sm:$0xff]  ;;  %v3435_v17 = vmul.f32 0.6931472, %v6750_v32  ;;  %v12434_v37 = vadd.f32 1.0, %v12409_v30  ;;  %v4011_v49 = vsub.f32 %v3723_v19, %v12377_v45  ;;  %v12444_v31 = vld [vmem:[%s7386_s17 + $0x438] sm:$0xff] }
 0x54a   : > { %16707 = vst [vmem:[#allocation835_spill] sm:$0xff] %v12365_v4  ;;  %6757 = vlog2.f32 %v12396_v35  ;;  %v12430_v36 = vld [vmem:[%s7386_s17 + $0x430] sm:$0xff]  ;;  %v3725_v40 = vmul.f32 %v3581_v9, %v12417_v33  ;;  %v4012_v45 = vsub.f32 %v3724_v34, %v12393_v53  ;;  %v3870_v9 = vmul.f32 %v12427_v54, %v12089_v55  ;;  %v12463_v34 = vld [vmem:[%s7381_s14 + $0x448] sm:$0xff] }
 0x54b   : > { %16708 = vst [vmem:[#allocation836_spill] sm:$0xff] %v12368_v44  ;;  %v12407_v44 = vadd.f32 1.0, %v12383_v62  ;;  %v4152_v8 = vadd.f32 %v4151_v5, %v4009_v21  ;;  %v3869_v21 = vmul.f32 %v12414_v63, %v12069_v2  ;;  %v3010_v5 = vmax.f32 %v12169_v48, 0.0 }
 0x54c   : > { %16710 = vst [vmem:[#allocation837_spill] sm:$0xff] %v12381_v27  ;;  %v6756_v32 = vpop.eup %6755  ;;  %v3726_v19 = vmul.f32 %v3582_v13, %v12430_v36  ;;  %v12466_v13 = vld [vmem:[%s7386_s17 + $0x448] sm:$0xff] }
 0x54d   : > { %16711 = vst [vmem:[#allocation838_spill] sm:$0xff] %v12383_v62  ;;  %6759 = vlog2.f32 %v12407_v44  ;;  %v4013_v53 = vsub.f32 %v3725_v40, %v3869_v21  ;;  %v12476_v40 = vld [vmem:[%s7386_s17 + $0x450] sm:$0xff]  ;;  %v3012_v21 = vmax.f32 %v12200_v46, 0.0 }
 0x54e   : > { %16712 = vst [vmem:[#allocation839_spill] sm:$0xff] %v12389_v15  ;;  %v3583_v15 = vadd.f32 %v3431_v52, %v3007_v56  ;;  %v4153_v56 = vadd.f32 %v4152_v8, %v4010_v23  ;;  %v3584_v52 = vadd.f32 %v3433_v25, %v3008_v41  ;;  %6761 = vlog2.f32 %v12422_v7 }
 0x54f   : > { %16713 = vst [vmem:[#allocation840_spill] sm:$0xff] %v12396_v35  ;;  %v3585_v8 = vadd.f32 %v3435_v17, %v3009_v47  ;;  %6763 = vlog2.f32 %v12434_v37  ;;  %v4014_v47 = vsub.f32 %v3726_v19, %v3870_v9  ;;  %v12473_v17 = vld [vmem:[%s7381_s14 + $0x450] sm:$0xff] }
 0x550   : > { %16714 = vst [vmem:[#allocation841_spill] sm:$0xff] %v12402_v50  ;;  %v3437_v50 = vmul.f32 0.6931472, %v6754_v3  ;;  %v4154_v23 = vadd.f32 %v4153_v56, %v4011_v49  ;;  %v6758_v25 = vpop.eup %6757  ;;  %v3727_v41 = vmul.f32 %v3583_v15, %v12444_v31  ;;  %v3871_v3 = vmul.f32 %v12441_v12, %v12105_v38 }
 0x551   : > { %16715 = vst [vmem:[#allocation842_spill] sm:$0xff] %v12414_v63  ;;  %v12453_v63 = vld [vmem:[%s7381_s14 + $0x440] sm:$0xff] }
 0x552   : > { %16716 = vst [vmem:[#allocation843_spill] sm:$0xff] %v12417_v33  ;;  %v12456_v33 = vld [vmem:[%s7386_s17 + $0x440] sm:$0xff]  ;;  %v4155_v49 = vadd.f32 %v4154_v23, %v4012_v45  ;;  %v3872_v14 = vmul.f32 %v12453_v63, %v12122_v11  ;;  %v3586_v2 = vadd.f32 %v3437_v50, %v3010_v5  ;;  %v4015_v45 = vsub.f32 %v3727_v41, %v3871_v3  ;;  %v12490_v3 = vld [vmem:[%s7386_s17 + $0x458] sm:$0xff] }
 0x553   : > { %16717 = vst [vmem:[#allocation844_spill] sm:$0xff] %v12427_v54  ;;  %v3011_v54 = vmax.f32 %v12187_v28, 0.0  ;;  %v6760_v56 = vpop.eup %6759  ;;  %v3728_v15 = vmul.f32 %v3584_v52, %v12456_v33  ;;  %v3729_v23 = vmul.f32 %v3585_v8, %v12466_v13  ;;  %v3873_v52 = vmul.f32 %v12463_v34, %v12145_v16  ;;  %v12493_v8 = vld [vmem:[%s7381_s14 + $0x460] sm:$0xff] }
 0x554   : > { %16718 = vst [vmem:[#allocation845_spill] sm:$0xff] %v12430_v36  ;;  %v3439_v36 = vmul.f32 0.6931472, %v6756_v32  ;;  %v4156_v32 = vadd.f32 %v4155_v49, %v4013_v53  ;;  %v6762_v22 = vpop.eup %6761  ;;  %v3013_v5 = vmax.f32 %v12219_v1, 0.0  ;;  %v3443_v19 = vmul.f32 0.6931472, %v6760_v56 }
 0x555   : > { %16719 = vst [vmem:[#allocation846_spill] sm:$0xff] %v12441_v12  ;;  %v3441_v12 = vmul.f32 0.6931472, %v6758_v25  ;;  %v6764_v51 = vpop.eup %6763  ;;  %v4016_v25 = vsub.f32 %v3728_v15, %v3872_v14  ;;  %v3730_v53 = vmul.f32 %v3586_v2, %v12476_v40  ;;  %v3874_v41 = vmul.f32 %v12473_v17, %v12169_v48  ;;  %v12499_v2 = vld [vmem:[%s7386_s17 + $0x460] sm:$0xff] }
 0x556   : > { %16720 = vst [vmem:[#allocation847_spill] sm:$0xff] %v12444_v31  ;;  %v12483_v31 = vld [vmem:[%s7381_s14 + $0x458] sm:$0xff]  ;;  %v3587_v50 = vadd.f32 %v3439_v36, %v3011_v54  ;;  %v4157_v9 = vadd.f32 %v4156_v32, %v4014_v47  ;;  %v3014_v54 = vmax.f32 %v12229_v20, 0.0  ;;  %v3445_v36 = vmul.f32 0.6931472, %v6762_v22  ;;  %v12503_v47 = vld [vmem:[%s7381_s14 + $0x468] sm:$0xff] }
 0x557   : > { %16721 = vst [vmem:[#allocation848_spill] sm:$0xff] %v12453_v63  ;;  %v3588_v49 = vadd.f32 %v3441_v12, %v3012_v21  ;;  %v4017_v56 = vsub.f32 %v3729_v23, %v3873_v52  ;;  %v3875_v14 = vmul.f32 %v12483_v31, %v12187_v28  ;;  %v3589_v32 = vadd.f32 %v3443_v19, %v3013_v5  ;;  %v12515_v5 = vld [vmem:[%s7381_s14 + $0x470] sm:$0xff] }
 0x558   : > { %16722 = vst [vmem:[#allocation849_spill] sm:$0xff] %v12456_v33  ;;  %v4158_v55 = vadd.f32 %v4157_v9, %v4015_v45  ;;  %v3731_v15 = vmul.f32 %v3587_v50, %v12490_v3  ;;  %v3447_v63 = vmul.f32 0.6931472, %v6764_v51  ;;  %v4018_v21 = vsub.f32 %v3730_v53, %v3874_v41  ;;  %v12508_v45 = vld [vmem:[%s7386_s17 + $0x468] sm:$0xff]  ;;  %v12518_v51 = vld [vmem:[%s7386_s17 + $0x470] sm:$0xff]  ;;  %v12522_v41 = vld [vmem:[%s7386_s17 + $0x478] sm:$0xff] }
 0x559   : > { %16723 = vst [vmem:[#allocation850_spill] sm:$0xff] %v12463_v34  ;;  %v3876_v22 = vmul.f32 %v12493_v8, %v12200_v46  ;;  %v3732_v23 = vmul.f32 %v3588_v49, %v12499_v2  ;;  %v3590_v52 = vadd.f32 %v3445_v36, %v3014_v54  ;;  %v3015_v9 = vmax.f32 %v12250_v24, 0.0 }
 0x55a   : > { %16724 = vst [vmem:[#allocation851_spill] sm:$0xff] %v12466_v13  ;;  %v4159_v12 = vadd.f32 %v4158_v55, %v4016_v25  ;;  %v3877_v50 = vmul.f32 %v12503_v47, %v12219_v1  ;;  %v4019_v55 = vsub.f32 %v3731_v15, %v3875_v14  ;;  %v3733_v25 = vmul.f32 %v3589_v32, %v12508_v45 }
 0x55b   : > { %16725 = vst [vmem:[#allocation852_spill] sm:$0xff] %v12473_v17  ;;  %v3591_v19 = vadd.f32 %v3447_v63, %v3015_v9  ;;  %v4020_v49 = vsub.f32 %v3732_v23, %v3876_v22  ;;  %v3878_v54 = vmul.f32 %v12515_v5, %v12229_v20  ;;  %v3734_v36 = vmul.f32 %v3590_v52, %v12518_v51 }
 0x55c   : > { %16726 = vst [vmem:[#allocation853_spill] sm:$0xff] %v12476_v40  ;;  %v4160_v58 = vadd.f32 %v4159_v12, %v4017_v56  ;;  %v12528_v12 = vld [vmem:[%s7381_s14 + $0x478] sm:$0xff]  ;;  %v4021_v61 = vsub.f32 %v3733_v25, %v3877_v50 }
 0x55d   : > { %16727 = vst [vmem:[#allocation854_spill] sm:$0xff] %v12483_v31  ;;  %v3735_v33 = vmul.f32 %v3591_v19, %v12522_v41  ;;  %v3879_v63 = vmul.f32 %v12528_v12, %v12250_v24  ;;  %v4022_v14 = vsub.f32 %v3734_v36, %v3878_v54 }
 0x55e   : > { %16728 = vst [vmem:[#allocation855_spill] sm:$0xff] %v12490_v3  ;;  %v4161_v53 = vadd.f32 %v4160_v58, %v4018_v21 }
 0x55f   : > { %16729 = vst [vmem:[#allocation856_spill] sm:$0xff] %v12493_v8  ;;  %v4023_v15 = vsub.f32 %v3735_v33, %v3879_v63 }
 0x560   : > { %16730 = vst [vmem:[#allocation857_spill] sm:$0xff] %v12499_v2  ;;  %v4162_v56 = vadd.f32 %v4161_v53, %v4019_v55 }
 0x561   : > { %16731 = vst [vmem:[#allocation858_spill] sm:$0xff] %v12503_v47 }
 0x562   : > { %16732 = vst [vmem:[#allocation859_spill] sm:$0xff] %v12508_v45  ;;  %v4163_v34 = vadd.f32 %v4162_v56, %v4020_v49 }
 0x563   : > { %16733 = vst [vmem:[#allocation860_spill] sm:$0xff] %v12515_v5 }
 0x564   : > { %v4164_v58 = vadd.f32 %v4163_v34, %v4021_v61 }
 0x566   : > { %v4165_v32 = vadd.f32 %v4164_v58, %v4022_v14 }
 0x568   : > { %v4166_v21 = vadd.f32 %v4165_v32, %v4023_v15 }
 0x56a   : > { %4167 = vadd.xlane.f32.xlu0 %v4166_v21 }
 0x5dd   : > { %v4168_v22 = vpop.xlane.xlu0 %4167 }
 0x5de   : > { %v4169_v23 = vrot.slane %v4168_v22, 4 }
 0x5e0   : > { %v4170_v9 = vadd.f32 %v4169_v23, %v4168_v22 }
 0x5e2   : > { %v4171_v52 = vrot.slane %v4170_v9, 2 }
 0x5e4   : > { %v4172_v55 = vadd.f32 %v4171_v52, %v4170_v9 }
 0x5e6   : > { %v4173_v53 = vrot.slane %v4172_v55, 1 }
 0x5e8   : > { %v4174_v38 = vadd.f32 %v4173_v53, %v4172_v55 }
 0x5ea   : > { %6158 = vpush %v4174_v38 }
 0x617   : > { %4178 = sbr.rel (%p6041_p5) target bundleno = 2142 (0x85e), region = 56 }
 0x61b   : > { %s12533_s14 = spop %6158 }
 0x61c   : > { %v16734_v61 = vld [vmem:[#allocation12_spill] sm:$0xff]  ;;  %v16736_v34 = vld [vmem:[#allocation42_spill] sm:$0xff]  ;;  %v16742_v38 = vld [vmem:[#allocation13_spill] sm:$0xff]  ;;  %s4179_s17 = sld [smem:[#allocation6]] }
 0x61d   : > { %v16735_v33 = vmax.f32 %v16734_v61, 0.0  ;;  %v16737_v50 = vmax.f32 %v16736_v34, 0.0  ;;  %v16738_v25 = vld [vmem:[#allocation82_spill] sm:$0xff]  ;;  %v16743_v63 = vmax.f32 %v16742_v38, 0.0  ;;  %v16744_v14 = vld [vmem:[#allocation44_spill] sm:$0xff]  ;;  %v16746_v32 = vld [vmem:[#allocation85_spill] sm:$0xff] }
 0x61e   : > { %v16739_v49 = vmax.f32 %v16738_v25, 0.0  ;;  %v16740_v54 = vld [vmem:[#allocation182_spill] sm:$0xff]  ;;  %v16745_v58 = vmax.f32 %v16744_v14, 0.0  ;;  %v16747_v21 = vmax.f32 %v16746_v32, 0.0  ;;  %v16748_v22 = vld [vmem:[#allocation191_spill] sm:$0xff]  ;;  %v16754_v34 = vld [vmem:[#allocation88_spill] sm:$0xff] }
 0x61f   : > { %v6773_v19 = vpack.i.bf16 %v16737_v50, %v16735_v33  ;;  %v16741_v36 = vmax.f32 %v16740_v54, 0.0  ;;  %v16749_v23 = vmax.f32 %v16748_v22, 0.0  ;;  %v16750_v52 = vld [vmem:[#allocation14_spill] sm:$0xff]  ;;  %v16755_v50 = vmax.f32 %v16754_v34, 0.0  ;;  %v16758_v54 = vld [vmem:[#allocation16_spill] sm:$0xff]  ;;  %v16762_v14 = vld [vmem:[#allocation91_spill] sm:$0xff] }
 0x620   : > { %v6775_v15 = vpack.i.bf16 %v16745_v58, %v16743_v63  ;;  %v16751_v55 = vmax.f32 %v16750_v52, 0.0  ;;  %v16752_v53 = vld [vmem:[#allocation46_spill] sm:$0xff]  ;;  %v16763_v58 = vmax.f32 %v16762_v14, 0.0  ;;  %v16958_v11 = vld [vmem:[#allocation213_spill] sm:$0xff]  ;;  %v16985_v31 = vld [vmem:[#allocation228_spill] sm:$0xff] }
 0x621   : > { %v6825_v56 = vpack.i.bf16 %v16741_v36, %v16739_v49  ;;  %6774 = vxpose.xlu0.b32.start [1/16] (narrow) %v6773_v19, 32  ;;  %v6827_v9 = vpack.i.bf16 %v16749_v23, %v16747_v21  ;;  %v16753_v61 = vmax.f32 %v16752_v53, 0.0  ;;  %v16756_v19 = vld [vmem:[#allocation206_spill] sm:$0xff]  ;;  %v16759_v36 = vmax.f32 %v16758_v54, 0.0  ;;  %v16966_v42 = vld [vmem:[#allocation157_spill] sm:$0xff]  ;;  %v16988_v16 = vld [vmem:[#allocation223_spill] sm:$0xff] }
 0x622   : > { %v16757_v25 = vmax.f32 %v16756_v19, 0.0  ;;  %v16766_v22 = vld [vmem:[#allocation18_spill] sm:$0xff]  ;;  %v16774_v19 = vld [vmem:[#allocation20_spill] sm:$0xff]  ;;  %s4180_s16 = sadd.f32 %s12533_s14, %s4179_s17  ;;  %vm4194_vm12 = vcmp.ge.f32.partialorder %v16966_v42, 0.0  ;;  %v16974_v42 = vld [vmem:[#allocation201_spill] sm:$0xff] }
 0x623   : > { %6826 = vxpose.xlu1.b32.start [1/16] (narrow) %v6825_v56, 32  ;;  %v6777_v33 = vpack.i.bf16 %v16753_v61, %v16751_v55  ;;  %v16760_v56 = vld [vmem:[#allocation48_spill] sm:$0xff]  ;;  %v16767_v23 = vmax.f32 %v16766_v22, 0.0  ;;  %v16770_v53 = vld [vmem:[#allocation94_spill] sm:$0xff]  ;;  %v17077_v4 = vld [vmem:[#allocation21_spill] sm:$0xff] }
 0x624   : > { %v6829_v49 = vpack.i.bf16 %v16757_v25, %v16755_v50  ;;  %v16761_v38 = vmax.f32 %v16760_v56, 0.0  ;;  %v16771_v61 = vmax.f32 %v16770_v53, 0.0  ;;  %v16775_v25 = vmax.f32 %v16774_v19, 0.0  ;;  %v16778_v56 = vld [vmem:[#allocation96_spill] sm:$0xff]  ;;  %4182 = sst [smem:[#allocation6]] %s4180_s16  ;;  %v16937_v60 = vld [vmem:[#allocation138_spill] sm:$0xff] }
 0x625   : > { %vm4190_vm8 = vcmp.ge.f32.partialorder %v16937_v60, 0.0  ;;  %v16945_v60 = vld [vmem:[#allocation204_spill] sm:$0xff]  ;;  %v17012_v8 = vld [vmem:[#allocation202_spill] sm:$0xff]  ;;  %v17082_v5 = vld [vmem:[#allocation263_spill] sm:$0xff] }
 0x626   : > { %v6779_v63 = vpack.i.bf16 %v16761_v38, %v16759_v36  ;;  %v16779_v38 = vmax.f32 %v16778_v56, 0.0  ;;  %v17037_v2 = vld [vmem:[#allocation316_spill] sm:$0xff]  ;;  %v17073_v28 = vld [vmem:[#allocation274_spill] sm:$0xff]  ;;  %v17459_v62 = vld [vmem:[#allocation581_spill] sm:$0xff] }
 0x627   : > { %v17076_v47 = vld [vmem:[#allocation266_spill] sm:$0xff] }
 0x628   : > { %v17079_v45 = vld [vmem:[#allocation54_spill] sm:$0xff] }
 0x629   : > { %6776 = vxpose.xlu0.b32.cont [2/16] (narrow) %v6775_v15, 32  ;;  %v16764_v15 = vld [vmem:[#allocation220_spill] sm:$0xff] }
 0x62a   : > { %v16765_v32 = vmax.f32 %v16764_v15, 0.0  ;;  %v16782_v15 = vld [vmem:[#allocation22_spill] sm:$0xff] }
 0x62b   : > { %6828 = vxpose.xlu1.b32.cont [2/16] (narrow) %v6827_v9, 32  ;;  %v16768_v9 = vld [vmem:[#allocation51_spill] sm:$0xff] }
 0x62c   : > { %v6831_v21 = vpack.i.bf16 %v16765_v32, %v16763_v58  ;;  %v16769_v52 = vmax.f32 %v16768_v9, 0.0  ;;  %v16783_v32 = vmax.f32 %v16782_v15, 0.0  ;;  %v16786_v9 = vld [vmem:[#allocation99_spill] sm:$0xff] }
 0x62e   : > { %v6781_v55 = vpack.i.bf16 %v16769_v52, %v16767_v23  ;;  %v16787_v52 = vmax.f32 %v16786_v9, 0.0 }
 0x631   : > { %6778 = vxpose.xlu0.b32.cont [3/16] (narrow) %v6777_v33, 32  ;;  %v16772_v33 = vld [vmem:[#allocation234_spill] sm:$0xff] }
 0x632   : > { %v16773_v34 = vmax.f32 %v16772_v33, 0.0  ;;  %v16790_v33 = vld [vmem:[#allocation24_spill] sm:$0xff] }
 0x633   : > { %6830 = vxpose.xlu1.b32.cont [3/16] (narrow) %v6829_v49, 32  ;;  %v16776_v49 = vld [vmem:[#allocation53_spill] sm:$0xff] }
 0x634   : > { %v6833_v50 = vpack.i.bf16 %v16773_v34, %v16771_v61  ;;  %v16777_v54 = vmax.f32 %v16776_v49, 0.0  ;;  %v16791_v34 = vmax.f32 %v16790_v33, 0.0  ;;  %v16794_v49 = vld [vmem:[#allocation102_spill] sm:$0xff] }
 0x636   : > { %v6783_v36 = vpack.i.bf16 %v16777_v54, %v16775_v25  ;;  %v16795_v54 = vmax.f32 %v16794_v49, 0.0 }
 0x639   : > { %6780 = vxpose.xlu0.b32.cont [4/16] (narrow) %v6779_v63, 32  ;;  %v16780_v63 = vld [vmem:[#allocation244_spill] sm:$0xff] }
 0x63a   : > { %v16781_v14 = vmax.f32 %v16780_v63, 0.0  ;;  %v16798_v63 = vld [vmem:[#allocation26_spill] sm:$0xff] }
 0x63b   : > { %6832 = vxpose.xlu1.b32.cont [4/16] (narrow) %v6831_v21, 32  ;;  %v16784_v21 = vld [vmem:[#allocation55_spill] sm:$0xff] }
 0x63c   : > { %v6835_v58 = vpack.i.bf16 %v16781_v14, %v16779_v38  ;;  %v16785_v22 = vmax.f32 %v16784_v21, 0.0  ;;  %v16799_v14 = vmax.f32 %v16798_v63, 0.0  ;;  %v16802_v21 = vld [vmem:[#allocation105_spill] sm:$0xff] }
 0x63e   : > { %v6785_v23 = vpack.i.bf16 %v16785_v22, %v16783_v32  ;;  %v16803_v22 = vmax.f32 %v16802_v21, 0.0 }
 0x641   : > { %6782 = vxpose.xlu0.b32.cont [5/16] (narrow) %v6781_v55, 32  ;;  %v16788_v55 = vld [vmem:[#allocation257_spill] sm:$0xff] }
 0x642   : > { %v16789_v53 = vmax.f32 %v16788_v55, 0.0  ;;  %v16806_v55 = vld [vmem:[#allocation28_spill] sm:$0xff] }
 0x643   : > { %6834 = vxpose.xlu1.b32.cont [5/16] (narrow) %v6833_v50, 32  ;;  %v16792_v50 = vld [vmem:[#allocation57_spill] sm:$0xff] }
 0x644   : > { %v6837_v61 = vpack.i.bf16 %v16789_v53, %v16787_v52  ;;  %v16793_v19 = vmax.f32 %v16792_v50, 0.0  ;;  %v16807_v53 = vmax.f32 %v16806_v55, 0.0  ;;  %v16810_v50 = vld [vmem:[#allocation111_spill] sm:$0xff] }
 0x646   : > { %v6787_v25 = vpack.i.bf16 %v16793_v19, %v16791_v34  ;;  %v16811_v19 = vmax.f32 %v16810_v50, 0.0 }
 0x649   : > { %6784 = vxpose.xlu0.b32.cont [6/16] (narrow) %v6783_v36, 32  ;;  %v16796_v36 = vld [vmem:[#allocation267_spill] sm:$0xff] }
 0x64a   : > { %v16797_v56 = vmax.f32 %v16796_v36, 0.0  ;;  %v16814_v36 = vld [vmem:[#allocation30_spill] sm:$0xff] }
 0x64b   : > { %6836 = vxpose.xlu1.b32.cont [6/16] (narrow) %v6835_v58, 32  ;;  %v16800_v58 = vld [vmem:[#allocation59_spill] sm:$0xff] }
 0x64c   : > { %v6839_v38 = vpack.i.bf16 %v16797_v56, %v16795_v54  ;;  %v16801_v15 = vmax.f32 %v16800_v58, 0.0  ;;  %v16815_v56 = vmax.f32 %v16814_v36, 0.0  ;;  %v16818_v58 = vld [vmem:[#allocation115_spill] sm:$0xff] }
 0x64e   : > { %v6789_v32 = vpack.i.bf16 %v16801_v15, %v16799_v14  ;;  %v16819_v15 = vmax.f32 %v16818_v58, 0.0  ;;  %v16836_v58 = vld [vmem:[#allocation31_spill] sm:$0xff] }
 0x651   : > { %6786 = vxpose.xlu0.b32.cont [7/16] (narrow) %v6785_v23, 32  ;;  %v16804_v23 = vld [vmem:[#allocation285_spill] sm:$0xff] }
 0x652   : > { %v16805_v9 = vmax.f32 %v16804_v23, 0.0  ;;  %v16822_v23 = vld [vmem:[#allocation377_spill] sm:$0xff] }
 0x653   : > { %6838 = vxpose.xlu1.b32.cont [7/16] (narrow) %v6837_v61, 32  ;;  %v16808_v61 = vld [vmem:[#allocation61_spill] sm:$0xff] }
 0x654   : > { %v6841_v52 = vpack.i.bf16 %v16805_v9, %v16803_v22  ;;  %v16809_v33 = vmax.f32 %v16808_v61, 0.0  ;;  %v16823_v9 = vmax.f32 %v16822_v23, 0.0  ;;  %v16826_v61 = vld [vmem:[#allocation32_spill] sm:$0xff] }
 0x656   : > { %v6791_v34 = vpack.i.bf16 %v16809_v33, %v16807_v53  ;;  %v16827_v33 = vmax.f32 %v16826_v61, 0.0 }
 0x659   : > { %6788 = vxpose.xlu0.b32.cont [8/16] (narrow) %v6787_v25, 32  ;;  %v16812_v25 = vld [vmem:[#allocation292_spill] sm:$0xff] }
 0x65a   : > { %v16813_v49 = vmax.f32 %v16812_v25, 0.0  ;;  %v16830_v25 = vld [vmem:[#allocation119_spill] sm:$0xff] }
 0x65b   : > { %6840 = vxpose.xlu1.b32.cont [8/16] (narrow) %v6839_v38, 32  ;;  %v16816_v38 = vld [vmem:[#allocation64_spill] sm:$0xff] }
 0x65c   : > { %v6843_v54 = vpack.i.bf16 %v16813_v49, %v16811_v19  ;;  %v16817_v63 = vmax.f32 %v16816_v38, 0.0  ;;  %v16831_v49 = vmax.f32 %v16830_v25, 0.0  ;;  %v16834_v38 = vld [vmem:[#allocation389_spill] sm:$0xff] }
 0x65d   : > { %v16848_v25 = vld [vmem:[#allocation33_spill] sm:$0xff] }
 0x65e   : > { %v6793_v14 = vpack.i.bf16 %v16817_v63, %v16815_v56  ;;  %v16835_v63 = vmax.f32 %v16834_v38, 0.0 }
 0x661   : > { %6790 = vxpose.xlu0.b32.cont [9/16] (narrow) %v6789_v32, 32  ;;  %v16820_v32 = vld [vmem:[#allocation304_spill] sm:$0xff] }
 0x662   : > { %v16821_v21 = vmax.f32 %v16820_v32, 0.0 }
 0x663   : > { %6842 = vxpose.xlu1.b32.cont [9/16] (narrow) %v6841_v52, 32  ;;  %v16824_v52 = vld [vmem:[#allocation29_spill] sm:$0xff] }
 0x664   : > { %v6845_v22 = vpack.i.bf16 %v16821_v21, %v16819_v15  ;;  %v16825_v55 = vmax.f32 %v16824_v52, 0.0  ;;  %v16837_v15 = vmax.f32 %v16836_v58, 0.0  ;;  %v16842_v52 = vld [vmem:[#allocation128_spill] sm:$0xff]  ;;  %v16854_v58 = vld [vmem:[#allocation139_spill] sm:$0xff] }
 0x666   : > { %v6877_v53 = vpack.i.bf16 %v16825_v55, %v16823_v9  ;;  %v6879_v32 = vpack.i.bf16 %v16837_v15, %v16835_v63  ;;  %v16843_v55 = vmax.f32 %v16842_v52, 0.0  ;;  %v16855_v15 = vmax.f32 %v16854_v58, 0.0  ;;  %v16860_v52 = vld [vmem:[#allocation35_spill] sm:$0xff]  ;;  %v16872_v58 = vld [vmem:[#allocation37_spill] sm:$0xff] }
 0x668   : > { %6878 = vxpose.xlu2.b32.start [1/16] (narrow) %v6877_v53, 32  ;;  %v16844_v53 = vld [vmem:[#allocation330_spill] sm:$0xff] }
 0x669   : > { %6792 = vxpose.xlu0.b32.cont [10/16] (narrow) %v6791_v34, 32  ;;  %v16828_v34 = vld [vmem:[#allocation67_spill] sm:$0xff]  ;;  %v16845_v61 = vmax.f32 %v16844_v53, 0.0 }
 0x66a   : > { %v16829_v50 = vmax.f32 %v16828_v34, 0.0  ;;  %v16846_v34 = vld [vmem:[#allocation398_spill] sm:$0xff] }
 0x66b   : > { %6844 = vxpose.xlu1.b32.cont [10/16] (narrow) %v6843_v54, 32  ;;  %v16832_v54 = vld [vmem:[#allocation318_spill] sm:$0xff] }
 0x66c   : > { %v6795_v19 = vpack.i.bf16 %v16829_v50, %v16827_v33  ;;  %v16833_v36 = vmax.f32 %v16832_v54, 0.0  ;;  %v6849_v33 = vpack.i.bf16 %v16845_v61, %v16843_v55  ;;  %v16847_v50 = vmax.f32 %v16846_v34, 0.0 }
 0x66d   : > { %v16861_v55 = vmax.f32 %v16860_v52, 0.0  ;;  %v16878_v52 = vld [vmem:[#allocation163_spill] sm:$0xff] }
 0x66e   : > { %v6847_v56 = vpack.i.bf16 %v16833_v36, %v16831_v49  ;;  %v16849_v49 = vmax.f32 %v16848_v25, 0.0  ;;  %v16866_v25 = vld [vmem:[#allocation153_spill] sm:$0xff] }
 0x670   : > { %6880 = vxpose.xlu2.b32.cont [2/16] (narrow) %v6879_v32, 32  ;;  %v6881_v54 = vpack.i.bf16 %v16849_v49, %v16847_v50  ;;  %v16856_v32 = vld [vmem:[#allocation339_spill] sm:$0xff]  ;;  %v16867_v49 = vmax.f32 %v16866_v25, 0.0 }
 0x671   : > { %6794 = vxpose.xlu0.b32.cont [11/16] (narrow) %v6793_v14, 32  ;;  %v16838_v14 = vld [vmem:[#allocation34_spill] sm:$0xff] }
 0x672   : > { %v16839_v21 = vmax.f32 %v16838_v14, 0.0  ;;  %v16857_v14 = vmax.f32 %v16856_v32, 0.0 }
 0x673   : > { %6846 = vxpose.xlu1.b32.cont [11/16] (narrow) %v6845_v22, 32  ;;  %v16840_v22 = vld [vmem:[#allocation70_spill] sm:$0xff] }
 0x674   : > { %v16841_v23 = vmax.f32 %v16840_v22, 0.0  ;;  %v16858_v22 = vld [vmem:[#allocation412_spill] sm:$0xff] }
 0x676   : > { %v6797_v9 = vpack.i.bf16 %v16841_v23, %v16839_v21  ;;  %v6851_v21 = vpack.i.bf16 %v16857_v14, %v16855_v15  ;;  %v16859_v23 = vmax.f32 %v16858_v22, 0.0  ;;  %v16873_v15 = vmax.f32 %v16872_v58, 0.0  ;;  %v16891_v58 = vld [vmem:[#allocation108_spill] sm:$0xff] }
 0x677   : > { %vm4183_vm2 = vcmp.ge.f32.partialorder %v16891_v58, 0.0 }
 0x678   : > { %6882 = vxpose.xlu2.b32.cont [3/16] (narrow) %v6881_v54, 32  ;;  %v6883_v53 = vpack.i.bf16 %v16861_v55, %v16859_v23  ;;  %v16868_v54 = vld [vmem:[#allocation356_spill] sm:$0xff]  ;;  %v16879_v55 = vmax.f32 %v16878_v52, 0.0 }
 0x679   : > { %6796 = vxpose.xlu0.b32.cont [12/16] (narrow) %v6795_v19, 32  ;;  %v16850_v19 = vld [vmem:[#allocation36_spill] sm:$0xff] }
 0x67a   : > { %v16851_v36 = vmax.f32 %v16850_v19, 0.0  ;;  %v16869_v19 = vmax.f32 %v16868_v54, 0.0  ;;  %v16896_v52 = vld [vmem:[#allocation148_spill] sm:$0xff] }
 0x67b   : > { %6848 = vxpose.xlu1.b32.cont [12/16] (narrow) %v6847_v56, 32  ;;  %v16852_v56 = vld [vmem:[#allocation73_spill] sm:$0xff] }
 0x67c   : > { %v16853_v38 = vmax.f32 %v16852_v56, 0.0  ;;  %v16870_v56 = vld [vmem:[#allocation425_spill] sm:$0xff] }
 0x67e   : > { %v6799_v63 = vpack.i.bf16 %v16853_v38, %v16851_v36  ;;  %v6853_v36 = vpack.i.bf16 %v16869_v19, %v16867_v49  ;;  %v16871_v38 = vmax.f32 %v16870_v56, 0.0  ;;  %v16885_v49 = vld [vmem:[#allocation39_spill] sm:$0xff]  ;;  %v16889_v56 = vld [vmem:[#allocation140_spill] sm:$0xff] }
 0x67f   : > { %v16886_v54 = vmax.f32 %v16885_v49, 0.0  ;;  %v16900_v49 = vld [vmem:[#allocation156_spill] sm:$0xff] }
 0x680   : > { %6884 = vxpose.xlu2.b32.cont [4/16] (narrow) %v6883_v53, 32  ;;  %v6885_v32 = vpack.i.bf16 %v16873_v15, %v16871_v38  ;;  %v16880_v53 = vld [vmem:[#allocation363_spill] sm:$0xff]  ;;  %v16890_v38 = vld [vmem:[#allocation106_spill] sm:$0xff] }
 0x681   : > { %6798 = vxpose.xlu0.b32.cont [13/16] (narrow) %v6797_v9, 32  ;;  %v16862_v9 = vld [vmem:[#allocation38_spill] sm:$0xff]  ;;  %vm4184_vm1 = vcmp.ge.f32.partialorder %v16890_v38, 0.0  ;;  %v16904_v38 = vld [vmem:[#allocation41_spill] sm:$0xff] }
 0x682   : > { %v16863_v61 = vmax.f32 %v16862_v9, 0.0  ;;  %v16881_v9 = vmax.f32 %v16880_v53, 0.0  ;;  %v16898_v53 = vld [vmem:[#allocation123_spill] sm:$0xff]  ;;  %v16905_v58 = vmax.f32 %v16904_v38, 0.0 }
 0x683   : > { %6850 = vxpose.xlu1.b32.cont [13/16] (narrow) %v6849_v33, 32  ;;  %v16864_v33 = vld [vmem:[#allocation76_spill] sm:$0xff] }
 0x684   : > { %v16865_v34 = vmax.f32 %v16864_v33, 0.0  ;;  %v16882_v33 = vld [vmem:[#allocation120_spill] sm:$0xff] }
 0x685   : > { %6981 = vrcp.f32 %v16882_v33  ;;  %v16899_v33 = vld [vmem:[#allocation110_spill] sm:$0xff] }
 0x686   : > { %v6801_v50 = vpack.i.bf16 %v16865_v34, %v16863_v61  ;;  %v6855_v61 = vpack.i.bf16 %v16881_v9, %v16879_v55  ;;  %v16883_v34 = vld [vmem:[#allocation435_spill] sm:$0xff]  ;;  %v16897_v55 = vld [vmem:[#allocation118_spill] sm:$0xff]  ;;  %v4327_v9 = vsel %vm4183_vm2, 1.0, %v16898_v53  ;;  %vm4185_vm3 = vcmp.ge.f32.partialorder %v16899_v33, 0.0 }
 0x687   : > { %v16884_v25 = vmax.f32 %v16883_v34, 0.0  ;;  %v16908_v53 = vld [vmem:[#allocation298_spill] sm:$0xff] }
 0x688   : > { %6886 = vxpose.xlu2.b32.cont [5/16] (narrow) %v6885_v32, 32  ;;  %v16892_v32 = vld [vmem:[#allocation63_spill] sm:$0xff]  ;;  %v16911_v33 = vld [vmem:[#allocation134_spill] sm:$0xff] }
 0x689   : > { %6800 = vxpose.xlu0.b32.cont [14/16] (narrow) %v6799_v63, 32  ;;  %v16874_v63 = vld [vmem:[#allocation40_spill] sm:$0xff]  ;;  %v6887_v19 = vpack.i.bf16 %v16886_v54, %v16884_v25  ;;  %v16901_v54 = vld [vmem:[#allocation125_spill] sm:$0xff] }
 0x68a   : > { %v16875_v14 = vmax.f32 %v16874_v63, 0.0  ;;  %v16893_v63 = vmax.f32 %v16892_v32, 0.0 }
 0x68b   : > { %6852 = vxpose.xlu1.b32.cont [14/16] (narrow) %v6851_v21, 32  ;;  %v16876_v21 = vld [vmem:[#allocation79_spill] sm:$0xff]  ;;  %v6982_v15 = vpop.eup %6981 }
 0x68c   : > { %v16877_v22 = vmax.f32 %v16876_v21, 0.0 }
 0x68e   : > { %v6803_v23 = vpack.i.bf16 %v16877_v22, %v16875_v14  ;;  %v16894_v14 = vld [vmem:[#allocation112_spill] sm:$0xff] }
 0x68f   : > { %v16895_v21 = vmax.f32 %v16894_v14, 0.0 }
 0x690   : > { %6888 = vxpose.xlu2.b32.cont [6/16] (narrow) %v6887_v19, 32  ;;  %v4329_v19 = vsel %vm4185_vm3, 1.0, %v16901_v54  ;;  %v16913_v54 = vld [vmem:[#allocation117_spill] sm:$0xff] }
 0x691   : > { %6802 = vxpose.xlu0.b32.cont [15/16] (narrow) %v6801_v50, 32  ;;  %v16887_v50 = vld [vmem:[#allocation126_spill] sm:$0xff]  ;;  %v6929_v22 = vpack.i.bf16 %v16895_v21, %v16893_v63  ;;  %v16906_v63 = vld [vmem:[#allocation113_spill] sm:$0xff]  ;;  %v16907_v21 = vld [vmem:[#allocation147_spill] sm:$0xff]  ;;  %vm4187_vm5 = vcmp.ge.f32.partialorder %v16913_v54, 0.0 }
 0x692   : > { %6983 = vrcp.f32 %v16887_v50  ;;  %vm4186_vm4 = vcmp.ge.f32.partialorder %v16906_v63, 0.0 }
 0x693   : > { %6854 = vxpose.xlu1.b32.cont [15/16] (narrow) %v6853_v36, 32  ;;  %v16888_v36 = vld [vmem:[#allocation127_spill] sm:$0xff] }
 0x694   : > { %6985 = vrcp.f32 %v16888_v36  ;;  %v16902_v36 = vld [vmem:[#allocation448_spill] sm:$0xff] }
 0x695   : > { %6987 = vrcp.f32 %v16889_v56  ;;  %v16903_v56 = vmax.f32 %v16902_v36, 0.0 }
 0x696   : > { %6989 = vrcp.f32 %v16896_v52 }
 0x697   : > { %6991 = vrcp.f32 %v16900_v49  ;;  %v6889_v32 = vpack.i.bf16 %v16905_v58, %v16903_v56  ;;  %v4330_v49 = vsel %vm4186_vm4, 1.0, %v16911_v33  ;;  %v16914_v56 = vld [vmem:[#allocation154_spill] sm:$0xff]  ;;  %v16921_v33 = vld [vmem:[#allocation143_spill] sm:$0xff] }
 0x698   : > { %v16917_v58 = vld [vmem:[#allocation142_spill] sm:$0xff] }
 0x699   : > { %6804 = vxpose.xlu0.b32.end [16/16] (narrow) %v6803_v23, 32  ;;  %v4328_v23 = vsel %vm4184_vm1, 1.0, %v16897_v55  ;;  %6890 = vxpose.xlu2.b32.cont [7/16] (narrow) %v6889_v32, 32  ;;  %v4331_v63 = vsel %vm4187_vm5, 1.0, %v16917_v58  ;;  %v16920_v32 = vld [vmem:[#allocation167_spill] sm:$0xff]  ;;  %vm4200_vm1 = vcmp.ge.f32.partialorder %v17012_v8, 0.0 }
 0x69a   : > { %v4616_v34 = vmul.f32 %v6982_v15, %v4328_v23  ;;  %v16909_v15 = vmax.f32 %v16908_v53, 0.0  ;;  %v16910_v23 = vld [vmem:[#allocation169_spill] sm:$0xff] }
 0x69b   : > { %6856 = vxpose.xlu1.b32.end [16/16] (narrow) %v6855_v61, 32  ;;  %v6984_v61 = vpop.eup %6983  ;;  %6993 = vrcp.f32 %v16910_v23 }
 0x69c   : > { %v6986_v25 = vpop.eup %6985  ;;  %v4615_v50 = vmul.f32 %v6984_v61, %v4327_v9  ;;  %v4760_v52 = vmul.f32 %v4616_v34, %v16907_v21  ;;  %v16912_v9 = vld [vmem:[#allocation152_spill] sm:$0xff] }
 0x69d   : > { %v4617_v14 = vmul.f32 %v6986_v25, %v4329_v19  ;;  %v6988_v55 = vpop.eup %6987  ;;  %v16915_v25 = vld [vmem:[#allocation137_spill] sm:$0xff]  ;;  %v16918_v21 = vld [vmem:[#allocation136_spill] sm:$0xff] }
 0x69e   : > { %v4759_v61 = vmul.f32 %v4615_v50, %v16912_v9  ;;  %v4618_v36 = vmul.f32 %v6988_v55, %v4330_v49  ;;  %v12721_v19 = vsub.f32 %v4760_v52, %v16915_v25  ;;  %v6990_v34 = vpop.eup %6989  ;;  %v16922_v49 = vld [vmem:[#allocation65_spill] sm:$0xff]  ;;  %v16924_v9 = vld [vmem:[#allocation116_spill] sm:$0xff]  ;;  %v16926_v25 = vld [vmem:[#allocation179_spill] sm:$0xff] }
 0x69f   : > { %v4761_v38 = vmul.f32 %v4617_v14, %v16914_v56  ;;  %v4619_v50 = vmul.f32 %v6990_v34, %v4331_v63  ;;  %v6992_v14 = vpop.eup %6991  ;;  %v16923_v52 = vmax.f32 %v16922_v49, 0.0  ;;  %v16925_v54 = vmax.f32 %v16924_v9, 0.0  ;;  %v16932_v49 = vld [vmem:[#allocation144_spill] sm:$0xff] }
 0x6a0   : > { %v12726_v53 = vsub.f32 %v4759_v61, %v16918_v21  ;;  %v4762_v23 = vmul.f32 %v4618_v36, %v16920_v32  ;;  %v16928_v21 = vld [vmem:[#allocation130_spill] sm:$0xff] }
 0x6a1   : > { %6930 = vxpose.xlu0.b32.start [1/16] (narrow) %v6929_v22, 32  ;;  %v16916_v22 = vld [vmem:[#allocation178_spill] sm:$0xff]  ;;  %v12731_v55 = vsub.f32 %v4761_v38, %v16921_v33  ;;  %v6931_v56 = vpack.i.bf16 %v16925_v54, %v16923_v52  ;;  %vm4189_vm7 = vcmp.ge.f32.partialorder %v16928_v21, 0.0  ;;  %v6994_v38 = vpop.eup %6993  ;;  %v16933_v54 = vld [vmem:[#allocation132_spill] sm:$0xff] }
 0x6a2   : > { %6995 = vrcp.f32 %v16916_v22  ;;  %v16927_v22 = vld [vmem:[#allocation151_spill] sm:$0xff]  ;;  %v5609_v61 = vadd.f32 %v12721_v19, %v12726_v53  ;;  %v16929_v36 = vld [vmem:[#allocation174_spill] sm:$0xff]  ;;  %v12746_v9 = vsub.f32 %v4762_v23, %v16932_v49  ;;  %v16942_v23 = vld [vmem:[#allocation172_spill] sm:$0xff] }
 0x6a3   : > { %5307 = vxpose.xlu1.b32.start [1/16] (narrow) %v16909_v15, 32  ;;  %v16919_v15 = vld [vmem:[#allocation121_spill] sm:$0xff]  ;;  %6997 = vrcp.f32 %v16926_v25  ;;  %v4763_v63 = vmul.f32 %v4619_v50, %v16929_v36  ;;  %v16931_v32 = vld [vmem:[#allocation166_spill] sm:$0xff]  ;;  %v16934_v25 = vmax.f32 %v16933_v54, 0.0  ;;  %v16939_v36 = vld [vmem:[#allocation312_spill] sm:$0xff]  ;;  %v4334_v49 = vsel %vm4190_vm8, 1.0, %v16942_v23 }
 0x6a4   : > { %vm4188_vm6 = vcmp.ge.f32.partialorder %v16919_v15, 0.0  ;;  %v16930_v15 = vld [vmem:[#allocation185_spill] sm:$0xff]  ;;  %v4333_v33 = vsel %vm4189_vm7, 1.0, %v16931_v32  ;;  %v5610_v52 = vadd.f32 %v5609_v61, %v12731_v55  ;;  %v16941_v32 = vld [vmem:[#allocation196_spill] sm:$0xff] }
 0x6a5   : > { %v4332_v58 = vsel %vm4188_vm6, 1.0, %v16927_v22  ;;  %6999 = vrcp.f32 %v16930_v15  ;;  %v16935_v22 = vld [vmem:[#allocation43_spill] sm:$0xff]  ;;  %v16940_v15 = vmax.f32 %v16939_v36, 0.0  ;;  %v16943_v61 = vld [vmem:[#allocation160_spill] sm:$0xff]  ;;  %v16944_v54 = vld [vmem:[#allocation141_spill] sm:$0xff] }
 0x6a6   : > { %v4620_v34 = vmul.f32 %v6992_v14, %v4332_v58  ;;  %v16936_v13 = vmax.f32 %v16935_v22, 0.0  ;;  %v4621_v14 = vmul.f32 %v6994_v38, %v4333_v33  ;;  %v16938_v58 = vld [vmem:[#allocation186_spill] sm:$0xff]  ;;  %7001 = vrcp.f32 %v16941_v32  ;;  %v16948_v22 = vld [vmem:[#allocation165_spill] sm:$0xff] }
 0x6a7   : > { %v12760_v17 = vsub.f32 %v4763_v63, %v16943_v61  ;;  %vm4191_vm9 = vcmp.ge.f32.partialorder %v16944_v54, 0.0  ;;  %v5611_v36 = vadd.f32 %v5610_v52, %v12746_v9  ;;  %v16951_v63 = vld [vmem:[#allocation124_spill] sm:$0xff]  ;;  %v16953_v61 = vld [vmem:[#allocation146_spill] sm:$0xff]  ;;  %v16955_v54 = vld [vmem:[#allocation181_spill] sm:$0xff] }
 0x6a8   : > { %v6891_v0 = vpack.i.bf16 %v16936_v13, %v16934_v25  ;;  %v4764_v50 = vmul.f32 %v4620_v34, %v16938_v58  ;;  %v6996_v21 = vpop.eup %6995  ;;  %v4765_v38 = vmul.f32 %v4621_v14, %v16945_v60  ;;  %v16946_v34 = vld [vmem:[#allocation197_spill] sm:$0xff]  ;;  %v16952_v23 = vmax.f32 %v16951_v63, 0.0  ;;  %v16959_v63 = vld [vmem:[#allocation214_spill] sm:$0xff] }
 0x6a9   : > { %6932 = vxpose.xlu0.b32.cont [2/16] (narrow) %v6931_v56, 32  ;;  %v4622_v13 = vmul.f32 %v6996_v21, %v4334_v49  ;;  %v6998_v33 = vpop.eup %6997  ;;  %7003 = vrcp.f32 %v16946_v34  ;;  %v16947_v56 = vld [vmem:[#allocation173_spill] sm:$0xff]  ;;  %vm4192_vm10 = vcmp.ge.f32.partialorder %v16953_v61, 0.0  ;;  %v16956_v34 = vld [vmem:[#allocation210_spill] sm:$0xff] }
 0x6aa   : > { %6892 = vxpose.xlu2.b32.cont [8/16] (narrow) %v6891_v0, 32  ;;  %v4335_v25 = vsel %vm4191_vm9, 1.0, %v16947_v56  ;;  %v12767_v58 = vsub.f32 %v4764_v50, %v16948_v22  ;;  %v16954_v14 = vld [vmem:[#allocation205_spill] sm:$0xff]  ;;  %v4336_v60 = vsel %vm4192_vm10, 1.0, %v16955_v54  ;;  %v5612_v50 = vadd.f32 %v5611_v36, %v12760_v17  ;;  %v16957_v22 = vld [vmem:[#allocation155_spill] sm:$0xff] }
 0x6ab   : > { %5308 = vxpose.xlu1.b32.cont [2/16] (narrow) %v16940_v15, 32  ;;  %v16949_v15 = vld [vmem:[#allocation69_spill] sm:$0xff]  ;;  %v4623_v21 = vmul.f32 %v6998_v33, %v4335_v25  ;;  %v7000_v49 = vpop.eup %6999  ;;  %7005 = vrcp.f32 %v16954_v14  ;;  %v4766_v56 = vmul.f32 %v4622_v13, %v16956_v34  ;;  %vm4193_vm11 = vcmp.ge.f32.partialorder %v16957_v22, 0.0 }
 0x6ac   : > { %v16950_v32 = vmax.f32 %v16949_v15, 0.0  ;;  %v4624_v52 = vmul.f32 %v7000_v49, %v4336_v60  ;;  %v7002_v40 = vpop.eup %7001  ;;  %7007 = vrcp.f32 %v16959_v63  ;;  %v16961_v33 = vld [vmem:[#allocation177_spill] sm:$0xff]  ;;  %v5613_v61 = vadd.f32 %v5612_v50, %v12767_v58  ;;  %v16970_v63 = vld [vmem:[#allocation192_spill] sm:$0xff] }
 0x6ad   : > { %v4767_v15 = vmul.f32 %v4623_v21, %v16958_v11  ;;  %v12784_v25 = vsub.f32 %v4765_v38, %v16961_v33  ;;  %v16962_v14 = vld [vmem:[#allocation133_spill] sm:$0xff]  ;;  %v16967_v11 = vld [vmem:[#allocation324_spill] sm:$0xff]  ;;  %v4338_v38 = vsel %vm4194_vm12, 1.0, %v16970_v63 }
 0x6ae   : > { %v6933_v0 = vpack.i.bf16 %v16952_v23, %v16950_v32  ;;  %v16960_v32 = vld [vmem:[#allocation190_spill] sm:$0xff]  ;;  %v16963_v54 = vmax.f32 %v16962_v14, 0.0  ;;  %v16964_v13 = vld [vmem:[#allocation45_spill] sm:$0xff]  ;;  %v16968_v21 = vmax.f32 %v16967_v11, 0.0 }
 0x6af   : > { %v4337_v23 = vsel %vm4193_vm11, 1.0, %v16960_v32  ;;  %v16965_v34 = vmax.f32 %v16964_v13, 0.0  ;;  %v7004_v60 = vpop.eup %7003  ;;  %v16969_v22 = vld [vmem:[#allocation221_spill] sm:$0xff]  ;;  %v16971_v32 = vld [vmem:[#allocation188_spill] sm:$0xff]  ;;  %v5614_v63 = vadd.f32 %v5613_v61, %v12784_v25 }
 0x6b0   : > { %v4625_v49 = vmul.f32 %v7002_v40, %v4337_v23  ;;  %7009 = vrcp.f32 %v16969_v22  ;;  %v12797_v33 = vsub.f32 %v4766_v56, %v16971_v32  ;;  %v16972_v50 = vld [vmem:[#allocation161_spill] sm:$0xff]  ;;  %v4626_v14 = vmul.f32 %v7004_v60, %v4338_v38  ;;  %v16978_v56 = vld [vmem:[#allocation170_spill] sm:$0xff]  ;;  %v16981_v38 = vld [vmem:[#allocation135_spill] sm:$0xff] }
 0x6b1   : > { %v6893_v36 = vpack.i.bf16 %v16965_v34, %v16963_v54  ;;  %6934 = vxpose.xlu0.b32.cont [3/16] (narrow) %v6933_v0, 32  ;;  %vm4195_vm13 = vcmp.ge.f32.partialorder %v16972_v50, 0.0  ;;  %v16973_v54 = vld [vmem:[#allocation219_spill] sm:$0xff]  ;;  %v12802_v40 = vsub.f32 %v4767_v15, %v16974_v42  ;;  %v7006_v0 = vpop.eup %7005  ;;  %v16975_v23 = vld [vmem:[#allocation229_spill] sm:$0xff]  ;;  %vm4196_vm14 = vcmp.ge.f32.partialorder %v16978_v56, 0.0 }
 0x6b2   : > { %v4768_v13 = vmul.f32 %v4624_v52, %v16973_v54  ;;  %7011 = vrcp.f32 %v16975_v23  ;;  %v16976_v34 = vld [vmem:[#allocation199_spill] sm:$0xff]  ;;  %v7008_v32 = vpop.eup %7007  ;;  %v16982_v52 = vmax.f32 %v16981_v38, 0.0  ;;  %v16983_v15 = vld [vmem:[#allocation209_spill] sm:$0xff]  ;;  %v5615_v43 = vadd.f32 %v5614_v63, %v12797_v33  ;;  %v16984_v23 = vld [vmem:[#allocation176_spill] sm:$0xff] }
 0x6b3   : > { %5309 = vxpose.xlu1.b32.cont [3/16] (narrow) %v16968_v21, 32  ;;  %6894 = vxpose.xlu2.b32.cont [9/16] (narrow) %v6893_v36, 32  ;;  %v4339_v11 = vsel %vm4195_vm13, 1.0, %v16976_v34  ;;  %v16977_v21 = vld [vmem:[#allocation225_spill] sm:$0xff]  ;;  %v16979_v50 = vld [vmem:[#allocation71_spill] sm:$0xff]  ;;  %v4340_v42 = vsel %vm4196_vm14, 1.0, %v16983_v15 }
 0x6b4   : > { %v4769_v22 = vmul.f32 %v4625_v49, %v16977_v21  ;;  %v4627_v36 = vmul.f32 %v7006_v0, %v4339_v11  ;;  %v16980_v60 = vmax.f32 %v16979_v50, 0.0  ;;  %vm4197_vm15 = vcmp.ge.f32.partialorder %v16984_v23, 0.0  ;;  %v16986_v21 = vld [vmem:[#allocation208_spill] sm:$0xff]  ;;  %v16989_v38 = vld [vmem:[#allocation15_spill] sm:$0xff] }
 0x6b5   : > { %v4628_v34 = vmul.f32 %v7008_v32, %v4340_v42  ;;  %v4770_v49 = vmul.f32 %v4626_v14, %v16985_v31  ;;  %v12818_v61 = vsub.f32 %v4768_v13, %v16986_v21  ;;  %v16987_v0 = vld [vmem:[#allocation216_spill] sm:$0xff]  ;;  %v16991_v15 = vld [vmem:[#allocation47_spill] sm:$0xff]  ;;  %v16995_v42 = vld [vmem:[#allocation333_spill] sm:$0xff] }
 0x6b6   : > { %v6935_v54 = vpack.i.bf16 %v16982_v52, %v16980_v60  ;;  %v7010_v56 = vpop.eup %7009  ;;  %v4341_v11 = vsel %vm4197_vm15, 1.0, %v16987_v0  ;;  %v12822_v50 = vsub.f32 %v4769_v22, %v16988_v16  ;;  %v5616_v60 = vadd.f32 %v5615_v43, %v12802_v40  ;;  %v16993_v23 = vld [vmem:[#allocation184_spill] sm:$0xff]  ;;  %v16994_v31 = vld [vmem:[#allocation235_spill] sm:$0xff]  ;;  %v16997_v0 = vld [vmem:[#allocation222_spill] sm:$0xff] }
 0x6b7   : > { %v16990_v52 = vmax.f32 %v16989_v38, 0.0  ;;  %v16992_v63 = vmax.f32 %v16991_v15, 0.0  ;;  %vm4198_vm0 = vcmp.ge.f32.partialorder %v16993_v23, 0.0  ;;  %v4629_v32 = vmul.f32 %v7010_v56, %v4341_v11  ;;  %v16998_v22 = vld [vmem:[#allocation232_spill] sm:$0xff]  ;;  %v16999_v38 = vld [vmem:[#allocation241_spill] sm:$0xff]  ;;  %v17001_v56 = vld [vmem:[#allocation242_spill] sm:$0xff] }
 0x6b8   : > { %v4771_v14 = vmul.f32 %v4627_v36, %v16994_v31  ;;  %v7012_v13 = vpop.eup %7011  ;;  %v16996_v21 = vmax.f32 %v16995_v42, 0.0  ;;  %v4342_v16 = vsel %vm4198_vm0, 1.0, %v16997_v0  ;;  %7013 = vrcp.f32 %v16998_v22  ;;  %v17000_v15 = vld [vmem:[#allocation224_spill] sm:$0xff]  ;;  %v17002_v36 = vld [vmem:[#allocation253_spill] sm:$0xff]  ;;  %v17004_v31 = vld [vmem:[#allocation231_spill] sm:$0xff] }
 0x6b9   : > { %v6895_v3 = vpack.i.bf16 %v16992_v63, %v16990_v52  ;;  %6936 = vxpose.xlu0.b32.cont [4/16] (narrow) %v6935_v54, 32  ;;  %v4630_v43 = vmul.f32 %v7012_v13, %v4342_v16  ;;  %v4772_v18 = vmul.f32 %v4628_v34, %v16999_v38  ;;  %v4914_v52 = vsub.f32 %v4770_v49, %v17000_v15  ;;  %v17003_v54 = vld [vmem:[#allocation247_spill] sm:$0xff]  ;;  %v17010_v49 = vld [vmem:[#allocation252_spill] sm:$0xff] }
 0x6ba   : > { %v5617_v63 = vadd.f32 %v5616_v60, %v12818_v61  ;;  %7015 = vrcp.f32 %v17001_v56  ;;  %v4773_v23 = vmul.f32 %v4629_v32, %v17003_v54  ;;  %v4915_v42 = vsub.f32 %v4771_v14, %v17004_v31  ;;  %v17005_v0 = vld [vmem:[#allocation75_spill] sm:$0xff]  ;;  %v17014_v14 = vld [vmem:[#allocation193_spill] sm:$0xff]  ;;  %v17017_v54 = vld [vmem:[#allocation50_spill] sm:$0xff] }
 0x6bb   : > { %5310 = vxpose.xlu1.b32.cont [4/16] (narrow) %v16996_v21, 32  ;;  %6896 = vxpose.xlu2.b32.cont [10/16] (narrow) %v6895_v3, 32  ;;  %v4774_v11 = vmul.f32 %v4630_v43, %v17002_v36  ;;  %v17006_v22 = vmax.f32 %v17005_v0, 0.0  ;;  %v17007_v3 = vld [vmem:[#allocation145_spill] sm:$0xff]  ;;  %v17009_v34 = vld [vmem:[#allocation251_spill] sm:$0xff]  ;;  %vm4199_vm2 = vcmp.ge.f32.partialorder %v17014_v14, 0.0 }
 0x6bc   : > { %v5618_v21 = vadd.f32 %v5617_v63, %v12822_v50  ;;  %v17008_v13 = vmax.f32 %v17007_v3, 0.0  ;;  %7017 = vrcp.f32 %v17009_v34  ;;  %v17011_v60 = vld [vmem:[#allocation239_spill] sm:$0xff]  ;;  %v17015_v63 = vld [vmem:[#allocation17_spill] sm:$0xff]  ;;  %v17018_v31 = vmax.f32 %v17017_v54, 0.0  ;;  %v17038_v14 = vld [vmem:[#allocation226_spill] sm:$0xff] }
 0x6bd   : > { %v4918_v38 = vsub.f32 %v4774_v11, %v17010_v49  ;;  %v4916_v15 = vsub.f32 %v4772_v18, %v17011_v60  ;;  %v17013_v32 = vld [vmem:[#allocation255_spill] sm:$0xff]  ;;  %v17016_v36 = vmax.f32 %v17015_v63, 0.0  ;;  %v17024_v49 = vld [vmem:[#allocation237_spill] sm:$0xff]  ;;  %vm4203_vm5 = vcmp.ge.f32.partialorder %v17038_v14, 0.0  ;;  %v17060_v14 = vld [vmem:[#allocation278_spill] sm:$0xff] }
 0x6be   : > { %v6937_v16 = vpack.i.bf16 %v17008_v13, %v17006_v22  ;;  %v5619_v56 = vadd.f32 %v5618_v21, %v4914_v52  ;;  %v7014_v43 = vpop.eup %7013  ;;  %7019 = vrcp.f32 %v17013_v32  ;;  %v17019_v22 = vld [vmem:[#allocation246_spill] sm:$0xff]  ;;  %v17023_v34 = vld [vmem:[#allocation271_spill] sm:$0xff]  ;;  %v4344_v60 = vsel %vm4200_vm1, 1.0, %v17024_v49  ;;  %v17027_v54 = vld [vmem:[#allocation277_spill] sm:$0xff] }
 0x6bf   : > { %v6897_v0 = vpack.i.bf16 %v17018_v31, %v17016_v36  ;;  %5339 = vmatpush.msra.mxu0 %v4918_v38  ;;  %v4917_v3 = vsub.f32 %v4773_v23, %v17019_v22  ;;  %v17020_v13 = vld [vmem:[#allocation262_spill] sm:$0xff]  ;;  %v17025_v32 = vld [vmem:[#allocation275_spill] sm:$0xff]  ;;  %vm4213_vm8 = vcmp.ge.f32.partialorder %v17060_v14, 0.0  ;;  %vm4211_vm15 = vcmp.ge.f32.partialorder %v17076_v47, 0.0  ;;  %v17086_v47 = vld [vmem:[#allocation341_spill] sm:$0xff] }
 0x6c0   : > { %7021 = vrcp.f32 %v17020_v13  ;;  %v5620_v11 = vadd.f32 %v5619_v56, %v4915_v42  ;;  %v7016_v18 = vpop.eup %7015  ;;  %v17021_v21 = vld [vmem:[#allocation346_spill] sm:$0xff]  ;;  %v17026_v63 = vld [vmem:[#allocation211_spill] sm:$0xff]  ;;  %v17028_v56 = vld [vmem:[#allocation217_spill] sm:$0xff]  ;;  %vm4210_vm0 = vcmp.ge.f32.partialorder %v17082_v5, 0.0 }
 0x6c1   : > { %6938 = vxpose.xlu0.b32.cont [5/16] (narrow) %v6937_v16, 32  ;;  %v17022_v8 = vmax.f32 %v17021_v21, 0.0  ;;  %7023 = vrcp.f32 %v17023_v34  ;;  %5340 = vmatpush.msra.mxu0 %v4917_v3  ;;  %vm4201_vm3 = vcmp.ge.f32.partialorder %v17026_v63, 0.0  ;;  %vm4202_vm4 = vcmp.ge.f32.partialorder %v17028_v56, 0.0  ;;  %v17029_v16 = vld [vmem:[#allocation230_spill] sm:$0xff]  ;;  %v17030_v22 = vld [vmem:[#allocation319_spill] sm:$0xff] }
 0x6c2   : > { %7025 = vrcp.f32 %v17025_v32  ;;  %v5621_v36 = vadd.f32 %v5620_v11, %v4916_v15  ;;  %v7018_v23 = vpop.eup %7017  ;;  %v4343_v31 = vsel %vm4199_vm2, 1.0, %v17029_v16  ;;  %v4632_v13 = vmul.f32 %v7016_v18, %v4344_v60  ;;  %v17031_v21 = vld [vmem:[#allocation77_spill] sm:$0xff]  ;;  %v17033_v34 = vld [vmem:[#allocation159_spill] sm:$0xff]  ;;  %v17035_v11 = vld [vmem:[#allocation280_spill] sm:$0xff] }
 0x6c3   : > { %5311 = vxpose.xlu1.b32.cont [5/16] (narrow) %v17022_v8, 32  ;;  %6898 = vxpose.xlu2.b32.cont [11/16] (narrow) %v6897_v0, 32  ;;  %7027 = vrcp.f32 %v17027_v54  ;;  %v17032_v8 = vmax.f32 %v17031_v21, 0.0  ;;  %v17034_v49 = vmax.f32 %v17033_v34, 0.0  ;;  %v17036_v63 = vld [vmem:[#allocation245_spill] sm:$0xff]  ;;  %v4631_v60 = vmul.f32 %v7014_v43, %v4343_v31  ;;  %v17050_v31 = vld [vmem:[#allocation270_spill] sm:$0xff] }
 0x6c4   : > { %7029 = vrcp.f32 %v17030_v22  ;;  %5341 = vmatpush.msra.mxu0 %v4916_v15  ;;  %v7020_v0 = vpop.eup %7019  ;;  %v4345_v54 = vsel %vm4201_vm3, 1.0, %v17036_v63  ;;  %v5622_v10 = vadd.f32 %v5621_v36, %v4917_v3  ;;  %v17039_v15 = vld [vmem:[#allocation250_spill] sm:$0xff]  ;;  %v17040_v22 = vld [vmem:[#allocation81_spill] sm:$0xff]  ;;  %v17047_v63 = vld [vmem:[#allocation52_spill] sm:$0xff] }
 0x6c5   : > { %v6939_v32 = vpack.i.bf16 %v17034_v49, %v17032_v8  ;;  %7031 = vrcp.f32 %v17035_v11  ;;  %v4346_v18 = vsel %vm4202_vm4, 1.0, %v17039_v15  ;;  %v17041_v21 = vmax.f32 %v17040_v22, 0.0  ;;  %v17042_v8 = vld [vmem:[#allocation171_spill] sm:$0xff] }
 0x6c6   : > { %v12877_v56 = vpop.eup %7021  ;;  %7033 = vrcp.f32 %v17037_v2  ;;  %5342 = vmatpush.msra.mxu0 %v4915_v42  ;;  %v17043_v34 = vmax.f32 %v17042_v8, 0.0  ;;  %v17044_v11 = vld [vmem:[#allocation287_spill] sm:$0xff]  ;;  %v12889_v3 = vadd.f32 %v5622_v10, %v4918_v38  ;;  %v17048_v48 = vmax.f32 %v17047_v63, 0.0  ;;  %v17051_v10 = vld [vmem:[#allocation357_spill] sm:$0xff]  ;;  %v17053_v8 = vld [vmem:[#allocation284_spill] sm:$0xff] }
 0x6c7   : > { %v12882_v16 = vpop.eup %7023  ;;  %7035 = vrcp.f32 %v17044_v11  ;;  %v17045_v2 = vld [vmem:[#allocation19_spill] sm:$0xff]  ;;  %v12898_v43 = vmul.f32 %v7018_v23, %v4345_v54  ;;  %v12901_v22 = vmul.f32 %v4632_v13, %v17050_v31  ;;  %v17052_v38 = vmax.f32 %v17051_v10, 0.0  ;;  %v17055_v11 = vld [vmem:[#allocation258_spill] sm:$0xff]  ;;  %v17061_v10 = vld [vmem:[#allocation300_spill] sm:$0xff] }
 0x6c8   : > { %v6941_v49 = vpack.i.bf16 %v17043_v34, %v17041_v21  ;;  %v12891_v36 = vpop.eup %7025  ;;  %v17046_v42 = vmax.f32 %v17045_v2, 0.0  ;;  %v17049_v15 = vld [vmem:[#allocation311_spill] sm:$0xff]  ;;  %5343 = vmatpush.msra.mxu0 %v4914_v52  ;;  %vm4214_vm6 = vcmp.ge.f32.partialorder %v17053_v8, 0.0  ;;  %v17054_v34 = vld [vmem:[#allocation294_spill] sm:$0xff]  ;;  %v12914_v52 = vmul.f32 %v7020_v0, %v4346_v18  ;;  %v17064_v8 = vld [vmem:[#allocation248_spill] sm:$0xff] }
 0x6c9   : > { %7037 = vrcp.f32 %v17049_v15  ;;  %v12903_v21 = vpop.eup %7027  ;;  %6940 = vxpose.xlu0.b32.cont [6/16] (narrow) %v6939_v32, 32  ;;  %v17056_v13 = vld [vmem:[#allocation315_spill] sm:$0xff]  ;;  %v17058_v32 = vld [vmem:[#allocation240_spill] sm:$0xff]  ;;  %v17063_v18 = vld [vmem:[#allocation310_spill] sm:$0xff]  ;;  %vm4208_vm10 = vcmp.ge.f32.partialorder %v17064_v8, 0.0 }
 0x6ca   : > { %v6899_v6 = vpack.i.bf16 %v17048_v48, %v17046_v42  ;;  %7039 = vrcp.f32 %v17054_v34  ;;  %v12912_v48 = vsel %vm4203_vm5, 1.0, %v17055_v11  ;;  %v7030_v23 = vpop.eup %7029  ;;  %v4358_v54 = vsel %vm4214_vm6, 1.0, %v17056_v13  ;;  %v17057_v2 = vld [vmem:[#allocation303_spill] sm:$0xff]  ;;  %5344 = vmatpush.msra.mxu0 %v12822_v50  ;;  %v17059_v42 = vld [vmem:[#allocation260_spill] sm:$0xff]  ;;  %v17065_v50 = vld [vmem:[#allocation238_spill] sm:$0xff] }
 0x6cb   : > { %5312 = vxpose.xlu1.b32.cont [6/16] (narrow) %v17052_v38, 32  ;;  %7041 = vrcp.f32 %v17057_v2  ;;  %vm4206_vm7 = vcmp.ge.f32.partialorder %v17058_v32, 0.0  ;;  %v12921_v63 = vmul.f32 %v4631_v60, %v17059_v42  ;;  %v7032_v15 = vpop.eup %7031  ;;  %v4646_v31 = vmul.f32 %v7030_v23, %v4358_v54  ;;  %v17062_v0 = vld [vmem:[#allocation243_spill] sm:$0xff]  ;;  %v17066_v34 = vld [vmem:[#allocation233_spill] sm:$0xff]  ;;  %v17069_v2 = vld [vmem:[#allocation272_spill] sm:$0xff] }
 0x6cc   : > { %6900 = vxpose.xlu2.b32.cont [12/16] (narrow) %v6899_v6, 32  ;;  %7043 = vrcp.f32 %v17061_v10  ;;  %vm4207_vm9 = vcmp.ge.f32.partialorder %v17062_v0, 0.0  ;;  %v7034_v6 = vpop.eup %7033  ;;  %v4357_v38 = vsel %vm4213_vm8, 1.0, %v17063_v18  ;;  %5345 = vmatpush.msra.mxu0 %v12818_v61  ;;  %vm4205_vm11 = vcmp.ge.f32.partialorder %v17065_v50, 0.0  ;;  %v17067_v11 = vld [vmem:[#allocation347_spill] sm:$0xff]  ;;  %v17068_v54 = vld [vmem:[#allocation273_spill] sm:$0xff] }
 0x6cd   : > { %vm4204_vm12 = vcmp.ge.f32.partialorder %v17066_v34, 0.0  ;;  %v7036_v60 = vpop.eup %7035  ;;  %v4790_v23 = vmul.f32 %v4646_v31, %v17067_v11  ;;  %v4645_v13 = vmul.f32 %v7034_v6, %v4357_v38  ;;  %vm4212_vm13 = vcmp.ge.f32.partialorder %v17068_v54, 0.0  ;;  %v17070_v10 = vld [vmem:[#allocation305_spill] sm:$0xff]  ;;  %v17071_v61 = vld [vmem:[#allocation256_spill] sm:$0xff]  ;;  %v17075_v54 = vld [vmem:[#allocation342_spill] sm:$0xff] }
 0x6ce   : > { %v4350_v42 = vsel %vm4206_vm7, 1.0, %v17069_v2  ;;  %v4356_v18 = vsel %vm4212_vm13, 1.0, %v17070_v10  ;;  %vm4209_vm14 = vcmp.ge.f32.partialorder %v17071_v61, 0.0  ;;  %5346 = vmatpush.msra.mxu0 %v12802_v40  ;;  %v17072_v8 = vld [vmem:[#allocation281_spill] sm:$0xff]  ;;  %v4351_v31 = vsel %vm4207_vm9, 1.0, %v17073_v28  ;;  %v17074_v38 = vld [vmem:[#allocation344_spill] sm:$0xff] }
 0x6cf   : > { %v7038_v14 = vpop.eup %7037  ;;  %v4352_v27 = vsel %vm4208_vm10, 1.0, %v17072_v8  ;;  %v12944_v11 = vsub.f32 %v4790_v23, %v17074_v38  ;;  %v4789_v32 = vmul.f32 %v4645_v13, %v17075_v54  ;;  %v17078_v61 = vmax.f32 %v17077_v4, 0.0  ;;  %v17081_v8 = vld [vmem:[#allocation299_spill] sm:$0xff]  ;;  %v17083_v28 = vld [vmem:[#allocation289_spill] sm:$0xff]  ;;  %v17084_v13 = vld [vmem:[#allocation372_spill] sm:$0xff] }
 0x6d0   : > { %v7040_v6 = vpop.eup %7039  ;;  %v4644_v2 = vmul.f32 %v7038_v14, %v4356_v18  ;;  %v17080_v40 = vmax.f32 %v17079_v45, 0.0  ;;  %v4355_v46 = vsel %vm4211_vm15, 1.0, %v17081_v8  ;;  %v4353_v0 = vsel %vm4209_vm14, 1.0, %v17083_v28  ;;  %5347 = vmatpush.msra.mxu0 %v12797_v33  ;;  %v17087_v4 = vld [vmem:[#allocation335_spill] sm:$0xff]  ;;  %v17089_v8 = vld [vmem:[#allocation269_spill] sm:$0xff] }
 0x6d1   : > { %v7042_v10 = vpop.eup %7041  ;;  %6942 = vxpose.xlu0.b32.cont [7/16] (narrow) %v6941_v49, 32  ;;  %v17085_v14 = vmax.f32 %v17084_v13, 0.0  ;;  %v12959_v18 = vsub.f32 %v4789_v32, %v17086_v47  ;;  %v17088_v54 = vld [vmem:[#allocation295_spill] sm:$0xff]  ;;  %5368 = vmatpush.msra.mxu1 %v12944_v11  ;;  %v4349_v33 = vsel %vm4205_vm11, 1.0, %v17089_v8  ;;  %v17090_v49 = vld [vmem:[#allocation265_spill] sm:$0xff]  ;;  %v17103_v8 = vld [vmem:[#allocation254_spill] sm:$0xff] }
 0x6d2   : > { %v6901_v35 = vpack.i.bf16 %v17080_v40, %v17078_v61  ;;  %v7044_v23 = vpop.eup %7043  ;;  %v4788_v38 = vmul.f32 %v4644_v2, %v17087_v4  ;;  %v4643_v45 = vmul.f32 %v7042_v10, %v4355_v46  ;;  %v4354_v61 = vsel %vm4210_vm0, 1.0, %v17088_v54  ;;  %v17091_v32 = vld [vmem:[#allocation337_spill] sm:$0xff]  ;;  %v17092_v2 = vld [vmem:[#allocation331_spill] sm:$0xff]  ;;  %5348 = vmatpush.msra.mxu0 %v12784_v25 }
 0x6d3   : > { %5313 = vxpose.xlu1.b32.cont [7/16] (narrow) %v17085_v14, 32  ;;  %v4642_v5 = vmul.f32 %v7044_v23, %v4354_v61  ;;  %v4641_v40 = vmul.f32 %v7040_v6, %v4353_v0  ;;  %v4348_v28 = vsel %vm4204_vm12, 1.0, %v17090_v49  ;;  %v4639_v10 = vmul.f32 %v7032_v15, %v4351_v31  ;;  %v17093_v23 = vld [vmem:[#allocation84_spill] sm:$0xff]  ;;  %v17095_v0 = vld [vmem:[#allocation189_spill] sm:$0xff]  ;;  %5369 = vmatpush.msra.mxu1 %v12959_v18  ;;  %v17097_v47 = vld [vmem:[#allocation327_spill] sm:$0xff] }
 0x6d4   : > { %6902 = vxpose.xlu2.b32.cont [13/16] (narrow) %v6901_v35, 32  ;;  %v12971_v13 = vsub.f32 %v4788_v38, %v17091_v32  ;;  %v4787_v46 = vmul.f32 %v4643_v45, %v17092_v2  ;;  %v4638_v35 = vmul.f32 %v12903_v21, %v4350_v42  ;;  %v17094_v6 = vmax.f32 %v17093_v23, 0.0  ;;  %v17098_v54 = vld [vmem:[#allocation279_spill] sm:$0xff]  ;;  %v17099_v61 = vld [vmem:[#allocation329_spill] sm:$0xff]  ;;  %5349 = vmatpush.msra.mxu0 %v12767_v58  ;;  %v17109_v2 = vld [vmem:[#allocation306_spill] sm:$0xff] }
 0x6d5   : > { %v17096_v14 = vmax.f32 %v17095_v0, 0.0  ;;  %v4786_v34 = vmul.f32 %v4642_v5, %v17097_v47  ;;  %v4640_v4 = vmul.f32 %v7036_v60, %v4352_v27  ;;  %v4777_v38 = vmul.f32 %v12898_v43, %v17098_v54  ;;  %v17100_v15 = vld [vmem:[#allocation259_spill] sm:$0xff]  ;;  %v17101_v27 = vld [vmem:[#allocation325_spill] sm:$0xff]  ;;  %v17110_v23 = vld [vmem:[#allocation282_spill] sm:$0xff] }
 0x6d6   : > { %v12985_v45 = vsub.f32 %v4787_v46, %v17099_v61  ;;  %v4637_v25 = vmul.f32 %v12891_v36, %v4349_v33  ;;  %v4635_v21 = vmul.f32 %v12877_v56, %v12912_v48  ;;  %v12993_v42 = vsub.f32 %v12901_v22, %v17100_v15  ;;  %5370 = vmatpush.msra.mxu1 %v12971_v13  ;;  %v17102_v43 = vld [vmem:[#allocation321_spill] sm:$0xff]  ;;  %v17104_v36 = vld [vmem:[#allocation87_spill] sm:$0xff]  ;;  %v17108_v22 = vld [vmem:[#allocation308_spill] sm:$0xff] }
 0x6d7   : > { %v6943_v50 = vpack.i.bf16 %v17096_v14, %v17094_v6  ;;  %v12997_v60 = vsub.f32 %v4786_v34, %v17101_v27  ;;  %v4785_v31 = vmul.f32 %v4641_v40, %v17102_v43  ;;  %v4636_v5 = vmul.f32 %v12882_v16, %v4348_v28  ;;  %v17106_v56 = vld [vmem:[#allocation203_spill] sm:$0xff]  ;;  %5350 = vmatpush.msra.mxu0 %v12760_v17  ;;  %v17115_v14 = vld [vmem:[#allocation314_spill] sm:$0xff]  ;;  %v17119_v54 = vld [vmem:[#allocation301_spill] sm:$0xff] }
 0x6d8   : > { %v13003_v58 = vsub.f32 %v12921_v63, %v17103_v8  ;;  %v17105_v33 = vmax.f32 %v17104_v36, 0.0  ;;  %v17107_v48 = vmax.f32 %v17106_v56, 0.0  ;;  %v4783_v32 = vmul.f32 %v4639_v10, %v17108_v22  ;;  %5371 = vmatpush.msra.mxu1 %v12985_v45  ;;  %v17111_v16 = vld [vmem:[#allocation23_spill] sm:$0xff]  ;;  %v17113_v63 = vld [vmem:[#allocation56_spill] sm:$0xff]  ;;  %v17116_v34 = vld [vmem:[#allocation414_spill] sm:$0xff] }
 0x6d9   : > { %v4782_v46 = vmul.f32 %v4638_v35, %v17109_v2  ;;  %v4778_v40 = vmul.f32 %v12914_v52, %v17110_v23  ;;  %v17112_v28 = vmax.f32 %v17111_v16, 0.0  ;;  %v17114_v6 = vmax.f32 %v17113_v63, 0.0  ;;  %6944 = vxpose.xlu0.b32.cont [8/16] (narrow) %v6943_v50, 32  ;;  %v17117_v35 = vld [vmem:[#allocation382_spill] sm:$0xff]  ;;  %v17120_v61 = vld [vmem:[#allocation291_spill] sm:$0xff]  ;;  %v17121_v27 = vld [vmem:[#allocation264_spill] sm:$0xff]  ;;  %5351 = vmatpush.msra.mxu0 %v12746_v9 }
 0x6da   : > { %v6945_v49 = vpack.i.bf16 %v17107_v48, %v17105_v33  ;;  %v4784_v47 = vmul.f32 %v4640_v4, %v17115_v14  ;;  %7045 = vrcp.f32 %v17116_v34  ;;  %v5624_v10 = vadd.f32 %v12889_v3, %v13003_v58  ;;  %5372 = vmatpush.msra.mxu1 %v12997_v60  ;;  %v17122_v4 = vld [vmem:[#allocation322_spill] sm:$0xff]  ;;  %v17123_v36 = vld [vmem:[#allocation296_spill] sm:$0xff]  ;;  %v17131_v23 = vld [vmem:[#allocation227_spill] sm:$0xff] }
 0x6db   : > { %v6903_v0 = vpack.i.bf16 %v17114_v6, %v17112_v28  ;;  %v17118_v17 = vmax.f32 %v17117_v35, 0.0  ;;  %v4781_v52 = vmul.f32 %v4637_v25, %v17119_v54  ;;  %v4779_v15 = vmul.f32 %v4635_v21, %v17120_v61  ;;  %v17124_v3 = vld [vmem:[#allocation410_spill] sm:$0xff]  ;;  %v17127_v25 = vld [vmem:[#allocation212_spill] sm:$0xff]  ;;  %v17135_v6 = vld [vmem:[#allocation313_spill] sm:$0xff]  ;;  %5352 = vmatpush.msra.mxu0 %v12731_v55 }
 0x6dc   : > { %v13028_v43 = vsub.f32 %v4777_v38, %v17121_v27  ;;  %v13032_v8 = vsub.f32 %v4785_v31, %v17122_v4  ;;  %v4780_v33 = vmul.f32 %v4636_v5, %v17123_v36  ;;  %7047 = vrcp.f32 %v17124_v3  ;;  %v17125_v56 = vld [vmem:[#allocation90_spill] sm:$0xff]  ;;  %v17129_v38 = vld [vmem:[#allocation92_spill] sm:$0xff]  ;;  %v17136_v14 = vld [vmem:[#allocation307_spill] sm:$0xff] }
 0x6dd   : > { %5314 = vxpose.xlu1.b32.cont [8/16] (narrow) %v17118_v17, 32  ;;  %6904 = vxpose.xlu2.b32.cont [14/16] (narrow) %v6903_v0, 32  ;;  %v5625_v50 = vadd.f32 %v5624_v10, %v12993_v42  ;;  %v17126_v48 = vmax.f32 %v17125_v56, 0.0  ;;  %v17128_v22 = vmax.f32 %v17127_v25, 0.0  ;;  %v17130_v2 = vmax.f32 %v17129_v38, 0.0  ;;  %v17133_v31 = vld [vmem:[#allocation686_spill] sm:$0xff] }
 0x6de   : > { %v17132_v16 = vmax.f32 %v17131_v23, 0.0  ;;  %7049 = vrcp.f32 %v17133_v31  ;;  %v17134_v5 = vld [vmem:[#allocation268_spill] sm:$0xff]  ;;  %5373 = vmatpush.msra.mxu1 %v13032_v8  ;;  %v13056_v0 = vsub.f32 %v4784_v47, %v17135_v6  ;;  %v13059_v34 = vsub.f32 %v4783_v32, %v17136_v14  ;;  %v17137_v10 = vld [vmem:[#allocation302_spill] sm:$0xff]  ;;  %v17139_v54 = vld [vmem:[#allocation375_spill] sm:$0xff]  ;;  %5353 = vmatpush.msra.mxu0 %v12721_v19 }
 0x6df   : > { %v13041_v21 = vpack.i.bf16 %v17128_v22, %v17126_v48  ;;  %v13052_v63 = vsub.f32 %v4778_v40, %v17134_v5  ;;  %v13062_v35 = vsub.f32 %v4782_v46, %v17137_v10  ;;  %v17138_v17 = vld [vmem:[#allocation406_spill] sm:$0xff]  ;;  %vm4230_vm1 = vcmp.ge.f32.partialorder %v17139_v54, 0.0  ;;  %v17140_v9 = vld [vmem:[#allocation283_spill] sm:$0xff]  ;;  %v17141_v40 = vld [vmem:[#allocation580_spill] sm:$0xff] }
 0x6e0   : > { %v13047_v28 = vpack.i.bf16 %v17132_v16, %v17130_v2  ;;  %7051 = vrcp.f32 %v17138_v17  ;;  %v13067_v61 = vsub.f32 %v4779_v15, %v17140_v9  ;;  %v5626_v47 = vadd.f32 %v5625_v50, %v13028_v43  ;;  %v7046_v27 = vpop.eup %7045  ;;  %5374 = vmatpush.msra.mxu1 %v13056_v0  ;;  %v17142_v32 = vld [vmem:[#allocation293_spill] sm:$0xff]  ;;  %v17143_v46 = vld [vmem:[#allocation290_spill] sm:$0xff]  ;;  %v17144_v3 = vld [vmem:[#allocation408_spill] sm:$0xff]  ;;  %5354 = vmatpush.msra.mxu0 %v12726_v53 }
 0x6e1   : > { %7053 = vrcp.f32 %v17141_v40  ;;  %v13074_v4 = vsub.f32 %v4781_v52, %v17142_v32  ;;  %v13077_v36 = vsub.f32 %v4780_v33, %v17143_v46  ;;  %v4374_v56 = vsel %vm4230_vm1, 1.0, %v17144_v3  ;;  %v17145_v48 = vld [vmem:[#allocation401_spill] sm:$0xff]  ;;  %v17148_v50 = vld [vmem:[#allocation566_spill] sm:$0xff]  ;;  %v17154_v5 = vld [vmem:[#allocation680_spill] sm:$0xff]  ;;  %6946 = vxpose.xlu0.b32.cont [9/16] (narrow) %v6945_v49, 32 }
 0x6e2   : > { %7055 = vrcp.f32 %v17145_v48  ;;  %v4662_v15 = vmul.f32 %v7046_v27, %v4374_v56  ;;  %v17146_v25 = vld [vmem:[#allocation369_spill] sm:$0xff]  ;;  %v7048_v22 = vpop.eup %7047  ;;  %5375 = vmatpush.msra.mxu1 %v13059_v34  ;;  %v17151_v33 = vld [vmem:[#allocation58_spill] sm:$0xff]  ;;  %v17156_v17 = vld [vmem:[#allocation391_spill] sm:$0xff]  ;;  %v5627_v32 = vadd.f32 %v5626_v47, %v13052_v63 }
 0x6e3   : > { %vm4229_vm2 = vcmp.ge.f32.partialorder %v17146_v25, 0.0  ;;  %v17147_v55 = vld [vmem:[#allocation637_spill] sm:$0xff]  ;;  %7057 = vrcp.f32 %v17148_v50  ;;  %v17152_v2 = vmax.f32 %v17151_v33, 0.0  ;;  %v17153_v16 = vld [vmem:[#allocation402_spill] sm:$0xff]  ;;  %v17157_v19 = vmax.f32 %v17156_v17, 0.0  ;;  %v17160_v56 = vld [vmem:[#allocation399_spill] sm:$0xff] }
 0x6e4   : > { %vm4246_vm3 = vcmp.ge.f32.partialorder %v17147_v55, 0.0  ;;  %v17149_v52 = vld [vmem:[#allocation25_spill] sm:$0xff]  ;;  %v4373_v31 = vsel %vm4229_vm2, 1.0, %v17153_v16  ;;  %v7050_v10 = vpop.eup %7049  ;;  %v17159_v27 = vld [vmem:[#allocation366_spill] sm:$0xff]  ;;  %5376 = vmatpush.msra.mxu1 %v13062_v35  ;;  %v17163_v50 = vld [vmem:[#allocation439_spill] sm:$0xff] }
 0x6e5   : > { %v17150_v38 = vmax.f32 %v17149_v52, 0.0  ;;  %v4390_v6 = vsel %vm4246_vm3, 1.0, %v17154_v5  ;;  %v17155_v14 = vld [vmem:[#allocation397_spill] sm:$0xff]  ;;  %5315 = vxpose.xlu1.b32.cont [9/16] (narrow) %v17157_v19, 32  ;;  %v4661_v40 = vmul.f32 %v7048_v22, %v4373_v31  ;;  %vm4228_vm4 = vcmp.ge.f32.partialorder %v17159_v27, 0.0  ;;  %v17161_v25 = vld [vmem:[#allocation558_spill] sm:$0xff] }
 0x6e6   : > { %7059 = vrcp.f32 %v17155_v14  ;;  %v17158_v54 = vld [vmem:[#allocation437_spill] sm:$0xff]  ;;  %v7052_v46 = vpop.eup %7051  ;;  %v4678_v3 = vmul.f32 %v7050_v10, %v4390_v6  ;;  %v4372_v48 = vsel %vm4228_vm4, 1.0, %v17160_v56  ;;  %vm4245_vm5 = vcmp.ge.f32.partialorder %v17161_v25, 0.0  ;;  %v17165_v33 = vld [vmem:[#allocation576_spill] sm:$0xff]  ;;  %5377 = vmatpush.msra.mxu1 %v13074_v4  ;;  %v17167_v5 = vld [vmem:[#allocation362_spill] sm:$0xff] }
 0x6e7   : > { %v6905_v23 = vpack.i.bf16 %v17152_v2, %v17150_v38  ;;  %v4806_v9 = vmul.f32 %v4662_v15, %v17158_v54  ;;  %v17162_v49 = vld [vmem:[#allocation557_spill] sm:$0xff]  ;;  %v7054_v55 = vpop.eup %7053  ;;  %v17164_v15 = vld [vmem:[#allocation436_spill] sm:$0xff]  ;;  %v4660_v38 = vmul.f32 %v7052_v46, %v4372_v48  ;;  %v4389_v47 = vsel %vm4245_vm5, 1.0, %v17165_v33  ;;  %v17169_v10 = vld [vmem:[#allocation434_spill] sm:$0xff] }
 0x6e8   : > { %7061 = vrcp.f32 %v17162_v49  ;;  %v4805_v22 = vmul.f32 %v4661_v40, %v17164_v15  ;;  %v7056_v2 = vpop.eup %7055  ;;  %v4677_v31 = vmul.f32 %v7054_v55, %v4389_v47  ;;  %vm4227_vm6 = vcmp.ge.f32.partialorder %v17167_v5, 0.0  ;;  %v17168_v6 = vld [vmem:[#allocation548_spill] sm:$0xff]  ;;  %v17170_v19 = vld [vmem:[#allocation433_spill] sm:$0xff]  ;;  %5378 = vmatpush.msra.mxu1 %v13077_v36  ;;  %v17175_v48 = vld [vmem:[#allocation602_spill] sm:$0xff] }
 0x6e9   : > { %6906 = vxpose.xlu2.b32.cont [15/16] (narrow) %v6905_v23, 32  ;;  %v13103_v52 = vsub.f32 %v4806_v9, %v17163_v50  ;;  %v17166_v23 = vld [vmem:[#allocation725_spill] sm:$0xff]  ;;  %vm4244_vm7 = vcmp.ge.f32.partialorder %v17168_v6, 0.0  ;;  %v7058_v14 = vpop.eup %7057  ;;  %v4804_v54 = vmul.f32 %v4660_v38, %v17170_v19  ;;  %v17171_v9 = vld [vmem:[#allocation394_spill] sm:$0xff]  ;;  %v17176_v50 = vld [vmem:[#allocation432_spill] sm:$0xff]  ;;  %v5628_v33 = vadd.f32 %v5627_v32, %v13067_v61  ;;  %6948 = vxpose.xlu0.b32.cont [10/16] (narrow) %v13041_v21, 32 }
 0x6ea   : > { %v4822_v16 = vmul.f32 %v4678_v3, %v17166_v23  ;;  %v13114_v17 = vsub.f32 %v4805_v22, %v17169_v10  ;;  %v4371_v53 = vsel %vm4227_vm6, 1.0, %v17171_v9  ;;  %v17172_v40 = vld [vmem:[#allocation565_spill] sm:$0xff]  ;;  %v4821_v25 = vmul.f32 %v4677_v31, %v17175_v48  ;;  %v17177_v22 = vld [vmem:[#allocation360_spill] sm:$0xff]  ;;  %5379 = vmatpush.msra.mxu1 %v13067_v61  ;;  %v17187_v32 = vld [vmem:[#allocation403_spill] sm:$0xff]  ;;  %v6805_v61 = vpop.trf.xlu0 }
 0x6eb   : > { %5397 = vmatpush.msra.mxu2 %v13103_v52  ;;  %v4388_v27 = vsel %vm4244_vm7, 1.0, %v17172_v40  ;;  %v17173_v3 = vld [vmem:[#allocation729_spill] sm:$0xff]  ;;  %v4659_v49 = vmul.f32 %v7056_v2, %v4371_v53  ;;  %v13126_v15 = vsub.f32 %v4804_v54, %v17176_v50  ;;  %vm4226_vm8 = vcmp.ge.f32.partialorder %v17177_v22, 0.0  ;;  %v17181_v2 = vld [vmem:[#allocation27_spill] sm:$0xff]  ;;  %v17183_v5 = vld [vmem:[#allocation60_spill] sm:$0xff] }
 0x6ec   : > { %v7060_v46 = vpop.eup %7059  ;;  %v13121_v56 = vsub.f32 %v4822_v16, %v17173_v3  ;;  %v4676_v55 = vmul.f32 %v7058_v14, %v4388_v27  ;;  %v17178_v38 = vld [vmem:[#allocation537_spill] sm:$0xff]  ;;  %v17182_v31 = vmax.f32 %v17181_v2, 0.0  ;;  %v17184_v6 = vmax.f32 %v17183_v5, 0.0  ;;  %v17186_v54 = vld [vmem:[#allocation392_spill] sm:$0xff]  ;;  %v17189_v40 = vld [vmem:[#allocation586_spill] sm:$0xff]  ;;  %5380 = vmatpush.msra.mxu1 %v13052_v63 }
 0x6ed   : > { %5398 = vmatpush.msra.mxu2 %v13114_v17  ;;  %vm4243_vm9 = vcmp.ge.f32.partialorder %v17178_v38, 0.0  ;;  %v17179_v23 = vld [vmem:[#allocation601_spill] sm:$0xff]  ;;  %v4370_v9 = vsel %vm4226_vm8, 1.0, %v17186_v54  ;;  %v17188_v53 = vmax.f32 %v17187_v32, 0.0  ;;  %v17190_v48 = vld [vmem:[#allocation556_spill] sm:$0xff]  ;;  %v5629_v50 = vadd.f32 %v5628_v33, %v13077_v36  ;;  %v17195_v36 = vld [vmem:[#allocation95_spill] sm:$0xff] }
 0x6ee   : > { %17174 = vst [vmem:[#allocation861_spill] sm:$0xff] %v13121_v56  ;;  %v7062_v47 = vpop.eup %7061  ;;  %5426 = vmatpush.msra.mxu3 %v13121_v56  ;;  %v13134_v16 = vsub.f32 %v4821_v25, %v17179_v23  ;;  %v6907_v14 = vpack.i.bf16 %v17184_v6, %v17182_v31  ;;  %v17185_v10 = vld [vmem:[#allocation429_spill] sm:$0xff]  ;;  %v4820_v27 = vmul.f32 %v4676_v55, %v17189_v40  ;;  %v4387_v25 = vsel %vm4243_vm9, 1.0, %v17190_v48  ;;  %v17194_v55 = vld [vmem:[#allocation427_spill] sm:$0xff]  ;;  %v17197_v63 = vld [vmem:[#allocation236_spill] sm:$0xff] }
 0x6ef   : > { %v4803_v19 = vmul.f32 %v4659_v49, %v17185_v10  ;;  %5316 = vxpose.xlu1.b32.cont [10/16] (narrow) %v17188_v53, 32  ;;  %v4658_v3 = vmul.f32 %v7060_v46, %v4370_v9  ;;  %5399 = vmatpush.msra.mxu2 %v13126_v15  ;;  %v17191_v49 = vld [vmem:[#allocation424_spill] sm:$0xff]  ;;  %v4675_v38 = vmul.f32 %v7062_v47, %v4387_v25  ;;  %v17192_v21 = vld [vmem:[#allocation585_spill] sm:$0xff]  ;;  %v6806_v2 = vunpack.i.l.bf16 %v6805_v61  ;;  %v17200_v10 = vld [vmem:[#allocation355_spill] sm:$0xff] }
 0x6f0   : > { %17180 = vst [vmem:[#allocation862_spill] sm:$0xff] %v13134_v16  ;;  %5427 = vmatpush.msra.mxu3 %v13134_v16  ;;  %v13155_v23 = vsub.f32 %v4820_v27, %v17192_v21  ;;  %v5630_v31 = vadd.f32 %v5629_v50, %v13074_v4  ;;  %v17196_v33 = vmax.f32 %v17195_v36, 0.0  ;;  %v17198_v5 = vmax.f32 %v17197_v63, 0.0  ;;  %5381 = vmatpush.msra.mxu1 %v13028_v43  ;;  %v17199_v47 = vld [vmem:[#allocation569_spill] sm:$0xff]  ;;  %v17202_v54 = vld [vmem:[#allocation98_spill] sm:$0xff]  ;;  %v17208_v48 = vld [vmem:[#allocation568_spill] sm:$0xff]  ;;  %v13498_v16 = vpop.trf.xlu1 }
 0x6f1   : > { %v13151_v22 = vsub.f32 %v4803_v19, %v17191_v49  ;;  %6908 = vxpose.xlu2.b32.end [16/16] (narrow) %v6907_v14, 32  ;;  %v4802_v46 = vmul.f32 %v4658_v3, %v17194_v55  ;;  %v4819_v14 = vmul.f32 %v4675_v38, %v17199_v47  ;;  %vm4225_vm10 = vcmp.ge.f32.partialorder %v17200_v10, 0.0  ;;  %v17201_v19 = vld [vmem:[#allocation390_spill] sm:$0xff]  ;;  %v17204_v32 = vld [vmem:[#allocation249_spill] sm:$0xff]  ;;  %5355 = vmatmul.f32.vlgmr.msra.gmra.mxu0 %v6806_v2  ;;  %v17207_v3 = vld [vmem:[#allocation523_spill] sm:$0xff] }
 0x6f2   : > { %17193 = vst [vmem:[#allocation863_spill] sm:$0xff] %v13155_v23  ;;  %v13163_v6 = vpack.i.bf16 %v17198_v5, %v17196_v33  ;;  %7063 = vrcp.f32 %v17201_v19  ;;  %v17203_v9 = vmax.f32 %v17202_v54, 0.0  ;;  %v17205_v4 = vmax.f32 %v17204_v32, 0.0  ;;  %5428 = vmatpush.msra.mxu3 %v13155_v23  ;;  %v17206_v40 = vld [vmem:[#allocation421_spill] sm:$0xff]  ;;  %5382 = vmatpush.msra.mxu1 %v12993_v42  ;;  %v17210_v50 = vld [vmem:[#allocation547_spill] sm:$0xff]  ;;  %v17211_v49 = vld [vmem:[#allocation62_spill] sm:$0xff] }
 0x6f3   : > { %5400 = vmatpush.msra.mxu2 %v13151_v22  ;;  %v13178_v27 = vsub.f32 %v4802_v46, %v17206_v40  ;;  %v5631_v43 = vadd.f32 %v5630_v31, %v13062_v35  ;;  %vm4242_vm11 = vcmp.ge.f32.partialorder %v17207_v3, 0.0  ;;  %v13184_v25 = vsub.f32 %v4819_v14, %v17208_v48  ;;  %v17212_v21 = vld [vmem:[#allocation101_spill] sm:$0xff]  ;;  %v17216_v2 = vld [vmem:[#allocation386_spill] sm:$0xff]  ;;  %v17220_v47 = vld [vmem:[#allocation388_spill] sm:$0xff]  ;;  %6950 = vxpose.xlu0.b32.cont [11/16] (narrow) %v13047_v28, 32 }
 0x6f4   : > { %v13174_v53 = vpack.i.bf16 %v17205_v4, %v17203_v9  ;;  %7065 = vrcp.f32 %v17210_v50  ;;  %vm4262_vm12 = vcmp.ge.f32.partialorder %v17211_v49, 0.0  ;;  %v6809_v38 = vunpack.i.h.bf16 %v6805_v61  ;;  %v17214_v36 = vld [vmem:[#allocation261_spill] sm:$0xff]  ;;  %v17217_v31 = vld [vmem:[#allocation478_spill] sm:$0xff]  ;;  %5383 = vmatpush.msra.mxu1 %v13003_v58  ;;  %v17218_v61 = vld [vmem:[#allocation544_spill] sm:$0xff]  ;;  %v13215_v4 = vpop.trf.xlu0 }
 0x6f5   : > { %17209 = vst [vmem:[#allocation864_spill] sm:$0xff] %v13184_v25  ;;  %v17213_v55 = vmax.f32 %v17212_v21, 0.0  ;;  %v17215_v46 = vmax.f32 %v17214_v36, 0.0  ;;  %5401 = vmatpush.msra.mxu2 %v13178_v27  ;;  %v5632_v35 = vadd.f32 %v5631_v43, %v13059_v34  ;;  %v4369_v42 = vsel %vm4225_vm10, 1.0, %v17216_v2  ;;  %5429 = vmatpush.msra.mxu3 %v13184_v25  ;;  %v17219_v5 = vld [vmem:[#allocation350_spill] sm:$0xff]  ;;  %v17221_v14 = vld [vmem:[#allocation505_spill] sm:$0xff] }
 0x6f6   : > { %7067 = vrcp.f32 %v17217_v31  ;;  %v4386_v63 = vsel %vm4242_vm11, 1.0, %v17218_v61  ;;  %vm4224_vm13 = vcmp.ge.f32.partialorder %v17219_v5, 0.0  ;;  %vm4241_vm14 = vcmp.ge.f32.partialorder %v17221_v14, 0.0  ;;  %v17222_v34 = vld [vmem:[#allocation417_spill] sm:$0xff]  ;;  %v17224_v54 = vld [vmem:[#allocation468_spill] sm:$0xff]  ;;  %v17226_v32 = vld [vmem:[#allocation195_spill] sm:$0xff]  ;;  %5384 = vmatmul.f32.vlgmr.msra.gmra.mxu1 %v6809_v38 }
 0x6f7   : > { %v13192_v33 = vpack.i.bf16 %v17215_v46, %v17213_v55  ;;  %7069 = vrcp.f32 %v17220_v47  ;;  %v17223_v19 = vmax.f32 %v17222_v34, 0.0  ;;  %v5633_v10 = vadd.f32 %v5632_v35, %v13056_v0  ;;  %v17225_v58 = vld [vmem:[#allocation532_spill] sm:$0xff]  ;;  %v17227_v43 = vld [vmem:[#allocation383_spill] sm:$0xff]  ;;  %v17228_v28 = vld [vmem:[#allocation469_spill] sm:$0xff] }
 0x6f8   : > { %v4406_v9 = vsel %vm4262_vm12, 1.0, %v17224_v54  ;;  %7071 = vrcp.f32 %v17225_v58  ;;  %vm4261_vm15 = vcmp.ge.f32.partialorder %v17226_v32, 0.0  ;;  %v7064_v40 = vpop.eup %7063  ;;  %v4368_v3 = vsel %vm4224_vm13, 1.0, %v17227_v43  ;;  %v17229_v48 = vld [vmem:[#allocation122_spill] sm:$0xff]  ;;  %v17230_v21 = vld [vmem:[#allocation528_spill] sm:$0xff]  ;;  %v17231_v55 = vld [vmem:[#allocation609_spill] sm:$0xff] }
 0x6f9   : > { %5317 = vxpose.xlu1.b32.cont [11/16] (narrow) %v17223_v19, 32  ;;  %7073 = vrcp.f32 %v17228_v28  ;;  %vm4278_vm0 = vcmp.ge.f32.partialorder %v17229_v48, 0.0  ;;  %v5634_v0 = vadd.f32 %v5633_v10, %v13032_v8  ;;  %v4657_v50 = vmul.f32 %v7064_v40, %v4369_v42  ;;  %v17232_v46 = vld [vmem:[#allocation464_spill] sm:$0xff]  ;;  %v17233_v2 = vld [vmem:[#allocation343_spill] sm:$0xff]  ;;  %v17237_v10 = vld [vmem:[#allocation374_spill] sm:$0xff] }
 0x6fa   : > { %v4385_v49 = vsel %vm4241_vm14, 1.0, %v17230_v21  ;;  %7075 = vrcp.f32 %v17231_v55  ;;  %v7066_v36 = vpop.eup %7065  ;;  %v4405_v35 = vsel %vm4261_vm15, 1.0, %v17232_v46  ;;  %vm4223_vm1 = vcmp.ge.f32.partialorder %v17233_v2, 0.0  ;;  %v17234_v31 = vld [vmem:[#allocation380_spill] sm:$0xff]  ;;  %v17238_v58 = vld [vmem:[#allocation490_spill] sm:$0xff]  ;;  %v17239_v32 = vld [vmem:[#allocation517_spill] sm:$0xff] }
 0x6fb   : > { %7077 = vrcp.f32 %v17234_v31  ;;  %v5635_v61 = vadd.f32 %v5634_v0, %v12997_v60  ;;  %v17235_v5 = vld [vmem:[#allocation420_spill] sm:$0xff]  ;;  %v4674_v14 = vmul.f32 %v7066_v36, %v4386_v63  ;;  %v4367_v54 = vsel %vm4223_vm1, 1.0, %v17237_v10  ;;  %v17240_v28 = vld [vmem:[#allocation419_spill] sm:$0xff]  ;;  %v17241_v60 = vld [vmem:[#allocation561_spill] sm:$0xff]  ;;  %6952 = vxpose.xlu0.b32.cont [12/16] (narrow) %v13163_v6, 32 }
 0x6fc   : > { %v7068_v38 = vpop.eup %7067  ;;  %v4801_v47 = vmul.f32 %v4657_v50, %v17235_v5  ;;  %v17236_v34 = vld [vmem:[#allocation604_spill] sm:$0xff]  ;;  %vm4240_vm2 = vcmp.ge.f32.partialorder %v17238_v58, 0.0  ;;  %7079 = vrcp.f32 %v17239_v32  ;;  %v17242_v21 = vld [vmem:[#allocation515_spill] sm:$0xff]  ;;  %v17253_v6 = vld [vmem:[#allocation546_spill] sm:$0xff] }
 0x6fd   : > { %v4422_v8 = vsel %vm4278_vm0, 1.0, %v17236_v34  ;;  %v7070_v42 = vpop.eup %7069  ;;  %v4694_v19 = vmul.f32 %v7068_v38, %v4406_v9  ;;  %v5636_v43 = vadd.f32 %v5635_v61, %v12985_v45  ;;  %v4818_v0 = vmul.f32 %v4674_v14, %v17241_v60  ;;  %v17243_v9 = vld [vmem:[#allocation175_spill] sm:$0xff]  ;;  %v17244_v46 = vld [vmem:[#allocation460_spill] sm:$0xff]  ;;  %v17250_v14 = vld [vmem:[#allocation514_spill] sm:$0xff] }
 0x6fe   : > { %v7072_v40 = vpop.eup %7071  ;;  %v13234_v48 = vsub.f32 %v4801_v47, %v17240_v28  ;;  %v4656_v50 = vmul.f32 %v7070_v42, %v4368_v3  ;;  %vm4260_vm3 = vcmp.ge.f32.partialorder %v17243_v9, 0.0  ;;  %7081 = vrcp.f32 %v17244_v46  ;;  %v17245_v31 = vld [vmem:[#allocation431_spill] sm:$0xff]  ;;  %v17247_v61 = vld [vmem:[#allocation560_spill] sm:$0xff]  ;;  %v17251_v42 = vld [vmem:[#allocation502_spill] sm:$0xff] }
 0x6ff   : > { %v7074_v63 = vpop.eup %7073  ;;  %v4838_v55 = vmul.f32 %v4694_v19, %v17242_v21  ;;  %v4673_v36 = vmul.f32 %v7072_v40, %v4385_v49  ;;  %v17246_v38 = vmax.f32 %v17245_v31, 0.0  ;;  %v5637_v45 = vadd.f32 %v5636_v43, %v12971_v13  ;;  %v17249_v3 = vld [vmem:[#allocation415_spill] sm:$0xff]  ;;  %v17254_v43 = vld [vmem:[#allocation409_spill] sm:$0xff]  ;;  %v17255_v58 = vld [vmem:[#allocation218_spill] sm:$0xff] }
 0x700   : > { %v7076_v2 = vpop.eup %7075  ;;  %v13245_v5 = vsub.f32 %v4818_v0, %v17247_v61  ;;  %v4800_v47 = vmul.f32 %v4656_v50, %v17249_v3  ;;  %v4384_v49 = vsel %vm4240_vm2, 1.0, %v17250_v14  ;;  %5402 = vmatpush.msra.mxu2 %v13234_v48  ;;  %v4693_v32 = vmul.f32 %v7074_v63, %v4405_v35  ;;  %v17256_v21 = vld [vmem:[#allocation545_spill] sm:$0xff]  ;;  %v17262_v31 = vld [vmem:[#allocation114_spill] sm:$0xff]  ;;  %v17265_v3 = vld [vmem:[#allocation276_spill] sm:$0xff] }
 0x701   : > { %5318 = vxpose.xlu1.b32.cont [12/16] (narrow) %v17246_v38, 32  ;;  %v7078_v34 = vpop.eup %7077  ;;  %v13253_v19 = vsub.f32 %v4838_v55, %v17251_v42  ;;  %v4817_v10 = vmul.f32 %v4673_v36, %v17253_v6  ;;  %v4710_v40 = vmul.f32 %v7076_v2, %v4422_v8  ;;  %v5638_v13 = vadd.f32 %v5637_v45, %v12959_v18  ;;  %v17258_v35 = vld [vmem:[#allocation509_spill] sm:$0xff]  ;;  %v17260_v36 = vld [vmem:[#allocation603_spill] sm:$0xff]  ;;  %v17263_v45 = vld [vmem:[#allocation104_spill] sm:$0xff] }
 0x702   : > { %17248 = vst [vmem:[#allocation865_spill] sm:$0xff] %v13245_v5  ;;  %5430 = vmatpush.msra.mxu3 %v13245_v5  ;;  %v13259_v28 = vsub.f32 %v4800_v47, %v17254_v43  ;;  %v4655_v60 = vmul.f32 %v7078_v34, %v4367_v54  ;;  %v4404_v0 = vsel %vm4260_vm3, 1.0, %v17255_v58  ;;  %v7080_v50 = vpop.eup %7079  ;;  %v4837_v8 = vmul.f32 %v4693_v32, %v17258_v35  ;;  %v17259_v63 = vld [vmem:[#allocation649_spill] sm:$0xff]  ;;  %v17261_v54 = vld [vmem:[#allocation411_spill] sm:$0xff]  ;;  %v17267_v34 = vld [vmem:[#allocation492_spill] sm:$0xff] }
 0x703   : > { %17252 = vst [vmem:[#allocation866_spill] sm:$0xff] %v13253_v19  ;;  %5455 = vmatpush.msrb.mxu0 %v13253_v19  ;;  %v13266_v55 = vsub.f32 %v4817_v10, %v17256_v21  ;;  %v4854_v18 = vmul.f32 %v4710_v40, %v17259_v63  ;;  %7083 = vrcp.f32 %v17260_v36  ;;  %v13272_v46 = vadd.f32 %v5638_v13, %v12944_v11  ;;  %v17269_v11 = vld [vmem:[#allocation636_spill] sm:$0xff]  ;;  %v17275_v58 = vld [vmem:[#allocation594_spill] sm:$0xff]  ;;  %v17276_v21 = vld [vmem:[#allocation473_spill] sm:$0xff] }
 0x704   : > { %5403 = vmatpush.msra.mxu2 %v13259_v28  ;;  %v4799_v9 = vmul.f32 %v4655_v60, %v17261_v54  ;;  %v4672_v2 = vmul.f32 %v7080_v50, %v4384_v49  ;;  %vm4277_vm4 = vcmp.ge.f32.partialorder %v17262_v31, 0.0  ;;  %v7082_v38 = vpop.eup %7081  ;;  %v17264_v61 = vmax.f32 %v17263_v45, 0.0  ;;  %v17271_v10 = vld [vmem:[#allocation376_spill] sm:$0xff]  ;;  %v17272_v49 = vld [vmem:[#allocation405_spill] sm:$0xff]  ;;  %v17274_v60 = vld [vmem:[#allocation338_spill] sm:$0xff]  ;;  %6954 = vxpose.xlu0.b32.cont [13/16] (narrow) %v13174_v53, 32 }
 0x705   : > { %17257 = vst [vmem:[#allocation867_spill] sm:$0xff] %v13266_v55  ;;  %v17266_v47 = vmax.f32 %v17265_v3, 0.0  ;;  %5431 = vmatpush.msra.mxu3 %v13266_v55  ;;  %v13285_v42 = vsub.f32 %v4837_v8, %v17267_v34  ;;  %v13288_v6 = vsub.f32 %v4854_v18, %v17269_v11  ;;  %7085 = vrcp.f32 %v17271_v10  ;;  %v17273_v40 = vld [vmem:[#allocation536_spill] sm:$0xff]  ;;  %v17277_v35 = vld [vmem:[#allocation503_spill] sm:$0xff]  ;;  %v17278_v8 = vld [vmem:[#allocation158_spill] sm:$0xff] }
 0x706   : > { %v13292_v32 = vsub.f32 %v4799_v9, %v17272_v49  ;;  %v4816_v13 = vmul.f32 %v4672_v2, %v17273_v40  ;;  %v4692_v43 = vmul.f32 %v7082_v38, %v4404_v0  ;;  %vm4222_vm5 = vcmp.ge.f32.partialorder %v17274_v60, 0.0  ;;  %v17279_v63 = vld [vmem:[#allocation443_spill] sm:$0xff]  ;;  %v17282_v54 = vld [vmem:[#allocation496_spill] sm:$0xff]  ;;  %v17284_v31 = vld [vmem:[#allocation109_spill] sm:$0xff] }
 0x707   : > { %v13281_v14 = vpack.i.bf16 %v17266_v47, %v17264_v61  ;;  %17268 = vst [vmem:[#allocation868_spill] sm:$0xff] %v13285_v42  ;;  %5456 = vmatpush.msrb.mxu0 %v13285_v42  ;;  %5484 = vmatpush.msrb.mxu1 %v13288_v6  ;;  %v4421_v50 = vsel %vm4277_vm4, 1.0, %v17275_v58  ;;  %vm4239_vm6 = vcmp.ge.f32.partialorder %v17276_v21, 0.0  ;;  %7087 = vrcp.f32 %v17277_v35  ;;  %v17281_v0 = vld [vmem:[#allocation535_spill] sm:$0xff]  ;;  %v17283_v2 = vld [vmem:[#allocation200_spill] sm:$0xff]  ;;  %v17285_v45 = vld [vmem:[#allocation370_spill] sm:$0xff] }
 0x708   : > { %17270 = vst [vmem:[#allocation869_spill] sm:$0xff] %v13288_v6  ;;  %vm4259_vm7 = vcmp.ge.f32.partialorder %v17278_v8, 0.0  ;;  %v17280_v18 = vmax.f32 %v17279_v63, 0.0  ;;  %v13306_v36 = vsub.f32 %v4816_v13, %v17281_v0  ;;  %v4836_v9 = vmul.f32 %v4692_v43, %v17282_v54  ;;  %5404 = vmatpush.msra.mxu2 %v13292_v32  ;;  %v17286_v3 = vld [vmem:[#allocation599_spill] sm:$0xff]  ;;  %v17287_v47 = vld [vmem:[#allocation336_spill] sm:$0xff]  ;;  %v17288_v34 = vld [vmem:[#allocation477_spill] sm:$0xff] }
 0x709   : > { %7089 = vrcp.f32 %v17283_v2  ;;  %vm4276_vm8 = vcmp.ge.f32.partialorder %v17284_v31, 0.0  ;;  %v7084_v38 = vpop.eup %7083  ;;  %v4366_v61 = vsel %vm4222_vm5, 1.0, %v17285_v45  ;;  %v6811_v53 = vunpack.i.l.bf16 %v13215_v4  ;;  %v17290_v49 = vld [vmem:[#allocation500_spill] sm:$0xff]  ;;  %v17291_v13 = vld [vmem:[#allocation373_spill] sm:$0xff]  ;;  %v17292_v60 = vld [vmem:[#allocation194_spill] sm:$0xff] }
 0x70a   : > { %5319 = vxpose.xlu1.b32.cont [13/16] (narrow) %v17280_v18, 32  ;;  %7091 = vrcp.f32 %v17286_v3  ;;  %vm4221_vm9 = vcmp.ge.f32.partialorder %v17287_v47, 0.0  ;;  %5432 = vmatpush.msra.mxu3 %v13306_v36  ;;  %v13318_v11 = vsub.f32 %v4836_v9, %v17288_v34  ;;  %v4709_v10 = vmul.f32 %v7084_v38, %v4421_v50  ;;  %v17293_v35 = vld [vmem:[#allocation592_spill] sm:$0xff]  ;;  %v17294_v18 = vld [vmem:[#allocation459_spill] sm:$0xff]  ;;  %v17298_v31 = vld [vmem:[#allocation149_spill] sm:$0xff] }
 0x70b   : > { %v4383_v40 = vsel %vm4239_vm6, 1.0, %v17290_v49  ;;  %7093 = vrcp.f32 %v17291_v13  ;;  %v7086_v43 = vpop.eup %7085  ;;  %v4403_v58 = vsel %vm4259_vm7, 1.0, %v17292_v60  ;;  %v4420_v63 = vsel %vm4276_vm8, 1.0, %v17293_v35  ;;  %5358 = vmatmul.f32.gmra.mxu0 %v6811_v53  ;;  %v17295_v0 = vld [vmem:[#allocation488_spill] sm:$0xff]  ;;  %v17296_v50 = vld [vmem:[#allocation635_spill] sm:$0xff]  ;;  %v17299_v45 = vld [vmem:[#allocation485_spill] sm:$0xff] }
 0x70c   : > { %17289 = vst [vmem:[#allocation870_spill] sm:$0xff] %v13318_v11  ;;  %vm4238_vm10 = vcmp.ge.f32.partialorder %v17294_v18, 0.0  ;;  %7095 = vrcp.f32 %v17295_v0  ;;  %5457 = vmatpush.msrb.mxu0 %v13318_v11  ;;  %v4853_v54 = vmul.f32 %v4709_v10, %v17296_v50  ;;  %v4654_v21 = vmul.f32 %v7086_v43, %v4366_v61  ;;  %v17297_v9 = vld [vmem:[#allocation367_spill] sm:$0xff]  ;;  %v17302_v49 = vld [vmem:[#allocation634_spill] sm:$0xff]  ;;  %v17304_v60 = vld [vmem:[#allocation404_spill] sm:$0xff]  ;;  %6956 = vxpose.xlu0.b32.cont [14/16] (narrow) %v13192_v33, 32 }
 0x70d   : > { %v4365_v2 = vsel %vm4221_vm9, 1.0, %v17297_v9  ;;  %vm4258_vm11 = vcmp.ge.f32.partialorder %v17298_v31, 0.0  ;;  %v7088_v38 = vpop.eup %7087  ;;  %v4382_v8 = vsel %vm4238_vm10, 1.0, %v17299_v45  ;;  %v17300_v3 = vld [vmem:[#allocation187_spill] sm:$0xff]  ;;  %v6814_v53 = vunpack.i.h.bf16 %v13215_v4  ;;  %v17305_v43 = vld [vmem:[#allocation596_spill] sm:$0xff]  ;;  %v17309_v4 = vld [vmem:[#allocation453_spill] sm:$0xff] }
 0x70e   : > { %7097 = vrcp.f32 %v17300_v3  ;;  %v17301_v47 = vld [vmem:[#allocation103_spill] sm:$0xff]  ;;  %v13339_v13 = vsub.f32 %v4853_v54, %v17302_v49  ;;  %v4798_v10 = vmul.f32 %v4654_v21, %v17304_v60  ;;  %v4671_v61 = vmul.f32 %v7088_v38, %v4383_v40  ;;  %v17307_v9 = vld [vmem:[#allocation332_spill] sm:$0xff]  ;;  %v17312_v40 = vld [vmem:[#allocation522_spill] sm:$0xff] }
 0x70f   : > { %vm4275_vm12 = vcmp.ge.f32.partialorder %v17301_v47, 0.0  ;;  %v7090_v34 = vpop.eup %7089  ;;  %7099 = vrcp.f32 %v17305_v43  ;;  %v17306_v0 = vld [vmem:[#allocation183_spill] sm:$0xff]  ;;  %5387 = vmatmul.f32.gmra.mxu1 %v6814_v53  ;;  %vm4220_vm13 = vcmp.ge.f32.partialorder %v17307_v9, 0.0  ;;  %v17308_v31 = vld [vmem:[#allocation368_spill] sm:$0xff]  ;;  %v17310_v54 = vmax.f32 %v17309_v4, 0.0  ;;  %v17357_v19 = vld [vmem:[#allocation97_spill] sm:$0xff] }
 0x710   : > { %17303 = vst [vmem:[#allocation871_spill] sm:$0xff] %v13339_v13  ;;  %v7092_v35 = vpop.eup %7091  ;;  %v4691_v18 = vmul.f32 %v7090_v34, %v4403_v58  ;;  %v4402_v50 = vsel %vm4258_vm11, 1.0, %v17306_v0  ;;  %7101 = vrcp.f32 %v17308_v31  ;;  %v17311_v3 = vld [vmem:[#allocation396_spill] sm:$0xff]  ;;  %v4815_v38 = vmul.f32 %v4671_v61, %v17312_v40  ;;  %5485 = vmatpush.msrb.mxu1 %v13339_v13  ;;  %v17314_v53 = vld [vmem:[#allocation491_spill] sm:$0xff]  ;;  %v17355_v13 = vld [vmem:[#allocation353_spill] sm:$0xff] }
 0x711   : > { %v7094_v45 = vpop.eup %7093  ;;  %v13350_v21 = vsub.f32 %v4798_v10, %v17311_v3  ;;  %v4708_v49 = vmul.f32 %v7092_v35, %v4420_v63  ;;  %v17313_v58 = vld [vmem:[#allocation452_spill] sm:$0xff]  ;;  %v17317_v10 = vld [vmem:[#allocation521_spill] sm:$0xff]  ;;  %vm4273_vm4 = vcmp.ge.f32.partialorder %v17357_v19, 0.0 }
 0x712   : > { %5320 = vxpose.xlu1.b32.cont [14/16] (narrow) %v17310_v54, 32  ;;  %vm4237_vm14 = vcmp.ge.f32.partialorder %v17313_v58, 0.0  ;;  %v7096_v34 = vpop.eup %7095  ;;  %v4835_v60 = vmul.f32 %v4691_v18, %v17314_v53  ;;  %v4653_v43 = vmul.f32 %v7094_v45, %v4365_v2  ;;  %v17315_v0 = vld [vmem:[#allocation588_spill] sm:$0xff]  ;;  %v13362_v4 = vsub.f32 %v4815_v38, %v17317_v10  ;;  %v17323_v58 = vld [vmem:[#allocation207_spill] sm:$0xff]  ;;  %v17325_v38 = vld [vmem:[#allocation629_spill] sm:$0xff] }
 0x713   : > { %v4419_v33 = vsel %vm4275_vm12, 1.0, %v17315_v0  ;;  %v17316_v31 = vld [vmem:[#allocation472_spill] sm:$0xff]  ;;  %5405 = vmatpush.msra.mxu2 %v13350_v21  ;;  %v4670_v35 = vmul.f32 %v7096_v34, %v4382_v8  ;;  %v4381_v53 = vsel %vm4237_vm14, 1.0, %v17323_v58  ;;  %v17328_v10 = vld [vmem:[#allocation129_spill] sm:$0xff]  ;;  %v13386_v58 = vpop.trf.xlu0 }
 0x714   : > { %7103 = vrcp.f32 %v17316_v31  ;;  %v17318_v63 = vld [vmem:[#allocation632_spill] sm:$0xff]  ;;  %v7098_v18 = vpop.eup %7097  ;;  %5433 = vmatpush.msra.mxu3 %v13362_v4  ;;  %vm4257_vm15 = vcmp.ge.f32.partialorder %v17328_v10, 0.0  ;;  %v17336_v10 = vld [vmem:[#allocation358_spill] sm:$0xff]  ;;  %6958 = vxpose.xlu0.b32.cont [15/16] (narrow) %v13281_v14, 32  ;;  %v17364_v19 = vld [vmem:[#allocation317_spill] sm:$0xff]  ;;  %v6816_v11 = vunpack.i.l.bf16 %v13386_v58  ;;  %v6819_v56 = vunpack.i.h.bf16 %v13386_v58 }
 0x715   : > { %v4852_v61 = vmul.f32 %v4708_v49, %v17318_v63  ;;  %v17319_v54 = vld [vmem:[#allocation364_spill] sm:$0xff]  ;;  %v7100_v31 = vpop.eup %7099  ;;  %v4690_v9 = vmul.f32 %v7098_v18, %v4402_v50  ;;  %v17333_v50 = vld [vmem:[#allocation481_spill] sm:$0xff]  ;;  %vm4218_vm5 = vcmp.ge.f32.partialorder %v17364_v19, 0.0 }
 0x716   : > { %v4364_v3 = vsel %vm4220_vm13, 1.0, %v17319_v54  ;;  %v17320_v2 = vld [vmem:[#allocation476_spill] sm:$0xff]  ;;  %v7102_v63 = vpop.eup %7101  ;;  %v4707_v54 = vmul.f32 %v7100_v31, %v4419_v33  ;;  %5361 = vmatmul.f32.gmra.mxu0 %v6816_v11  ;;  %v17393_v11 = vld [vmem:[#allocation694_spill] sm:$0xff] }
 0x717   : > { %v13369_v45 = vsub.f32 %v4835_v60, %v17320_v2  ;;  %v17322_v47 = vld [vmem:[#allocation400_spill] sm:$0xff]  ;;  %v13376_v49 = vsub.f32 %v4852_v61, %v17325_v38  ;;  %v17329_v60 = vld [vmem:[#allocation385_spill] sm:$0xff]  ;;  %v17332_v61 = vld [vmem:[#allocation507_spill] sm:$0xff]  ;;  %v4834_v18 = vmul.f32 %v4690_v9, %v17333_v50  ;;  %vm4254_vm11 = vcmp.ge.f32.partialorder %v17393_v11, 0.0  ;;  %5390 = vmatmul.f32.gmra.mxu1 %v6819_v56 }
 0x718   : > { %v4797_v40 = vmul.f32 %v4653_v43, %v17322_v47  ;;  %v17324_v0 = vld [vmem:[#allocation168_spill] sm:$0xff]  ;;  %v17331_v47 = vld [vmem:[#allocation593_spill] sm:$0xff]  ;;  %v17416_v11 = vld [vmem:[#allocation371_spill] sm:$0xff] }
 0x719   : > { %17321 = vst [vmem:[#allocation872_spill] sm:$0xff] %v13369_v45  ;;  %7105 = vrcp.f32 %v17324_v0  ;;  %v17327_v8 = vld [vmem:[#allocation508_spill] sm:$0xff]  ;;  %5458 = vmatpush.msrb.mxu0 %v13369_v45  ;;  %5486 = vmatpush.msrb.mxu1 %v13376_v49  ;;  %v4652_v0 = vmul.f32 %v7102_v63, %v4364_v3  ;;  %v17340_v3 = vld [vmem:[#allocation323_spill] sm:$0xff]  ;;  %v17341_v50 = vld [vmem:[#allocation621_spill] sm:$0xff] }
 0x71a   : > { %17326 = vst [vmem:[#allocation873_spill] sm:$0xff] %v13376_v49  ;;  %v4814_v34 = vmul.f32 %v4670_v35, %v17327_v8  ;;  %v13382_v43 = vsub.f32 %v4797_v40, %v17329_v60  ;;  %v17330_v2 = vld [vmem:[#allocation100_spill] sm:$0xff]  ;;  %7107 = vrcp.f32 %v17331_v47  ;;  %v7104_v38 = vpop.eup %7103  ;;  %v17334_v40 = vld [vmem:[#allocation626_spill] sm:$0xff]  ;;  %v17337_v60 = vld [vmem:[#allocation467_spill] sm:$0xff]  ;;  %vm4219_vm1 = vcmp.ge.f32.partialorder %v17340_v3, 0.0 }
 0x71b   : > { %vm4274_vm0 = vcmp.ge.f32.partialorder %v17330_v2, 0.0  ;;  %v4851_v8 = vmul.f32 %v4707_v54, %v17334_v40  ;;  %v17335_v33 = vld [vmem:[#allocation164_spill] sm:$0xff]  ;;  %7109 = vrcp.f32 %v17336_v10  ;;  %v13400_v47 = vsub.f32 %v4834_v18, %v17337_v60  ;;  %v17343_v54 = vld [vmem:[#allocation587_spill] sm:$0xff]  ;;  %v17347_v18 = vld [vmem:[#allocation458_spill] sm:$0xff] }
 0x71c   : > { %v13390_v35 = vsub.f32 %v4814_v34, %v17332_v61  ;;  %5406 = vmatpush.msra.mxu2 %v13382_v43  ;;  %v4401_v31 = vsel %vm4257_vm15, 1.0, %v17335_v33  ;;  %v17339_v34 = vld [vmem:[#allocation395_spill] sm:$0xff]  ;;  %v4669_v9 = vmul.f32 %v7104_v38, %v4381_v53  ;;  %v4418_v40 = vsel %vm4274_vm0, 1.0, %v17343_v54  ;;  %v17346_v10 = vld [vmem:[#allocation440_spill] sm:$0xff]  ;;  %v17353_v54 = vld [vmem:[#allocation286_spill] sm:$0xff] }
 0x71d   : > { %17338 = vst [vmem:[#allocation874_spill] sm:$0xff] %v13400_v47  ;;  %v4796_v61 = vmul.f32 %v4652_v0, %v17339_v34  ;;  %v13405_v6 = vsub.f32 %v4851_v8, %v17341_v50  ;;  %v17344_v33 = vld [vmem:[#allocation463_spill] sm:$0xff]  ;;  %vm4236_vm2 = vcmp.ge.f32.partialorder %v17346_v10, 0.0  ;;  %7111 = vrcp.f32 %v17347_v18  ;;  %5459 = vmatpush.msrb.mxu0 %v13400_v47  ;;  %v17348_v53 = vld [vmem:[#allocation384_spill] sm:$0xff]  ;;  %v17380_v45 = vld [vmem:[#allocation49_spill] sm:$0xff] }
 0x71e   : > { %5434 = vmatpush.msra.mxu3 %v13390_v35  ;;  %v17345_v14 = vmax.f32 %v17344_v33, 0.0  ;;  %v17349_v38 = vld [vmem:[#allocation495_spill] sm:$0xff]  ;;  %v17354_v33 = vmax.f32 %v17353_v54, 0.0  ;;  %v4363_v18 = vsel %vm4219_vm1, 1.0, %v17355_v13  ;;  %v17362_v13 = vld [vmem:[#allocation582_spill] sm:$0xff]  ;;  %v17378_v42 = vld [vmem:[#allocation584_spill] sm:$0xff] }
 0x71f   : > { %v7106_v63 = vpop.eup %7105  ;;  %17342 = vst [vmem:[#allocation875_spill] sm:$0xff] %v13405_v6  ;;  %v13416_v0 = vsub.f32 %v4796_v61, %v17348_v53  ;;  %v4813_v60 = vmul.f32 %v4669_v9, %v17349_v38  ;;  %v17350_v34 = vld [vmem:[#allocation727_spill] sm:$0xff]  ;;  %5487 = vmatpush.msrb.mxu1 %v13405_v6  ;;  %v17358_v61 = vld [vmem:[#allocation494_spill] sm:$0xff]  ;;  %v17360_v38 = vld [vmem:[#allocation457_spill] sm:$0xff]  ;;  %v17381_v47 = vmax.f32 %v17380_v45, 0.0 }
 0x720   : > { %5321 = vxpose.xlu1.b32.cont [15/16] (narrow) %v17345_v14, 32  ;;  %v4689_v8 = vmul.f32 %v7106_v63, %v4401_v31  ;;  %vm4256_vm3 = vcmp.ge.f32.partialorder %v17350_v34, 0.0  ;;  %v7108_v3 = vpop.eup %7107  ;;  %v17351_v2 = vld [vmem:[#allocation107_spill] sm:$0xff]  ;;  %v4380_v34 = vsel %vm4236_vm2, 1.0, %v17360_v38  ;;  %v17369_v38 = vld [vmem:[#allocation430_spill] sm:$0xff]  ;;  %v17373_v6 = vld [vmem:[#allocation620_spill] sm:$0xff] }
 0x721   : > { %v17352_v50 = vmax.f32 %v17351_v2, 0.0  ;;  %v17356_v49 = vld [vmem:[#allocation751_spill] sm:$0xff]  ;;  %5407 = vmatpush.msra.mxu2 %v13416_v0  ;;  %v13430_v31 = vsub.f32 %v4813_v60, %v17358_v61  ;;  %v4706_v53 = vmul.f32 %v7108_v3, %v4418_v40  ;;  %v7110_v2 = vpop.eup %7109  ;;  %v17365_v60 = vld [vmem:[#allocation466_spill] sm:$0xff]  ;;  %vm4235_vm6 = vcmp.ge.f32.partialorder %v17369_v38, 0.0  ;;  %v17401_v23 = vld [vmem:[#allocation608_spill] sm:$0xff] }
 0x722   : > { %7113 = vrcp.f32 %v17356_v49  ;;  %v17359_v9 = vld [vmem:[#allocation479_spill] sm:$0xff]  ;;  %v4651_v3 = vmul.f32 %v7110_v2, %v4363_v18  ;;  %v17376_v2 = vld [vmem:[#allocation737_spill] sm:$0xff] }
 0x723   : > { %v6959_v14 = vpack.i.bf16 %v17354_v33, %v17352_v50  ;;  %v4833_v63 = vmul.f32 %v4689_v8, %v17359_v9  ;;  %v17361_v50 = vld [vmem:[#allocation748_spill] sm:$0xff]  ;;  %v4417_v33 = vsel %vm4273_vm4, 1.0, %v17362_v13  ;;  %v17363_v49 = vld [vmem:[#allocation591_spill] sm:$0xff]  ;;  %5435 = vmatpush.msra.mxu3 %v13430_v31  ;;  %v17367_v8 = vld [vmem:[#allocation622_spill] sm:$0xff]  ;;  %v7112_v10 = vpop.eup %7111 }
 0x724   : > { %v4400_v54 = vsel %vm4256_vm3, 1.0, %v17361_v50  ;;  %7115 = vrcp.f32 %v17363_v49  ;;  %v4850_v40 = vmul.f32 %v4706_v53, %v17367_v8  ;;  %v17368_v9 = vld [vmem:[#allocation352_spill] sm:$0xff]  ;;  %v17370_v50 = vld [vmem:[#allocation451_spill] sm:$0xff]  ;;  %v17371_v13 = vld [vmem:[#allocation714_spill] sm:$0xff]  ;;  %v4668_v18 = vmul.f32 %v7112_v10, %v4380_v34 }
 0x725   : > { %v13442_v61 = vsub.f32 %v4833_v63, %v17365_v60  ;;  %7117 = vrcp.f32 %v17368_v9  ;;  %vm4255_vm7 = vcmp.ge.f32.partialorder %v17371_v13, 0.0  ;;  %v17372_v49 = vld [vmem:[#allocation93_spill] sm:$0xff]  ;;  %6960 = vxpose.xlu0.b32.end [16/16] (narrow) %v6959_v14, 32  ;;  %v17375_v60 = vld [vmem:[#allocation387_spill] sm:$0xff] }
 0x726   : > { %7119 = vrcp.f32 %v17370_v50  ;;  %vm4272_vm8 = vcmp.ge.f32.partialorder %v17372_v49, 0.0  ;;  %v13452_v63 = vsub.f32 %v4850_v40, %v17373_v6  ;;  %v4795_v53 = vmul.f32 %v4651_v3, %v17375_v60  ;;  %v17377_v9 = vld [vmem:[#allocation349_spill] sm:$0xff]  ;;  %v17382_v6 = vld [vmem:[#allocation378_spill] sm:$0xff]  ;;  %v17383_v40 = vld [vmem:[#allocation471_spill] sm:$0xff] }
 0x727   : > { %17366 = vst [vmem:[#allocation876_spill] sm:$0xff] %v13442_v61  ;;  %5460 = vmatpush.msrb.mxu0 %v13442_v61  ;;  %7121 = vrcp.f32 %v17376_v2  ;;  %v4362_v50 = vsel %vm4218_vm5, 1.0, %v17377_v9  ;;  %v17379_v14 = vld [vmem:[#allocation309_spill] sm:$0xff]  ;;  %v4812_v3 = vmul.f32 %v4668_v18, %v17383_v40  ;;  %v17385_v2 = vld [vmem:[#allocation734_spill] sm:$0xff]  ;;  %v17391_v13 = vld [vmem:[#allocation423_spill] sm:$0xff] }
 0x728   : > { %17374 = vst [vmem:[#allocation877_spill] sm:$0xff] %v13452_v63  ;;  %v7114_v8 = vpop.eup %7113  ;;  %7123 = vrcp.f32 %v17378_v42  ;;  %vm4217_vm9 = vcmp.ge.f32.partialorder %v17379_v14, 0.0  ;;  %5322 = vxpose.xlu1.b32.end [16/16] (narrow) %v17381_v47, 32  ;;  %5488 = vmatpush.msrb.mxu1 %v13452_v63  ;;  %v13466_v34 = vsub.f32 %v4795_v53, %v17382_v6  ;;  %v17384_v60 = vld [vmem:[#allocation449_spill] sm:$0xff]  ;;  %v4399_v9 = vsel %vm4255_vm7, 1.0, %v17385_v2  ;;  %v17386_v14 = vld [vmem:[#allocation574_spill] sm:$0xff] }
 0x729   : > { %v4688_v10 = vmul.f32 %v7114_v8, %v4400_v54  ;;  %v4379_v19 = vsel %vm4235_vm6, 1.0, %v17384_v60  ;;  %v4416_v45 = vsel %vm4272_vm8, 1.0, %v17386_v14  ;;  %v17387_v47 = vld [vmem:[#allocation340_spill] sm:$0xff]  ;;  %v17388_v6 = vld [vmem:[#allocation345_spill] sm:$0xff]  ;;  %v17389_v54 = vld [vmem:[#allocation470_spill] sm:$0xff]  ;;  %vm4234_vm10 = vcmp.ge.f32.partialorder %v17391_v13, 0.0 }
 0x72a   : > { %v7116_v42 = vpop.eup %7115  ;;  %v4361_v53 = vsel %vm4217_vm9, 1.0, %v17387_v47  ;;  %7125 = vrcp.f32 %v17388_v6  ;;  %5408 = vmatpush.msra.mxu2 %v13466_v34  ;;  %v13482_v38 = vsub.f32 %v4812_v3, %v17389_v54  ;;  %v17390_v8 = vld [vmem:[#allocation764_spill] sm:$0xff]  ;;  %v17392_v49 = vld [vmem:[#allocation442_spill] sm:$0xff]  ;;  %v17394_v14 = vld [vmem:[#allocation89_spill] sm:$0xff] }
 0x72b   : > { %v7118_v18 = vpop.eup %7117  ;;  %v4832_v40 = vmul.f32 %v4688_v10, %v17390_v8  ;;  %v4705_v60 = vmul.f32 %v7116_v42, %v4417_v33  ;;  %7127 = vrcp.f32 %v17392_v49  ;;  %vm4271_vm12 = vcmp.ge.f32.partialorder %v17394_v14, 0.0  ;;  %v17395_v6 = vld [vmem:[#allocation763_spill] sm:$0xff]  ;;  %v17398_v33 = vld [vmem:[#allocation726_spill] sm:$0xff]  ;;  %v17412_v13 = vld [vmem:[#allocation572_spill] sm:$0xff] }
 0x72c   : > { %v7120_v2 = vpop.eup %7119  ;;  %v4650_v63 = vmul.f32 %v7118_v18, %v4362_v50  ;;  %5436 = vmatpush.msra.mxu3 %v13482_v38  ;;  %v17397_v3 = vld [vmem:[#allocation619_spill] sm:$0xff]  ;;  %7129 = vrcp.f32 %v17398_v33  ;;  %v17400_v49 = vld [vmem:[#allocation578_spill] sm:$0xff]  ;;  %v4415_v56 = vsel %vm4271_vm12, 1.0, %v17412_v13  ;;  %v17419_v14 = vld [vmem:[#allocation428_spill] sm:$0xff] }
 0x72d   : > { %v7122_v47 = vpop.eup %7121  ;;  %v13491_v61 = vsub.f32 %v4832_v40, %v17395_v6  ;;  %v4849_v54 = vmul.f32 %v4705_v60, %v17397_v3  ;;  %v4667_v10 = vmul.f32 %v7120_v2, %v4379_v19  ;;  %v17399_v8 = vld [vmem:[#allocation379_spill] sm:$0xff]  ;;  %7131 = vrcp.f32 %v17400_v49  ;;  %v17403_v6 = vld [vmem:[#allocation462_spill] sm:$0xff]  ;;  %v17404_v3 = vld [vmem:[#allocation365_spill] sm:$0xff] }
 0x72e   : > { %v7124_v42 = vpop.eup %7123  ;;  %v4794_v50 = vmul.f32 %v4650_v63, %v17399_v8  ;;  %v4687_v18 = vmul.f32 %v7122_v47, %v4399_v9  ;;  %v17405_v63 = vld [vmem:[#allocation756_spill] sm:$0xff]  ;;  %v17406_v47 = vld [vmem:[#allocation438_spill] sm:$0xff]  ;;  %v17407_v8 = vld [vmem:[#allocation461_spill] sm:$0xff] }
 0x72f   : > { %17396 = vst [vmem:[#allocation878_spill] sm:$0xff] %v13491_v61  ;;  %5461 = vmatpush.msrb.mxu0 %v13491_v61  ;;  %v13502_v40 = vsub.f32 %v4849_v54, %v17401_v23  ;;  %v4811_v60 = vmul.f32 %v4667_v10, %v17403_v6  ;;  %v4704_v19 = vmul.f32 %v7124_v42, %v4416_v45  ;;  %v4378_v58 = vsel %vm4234_vm10, 1.0, %v17406_v47  ;;  %v17408_v23 = vld [vmem:[#allocation616_spill] sm:$0xff]  ;;  %v17409_v45 = vld [vmem:[#allocation723_spill] sm:$0xff]  ;;  %v17417_v47 = vld [vmem:[#allocation297_spill] sm:$0xff] }
 0x730   : > { %v7126_v2 = vpop.eup %7125  ;;  %v13506_v33 = vsub.f32 %v4794_v50, %v17404_v3  ;;  %v4831_v9 = vmul.f32 %v4687_v18, %v17405_v63  ;;  %v4398_v42 = vsel %vm4254_vm11, 1.0, %v17409_v45  ;;  %v17410_v18 = vld [vmem:[#allocation757_spill] sm:$0xff]  ;;  %v17413_v3 = vld [vmem:[#allocation334_spill] sm:$0xff]  ;;  %vm4216_vm13 = vcmp.ge.f32.partialorder %v17417_v47, 0.0  ;;  %v17422_v13 = vld [vmem:[#allocation456_spill] sm:$0xff] }
 0x731   : > { %17402 = vst [vmem:[#allocation879_spill] sm:$0xff] %v13502_v40  ;;  %5489 = vmatpush.msrb.mxu1 %v13502_v40  ;;  %v13514_v49 = vsub.f32 %v4811_v60, %v17407_v8  ;;  %v4848_v54 = vmul.f32 %v4704_v19, %v17408_v23  ;;  %v4649_v10 = vmul.f32 %v7126_v2, %v4361_v53  ;;  %v7128_v50 = vpop.eup %7127  ;;  %7133 = vrcp.f32 %v17413_v3  ;;  %v17414_v53 = vld [vmem:[#allocation607_spill] sm:$0xff]  ;;  %v17420_v45 = vld [vmem:[#allocation678_spill] sm:$0xff]  ;;  %v13544_v3 = vpop.trf.xlu0 }
 0x732   : > { %5409 = vmatpush.msra.mxu2 %v13506_v33  ;;  %v13522_v6 = vsub.f32 %v4831_v9, %v17410_v18  ;;  %v7130_v60 = vpop.eup %7129  ;;  %v4666_v63 = vmul.f32 %v7128_v50, %v4378_v58  ;;  %v17418_v23 = vld [vmem:[#allocation407_spill] sm:$0xff]  ;;  %7135 = vrcp.f32 %v17419_v14  ;;  %vm4253_vm15 = vcmp.ge.f32.partialorder %v17420_v45, 0.0  ;;  %v17423_v50 = vld [vmem:[#allocation721_spill] sm:$0xff] }
 0x733   : > { %5437 = vmatpush.msra.mxu3 %v13514_v49  ;;  %v13530_v19 = vsub.f32 %v4848_v54, %v17414_v53  ;;  %v4793_v2 = vmul.f32 %v4649_v10, %v17416_v11  ;;  %v7132_v8 = vpop.eup %7131  ;;  %v4686_v9 = vmul.f32 %v7130_v60, %v4398_v42  ;;  %vm4233_vm14 = vcmp.ge.f32.partialorder %v17418_v23, 0.0  ;;  %v17421_v18 = vld [vmem:[#allocation359_spill] sm:$0xff]  ;;  %v17424_v53 = vld [vmem:[#allocation753_spill] sm:$0xff]  ;;  %v17425_v60 = vld [vmem:[#allocation328_spill] sm:$0xff] }
 0x734   : > { %17411 = vst [vmem:[#allocation880_spill] sm:$0xff] %v13522_v6  ;;  %5462 = vmatpush.msrb.mxu0 %v13522_v6  ;;  %v4810_v10 = vmul.f32 %v4666_v63, %v17422_v13  ;;  %v4703_v58 = vmul.f32 %v7132_v8, %v4415_v56  ;;  %7137 = vrcp.f32 %v17423_v50  ;;  %v4360_v11 = vsel %vm4216_vm13, 1.0, %v17425_v60  ;;  %v17426_v47 = vld [vmem:[#allocation571_spill] sm:$0xff]  ;;  %v17432_v13 = vld [vmem:[#allocation426_spill] sm:$0xff]  ;;  %v17433_v50 = vld [vmem:[#allocation716_spill] sm:$0xff] }
 0x735   : > { %17415 = vst [vmem:[#allocation881_spill] sm:$0xff] %v13530_v19  ;;  %5490 = vmatpush.msrb.mxu1 %v13530_v19  ;;  %v13540_v54 = vsub.f32 %v4793_v2, %v17421_v18  ;;  %v4830_v42 = vmul.f32 %v4686_v9, %v17424_v53  ;;  %7139 = vrcp.f32 %v17426_v47  ;;  %v17427_v14 = vld [vmem:[#allocation455_spill] sm:$0xff]  ;;  %v17428_v2 = vld [vmem:[#allocation613_spill] sm:$0xff]  ;;  %v17429_v19 = vld [vmem:[#allocation86_spill] sm:$0xff]  ;;  %v4377_v9 = vsel %vm4233_vm14, 1.0, %v17432_v13 }
 0x736   : > { %v13551_v40 = vsub.f32 %v4810_v10, %v17427_v14  ;;  %v4847_v18 = vmul.f32 %v4703_v58, %v17428_v2  ;;  %vm4270_vm0 = vcmp.ge.f32.partialorder %v17429_v19, 0.0  ;;  %v17430_v63 = vld [vmem:[#allocation755_spill] sm:$0xff]  ;;  %v4397_v53 = vsel %vm4253_vm15, 1.0, %v17433_v50  ;;  %v17434_v60 = vld [vmem:[#allocation326_spill] sm:$0xff]  ;;  %v17437_v47 = vld [vmem:[#allocation288_spill] sm:$0xff] }
 0x737   : > { %5410 = vmatpush.msra.mxu2 %v13540_v54  ;;  %v7134_v56 = vpop.eup %7133  ;;  %v13556_v8 = vsub.f32 %v4830_v42, %v17430_v63  ;;  %7141 = vrcp.f32 %v17434_v60  ;;  %v17435_v10 = vld [vmem:[#allocation598_spill] sm:$0xff]  ;;  %vm4215_vm1 = vcmp.ge.f32.partialorder %v17437_v47, 0.0  ;;  %v17440_v63 = vld [vmem:[#allocation719_spill] sm:$0xff]  ;;  %v17441_v13 = vld [vmem:[#allocation361_spill] sm:$0xff]  ;;  %vm4310_vm11 = vcmp.ge.f32.partialorder %v11902_v59, 0.0 }
 0x738   : > { %5438 = vmatpush.msra.mxu3 %v13551_v40  ;;  %v13567_v58 = vsub.f32 %v4847_v18, %v17435_v10  ;;  %v4648_v19 = vmul.f32 %v7134_v56, %v4360_v11  ;;  %v17438_v42 = vld [vmem:[#allocation422_spill] sm:$0xff]  ;;  %v7136_v14 = vpop.eup %7135  ;;  %v17442_v18 = vld [vmem:[#allocation563_spill] sm:$0xff]  ;;  %v17443_v10 = vld [vmem:[#allocation320_spill] sm:$0xff]  ;;  %vm4309_vm15 = vcmp.ge.f32.partialorder %v11880_v57, 0.0 }
 0x739   : > { %17431 = vst [vmem:[#allocation882_spill] sm:$0xff] %v13556_v8  ;;  %7143 = vrcp.f32 %v17438_v42  ;;  %5463 = vmatpush.msrb.mxu0 %v13556_v8  ;;  %v17439_v23 = vld [vmem:[#allocation562_spill] sm:$0xff]  ;;  %v4665_v60 = vmul.f32 %v7136_v14, %v4377_v9  ;;  %v4359_v47 = vsel %vm4215_vm1, 1.0, %v17443_v10  ;;  %v17444_v42 = vld [vmem:[#allocation416_spill] sm:$0xff]  ;;  %v17445_v61 = vld [vmem:[#allocation351_spill] sm:$0xff] }
 0x73a   : > { %17436 = vst [vmem:[#allocation883_spill] sm:$0xff] %v13567_v58  ;;  %v4414_v2 = vsel %vm4270_vm0, 1.0, %v17439_v23  ;;  %7145 = vrcp.f32 %v17440_v63  ;;  %v7138_v45 = vpop.eup %7137  ;;  %5491 = vmatpush.msrb.mxu1 %v13567_v58  ;;  %v4792_v50 = vmul.f32 %v4648_v19, %v17441_v13  ;;  %v17446_v8 = vld [vmem:[#allocation447_spill] sm:$0xff]  ;;  %v17447_v63 = vld [vmem:[#allocation381_spill] sm:$0xff]  ;;  %v17448_v58 = vld [vmem:[#allocation750_spill] sm:$0xff] }
 0x73b   : > { %7147 = vrcp.f32 %v17442_v18  ;;  %v7140_v11 = vpop.eup %7139  ;;  %v4685_v56 = vmul.f32 %v7138_v45, %v4397_v53  ;;  %v4809_v23 = vmul.f32 %v4665_v60, %v17446_v8  ;;  %vm4231_vm2 = vcmp.ge.f32.partialorder %v17447_v63, 0.0  ;;  %v17449_v19 = vld [vmem:[#allocation393_spill] sm:$0xff]  ;;  %v17450_v9 = vld [vmem:[#allocation670_spill] sm:$0xff]  ;;  %v17451_v14 = vld [vmem:[#allocation83_spill] sm:$0xff] }
 0x73c   : > { %7149 = vrcp.f32 %v17444_v42  ;;  %v4936_v6 = vsub.f32 %v4792_v50, %v17445_v61  ;;  %v4702_v25 = vmul.f32 %v7140_v11, %v4414_v2  ;;  %vm4232_vm3 = vcmp.ge.f32.partialorder %v17449_v19, 0.0  ;;  %v17452_v45 = vld [vmem:[#allocation450_spill] sm:$0xff]  ;;  %v17455_v11 = vld [vmem:[#allocation752_spill] sm:$0xff]  ;;  %v17458_v19 = vld [vmem:[#allocation559_spill] sm:$0xff] }
 0x73d   : > { %v7142_v5 = vpop.eup %7141  ;;  %v4829_v55 = vmul.f32 %v4685_v56, %v17448_v58  ;;  %vm4252_vm4 = vcmp.ge.f32.partialorder %v17450_v9, 0.0  ;;  %vm4269_vm5 = vcmp.ge.f32.partialorder %v17451_v14, 0.0  ;;  %v13587_v13 = vsub.f32 %v4809_v23, %v17452_v45  ;;  %v17453_v61 = vld [vmem:[#allocation606_spill] sm:$0xff]  ;;  %v17457_v56 = vld [vmem:[#allocation712_spill] sm:$0xff]  ;;  %v17507_v57 = vld [vmem:[#allocation743_spill] sm:$0xff] }
 0x73e   : > { %5411 = vmatpush.msra.mxu2 %v4936_v6  ;;  %v4846_v50 = vmul.f32 %v4702_v25, %v17453_v61  ;;  %v4647_v8 = vmul.f32 %v7142_v5, %v4359_v47  ;;  %v17454_v2 = vld [vmem:[#allocation418_spill] sm:$0xff]  ;;  %v4396_v42 = vsel %vm4252_vm4, 1.0, %v17457_v56  ;;  %v4413_v9 = vsel %vm4269_vm5, 1.0, %v17458_v19  ;;  %v17462_v47 = vld [vmem:[#allocation413_spill] sm:$0xff]  ;;  %v17465_v56 = vld [vmem:[#allocation715_spill] sm:$0xff] }
 0x73f   : > { %v7144_v53 = vpop.eup %7143  ;;  %v4376_v60 = vsel %vm4232_vm3, 1.0, %v17454_v2  ;;  %v13592_v10 = vsub.f32 %v4829_v55, %v17455_v11  ;;  %5439 = vmatpush.msra.mxu3 %v13587_v13  ;;  %v17461_v45 = vld [vmem:[#allocation354_spill] sm:$0xff]  ;;  %v4375_v61 = vsel %vm4231_vm2, 1.0, %v17462_v47  ;;  %v17464_v11 = vld [vmem:[#allocation667_spill] sm:$0xff]  ;;  %7151 = vrcp.f32 %v17465_v56  ;;  %v17469_v47 = vld [vmem:[#allocation597_spill] sm:$0xff] }
 0x740   : > { %v7146_v18 = vpop.eup %7145  ;;  %v4664_v58 = vmul.f32 %v7144_v53, %v4376_v60  ;;  %v13598_v23 = vsub.f32 %v4846_v50, %v17459_v62  ;;  %v4791_v25 = vmul.f32 %v4647_v8, %v17461_v45  ;;  %v17463_v53 = vld [vmem:[#allocation445_spill] sm:$0xff]  ;;  %vm4251_vm6 = vcmp.ge.f32.partialorder %v17464_v11, 0.0  ;;  %v17466_v62 = vld [vmem:[#allocation348_spill] sm:$0xff]  ;;  %v17467_v8 = vld [vmem:[#allocation747_spill] sm:$0xff] }
 0x741   : > { %17456 = vst [vmem:[#allocation884_spill] sm:$0xff] %v13592_v10  ;;  %v7148_v14 = vpop.eup %7147  ;;  %v4684_v5 = vmul.f32 %v7146_v18, %v4396_v42  ;;  %5464 = vmatpush.msrb.mxu0 %v13592_v10  ;;  %v6858_v42 = vunpack.i.l.bf16 %v13498_v16  ;;  %v17468_v19 = vld [vmem:[#allocation446_spill] sm:$0xff]  ;;  %v17472_v11 = vld [vmem:[#allocation749_spill] sm:$0xff] }
 0x742   : > { %17460 = vst [vmem:[#allocation885_spill] sm:$0xff] %v13598_v23  ;;  %v7150_v55 = vpop.eup %7149  ;;  %v4808_v2 = vmul.f32 %v4664_v58, %v17463_v53  ;;  %v4701_v60 = vmul.f32 %v7148_v14, %v4413_v9  ;;  %5492 = vmatpush.msrb.mxu1 %v13598_v23  ;;  %v4935_v50 = vsub.f32 %v4791_v25, %v17466_v62  ;;  %v17470_v58 = vld [vmem:[#allocation708_spill] sm:$0xff]  ;;  %v17473_v25 = vld [vmem:[#allocation441_spill] sm:$0xff]  ;;  %v17495_v59 = vld [vmem:[#allocation746_spill] sm:$0xff] }
 0x743   : > { %v4828_v18 = vmul.f32 %v4684_v5, %v17467_v8  ;;  %v4663_v63 = vmul.f32 %v7150_v55, %v4375_v61  ;;  %v4395_v9 = vsel %vm4251_vm6, 1.0, %v17470_v58  ;;  %v17471_v14 = vld [vmem:[#allocation80_spill] sm:$0xff]  ;;  %v17475_v61 = vld [vmem:[#allocation570_spill] sm:$0xff]  ;;  %vm4293_vm14 = vcmp.ge.f32.partialorder %v17495_v59, 0.0 }
 0x744   : > { %v13613_v45 = vsub.f32 %v4808_v2, %v17468_v19  ;;  %v4845_v10 = vmul.f32 %v4701_v60, %v17469_v47  ;;  %vm4268_vm7 = vcmp.ge.f32.partialorder %v17471_v14, 0.0  ;;  %5412 = vmatpush.msra.mxu2 %v4935_v50  ;;  %v5640_v53 = vadd.f32 %v13272_v46, %v4935_v50  ;;  %v17474_v62 = vld [vmem:[#allocation552_spill] sm:$0xff]  ;;  %v17477_v2 = vld [vmem:[#allocation555_spill] sm:$0xff]  ;;  %v17479_v19 = vld [vmem:[#allocation78_spill] sm:$0xff] }
 0x745   : > { %v13620_v56 = vsub.f32 %v4828_v18, %v17472_v11  ;;  %v4807_v5 = vmul.f32 %v4663_v63, %v17473_v25  ;;  %v4412_v8 = vsel %vm4268_vm7, 1.0, %v17474_v62  ;;  %5413 = vmatmul.f32.vlgmr.msra.gmra.mxu2 %v6858_v42  ;;  %7153 = vrcp.f32 %v17477_v2  ;;  %v17478_v60 = vld [vmem:[#allocation660_spill] sm:$0xff]  ;;  %v7152_v58 = vpop.eup %7151  ;;  %v17482_v14 = vld [vmem:[#allocation710_spill] sm:$0xff]  ;;  %v17483_v11 = vld [vmem:[#allocation541_spill] sm:$0xff] }
 0x746   : > { %5440 = vmatpush.msra.mxu3 %v13613_v45  ;;  %v13626_v55 = vsub.f32 %v4845_v10, %v17475_v61  ;;  %vm4250_vm8 = vcmp.ge.f32.partialorder %v17478_v60, 0.0  ;;  %vm4267_vm9 = vcmp.ge.f32.partialorder %v17479_v19, 0.0  ;;  %v5641_v46 = vadd.f32 %v5640_v53, %v4936_v6  ;;  %v17480_v50 = vld [vmem:[#allocation444_spill] sm:$0xff]  ;;  %v17484_v62 = vld [vmem:[#allocation754_spill] sm:$0xff]  ;;  %v17486_v61 = vld [vmem:[#allocation501_spill] sm:$0xff] }
 0x747   : > { %5465 = vmatpush.msrb.mxu0 %v13620_v56  ;;  %v13633_v18 = vsub.f32 %v4807_v5, %v17480_v50  ;;  %v6821_v63 = vunpack.i.l.bf16 %v13544_v3  ;;  %v6861_v47 = vunpack.i.h.bf16 %v13498_v16  ;;  %v17481_v10 = vld [vmem:[#allocation700_spill] sm:$0xff]  ;;  %7155 = vrcp.f32 %v17482_v14  ;;  %v17485_v5 = vld [vmem:[#allocation550_spill] sm:$0xff]  ;;  %v17487_v60 = vld [vmem:[#allocation775_spill] sm:$0xff] }
 0x748   : > { %17476 = vst [vmem:[#allocation886_spill] sm:$0xff] %v13626_v55  ;;  %5493 = vmatpush.msrb.mxu1 %v13626_v55  ;;  %v4394_v42 = vsel %vm4250_vm8, 1.0, %v17481_v10  ;;  %v4411_v25 = vsel %vm4267_vm9, 1.0, %v17483_v11  ;;  %vm4294_vm10 = vcmp.ge.f32.partialorder %v17484_v62, 0.0  ;;  %v5642_v6 = vadd.f32 %v5641_v46, %v13540_v54  ;;  %v17488_v19 = vld [vmem:[#allocation656_spill] sm:$0xff]  ;;  %v17493_v11 = vld [vmem:[#allocation705_spill] sm:$0xff] }
 0x749   : > { %5441 = vmatpush.msra.mxu3 %v13633_v18  ;;  %v4683_v53 = vmul.f32 %v7152_v58, %v4395_v9  ;;  %5364 = vmatmul.f32.gmra.mxu0 %v6821_v63  ;;  %7157 = vrcp.f32 %v17485_v5  ;;  %v6824_v16 = vunpack.i.h.bf16 %v13544_v3  ;;  %v4438_v2 = vsel %vm4294_vm10, 1.0, %v17486_v61  ;;  %v17489_v54 = vld [vmem:[#allocation744_spill] sm:$0xff]  ;;  %v17490_v9 = vld [vmem:[#allocation810_spill] sm:$0xff]  ;;  %v17491_v58 = vld [vmem:[#allocation583_spill] sm:$0xff]  ;;  %v13654_v3 = vpop.trf.xlu1 }
 0x74a   : > { %5442 = vmatmul.f32.vlgmr.msra.gmra.mxu3 %v6861_v47  ;;  %7159 = vrcp.f32 %v17487_v60  ;;  %vm4249_vm12 = vcmp.ge.f32.partialorder %v17488_v19, 0.0  ;;  %v5643_v50 = vadd.f32 %v5642_v6, %v13506_v33  ;;  %v4454_v63 = vsel %vm4310_vm11, 1.0, %v17490_v9  ;;  %v17492_v47 = vld [vmem:[#allocation695_spill] sm:$0xff]  ;;  %v17494_v62 = vld [vmem:[#allocation74_spill] sm:$0xff]  ;;  %v17496_v6 = vld [vmem:[#allocation745_spill] sm:$0xff] }
 0x74b   : > { %v4827_v46 = vmul.f32 %v4683_v53, %v17489_v54  ;;  %5393 = vmatmul.f32.gmra.mxu1 %v6824_v16  ;;  %7161 = vrcp.f32 %v17491_v58  ;;  %v7154_v10 = vpop.eup %7153  ;;  %v4393_v14 = vsel %vm4249_vm12, 1.0, %v17492_v47  ;;  %vm4266_vm13 = vcmp.ge.f32.partialorder %v17494_v62, 0.0  ;;  %v17497_v61 = vld [vmem:[#allocation526_spill] sm:$0xff]  ;;  %v17498_v19 = vld [vmem:[#allocation531_spill] sm:$0xff] }
 0x74c   : > { %7163 = vrcp.f32 %v17493_v11  ;;  %v5644_v33 = vadd.f32 %v5643_v50, %v13466_v34  ;;  %v4700_v5 = vmul.f32 %v7154_v10, %v4412_v8  ;;  %v4410_v60 = vsel %vm4266_vm13, 1.0, %v17497_v61  ;;  %v17499_v54 = vld [vmem:[#allocation475_spill] sm:$0xff]  ;;  %v17500_v11 = vld [vmem:[#allocation589_spill] sm:$0xff]  ;;  %v13671_v50 = vpop.trf.xlu2  ;;  %v17506_v23 = vld [vmem:[#allocation806_spill] sm:$0xff] }
 0x74d   : > { %v13662_v53 = vsub.f32 %v4827_v46, %v17496_v6  ;;  %v7156_v16 = vpop.eup %7155  ;;  %7165 = vrcp.f32 %v17498_v19  ;;  %v4437_v9 = vsel %vm4293_vm14, 1.0, %v17499_v54  ;;  %v17501_v34 = vld [vmem:[#allocation483_spill] sm:$0xff]  ;;  %v4453_v55 = vsel %vm4309_vm15, 1.0, %v17506_v23 }
 0x74e   : > { %v5645_v47 = vadd.f32 %v5644_v33, %v13416_v0  ;;  %v4844_v62 = vmul.f32 %v4700_v5, %v17500_v11  ;;  %v4682_v59 = vmul.f32 %v7156_v16, %v4394_v42  ;;  %7167 = vrcp.f32 %v17501_v34  ;;  %v17502_v10 = vld [vmem:[#allocation811_spill] sm:$0xff]  ;;  %v17505_v16 = vld [vmem:[#allocation577_spill] sm:$0xff] }
 0x74f   : > { %v7158_v58 = vpop.eup %7157  ;;  %5466 = vmatpush.msrb.mxu0 %v13662_v53  ;;  %7169 = vrcp.f32 %v17502_v10  ;;  %v17503_v19 = vld [vmem:[#allocation551_spill] sm:$0xff]  ;;  %vm4326_vm11 = vcmp.ge.f32.partialorder %v12250_v24, 0.0  ;;  %v17568_v24 = vld [vmem:[#allocation688_spill] sm:$0xff]  ;;  %vm4325_vm14 = vcmp.ge.f32.partialorder %v12229_v20, 0.0 }
 0x750   : > { %v7160_v8 = vpop.eup %7159  ;;  %v4699_v46 = vmul.f32 %v7158_v58, %v4411_v25  ;;  %v5646_v61 = vadd.f32 %v5645_v47, %v13382_v43  ;;  %v13677_v0 = vsub.f32 %v4844_v62, %v17503_v19  ;;  %v17504_v33 = vld [vmem:[#allocation739_spill] sm:$0xff]  ;;  %v17509_v19 = vld [vmem:[#allocation540_spill] sm:$0xff]  ;;  %vm4289_vm12 = vcmp.ge.f32.partialorder %v17568_v24, 0.0 }
 0x751   : > { %v7162_v6 = vpop.eup %7161  ;;  %v4826_v54 = vmul.f32 %v4682_v59, %v17504_v33  ;;  %v4726_v5 = vmul.f32 %v7160_v8, %v4438_v2  ;;  %v17508_v43 = vld [vmem:[#allocation579_spill] sm:$0xff] }
 0x752   : > { %v7164_v42 = vpop.eup %7163  ;;  %v4843_v11 = vmul.f32 %v4699_v46, %v17505_v16  ;;  %v4742_v34 = vmul.f32 %v7162_v6, %v4454_v63  ;;  %v5647_v25 = vadd.f32 %v5646_v61, %v13350_v21  ;;  %5494 = vmatpush.msrb.mxu1 %v13677_v0  ;;  %v17510_v8 = vld [vmem:[#allocation651_spill] sm:$0xff]  ;;  %v17512_v46 = vld [vmem:[#allocation549_spill] sm:$0xff]  ;;  %v17513_v61 = vld [vmem:[#allocation736_spill] sm:$0xff] }
 0x753   : > { %v13685_v58 = vsub.f32 %v4826_v54, %v17507_v57  ;;  %v4870_v47 = vmul.f32 %v4726_v5, %v17508_v43  ;;  %v4681_v62 = vmul.f32 %v7164_v42, %v4393_v14  ;;  %v7166_v10 = vpop.eup %7165  ;;  %vm4248_vm0 = vcmp.ge.f32.partialorder %v17510_v8, 0.0  ;;  %v17511_v63 = vld [vmem:[#allocation699_spill] sm:$0xff]  ;;  %v17514_v5 = vld [vmem:[#allocation816_spill] sm:$0xff] }
 0x754   : > { %v13689_v59 = vsub.f32 %v4843_v11, %v17509_v19  ;;  %v4886_v2 = vmul.f32 %v4742_v34, %v12299_v39  ;;  %7171 = vrcp.f32 %v17511_v63  ;;  %v7168_v23 = vpop.eup %7167  ;;  %v5648_v21 = vadd.f32 %v5647_v25, %v13292_v32  ;;  %v17516_v16 = vld [vmem:[#allocation72_spill] sm:$0xff]  ;;  %v17517_v32 = vld [vmem:[#allocation741_spill] sm:$0xff]  ;;  %v17518_v25 = vld [vmem:[#allocation567_spill] sm:$0xff] }
 0x755   : > { %5467 = vmatpush.msrb.mxu0 %v13685_v58  ;;  %v13697_v6 = vsub.f32 %v4870_v47, %v17512_v46  ;;  %v4825_v14 = vmul.f32 %v4681_v62, %v17513_v61  ;;  %v4698_v33 = vmul.f32 %v7166_v10, %v4410_v60  ;;  %v7170_v54 = vpop.eup %7169  ;;  %v4725_v42 = vmul.f32 %v7168_v23, %v4437_v9  ;;  %v17519_v60 = vld [vmem:[#allocation605_spill] sm:$0xff]  ;;  %v17521_v10 = vld [vmem:[#allocation511_spill] sm:$0xff]  ;;  %v17524_v61 = vld [vmem:[#allocation504_spill] sm:$0xff] }
 0x756   : > { %5495 = vmatpush.msrb.mxu1 %v13689_v59  ;;  %v13702_v39 = vsub.f32 %v4886_v2, %v17514_v5  ;;  %vm4265_vm1 = vcmp.ge.f32.partialorder %v17516_v16, 0.0  ;;  %v5649_v11 = vadd.f32 %v5648_v21, %v13259_v28  ;;  %v4741_v43 = vmul.f32 %v7170_v54, %v4453_v55  ;;  %v17520_v62 = vld [vmem:[#allocation689_spill] sm:$0xff]  ;;  %v17522_v2 = vld [vmem:[#allocation530_spill] sm:$0xff]  ;;  %v17523_v21 = vld [vmem:[#allocation512_spill] sm:$0xff] }
 0x757   : > { %5513 = vmatpush.msrb.mxu2 %v13697_v6  ;;  %v13708_v34 = vsub.f32 %v4825_v14, %v17517_v32  ;;  %v4842_v57 = vmul.f32 %v4698_v33, %v17518_v25  ;;  %v4869_v47 = vmul.f32 %v4725_v42, %v17519_v60  ;;  %v4392_v9 = vsel %vm4248_vm0, 1.0, %v17520_v62  ;;  %v17525_v14 = vld [vmem:[#allocation740_spill] sm:$0xff]  ;;  %v17526_v33 = vld [vmem:[#allocation773_spill] sm:$0xff]  ;;  %v17527_v54 = vld [vmem:[#allocation807_spill] sm:$0xff] }
 0x758   : > { %17515 = vst [vmem:[#allocation887_spill] sm:$0xff] %v13702_v39  ;;  %5542 = vmatpush.msrb.mxu3 %v13702_v39  ;;  %7173 = vrcp.f32 %v17521_v10  ;;  %v6863_v28 = vunpack.i.l.bf16 %v13654_v3  ;;  %v5650_v19 = vadd.f32 %v5649_v11, %v13234_v48  ;;  %v4885_v55 = vmul.f32 %v4741_v43, %v12263_v26  ;;  %v17529_v42 = vld [vmem:[#allocation600_spill] sm:$0xff]  ;;  %v17530_v11 = vld [vmem:[#allocation707_spill] sm:$0xff]  ;;  %v17534_v60 = vld [vmem:[#allocation769_spill] sm:$0xff] }
 0x759   : > { %5468 = vmatpush.msrb.mxu0 %v13708_v34  ;;  %v13721_v63 = vsub.f32 %v4842_v57, %v17522_v2  ;;  %v13725_v46 = vsub.f32 %v4869_v47, %v17523_v21  ;;  %v4409_v8 = vsel %vm4265_vm1, 1.0, %v17524_v61  ;;  %vm4292_vm2 = vcmp.ge.f32.partialorder %v17525_v14, 0.0  ;;  %v17531_v16 = vld [vmem:[#allocation643_spill] sm:$0xff]  ;;  %v17532_v32 = vld [vmem:[#allocation68_spill] sm:$0xff]  ;;  %v17533_v57 = vld [vmem:[#allocation733_spill] sm:$0xff] }
 0x75a   : > { %v7172_v23 = vpop.eup %7171  ;;  %5416 = vmatmul.f32.gmra.mxu2 %v6863_v28  ;;  %7175 = vrcp.f32 %v17526_v33  ;;  %v5651_v48 = vadd.f32 %v5650_v19, %v13178_v27  ;;  %v13735_v5 = vsub.f32 %v4885_v55, %v17527_v54  ;;  %vm4308_vm3 = vcmp.ge.f32.partialorder %v17529_v42, 0.0  ;;  %v17535_v62 = vld [vmem:[#allocation691_spill] sm:$0xff]  ;;  %v17536_v10 = vld [vmem:[#allocation681_spill] sm:$0xff]  ;;  %v17537_v19 = vld [vmem:[#allocation684_spill] sm:$0xff] }
 0x75b   : > { %5496 = vmatpush.msrb.mxu1 %v13721_v63  ;;  %v4680_v26 = vmul.f32 %v7172_v23, %v4392_v9  ;;  %5514 = vmatpush.msrb.mxu2 %v13725_v46  ;;  %7177 = vrcp.f32 %v17530_v11  ;;  %vm4247_vm4 = vcmp.ge.f32.partialorder %v17531_v16, 0.0  ;;  %vm4264_vm5 = vcmp.ge.f32.partialorder %v17532_v32, 0.0  ;;  %v17538_v55 = vld [vmem:[#allocation497_spill] sm:$0xff]  ;;  %v17539_v23 = vld [vmem:[#allocation728_spill] sm:$0xff]  ;;  %v17541_v14 = vld [vmem:[#allocation486_spill] sm:$0xff] }
 0x75c   : > { %17528 = vst [vmem:[#allocation888_spill] sm:$0xff] %v13735_v5  ;;  %v6866_v25 = vunpack.i.h.bf16 %v13654_v3  ;;  %v5652_v27 = vadd.f32 %v5651_v48, %v13151_v22  ;;  %5543 = vmatpush.msrb.mxu3 %v13735_v5  ;;  %v4436_v47 = vsel %vm4292_vm2, 1.0, %v17534_v60  ;;  %7179 = vrcp.f32 %v17535_v62  ;;  %v17540_v3 = vld [vmem:[#allocation735_spill] sm:$0xff]  ;;  %v17543_v42 = vld [vmem:[#allocation590_spill] sm:$0xff]  ;;  %v17548_v62 = vld [vmem:[#allocation672_spill] sm:$0xff] }
 0x75d   : > { %v4824_v43 = vmul.f32 %v4680_v26, %v17533_v57  ;;  %v4452_v28 = vsel %vm4308_vm3, 1.0, %v17536_v10  ;;  %v4391_v2 = vsel %vm4247_vm4, 1.0, %v17537_v19  ;;  %7181 = vrcp.f32 %v17538_v55  ;;  %v17542_v26 = vld [vmem:[#allocation768_spill] sm:$0xff]  ;;  %v17544_v11 = vld [vmem:[#allocation66_spill] sm:$0xff]  ;;  %v17584_v20 = vld [vmem:[#allocation803_spill] sm:$0xff] }
 0x75e   : > { %v7174_v9 = vpop.eup %7173  ;;  %5445 = vmatmul.f32.gmra.mxu3 %v6866_v25  ;;  %vm4291_vm6 = vcmp.ge.f32.partialorder %v17539_v23, 0.0  ;;  %v5653_v22 = vadd.f32 %v5652_v27, %v13126_v15  ;;  %v4408_v33 = vsel %vm4264_vm5, 1.0, %v17541_v14  ;;  %v6910_v54 = vunpack.i.l.bf16 %v13671_v50  ;;  %v17545_v15 = vld [vmem:[#allocation543_spill] sm:$0xff]  ;;  %v17546_v27 = vld [vmem:[#allocation765_spill] sm:$0xff] }
 0x75f   : > { %v13754_v21 = vsub.f32 %v4824_v43, %v17540_v3  ;;  %v4697_v61 = vmul.f32 %v7174_v9, %v4409_v8  ;;  %7183 = vrcp.f32 %v17542_v26  ;;  %vm4307_vm7 = vcmp.ge.f32.partialorder %v17543_v42, 0.0  ;;  %v17547_v43 = vld [vmem:[#allocation683_spill] sm:$0xff]  ;;  %v17549_v9 = vld [vmem:[#allocation480_spill] sm:$0xff]  ;;  %v17551_v3 = vld [vmem:[#allocation778_spill] sm:$0xff] }
 0x760   : > { %v7176_v48 = vpop.eup %7175  ;;  %vm4263_vm8 = vcmp.ge.f32.partialorder %v17544_v11, 0.0  ;;  %v5654_v16 = vadd.f32 %v5653_v22, %v13114_v17  ;;  %v4435_v57 = vsel %vm4291_vm6, 1.0, %v17546_v27  ;;  %v4451_v60 = vsel %vm4307_vm7, 1.0, %v17547_v43  ;;  %v17550_v17 = vld [vmem:[#allocation520_spill] sm:$0xff]  ;;  %v17552_v26 = vld [vmem:[#allocation493_spill] sm:$0xff] }
 0x761   : > { %5469 = vmatpush.msrb.mxu0 %v13754_v21  ;;  %v4841_v25 = vmul.f32 %v4697_v61, %v17545_v15  ;;  %v4724_v8 = vmul.f32 %v7176_v48, %v4436_v47  ;;  %v7178_v32 = vpop.eup %7177  ;;  %7185 = vrcp.f32 %v17548_v62  ;;  %v4407_v10 = vsel %vm4263_vm8, 1.0, %v17549_v9  ;;  %v17553_v42 = vld [vmem:[#allocation704_spill] sm:$0xff]  ;;  %v17555_v27 = vld [vmem:[#allocation465_spill] sm:$0xff] }
 0x762   : > { %v6913_v19 = vunpack.i.h.bf16 %v13671_v50  ;;  %v7180_v55 = vpop.eup %7179  ;;  %v5655_v23 = vadd.f32 %v5654_v16, %v13103_v52  ;;  %v4740_v47 = vmul.f32 %v7178_v32, %v4452_v28  ;;  %7187 = vrcp.f32 %v17552_v26  ;;  %v17554_v11 = vld [vmem:[#allocation564_spill] sm:$0xff]  ;;  %v17556_v16 = vld [vmem:[#allocation818_spill] sm:$0xff]  ;;  %v17558_v62 = vld [vmem:[#allocation761_spill] sm:$0xff] }
 0x763   : > { %v13773_v22 = vsub.f32 %v4841_v25, %v17550_v17  ;;  %v4868_v61 = vmul.f32 %v4724_v8, %v17551_v3  ;;  %v7182_v14 = vpop.eup %7181  ;;  %v4679_v48 = vmul.f32 %v7180_v55, %v4391_v2  ;;  %vm4290_vm9 = vcmp.ge.f32.partialorder %v17553_v42, 0.0  ;;  %v13785_v8 = vpop.trf.xlu1  ;;  %v17557_v2 = vld [vmem:[#allocation730_spill] sm:$0xff] }
 0x764   : > { %vm4306_vm10 = vcmp.ge.f32.partialorder %v17554_v11, 0.0  ;;  %v5656_v15 = vadd.f32 %v5655_v23, %v13633_v18  ;;  %v4884_v25 = vmul.f32 %v4740_v47, %v17556_v16  ;;  %v4696_v43 = vmul.f32 %v7182_v14, %v4408_v33  ;;  %v17559_v18 = vld [vmem:[#allocation804_spill] sm:$0xff]  ;;  %v17561_v23 = vld [vmem:[#allocation533_spill] sm:$0xff]  ;;  %v17562_v47 = vld [vmem:[#allocation731_spill] sm:$0xff]  ;;  %v13823_v11 = vpop.trf.xlu2 }
 0x765   : > { %5497 = vmatpush.msrb.mxu1 %v13773_v22  ;;  %v13782_v52 = vsub.f32 %v4868_v61, %v17555_v27  ;;  %v7184_v28 = vpop.eup %7183  ;;  %v4823_v32 = vmul.f32 %v4679_v48, %v17557_v2  ;;  %7189 = vrcp.f32 %v17558_v62  ;;  %v17563_v14 = vld [vmem:[#allocation742_spill] sm:$0xff]  ;;  %v4470_v2 = vsel %vm4326_vm11, 1.0, %v12409_v30  ;;  %v17570_v62 = vld [vmem:[#allocation776_spill] sm:$0xff] }
 0x766   : > { %v5657_v9 = vadd.f32 %v5656_v15, %v13613_v45  ;;  %v13792_v55 = vsub.f32 %v4884_v25, %v17559_v18  ;;  %v4840_v17 = vmul.f32 %v4696_v43, %v17561_v23  ;;  %v4723_v3 = vmul.f32 %v7184_v28, %v4435_v57  ;;  %v17564_v26 = vld [vmem:[#allocation650_spill] sm:$0xff]  ;;  %v17565_v15 = vld [vmem:[#allocation516_spill] sm:$0xff]  ;;  %v17566_v57 = vld [vmem:[#allocation539_spill] sm:$0xff] }
 0x767   : > { %5515 = vmatpush.msrb.mxu2 %v13782_v52  ;;  %v7186_v61 = vpop.eup %7185  ;;  %v13796_v33 = vsub.f32 %v4823_v32, %v17562_v47  ;;  %v4434_v48 = vsel %vm4290_vm9, 1.0, %v17563_v14  ;;  %7191 = vrcp.f32 %v17564_v26  ;;  %v17567_v28 = vld [vmem:[#allocation658_spill] sm:$0xff]  ;;  %v17569_v32 = vld [vmem:[#allocation489_spill] sm:$0xff]  ;;  %vm4324_vm1 = vcmp.ge.f32.partialorder %v12219_v1, 0.0 }
 0x768   : > { %17560 = vst [vmem:[#allocation889_spill] sm:$0xff] %v13792_v55  ;;  %v5658_v45 = vadd.f32 %v5657_v9, %v13587_v13  ;;  %5544 = vmatpush.msrb.mxu3 %v13792_v55  ;;  %v13806_v27 = vsub.f32 %v4840_v17, %v17565_v15  ;;  %v4867_v16 = vmul.f32 %v4723_v3, %v17566_v57  ;;  %v7188_v43 = vpop.eup %7187  ;;  %v4450_v42 = vsel %vm4306_vm10, 1.0, %v17567_v28  ;;  %v17571_v18 = vld [vmem:[#allocation738_spill] sm:$0xff]  ;;  %v17572_v17 = vld [vmem:[#allocation527_spill] sm:$0xff]  ;;  %v17576_v14 = vld [vmem:[#allocation525_spill] sm:$0xff] }
 0x769   : > { %v4739_v25 = vmul.f32 %v7186_v61, %v4451_v60  ;;  %5470 = vmatpush.msrb.mxu0 %v13796_v33  ;;  %7193 = vrcp.f32 %v12434_v37  ;;  %v4695_v30 = vmul.f32 %v7188_v43, %v4407_v10  ;;  %vm4305_vm13 = vcmp.ge.f32.partialorder %v17572_v17, 0.0  ;;  %v17573_v37 = vld [vmem:[#allocation795_spill] sm:$0xff]  ;;  %v17579_v43 = vld [vmem:[#allocation506_spill] sm:$0xff] }
 0x76a   : > { %v5659_v13 = vadd.f32 %v5658_v45, %v13551_v40  ;;  %5498 = vmatpush.msrb.mxu1 %v13806_v27  ;;  %5471 = vmatmul.f32.vlgmr.msrb.gmra.mxu0 %v6910_v54  ;;  %v13819_v60 = vsub.f32 %v4867_v16, %v17569_v32  ;;  %7195 = vrcp.f32 %v17571_v18  ;;  %v17574_v54 = vld [vmem:[#allocation801_spill] sm:$0xff]  ;;  %v17577_v45 = vld [vmem:[#allocation732_spill] sm:$0xff]  ;;  %v6868_v10 = vunpack.i.l.bf16 %v13785_v8  ;;  %v17582_v32 = vld [vmem:[#allocation722_spill] sm:$0xff] }
 0x76b   : > { %v4883_v9 = vmul.f32 %v4739_v25, %v17570_v62  ;;  %v7190_v23 = vpop.eup %7189  ;;  %7197 = vrcp.f32 %v17573_v37  ;;  %v4839_v26 = vmul.f32 %v4695_v30, %v17576_v14  ;;  %v4433_v15 = vsel %vm4289_vm12, 1.0, %v17577_v45  ;;  %v17589_v14 = vld [vmem:[#allocation717_spill] sm:$0xff]  ;;  %v17590_v45 = vld [vmem:[#allocation454_spill] sm:$0xff] }
 0x76c   : > { %v5660_v40 = vadd.f32 %v5659_v13, %v13514_v49  ;;  %5516 = vmatpush.msrb.mxu2 %v13819_v60  ;;  %v4722_v61 = vmul.f32 %v7190_v23, %v4434_v48  ;;  %7199 = vrcp.f32 %v12422_v7  ;;  %v17578_v49 = vld [vmem:[#allocation499_spill] sm:$0xff]  ;;  %v17580_v13 = vld [vmem:[#allocation640_spill] sm:$0xff]  ;;  %v17581_v7 = vld [vmem:[#allocation673_spill] sm:$0xff]  ;;  %v4469_v17 = vsel %vm4325_vm14, 1.0, %v12398_v29 }
 0x76d   : > { %v13830_v3 = vsub.f32 %v4883_v9, %v17574_v54  ;;  %v7192_v47 = vpop.eup %7191  ;;  %v13843_v28 = vsub.f32 %v4839_v26, %v17579_v43  ;;  %v4449_v24 = vsel %vm4305_vm13, 1.0, %v17580_v13  ;;  %5419 = vmatmul.f32.gmra.mxu2 %v6868_v10  ;;  %vm4288_vm15 = vcmp.ge.f32.partialorder %v17581_v7, 0.0  ;;  %v17583_v9 = vld [vmem:[#allocation771_spill] sm:$0xff]  ;;  %v17586_v54 = vld [vmem:[#allocation792_spill] sm:$0xff]  ;;  %v17593_v43 = vld [vmem:[#allocation633_spill] sm:$0xff] }
 0x76e   : > { %v5661_v57 = vadd.f32 %v5660_v40, %v13482_v38  ;;  %v4866_v16 = vmul.f32 %v4722_v61, %v17578_v49  ;;  %v4738_v25 = vmul.f32 %v7192_v47, %v4450_v42  ;;  %7201 = vrcp.f32 %v17582_v32  ;;  %v17585_v40 = vld [vmem:[#allocation524_spill] sm:$0xff]  ;;  %v17591_v49 = vld [vmem:[#allocation766_spill] sm:$0xff] }
 0x76f   : > { %17575 = vst [vmem:[#allocation890_spill] sm:$0xff] %v13830_v3  ;;  %5545 = vmatpush.msrb.mxu3 %v13830_v3  ;;  %v7194_v48 = vpop.eup %7193  ;;  %5499 = vmatpush.msrb.mxu1 %v13843_v28  ;;  %vm4304_vm0 = vcmp.ge.f32.partialorder %v17585_v40, 0.0  ;;  %7203 = vrcp.f32 %v17586_v54  ;;  %v4432_v29 = vsel %vm4288_vm15, 1.0, %v17589_v14  ;;  %v17594_v7 = vld [vmem:[#allocation798_spill] sm:$0xff]  ;;  %v17603_v54 = vld [vmem:[#allocation788_spill] sm:$0xff] }
 0x770   : > { %v7196_v38 = vpop.eup %7195  ;;  %v5662_v62 = vadd.f32 %v5661_v57, %v13430_v31  ;;  %v13852_v42 = vsub.f32 %v4866_v16, %v17583_v9  ;;  %v4882_v18 = vmul.f32 %v4738_v25, %v17584_v20  ;;  %v4758_v23 = vmul.f32 %v7194_v48, %v4470_v2  ;;  %5500 = vmatmul.f32.vlgmr.msrb.gmra.mxu1 %v6913_v19  ;;  %v17587_v31 = vld [vmem:[#allocation799_spill] sm:$0xff]  ;;  %v17592_v25 = vld [vmem:[#allocation800_spill] sm:$0xff]  ;;  %v17597_v9 = vld [vmem:[#allocation665_spill] sm:$0xff] }
 0x771   : > { %v7198_v30 = vpop.eup %7197  ;;  %v4721_v37 = vmul.f32 %v7196_v38, %v4433_v15  ;;  %7205 = vrcp.f32 %v12407_v44  ;;  %v6871_v19 = vunpack.i.h.bf16 %v13785_v8  ;;  %v4448_v44 = vsel %vm4304_vm0, 1.0, %v17593_v43  ;;  %v17596_v38 = vld [vmem:[#allocation838_spill] sm:$0xff]  ;;  %v17599_v20 = vld [vmem:[#allocation867_spill] sm:$0xff] }
 0x772   : > { %v5663_v61 = vadd.f32 %v5662_v62, %v13390_v35  ;;  %5517 = vmatpush.msrb.mxu2 %v13852_v42  ;;  %v13864_v47 = vsub.f32 %v4882_v18, %v17587_v31  ;;  %v4902_v2 = vmul.f32 %v4758_v23, %v12522_v41  ;;  %v7200_v26 = vpop.eup %7199  ;;  %v4737_v10 = vmul.f32 %v7198_v30, %v4449_v24  ;;  %v17601_v30 = vld [vmem:[#allocation487_spill] sm:$0xff]  ;;  %v17602_v1 = vld [vmem:[#allocation510_spill] sm:$0xff] }
 0x773   : > { %v4865_v15 = vmul.f32 %v4721_v37, %v17590_v45  ;;  %v4757_v41 = vmul.f32 %v7200_v26, %v4469_v17  ;;  %5448 = vmatmul.f32.gmra.mxu3 %v6871_v19  ;;  %v4468_v62 = vsel %vm4324_vm1, 1.0, %v17596_v38  ;;  %vm4287_vm2 = vcmp.ge.f32.partialorder %v17597_v9, 0.0  ;;  %v17607_v45 = vld [vmem:[#allocation690_spill] sm:$0xff]  ;;  %v17618_v9 = vld [vmem:[#allocation863_spill] sm:$0xff] }
 0x774   : > { %17588 = vst [vmem:[#allocation891_spill] sm:$0xff] %v13864_v47  ;;  %v5664_v35 = vadd.f32 %v5663_v61, %v13362_v4  ;;  %5546 = vmatpush.msrb.mxu3 %v13864_v47  ;;  %v13876_v50 = vsub.f32 %v4902_v2, %v12528_v12  ;;  %v7202_v57 = vpop.eup %7201  ;;  %v4881_v48 = vmul.f32 %v4737_v10, %v17592_v25  ;;  %v6915_v4 = vunpack.i.l.bf16 %v13823_v11  ;;  %v17604_v61 = vld [vmem:[#allocation785_spill] sm:$0xff] }
 0x775   : > { %v13880_v16 = vsub.f32 %v4865_v15, %v17591_v49  ;;  %v4901_v12 = vmul.f32 %v4757_v41, %v12518_v51  ;;  %v4720_v24 = vmul.f32 %v7202_v57, %v4432_v29  ;;  %v7204_v8 = vpop.eup %7203  ;;  %v17600_v51 = vld [vmem:[#allocation860_spill] sm:$0xff]  ;;  %vm4303_vm3 = vcmp.ge.f32.partialorder %v17602_v1, 0.0  ;;  %v17605_v2 = vld [vmem:[#allocation865_spill] sm:$0xff]  ;;  %v17606_v29 = vld [vmem:[#allocation718_spill] sm:$0xff] }
 0x776   : > { %v5665_v13 = vadd.f32 %v5664_v35, %v13306_v36  ;;  %5571 = vmatpush.msra.mxu0 %v13876_v50  ;;  %v13892_v32 = vsub.f32 %v4881_v48, %v17594_v7  ;;  %v17598_v36 = vld [vmem:[#allocation713_spill] sm:$0xff]  ;;  %v4736_v17 = vmul.f32 %v7204_v8, %v4448_v44  ;;  %6086 = vmatpush.msra.mxu1 %v13876_v50  ;;  %vm4323_vm4 = vcmp.ge.f32.partialorder %v17604_v61, 0.0  ;;  %v13916_v35 = vpop.trf.xlu1  ;;  %v17608_v41 = vld [vmem:[#allocation706_spill] sm:$0xff]  ;;  %v17609_v57 = vld [vmem:[#allocation840_spill] sm:$0xff] }
 0x777   : > { %5518 = vmatpush.msrb.mxu2 %v13880_v16  ;;  %5474 = vmatmul.f32.gmra.mxu0 %v6915_v4  ;;  %7207 = vrcp.f32 %v17598_v36  ;;  %v13901_v23 = vsub.f32 %v4901_v12, %v17600_v51  ;;  %v4864_v37 = vmul.f32 %v4720_v24, %v17601_v30  ;;  %v7206_v40 = vpop.eup %7205  ;;  %v6918_v31 = vunpack.i.h.bf16 %v13823_v11  ;;  %v17610_v11 = vld [vmem:[#allocation659_spill] sm:$0xff]  ;;  %v17611_v49 = vld [vmem:[#allocation864_spill] sm:$0xff]  ;;  %v17612_v48 = vld [vmem:[#allocation662_spill] sm:$0xff] }
 0x778   : > { %17595 = vst [vmem:[#allocation892_spill] sm:$0xff] %v13892_v32  ;;  %v5666_v18 = vadd.f32 %v5665_v13, %v17599_v20  ;;  %5547 = vmatpush.msrb.mxu3 %v13892_v32  ;;  %7209 = vrcp.f32 %v17603_v54  ;;  %v4880_v15 = vmul.f32 %v4736_v17, %v17607_v45  ;;  %v4756_v10 = vmul.f32 %v7206_v40, %v4468_v62  ;;  %v17613_v44 = vld [vmem:[#allocation859_spill] sm:$0xff]  ;;  %v17614_v13 = vld [vmem:[#allocation484_spill] sm:$0xff]  ;;  %v17615_v24 = vld [vmem:[#allocation625_spill] sm:$0xff] }
 0x779   : > { %5572 = vmatpush.msra.mxu0 %v13901_v23  ;;  %v13913_v26 = vsub.f32 %v4864_v37, %v17606_v29  ;;  %v4431_v19 = vsel %vm4287_vm2, 1.0, %v17608_v41  ;;  %7211 = vrcp.f32 %v17609_v57  ;;  %5503 = vmatmul.f32.gmra.mxu1 %v6918_v31  ;;  %vm4286_vm5 = vcmp.ge.f32.partialorder %v17610_v11, 0.0  ;;  %v17616_v7 = vld [vmem:[#allocation835_spill] sm:$0xff]  ;;  %v17619_v20 = vld [vmem:[#allocation858_spill] sm:$0xff]  ;;  %v17621_v17 = vld [vmem:[#allocation697_spill] sm:$0xff]  ;;  %v13954_v41 = vpop.trf.xlu2 }
 0x77a   : > { %v5667_v14 = vadd.f32 %v5666_v18, %v17605_v2  ;;  %v13926_v43 = vsub.f32 %v4880_v15, %v17612_v48  ;;  %v4900_v4 = vmul.f32 %v4756_v10, %v17613_v44  ;;  %vm4302_vm6 = vcmp.ge.f32.partialorder %v17614_v13, 0.0  ;;  %6089 = vmatpush.msra.mxu1 %v13901_v23  ;;  %v17617_v62 = vld [vmem:[#allocation711_spill] sm:$0xff]  ;;  %v17620_v30 = vld [vmem:[#allocation786_spill] sm:$0xff]  ;;  %v17624_v31 = vld [vmem:[#allocation837_spill] sm:$0xff] }
 0x77b   : > { %5519 = vmatpush.msrb.mxu2 %v13913_v26  ;;  %v4447_v8 = vsel %vm4303_vm3, 1.0, %v17615_v24  ;;  %v4467_v38 = vsel %vm4323_vm4, 1.0, %v17616_v7  ;;  %7213 = vrcp.f32 %v17617_v62  ;;  %v4430_v40 = vsel %vm4286_vm5, 1.0, %v17621_v17  ;;  %v17622_v1 = vld [vmem:[#allocation782_spill] sm:$0xff]  ;;  %v17623_v61 = vld [vmem:[#allocation819_spill] sm:$0xff]  ;;  %v17631_v48 = vld [vmem:[#allocation709_spill] sm:$0xff] }
 0x77c   : > { %v5668_v25 = vadd.f32 %v5667_v14, %v17611_v49  ;;  %5548 = vmatpush.msrb.mxu3 %v13926_v43  ;;  %v13941_v18 = vsub.f32 %v4900_v4, %v17619_v20  ;;  %7215 = vrcp.f32 %v17620_v30  ;;  %v4446_v54 = vsel %vm4302_vm6, 1.0, %v17622_v1  ;;  %v17625_v2 = vld [vmem:[#allocation862_spill] sm:$0xff]  ;;  %v17626_v29 = vld [vmem:[#allocation767_spill] sm:$0xff]  ;;  %v17630_v49 = vld [vmem:[#allocation861_spill] sm:$0xff] }
 0x77d   : > { %v7208_v12 = vpop.eup %7207  ;;  %vm4322_vm7 = vcmp.ge.f32.partialorder %v17623_v61, 0.0  ;;  %7217 = vrcp.f32 %v17624_v31  ;;  %v17627_v10 = vld [vmem:[#allocation627_spill] sm:$0xff]  ;;  %v17628_v57 = vld [vmem:[#allocation682_spill] sm:$0xff]  ;;  %v17632_v4 = vld [vmem:[#allocation797_spill] sm:$0xff] }
 0x77e   : > { %v5669_v36 = vadd.f32 %v5668_v25, %v17618_v9  ;;  %v4719_v51 = vmul.f32 %v7208_v12, %v4431_v19  ;;  %v7210_v37 = vpop.eup %7209  ;;  %5573 = vmatpush.msra.mxu0 %v13941_v18  ;;  %vm4285_vm8 = vcmp.ge.f32.partialorder %v17627_v10, 0.0  ;;  %6092 = vmatpush.msra.mxu1 %v13941_v18  ;;  %7219 = vrcp.f32 %v17628_v57  ;;  %v17629_v11 = vld [vmem:[#allocation498_spill] sm:$0xff]  ;;  %v17634_v62 = vld [vmem:[#allocation784_spill] sm:$0xff]  ;;  %v17635_v9 = vld [vmem:[#allocation815_spill] sm:$0xff] }
 0x77f   : > { %v4735_v15 = vmul.f32 %v7210_v37, %v4447_v8  ;;  %v7212_v19 = vpop.eup %7211  ;;  %vm4301_vm9 = vcmp.ge.f32.partialorder %v17629_v11, 0.0  ;;  %v17633_v8 = vld [vmem:[#allocation831_spill] sm:$0xff]  ;;  %7221 = vrcp.f32 %v17634_v62  ;;  %vm4321_vm10 = vcmp.ge.f32.partialorder %v17635_v9, 0.0  ;;  %v17636_v30 = vld [vmem:[#allocation666_spill] sm:$0xff]  ;;  %v17643_v10 = vld [vmem:[#allocation696_spill] sm:$0xff] }
 0x780   : > { %v5670_v14 = vadd.f32 %v5669_v36, %v17625_v2  ;;  %v4863_v45 = vmul.f32 %v4719_v51, %v17626_v29  ;;  %v4755_v12 = vmul.f32 %v7212_v19, %v4467_v38  ;;  %v4466_v7 = vsel %vm4322_vm7, 1.0, %v17633_v8  ;;  %v17637_v38 = vld [vmem:[#allocation857_spill] sm:$0xff]  ;;  %v17638_v2 = vld [vmem:[#allocation675_spill] sm:$0xff]  ;;  %v17639_v29 = vld [vmem:[#allocation610_spill] sm:$0xff] }
 0x781   : > { %v4879_v13 = vmul.f32 %v4735_v15, %v17632_v4  ;;  %v7214_v24 = vpop.eup %7213  ;;  %v6873_v36 = vunpack.i.l.bf16 %v13916_v35  ;;  %v17640_v15 = vld [vmem:[#allocation834_spill] sm:$0xff]  ;;  %v17641_v19 = vld [vmem:[#allocation856_spill] sm:$0xff]  ;;  %v17644_v4 = vld [vmem:[#allocation827_spill] sm:$0xff] }
 0x782   : > { %v5671_v25 = vadd.f32 %v5670_v14, %v17630_v49  ;;  %v13961_v44 = vsub.f32 %v4863_v45, %v17631_v48  ;;  %v7216_v20 = vpop.eup %7215  ;;  %v4899_v17 = vmul.f32 %v4755_v12, %v17637_v38  ;;  %v4718_v1 = vmul.f32 %v7214_v24, %v4430_v40  ;;  %v17642_v40 = vld [vmem:[#allocation760_spill] sm:$0xff]  ;;  %v17647_v24 = vld [vmem:[#allocation703_spill] sm:$0xff]  ;;  %v17650_v9 = vld [vmem:[#allocation474_spill] sm:$0xff] }
 0x783   : > { %v13973_v37 = vsub.f32 %v4879_v13, %v17636_v30  ;;  %v7218_v31 = vpop.eup %7217  ;;  %v4734_v61 = vmul.f32 %v7216_v20, %v4446_v54  ;;  %v4429_v14 = vsel %vm4285_vm8, 1.0, %v17638_v2  ;;  %v4445_v45 = vsel %vm4301_vm9, 1.0, %v17639_v29  ;;  %5422 = vmatmul.f32.gmra.mxu2 %v6873_v36  ;;  %v17645_v13 = vld [vmem:[#allocation215_spill] sm:$0xff]  ;;  %v17646_v12 = vld [vmem:[#allocation664_spill] sm:$0xff] }
 0x784   : > { %v5672_v51 = vadd.f32 %v5671_v25, %v13796_v33  ;;  %5520 = vmatpush.msrb.mxu2 %v13961_v44  ;;  %7223 = vrcp.f32 %v17640_v15  ;;  %v13986_v57 = vsub.f32 %v4899_v17, %v17641_v19  ;;  %v4862_v54 = vmul.f32 %v4718_v1, %v17642_v40  ;;  %v7220_v25 = vpop.eup %7219  ;;  %v17648_v62 = vld [vmem:[#allocation855_spill] sm:$0xff]  ;;  %v17652_v17 = vld [vmem:[#allocation554_spill] sm:$0xff]  ;;  %v17655_v15 = vld [vmem:[#allocation657_spill] sm:$0xff] }
 0x785   : > { %5549 = vmatpush.msrb.mxu3 %v13973_v37  ;;  %v4754_v49 = vmul.f32 %v7218_v31, %v4466_v7  ;;  %v4878_v48 = vmul.f32 %v4734_v61, %v17643_v10  ;;  %v4465_v11 = vsel %vm4321_vm10, 1.0, %v17644_v4  ;;  %vm4284_vm11 = vcmp.ge.f32.partialorder %v17645_v13, 0.0  ;;  %v7222_v20 = vpop.eup %7221  ;;  %v17651_v38 = vld [vmem:[#allocation575_spill] sm:$0xff]  ;;  %v17653_v1 = vld [vmem:[#allocation854_spill] sm:$0xff]  ;;  %v17654_v61 = vld [vmem:[#allocation724_spill] sm:$0xff] }
 0x786   : > { %v5673_v33 = vadd.f32 %v5672_v51, %v13754_v21  ;;  %7225 = vrcp.f32 %v17646_v12  ;;  %5574 = vmatpush.msra.mxu0 %v13986_v57  ;;  %v13998_v8 = vsub.f32 %v4862_v54, %v17647_v24  ;;  %v4717_v36 = vmul.f32 %v7220_v25, %v4429_v14  ;;  %v17649_v51 = vld [vmem:[#allocation668_spill] sm:$0xff]  ;;  %6095 = vmatpush.msra.mxu1 %v13986_v57  ;;  %v17659_v12 = vld [vmem:[#allocation595_spill] sm:$0xff] }
 0x787   : > { %v4898_v7 = vmul.f32 %v4754_v49, %v17648_v62  ;;  %v14002_v30 = vsub.f32 %v4878_v48, %v17649_v51  ;;  %vm4300_vm12 = vcmp.ge.f32.partialorder %v17650_v9, 0.0  ;;  %7227 = vrcp.f32 %v17651_v38  ;;  %v17656_v19 = vld [vmem:[#allocation828_spill] sm:$0xff]  ;;  %v17657_v49 = vld [vmem:[#allocation693_spill] sm:$0xff]  ;;  %v17662_v24 = vld [vmem:[#allocation663_spill] sm:$0xff] }
 0x788   : > { %v5674_v21 = vadd.f32 %v5673_v33, %v13708_v34  ;;  %vm4320_vm13 = vcmp.ge.f32.partialorder %v17652_v17, 0.0  ;;  %5521 = vmatpush.msrb.mxu2 %v13998_v8  ;;  %v4861_v2 = vmul.f32 %v4717_v36, %v17654_v61  ;;  %v4733_v14 = vmul.f32 %v7222_v20, %v4445_v45  ;;  %v17658_v45 = vld [vmem:[#allocation653_spill] sm:$0xff]  ;;  %v17665_v38 = vld [vmem:[#allocation772_spill] sm:$0xff] }
 0x789   : > { %v14011_v31 = vsub.f32 %v4898_v7, %v17653_v1  ;;  %5550 = vmatpush.msrb.mxu3 %v14002_v30  ;;  %v4428_v33 = vsel %vm4284_vm11, 1.0, %v17655_v15  ;;  %7229 = vrcp.f32 %v17656_v19  ;;  %v6876_v40 = vunpack.i.h.bf16 %v13916_v35  ;;  %v17664_v36 = vld [vmem:[#allocation853_spill] sm:$0xff]  ;;  %v17666_v17 = vld [vmem:[#allocation780_spill] sm:$0xff] }
 0x78a   : > { %v5675_v34 = vadd.f32 %v5674_v21, %v13685_v58  ;;  %v7224_v29 = vpop.eup %7223  ;;  %v6920_v58 = vunpack.i.l.bf16 %v13954_v41  ;;  %v14024_v25 = vsub.f32 %v4861_v2, %v17657_v49  ;;  %v4877_v10 = vmul.f32 %v4733_v14, %v17658_v45  ;;  %v17660_v21 = vld [vmem:[#allocation824_spill] sm:$0xff]  ;;  %v17674_v45 = vld [vmem:[#allocation685_spill] sm:$0xff] }
 0x78b   : > { %5575 = vmatpush.msra.mxu0 %v14011_v31  ;;  %v4753_v48 = vmul.f32 %v7224_v29, %v4465_v11  ;;  %v4444_v13 = vsel %vm4300_vm12, 1.0, %v17659_v12  ;;  %v4464_v35 = vsel %vm4320_vm13, 1.0, %v17660_v21  ;;  %5451 = vmatmul.f32.gmra.mxu3 %v6876_v40  ;;  %7231 = vrcp.f32 %v17662_v24  ;;  %v17663_v11 = vld [vmem:[#allocation794_spill] sm:$0xff]  ;;  %v17669_v2 = vld [vmem:[#allocation852_spill] sm:$0xff] }
 0x78c   : > { %v5676_v54 = vadd.f32 %v5675_v34, %v13662_v53  ;;  %v7226_v4 = vpop.eup %7225  ;;  %5477 = vmatmul.f32.gmra.mxu0 %v6920_v58  ;;  %v17661_v53 = vld [vmem:[#allocation198_spill] sm:$0xff]  ;;  %5522 = vmatpush.msrb.mxu2 %v14024_v25  ;;  %v14038_v7 = vsub.f32 %v4877_v10, %v17663_v11  ;;  %vm4299_vm15 = vcmp.ge.f32.partialorder %v17665_v38, 0.0  ;;  %7233 = vrcp.f32 %v17666_v17  ;;  %v17671_v40 = vld [vmem:[#allocation652_spill] sm:$0xff]  ;;  %v17682_v17 = vld [vmem:[#allocation851_spill] sm:$0xff] }
 0x78d   : > { %vm4283_vm14 = vcmp.ge.f32.partialorder %v17661_v53, 0.0  ;;  %v4897_v20 = vmul.f32 %v4753_v48, %v17664_v36  ;;  %v4716_v51 = vmul.f32 %v7226_v4, %v4428_v33  ;;  %v7228_v9 = vpop.eup %7227  ;;  %v17667_v34 = vld [vmem:[#allocation482_spill] sm:$0xff]  ;;  %v6923_v1 = vunpack.i.h.bf16 %v13954_v41  ;;  %6098 = vmatpush.msra.mxu1 %v14011_v31  ;;  %v17675_v48 = vld [vmem:[#allocation796_spill] sm:$0xff]  ;;  %v17677_v53 = vld [vmem:[#allocation821_spill] sm:$0xff] }
 0x78e   : > { %v5677_v62 = vadd.f32 %v5676_v54, %v13620_v56  ;;  %vm4319_vm0 = vcmp.ge.f32.partialorder %v17667_v34, 0.0  ;;  %v17668_v56 = vld [vmem:[#allocation884_spill] sm:$0xff]  ;;  %5551 = vmatpush.msrb.mxu3 %v14038_v7  ;;  %v17670_v29 = vld [vmem:[#allocation698_spill] sm:$0xff]  ;;  %v4732_v33 = vmul.f32 %v7228_v9, %v4444_v13  ;;  %v4427_v58 = vsel %vm4283_vm14, 1.0, %v17671_v40  ;;  %v17672_v54 = vld [vmem:[#allocation825_spill] sm:$0xff] }
 0x78f   : > { %v14049_v14 = vsub.f32 %v4897_v20, %v17669_v2  ;;  %v4860_v15 = vmul.f32 %v4716_v51, %v17670_v29  ;;  %v7230_v19 = vpop.eup %7229  ;;  %7235 = vrcp.f32 %v17672_v54  ;;  %5506 = vmatmul.f32.gmra.mxu1 %v6923_v1  ;;  %v17673_v41 = vld [vmem:[#allocation882_spill] sm:$0xff]  ;;  %v17678_v11 = vld [vmem:[#allocation180_spill] sm:$0xff]  ;;  %v17679_v36 = vld [vmem:[#allocation655_spill] sm:$0xff] }
 0x790   : > { %v5678_v61 = vadd.f32 %v5677_v62, %v17668_v56  ;;  %v4876_v4 = vmul.f32 %v4732_v33, %v17675_v48  ;;  %v4752_v12 = vmul.f32 %v7230_v19, %v4464_v35  ;;  %v17676_v13 = vld [vmem:[#allocation534_spill] sm:$0xff]  ;;  %v4463_v62 = vsel %vm4319_vm0, 1.0, %v17677_v53  ;;  %v17680_v20 = vld [vmem:[#allocation880_spill] sm:$0xff]  ;;  %v17681_v35 = vld [vmem:[#allocation791_spill] sm:$0xff]  ;;  %v14077_v56 = vpop.trf.xlu2 }
 0x791   : > { %5576 = vmatpush.msra.mxu0 %v14049_v14  ;;  %v14059_v10 = vsub.f32 %v4860_v15, %v17674_v45  ;;  %v7232_v21 = vpop.eup %7231  ;;  %v4443_v24 = vsel %vm4299_vm15, 1.0, %v17676_v13  ;;  %vm4282_vm1 = vcmp.ge.f32.partialorder %v17678_v11, 0.0  ;;  %7237 = vrcp.f32 %v17679_v36  ;;  %6101 = vmatpush.msra.mxu1 %v14049_v14  ;;  %v17684_v2 = vld [vmem:[#allocation779_spill] sm:$0xff]  ;;  %v17685_v29 = vld [vmem:[#allocation809_spill] sm:$0xff]  ;;  %v17686_v15 = vld [vmem:[#allocation878_spill] sm:$0xff] }
 0x792   : > { %v5679_v49 = vadd.f32 %v5678_v61, %v17673_v41  ;;  %v14074_v9 = vsub.f32 %v4876_v4, %v17681_v35  ;;  %v4896_v38 = vmul.f32 %v4752_v12, %v17682_v17  ;;  %v4715_v1 = vmul.f32 %v7232_v21, %v4427_v58  ;;  %v7234_v34 = vpop.eup %7233  ;;  %v17683_v61 = vld [vmem:[#allocation770_spill] sm:$0xff]  ;;  %v17688_v54 = vld [vmem:[#allocation692_spill] sm:$0xff]  ;;  %v17689_v45 = vld [vmem:[#allocation647_spill] sm:$0xff] }
 0x793   : > { %5523 = vmatpush.msrb.mxu2 %v14059_v10  ;;  %vm4298_vm2 = vcmp.ge.f32.partialorder %v17683_v61, 0.0  ;;  %7239 = vrcp.f32 %v17684_v2  ;;  %vm4318_vm3 = vcmp.ge.f32.partialorder %v17685_v29, 0.0  ;;  %v17687_v19 = vld [vmem:[#allocation850_spill] sm:$0xff]  ;;  %v4426_v48 = vsel %vm4282_vm1, 1.0, %v17689_v45  ;;  %v17690_v4 = vld [vmem:[#allocation823_spill] sm:$0xff]  ;;  %v17692_v21 = vld [vmem:[#allocation876_spill] sm:$0xff] }
 0x794   : > { %v5680_v51 = vadd.f32 %v5679_v49, %v17680_v20  ;;  %5552 = vmatpush.msrb.mxu3 %v14074_v9  ;;  %v14085_v40 = vsub.f32 %v4896_v38, %v17687_v19  ;;  %v4859_v41 = vmul.f32 %v4715_v1, %v17688_v54  ;;  %v4731_v49 = vmul.f32 %v7234_v34, %v4443_v24  ;;  %v17691_v12 = vld [vmem:[#allocation162_spill] sm:$0xff]  ;;  %v17693_v53 = vld [vmem:[#allocation677_spill] sm:$0xff]  ;;  %v14103_v1 = vpop.trf.xlu0 }
 0x795   : > { %v7236_v58 = vpop.eup %7235  ;;  %7241 = vrcp.f32 %v17690_v4  ;;  %vm4281_vm4 = vcmp.ge.f32.partialorder %v17691_v12, 0.0  ;;  %v17694_v20 = vld [vmem:[#allocation793_spill] sm:$0xff]  ;;  %v17696_v38 = vld [vmem:[#allocation642_spill] sm:$0xff] }
 0x796   : > { %v5681_v33 = vadd.f32 %v5680_v51, %v17686_v15  ;;  %5577 = vmatpush.msra.mxu0 %v14085_v40  ;;  %v14096_v36 = vsub.f32 %v4859_v41, %v17693_v53  ;;  %v4875_v51 = vmul.f32 %v4731_v49, %v17694_v20  ;;  %v4751_v35 = vmul.f32 %v7236_v58, %v4463_v62  ;;  %v17695_v17 = vld [vmem:[#allocation573_spill] sm:$0xff]  ;;  %v17697_v34 = vld [vmem:[#allocation874_spill] sm:$0xff]  ;;  %v17705_v20 = vld [vmem:[#allocation848_spill] sm:$0xff] }
 0x797   : > { %v7238_v24 = vpop.eup %7237  ;;  %v4442_v11 = vsel %vm4298_vm2, 1.0, %v17695_v17  ;;  %7243 = vrcp.f32 %v17696_v38  ;;  %6104 = vmatpush.msra.mxu1 %v14085_v40  ;;  %v17698_v15 = vld [vmem:[#allocation790_spill] sm:$0xff]  ;;  %v17699_v19 = vld [vmem:[#allocation849_spill] sm:$0xff]  ;;  %v17707_v17 = vld [vmem:[#allocation808_spill] sm:$0xff] }
 0x798   : > { %v5682_v13 = vadd.f32 %v5681_v33, %v17692_v21  ;;  %5524 = vmatpush.msrb.mxu2 %v14096_v36  ;;  %v14109_v33 = vsub.f32 %v4875_v51, %v17698_v15  ;;  %v4895_v62 = vmul.f32 %v4751_v35, %v17699_v19  ;;  %v4714_v54 = vmul.f32 %v7238_v24, %v4426_v48  ;;  %v17700_v49 = vld [vmem:[#allocation645_spill] sm:$0xff]  ;;  %v17701_v58 = vld [vmem:[#allocation630_spill] sm:$0xff]  ;;  %v17706_v48 = vld [vmem:[#allocation687_spill] sm:$0xff] }
 0x799   : > { %v7240_v41 = vpop.eup %7239  ;;  %v4462_v61 = vsel %vm4318_vm3, 1.0, %v17700_v49  ;;  %v4425_v45 = vsel %vm4281_vm4, 1.0, %v17701_v58  ;;  %v17702_v4 = vld [vmem:[#allocation762_spill] sm:$0xff]  ;;  %vm4317_vm6 = vcmp.ge.f32.partialorder %v17707_v17, 0.0  ;;  %v17710_v15 = vld [vmem:[#allocation669_spill] sm:$0xff] }
 0x79a   : > { %v5683_v2 = vadd.f32 %v5682_v13, %v17697_v34  ;;  %vm4297_vm5 = vcmp.ge.f32.partialorder %v17702_v4, 0.0  ;;  %v17703_v21 = vld [vmem:[#allocation538_spill] sm:$0xff]  ;;  %v17704_v13 = vld [vmem:[#allocation872_spill] sm:$0xff]  ;;  %5553 = vmatpush.msrb.mxu3 %v14109_v33  ;;  %v14123_v51 = vsub.f32 %v4895_v62, %v17705_v20  ;;  %v4858_v35 = vmul.f32 %v4714_v54, %v17706_v48  ;;  %v17716_v48 = vld [vmem:[#allocation623_spill] sm:$0xff] }
 0x79b   : > { %7245 = vrcp.f32 %v17703_v21  ;;  %v4730_v24 = vmul.f32 %v7240_v41, %v4442_v11  ;;  %v7242_v29 = vpop.eup %7241  ;;  %v17708_v38 = vld [vmem:[#allocation822_spill] sm:$0xff]  ;;  %v17712_v21 = vld [vmem:[#allocation529_spill] sm:$0xff]  ;;  %v17714_v41 = vld [vmem:[#allocation624_spill] sm:$0xff] }
 0x79c   : > { %v5684_v53 = vadd.f32 %v5683_v2, %v17704_v13  ;;  %7247 = vrcp.f32 %v17708_v38  ;;  %v17709_v12 = vld [vmem:[#allocation870_spill] sm:$0xff]  ;;  %5578 = vmatpush.msra.mxu0 %v14123_v51  ;;  %v14131_v19 = vsub.f32 %v4858_v35, %v17710_v15  ;;  %v4750_v58 = vmul.f32 %v7242_v29, %v4462_v61  ;;  %6107 = vmatpush.msra.mxu1 %v14123_v51  ;;  %v17717_v61 = vld [vmem:[#allocation847_spill] sm:$0xff] }
 0x79d   : > { %v17711_v2 = vld [vmem:[#allocation638_spill] sm:$0xff]  ;;  %v7244_v62 = vpop.eup %7243  ;;  %v4441_v11 = vsel %vm4297_vm5, 1.0, %v17712_v21  ;;  %7249 = vrcp.f32 %v17714_v41  ;;  %v6925_v13 = vunpack.i.l.bf16 %v14077_v56  ;;  %v17718_v38 = vld [vmem:[#allocation639_spill] sm:$0xff] }
 0x79e   : > { %v5685_v34 = vadd.f32 %v5684_v53, %v17709_v12  ;;  %v4874_v49 = vmul.f32 %v4730_v24, %v17711_v2  ;;  %v17713_v54 = vld [vmem:[#allocation150_spill] sm:$0xff]  ;;  %v17715_v53 = vld [vmem:[#allocation868_spill] sm:$0xff]  ;;  %5525 = vmatpush.msrb.mxu2 %v14131_v19  ;;  %v4894_v24 = vmul.f32 %v4750_v58, %v17717_v61  ;;  %v4713_v29 = vmul.f32 %v7244_v62, %v4425_v45  ;;  %v17719_v15 = vld [vmem:[#allocation759_spill] sm:$0xff] }
 0x79f   : > { %vm4280_vm7 = vcmp.ge.f32.partialorder %v17713_v54, 0.0  ;;  %v4461_v12 = vsel %vm4317_vm6, 1.0, %v17718_v38  ;;  %vm4296_vm8 = vcmp.ge.f32.partialorder %v17719_v15, 0.0  ;;  %v17720_v2 = vld [vmem:[#allocation777_spill] sm:$0xff]  ;;  %5480 = vmatmul.f32.gmra.mxu0 %v6925_v13  ;;  %v17721_v21 = vld [vmem:[#allocation866_spill] sm:$0xff]  ;;  %v17726_v38 = vld [vmem:[#allocation820_spill] sm:$0xff]  ;;  %v14163_v13 = vpop.trf.xlu0 }
 0x7a0   : > { %v5686_v20 = vadd.f32 %v5685_v34, %v17715_v53  ;;  %v14144_v35 = vsub.f32 %v4874_v49, %v17716_v48  ;;  %7251 = vrcp.f32 %v17720_v2  ;;  %v17722_v41 = vld [vmem:[#allocation846_spill] sm:$0xff]  ;;  %v17723_v53 = vld [vmem:[#allocation676_spill] sm:$0xff]  ;;  %v17725_v61 = vld [vmem:[#allocation805_spill] sm:$0xff] }
 0x7a1   : > { %v7246_v4 = vpop.eup %7245  ;;  %v14155_v49 = vsub.f32 %v4894_v24, %v17722_v41  ;;  %v4857_v58 = vmul.f32 %v4713_v29, %v17723_v53  ;;  %v17724_v48 = vld [vmem:[#allocation618_spill] sm:$0xff]  ;;  %vm4316_vm9 = vcmp.ge.f32.partialorder %v17725_v61, 0.0  ;;  %7253 = vrcp.f32 %v17726_v38  ;;  %v17728_v29 = vld [vmem:[#allocation631_spill] sm:$0xff] }
 0x7a2   : > { %v5687_v34 = vadd.f32 %v5686_v20, %v17721_v21  ;;  %5554 = vmatpush.msrb.mxu3 %v14144_v35  ;;  %v4729_v45 = vmul.f32 %v7246_v4, %v4441_v11  ;;  %v7248_v62 = vpop.eup %7247  ;;  %v4424_v17 = vsel %vm4280_vm7, 1.0, %v17724_v48  ;;  %v17727_v24 = vld [vmem:[#allocation654_spill] sm:$0xff]  ;;  %v17729_v41 = vld [vmem:[#allocation519_spill] sm:$0xff]  ;;  %v17731_v48 = vld [vmem:[#allocation617_spill] sm:$0xff]  ;;  %v6928_v61 = vunpack.i.h.bf16 %v14077_v56 }
 0x7a3   : > { %5579 = vmatpush.msra.mxu0 %v14155_v49  ;;  %v14168_v2 = vsub.f32 %v4857_v58, %v17727_v24  ;;  %v4749_v4 = vmul.f32 %v7248_v62, %v4461_v12  ;;  %v7250_v21 = vpop.eup %7249  ;;  %v4440_v54 = vsel %vm4296_vm8, 1.0, %v17729_v41  ;;  %v17730_v53 = vld [vmem:[#allocation131_spill] sm:$0xff]  ;;  %7255 = vrcp.f32 %v17731_v48  ;;  %6110 = vmatpush.msra.mxu1 %v14155_v49  ;;  %v17734_v24 = vld [vmem:[#allocation789_spill] sm:$0xff]  ;;  %v17735_v41 = vld [vmem:[#allocation844_spill] sm:$0xff] }
 0x7a4   : > { %v5688_v20 = vadd.f32 %v5687_v34, %v13843_v28  ;;  %v4873_v11 = vmul.f32 %v4729_v45, %v17728_v29  ;;  %vm4279_vm10 = vcmp.ge.f32.partialorder %v17730_v53, 0.0  ;;  %v17732_v34 = vld [vmem:[#allocation783_spill] sm:$0xff]  ;;  %v17733_v45 = vld [vmem:[#allocation845_spill] sm:$0xff]  ;;  %v4712_v62 = vmul.f32 %v7250_v21, %v4424_v17  ;;  %v17739_v21 = vld [vmem:[#allocation518_spill] sm:$0xff]  ;;  %5509 = vmatmul.f32.gmra.mxu1 %v6928_v61 }
 0x7a5   : > { %5526 = vmatpush.msrb.mxu2 %v14168_v2  ;;  %v4893_v12 = vmul.f32 %v4749_v4, %v17733_v45  ;;  %v4460_v15 = vsel %vm4316_vm9, 1.0, %v17734_v24  ;;  %v17738_v4 = vld [vmem:[#allocation758_spill] sm:$0xff]  ;;  %7257 = vrcp.f32 %v17739_v21  ;;  %v17742_v24 = vld [vmem:[#allocation812_spill] sm:$0xff]  ;;  %v17743_v56 = vld [vmem:[#allocation781_spill] sm:$0xff] }
 0x7a6   : > { %v5689_v28 = vadd.f32 %v5688_v20, %v13806_v27  ;;  %v14180_v58 = vsub.f32 %v4873_v11, %v17732_v34  ;;  %v7252_v38 = vpop.eup %7251  ;;  %v17736_v27 = vld [vmem:[#allocation671_spill] sm:$0xff]  ;;  %v17737_v34 = vld [vmem:[#allocation612_spill] sm:$0xff]  ;;  %vm4295_vm11 = vcmp.ge.f32.partialorder %v17738_v4, 0.0  ;;  %7259 = vrcp.f32 %v17742_v24  ;;  %v17748_v61 = vld [vmem:[#allocation661_spill] sm:$0xff] }
 0x7a7   : > { %v14189_v48 = vsub.f32 %v4893_v12, %v17735_v41  ;;  %v4856_v20 = vmul.f32 %v4712_v62, %v17736_v27  ;;  %v4728_v39 = vmul.f32 %v7252_v38, %v4440_v54  ;;  %v7254_v11 = vpop.eup %7253  ;;  %v4423_v17 = vsel %vm4279_vm10, 1.0, %v17737_v34  ;;  %v17741_v12 = vld [vmem:[#allocation787_spill] sm:$0xff]  ;;  %v14205_v53 = vpop.trf.xlu0  ;;  %v17745_v34 = vld [vmem:[#allocation513_spill] sm:$0xff]  ;;  %v17751_v4 = vld [vmem:[#allocation720_spill] sm:$0xff] }
 0x7a8   : > { %v5690_v29 = vadd.f32 %v5689_v28, %v13773_v22  ;;  %5555 = vmatpush.msrb.mxu3 %v14180_v58  ;;  %v17740_v28 = vld [vmem:[#allocation648_spill] sm:$0xff]  ;;  %v4748_v62 = vmul.f32 %v7254_v11, %v4460_v15  ;;  %v17746_v15 = vld [vmem:[#allocation814_spill] sm:$0xff]  ;;  %vm4314_vm13 = vcmp.ge.f32.partialorder %v17751_v4, 0.0  ;;  %v17754_v24 = vld [vmem:[#allocation641_spill] sm:$0xff] }
 0x7a9   : > { %5580 = vmatpush.msra.mxu0 %v14189_v48  ;;  %v14201_v45 = vsub.f32 %v4856_v20, %v17740_v28  ;;  %v4872_v54 = vmul.f32 %v4728_v39, %v17741_v12  ;;  %v7256_v38 = vpop.eup %7255  ;;  %v4439_v39 = vsel %vm4295_vm11, 1.0, %v17745_v34  ;;  %7261 = vrcp.f32 %v17746_v15  ;;  %6113 = vmatpush.msra.mxu1 %v14189_v48  ;;  %v17749_v28 = vld [vmem:[#allocation817_spill] sm:$0xff]  ;;  %v17750_v12 = vld [vmem:[#allocation702_spill] sm:$0xff] }
 0x7aa   : > { %v5691_v22 = vadd.f32 %v5690_v29, %v13721_v63  ;;  %v17744_v29 = vld [vmem:[#allocation843_spill] sm:$0xff]  ;;  %v4711_v20 = vmul.f32 %v7256_v38, %v4423_v17  ;;  %7263 = vrcp.f32 %v17749_v28  ;;  %vm4313_vm12 = vcmp.ge.f32.partialorder %v17750_v12, 0.0  ;;  %v17753_v38 = vld [vmem:[#allocation886_spill] sm:$0xff]  ;;  %v17758_v15 = vld [vmem:[#allocation885_spill] sm:$0xff] }
 0x7ab   : > { %5527 = vmatpush.msrb.mxu2 %v14201_v45  ;;  %v14210_v63 = vsub.f32 %v4872_v54, %v17743_v56  ;;  %v4892_v27 = vmul.f32 %v4748_v62, %v17744_v29  ;;  %v7258_v17 = vpop.eup %7257  ;;  %v17752_v54 = vld [vmem:[#allocation646_spill] sm:$0xff]  ;;  %v6962_v62 = vunpack.i.l.bf16 %v14103_v1  ;;  %v17755_v56 = vld [vmem:[#allocation644_spill] sm:$0xff]  ;;  %v17760_v28 = vld [vmem:[#allocation611_spill] sm:$0xff] }
 0x7ac   : > { %v5692_v41 = vadd.f32 %v5691_v22, %v13689_v59  ;;  %v17747_v59 = vld [vmem:[#allocation842_spill] sm:$0xff]  ;;  %v4855_v22 = vmul.f32 %v4711_v20, %v17748_v61  ;;  %7265 = vrcp.f32 %v17752_v54  ;;  %v4727_v29 = vmul.f32 %v7258_v17, %v4439_v39  ;;  %v17756_v20 = vld [vmem:[#allocation679_spill] sm:$0xff] }
 0x7ad   : > { %5556 = vmatpush.msrb.mxu3 %v14210_v63  ;;  %v14221_v21 = vsub.f32 %v4892_v27, %v17747_v59  ;;  %7267 = vrcp.f32 %v17755_v56  ;;  %v7260_v27 = vpop.eup %7259  ;;  %vm4312_vm14 = vcmp.ge.f32.partialorder %v17756_v20, 0.0  ;;  %v17757_v34 = vld [vmem:[#allocation802_spill] sm:$0xff]  ;;  %v6965_v17 = vunpack.i.h.bf16 %v14103_v1  ;;  %v17768_v1 = vld [vmem:[#allocation553_spill] sm:$0xff] }
 0x7ae   : > { %v5693_v11 = vadd.f32 %v5692_v41, %v13677_v0  ;;  %v14232_v41 = vsub.f32 %v4855_v22, %v17754_v24  ;;  %vm4315_vm15 = vcmp.ge.f32.partialorder %v17757_v34, 0.0  ;;  %v4871_v12 = vmul.f32 %v4727_v29, %v17760_v28  ;;  %v17761_v54 = vld [vmem:[#allocation674_spill] sm:$0xff] }
 0x7af   : > { %5581 = vmatpush.msra.mxu0 %v14221_v21  ;;  %6116 = vmatpush.msra.mxu1 %v14221_v21  ;;  %v7262_v22 = vpop.eup %7261  ;;  %vm4311_vm0 = vcmp.ge.f32.partialorder %v17761_v54, 0.0  ;;  %v14247_v24 = vpop.trf.xlu0  ;;  %v17764_v34 = vld [vmem:[#allocation774_spill] sm:$0xff] }
 0x7b0   : > { %v5694_v0 = vadd.f32 %v5693_v11, %v17753_v38  ;;  %5528 = vmatpush.msrb.mxu2 %v14232_v41  ;;  %v17759_v11 = vld [vmem:[#allocation813_spill] sm:$0xff]  ;;  %v7264_v56 = vpop.eup %7263  ;;  %v17766_v29 = vld [vmem:[#allocation542_spill] sm:$0xff]  ;;  %v4455_v3 = vsel %vm4311_vm0, 1.0, %v17768_v1 }
 0x7b1   : > { %v4457_v61 = vsel %vm4313_vm12, 1.0, %v17759_v11  ;;  %v17762_v38 = vld [vmem:[#allocation701_spill] sm:$0xff]  ;;  %5529 = vmatmul.f32.vlgmr.msrb.gmra.mxu2 %v6962_v62  ;;  %v17765_v11 = vld [vmem:[#allocation614_spill] sm:$0xff]  ;;  %v14253_v28 = vsub.f32 %v4871_v12, %v17766_v29  ;;  %v17769_v12 = vld [vmem:[#allocation879_spill] sm:$0xff] }
 0x7b2   : > { %v5695_v59 = vadd.f32 %v5694_v0, %v17758_v15  ;;  %v4458_v39 = vsel %vm4314_vm13, 1.0, %v17762_v38  ;;  %v17763_v0 = vld [vmem:[#allocation883_spill] sm:$0xff]  ;;  %v4456_v15 = vsel %vm4312_vm14, 1.0, %v17764_v34  ;;  %v4459_v5 = vsel %vm4315_vm15, 1.0, %v17765_v11  ;;  %6087 = vmatpush.msra.mxu2 %v13876_v50  ;;  %v7266_v54 = vpop.eup %7265  ;;  %v17767_v62 = vld [vmem:[#allocation881_spill] sm:$0xff]  ;;  %v5323_v34 = vpop.trf.xlu1 }
 0x7b3   : > { %v4745_v4 = vmul.f32 %v7264_v56, %v4457_v61  ;;  %v7268_v38 = vpop.eup %7267  ;;  %v4746_v47 = vmul.f32 %v7266_v54, %v4458_v39  ;;  %5557 = vmatpush.msrb.mxu3 %v14253_v28  ;;  %v17770_v29 = vld [vmem:[#allocation839_spill] sm:$0xff]  ;;  %v6967_v61 = vunpack.i.l.bf16 %v14163_v13  ;;  %v4743_v56 = vmul.f32 %v7260_v27, %v4455_v3  ;;  %v17772_v39 = vld [vmem:[#allocation841_spill] sm:$0xff] }
 0x7b4   : > { %v5696_v20 = vadd.f32 %v5695_v59, %v17763_v0  ;;  %v4744_v59 = vmul.f32 %v7262_v22, %v4456_v15  ;;  %v4747_v0 = vmul.f32 %v7268_v38, %v4459_v5  ;;  %5558 = vmatmul.f32.vlgmr.msrb.gmra.mxu3 %v6965_v17  ;;  %6090 = vmatpush.msra.mxu2 %v13901_v23  ;;  %v17773_v5 = vld [vmem:[#allocation877_spill] sm:$0xff]  ;;  %v17774_v17 = vld [vmem:[#allocation830_spill] sm:$0xff]  ;;  %v6970_v3 = vunpack.i.h.bf16 %v14163_v13  ;;  %v17777_v27 = vld [vmem:[#allocation875_spill] sm:$0xff] }
 0x7b5   : > { %v4890_v32 = vmul.f32 %v4746_v47, %v17770_v29  ;;  %6088 = vmatpush.msra.mxu3 %v13876_v50  ;;  %v17776_v47 = vld [vmem:[#allocation836_spill] sm:$0xff]  ;;  %v17781_v13 = vld [vmem:[#allocation615_spill] sm:$0xff] }
 0x7b6   : > { %v5697_v55 = vadd.f32 %v5696_v20, %v17767_v62  ;;  %v17771_v20 = vld [vmem:[#allocation832_spill] sm:$0xff]  ;;  %v4891_v54 = vmul.f32 %v4747_v0, %v17772_v39  ;;  %6093 = vmatpush.msra.mxu2 %v13941_v18  ;;  %v4888_v15 = vmul.f32 %v4744_v59, %v17774_v17  ;;  %v17778_v0 = vld [vmem:[#allocation829_spill] sm:$0xff]  ;;  %v6972_v17 = vunpack.i.l.bf16 %v14205_v53 }
 0x7b7   : > { %v4889_v62 = vmul.f32 %v4745_v4, %v17771_v20  ;;  %6091 = vmatpush.msra.mxu3 %v13901_v23 }
 0x7b8   : > { %v5698_v11 = vadd.f32 %v5697_v55, %v17769_v12  ;;  %v17775_v55 = vld [vmem:[#allocation833_spill] sm:$0xff]  ;;  %v14274_v1 = vsub.f32 %v4891_v54, %v17776_v47  ;;  %6096 = vmatpush.msra.mxu2 %v13986_v57  ;;  %v4887_v12 = vmul.f32 %v4743_v56, %v17778_v0  ;;  %v14290_v20 = vsub.f32 %v4888_v15, %v17781_v13 }
 0x7b9   : > { %v14271_v38 = vsub.f32 %v4890_v32, %v17775_v55  ;;  %6094 = vmatpush.msra.mxu3 %v13941_v18  ;;  %5532 = vmatmul.f32.gmra.mxu2 %v6967_v61  ;;  %v17780_v32 = vld [vmem:[#allocation873_spill] sm:$0xff]  ;;  %v17782_v61 = vld [vmem:[#allocation871_spill] sm:$0xff]  ;;  %v6975_v55 = vunpack.i.h.bf16 %v14205_v53 }
 0x7ba   : > { %v5699_v22 = vadd.f32 %v5698_v11, %v17773_v5  ;;  %v17779_v11 = vld [vmem:[#allocation826_spill] sm:$0xff]  ;;  %5582 = vmatpush.msra.mxu0 %v14274_v1  ;;  %6119 = vmatpush.msra.mxu1 %v14274_v1  ;;  %v5324_v54 = vpop.trf.xlu1  ;;  %v17784_v5 = vld [vmem:[#allocation869_spill] sm:$0xff] }
 0x7bb   : > { %v14282_v29 = vsub.f32 %v4889_v62, %v17779_v11  ;;  %6097 = vmatpush.msra.mxu3 %v13986_v57  ;;  %6099 = vmatpush.msra.mxu2 %v14011_v31  ;;  %v17783_v62 = vld [vmem:[#allocation628_spill] sm:$0xff] }
 0x7bc   : > { %v5700_v4 = vadd.f32 %v5699_v22, %v17777_v27  ;;  %5583 = vmatpush.msra.mxu0 %v14271_v38  ;;  %5561 = vmatmul.f32.gmra.mxu3 %v6970_v3  ;;  %v14297_v39 = vsub.f32 %v4887_v12, %v17783_v62  ;;  %v17786_v62 = vld [vmem:[#allocation891_spill] sm:$0xff] }
 0x7bd   : > { %6100 = vmatpush.msra.mxu3 %v14011_v31  ;;  %6122 = vmatpush.msra.mxu1 %v14271_v38 }
 0x7be   : > { %v5701_v59 = vadd.f32 %v5700_v4, %v17780_v32  ;;  %5584 = vmatpush.msra.mxu0 %v14282_v29  ;;  %6102 = vmatpush.msra.mxu2 %v14049_v14 }
 0x7bf   : > { %6103 = vmatpush.msra.mxu3 %v14049_v14  ;;  %6125 = vmatpush.msra.mxu1 %v14282_v29 }
 0x7c0   : > { %v5702_v56 = vadd.f32 %v5701_v59, %v17782_v61  ;;  %5585 = vmatpush.msra.mxu0 %v14290_v20  ;;  %6105 = vmatpush.msra.mxu2 %v14085_v40  ;;  %v5356_v61 = vpop.f32.mrf.mxu0 }
 0x7c1   : > { %6106 = vmatpush.msra.mxu3 %v14085_v40  ;;  %6128 = vmatpush.msra.mxu1 %v14290_v20 }
 0x7c2   : > { %v5703_v22 = vadd.f32 %v5702_v56, %v17784_v5  ;;  %5586 = vmatpush.msra.mxu0 %v14297_v39  ;;  %6108 = vmatpush.msra.mxu2 %v14123_v51  ;;  %v17788_v5 = vld [vmem:[#allocation889_spill] sm:$0xff] }
 0x7c3   : > { %5587 = vmatmul.f32.vlgmr.msra.gmra.mxu0 %v5323_v34  ;;  %6109 = vmatpush.msra.mxu3 %v14123_v51  ;;  %v6977_v34 = vunpack.i.l.bf16 %v14247_v24 }
 0x7c4   : > { %v5704_v15 = vadd.f32 %v5703_v22, %v14232_v41  ;;  %6131 = vmatpush.msra.mxu1 %v14297_v39  ;;  %5535 = vmatmul.f32.gmra.mxu2 %v6972_v17 }
 0x7c5   : > { %5564 = vmatmul.f32.gmra.mxu3 %v6975_v55  ;;  %6111 = vmatpush.msra.mxu2 %v14155_v49 }
 0x7c6   : > { %v5705_v47 = vadd.f32 %v5704_v15, %v14201_v45  ;;  %6112 = vmatpush.msra.mxu3 %v14155_v49  ;;  %5590 = vmatmul.f32.vlgmr.msra.gmra.mxu1 %v5324_v54  ;;  %v5325_v45 = vpop.trf.xlu1  ;;  %v17787_v54 = vld [vmem:[#allocation890_spill] sm:$0xff] }
 0x7c7   : > { %6114 = vmatpush.msra.mxu2 %v14189_v48 }
 0x7c8   : > { %v5706_v41 = vadd.f32 %v5705_v47, %v14168_v2  ;;  %6115 = vmatpush.msra.mxu3 %v14189_v48  ;;  %v6980_v2 = vunpack.i.h.bf16 %v14247_v24  ;;  %v5359_v22 = vpop.f32.mrf.mxu0 }
 0x7c9   : > { %6117 = vmatpush.msra.mxu2 %v14221_v21 }
 0x7ca   : > { %v5707_v53 = vadd.f32 %v5706_v41, %v14131_v19  ;;  %6118 = vmatpush.msra.mxu3 %v14221_v21 }
 0x7cb   : > { %6120 = vmatpush.msra.mxu2 %v14274_v1 }
 0x7cc   : > { %v5708_v3 = vadd.f32 %v5707_v53, %v14096_v36  ;;  %6121 = vmatpush.msra.mxu3 %v14274_v1  ;;  %5538 = vmatmul.f32.gmra.mxu2 %v6977_v34 }
 0x7cd   : > { %5567 = vmatmul.f32.gmra.mxu3 %v6980_v2  ;;  %6123 = vmatpush.msra.mxu2 %v14271_v38  ;;  %v5414_v2 = vpop.f32.mrf.mxu2 }
 0x7ce   : > { %v5709_v27 = vadd.f32 %v5708_v3, %v14059_v10  ;;  %6124 = vmatpush.msra.mxu3 %v14271_v38  ;;  %v5326_v24 = vpop.trf.xlu1 }
 0x7cf   : > { %6126 = vmatpush.msra.mxu2 %v14282_v29 }
 0x7d0   : > { %v5710_v19 = vadd.f32 %v5709_v27, %v14024_v25  ;;  %6127 = vmatpush.msra.mxu3 %v14282_v29  ;;  %v5362_v47 = vpop.f32.mrf.mxu0 }
 0x7d1   : > { %6129 = vmatpush.msra.mxu2 %v14290_v20 }
 0x7d2   : > { %v5711_v36 = vadd.f32 %v5710_v19, %v13998_v8  ;;  %6130 = vmatpush.msra.mxu3 %v14290_v20 }
 0x7d3   : > { %6132 = vmatpush.msra.mxu2 %v14297_v39 }
 0x7d4   : > { %v5712_v10 = vadd.f32 %v5711_v36, %v13961_v44  ;;  %6133 = vmatpush.msra.mxu3 %v14297_v39  ;;  %5593 = vmatmul.f32.vlgmr.msra.gmra.mxu2 %v5325_v45  ;;  %v5443_v36 = vpop.f32.mrf.mxu3 }
 0x7d5   : > { %5596 = vmatmul.f32.vlgmr.msra.gmra.mxu3 %v5326_v24 }
 0x7d6   : > { %v5713_v25 = vadd.f32 %v5712_v10, %v13913_v26 }
 0x7d8   : > { %v5714_v8 = vadd.f32 %v5713_v25, %v13880_v16  ;;  %v5365_v19 = vpop.f32.mrf.mxu0 }
 0x7da   : > { %v5715_v4 = vadd.f32 %v5714_v8, %v13852_v42 }
 0x7dc   : > { %v5716_v0 = vadd.f32 %v5715_v4, %v13819_v60 }
 0x7de   : > { %v5717_v44 = vadd.f32 %v5716_v0, %v13782_v52 }
 0x7e0   : > { %v5718_v12 = vadd.f32 %v5717_v44, %v13725_v46 }
 0x7e1   : > { %v5446_v25 = vpop.f32.mrf.mxu3 }
 0x7e2   : > { %v5719_v11 = vadd.f32 %v5718_v12, %v13697_v6 }
 0x7e4   : > { %v5720_v26 = vadd.f32 %v5719_v11, %v14253_v28  ;;  %v17785_v28 = vld [vmem:[#allocation892_spill] sm:$0xff] }
 0x7e6   : > { %v5721_v32 = vadd.f32 %v5720_v26, %v14210_v63  ;;  %v5385_v63 = vpop.f32.mrf.mxu1 }
 0x7e8   : > { %v5722_v59 = vadd.f32 %v5721_v32, %v14180_v58 }
 0x7ea   : > { %v5723_v13 = vadd.f32 %v5722_v59, %v14144_v35 }
 0x7ec   : > { %v5724_v16 = vadd.f32 %v5723_v13, %v14109_v33 }
 0x7ee   : > { %v5725_v42 = vadd.f32 %v5724_v16, %v14074_v9  ;;  %v17789_v9 = vld [vmem:[#allocation888_spill] sm:$0xff] }
 0x7f0   : > { %v5726_v60 = vadd.f32 %v5725_v42, %v14038_v7  ;;  %v17790_v7 = vld [vmem:[#allocation887_spill] sm:$0xff] }
 0x7f2   : > { %v5727_v52 = vadd.f32 %v5726_v60, %v14002_v30  ;;  %v5388_v30 = vpop.f32.mrf.mxu1 }
 0x7f3   : > { %v5389_v13 = vadd.f32 %v5388_v30, %v5359_v22 }
 0x7f4   : > { %v5728_v46 = vadd.f32 %v5727_v52, %v13973_v37 }
 0x7f6   : > { %v5729_v6 = vadd.f32 %v5728_v46, %v13926_v43 }
 0x7f8   : > { %v5730_v56 = vadd.f32 %v5729_v6, %v17785_v28 }
 0x7fa   : > { %v5731_v58 = vadd.f32 %v5730_v56, %v17786_v62  ;;  %v5391_v45 = vpop.f32.mrf.mxu1 }
 0x7fc   : > { %v5732_v35 = vadd.f32 %v5731_v58, %v17787_v54 }
 0x7fe   : > { %v5733_v33 = vadd.f32 %v5732_v35, %v17788_v5 }
 0x800   : > { %v5734_v17 = vadd.f32 %v5733_v33, %v17789_v9 }
 0x802   : > { %v5735_v15 = vadd.f32 %v5734_v17, %v17790_v7  ;;  %v5392_v7 = vadd.f32 %v5391_v45, %v5362_v47 }
 0x804   : > { %v5736_v37 = vadd.f32 %v5735_v15, %v14297_v39  ;;  %v5047_v15 = vld [vmem:[#allocation2 + $0x10] sm:$0xff] }
 0x806   : > { %v5737_v55 = vadd.f32 %v5736_v37, %v14290_v20 }
 0x808   : > { %v5738_v43 = vadd.f32 %v5737_v55, %v14282_v29  ;;  %v5394_v29 = vpop.f32.mrf.mxu1 }
 0x809   : > { %v5395_v55 = vadd.f32 %v5394_v29, %v5365_v19 }
 0x80a   : > { %v5739_v41 = vadd.f32 %v5738_v43, %v14271_v38 }
 0x80c   : > { %v5740_v53 = vadd.f32 %v5739_v41, %v14274_v1  ;;  %v5417_v1 = vpop.f32.mrf.mxu2 }
 0x80e   : > { %v5741_v34 = vadd.f32 %v5740_v53, %v14221_v21  ;;  %v5472_v21 = vpop.f32.mrf.mxu0  ;;  %v5048_v53 = vld [vmem:[#allocation2] sm:$0xff] }
 0x810   : > { %v5742_v3 = vadd.f32 %v5741_v34, %v14189_v48  ;;  %v5501_v8 = vpop.f32.mrf.mxu1 }
 0x812   : > { %v5743_v27 = vadd.f32 %v5742_v3, %v14155_v49 }
 0x814   : > { %v5744_v39 = vadd.f32 %v5743_v27, %v14123_v51  ;;  %v5420_v0 = vpop.f32.mrf.mxu2 }
 0x815   : > { %v5421_v3 = vadd.f32 %v5420_v0, %v5392_v7  ;;  %v5050_v0 = vld [vmem:[#allocation2 + $0x8] sm:$0xff] }
 0x816   : > { %v5745_v20 = vadd.f32 %v5744_v39, %v14085_v40  ;;  %v5475_v44 = vpop.f32.mrf.mxu0 }
 0x818   : > { %v5746_v10 = vadd.f32 %v5745_v20, %v14049_v14  ;;  %v5449_v14 = vpop.f32.mrf.mxu3  ;;  %v5504_v26 = vpop.f32.mrf.mxu1 }
 0x819   : > { %v5450_v20 = vadd.f32 %v5449_v14, %v5421_v3 }
 0x81a   : > { %v5747_v38 = vadd.f32 %v5746_v10, %v14011_v31  ;;  %v5386_v31 = vadd.f32 %v5385_v63, %v5356_v61 }
 0x81c   : > { %v5748_v24 = vadd.f32 %v5747_v38, %v13986_v57  ;;  %v5608_v57 = vld [vmem:[#allocation3] sm:$0x1]  ;;  %v5423_v16 = vpop.f32.mrf.mxu2 }
 0x81d   : > { %v5424_v27 = vadd.f32 %v5423_v16, %v5395_v55 }
 0x81e   : > { %v5749_v48 = vadd.f32 %v5748_v24, %v13941_v18  ;;  %v5415_v18 = vadd.f32 %v5414_v2, %v5386_v31 }
 0x820   : > { %v5750_v49 = vadd.f32 %v5749_v48, %v13901_v23  ;;  %v5478_v23 = vpop.f32.mrf.mxu0  ;;  %v5444_v60 = vadd.f32 %v5443_v36, %v5415_v18  ;;  %v5452_v52 = vpop.f32.mrf.mxu3 }
 0x821   : > { %v5507_v46 = vpop.f32.mrf.mxu1  ;;  %v5453_v38 = vadd.f32 %v5452_v52, %v5424_v27 }
 0x822   : > { %v5751_v51 = vadd.f32 %v5750_v49, %v13876_v50  ;;  %v5418_v50 = vadd.f32 %v5417_v1, %v5389_v13  ;;  %v5473_v6 = vadd.f32 %v5472_v21, %v5444_v60  ;;  %v5479_v1 = vadd.f32 %v5478_v23, %v5450_v20 }
 0x824   : > { %v5752_v4 = vrot.slane %v5751_v51, 4  ;;  %v5447_v28 = vadd.f32 %v5446_v25, %v5418_v50  ;;  %v5502_v62 = vadd.f32 %v5501_v8, %v5473_v6  ;;  %v5508_v24 = vadd.f32 %v5507_v46, %v5479_v1  ;;  %v5049_v8 = vld [vmem:[#allocation2 + $0x18] sm:$0xff] }
 0x826   : > { %v5753_v40 = vadd.f32 %v5752_v4, %v5751_v51  ;;  %v5476_v58 = vadd.f32 %v5475_v44, %v5447_v28 }
 0x828   : > { %v5754_v12 = vrot.slane %v5753_v40, 2  ;;  %v5481_v63 = vpop.f32.mrf.mxu0  ;;  %v5505_v35 = vadd.f32 %v5504_v26, %v5476_v58 }
 0x829   : > { %v5510_v5 = vpop.f32.mrf.mxu1  ;;  %v5482_v47 = vadd.f32 %v5481_v63, %v5453_v38 }
 0x82a   : > { %v5755_v11 = vadd.f32 %v5754_v12, %v5753_v40 }
 0x82b   : > { %v5511_v19 = vadd.f32 %v5510_v5, %v5482_v47 }
 0x82c   : > { %v5756_v32 = vrot.slane %v5755_v11, 1 }
 0x82e   : > { %v5757_v59 = vadd.f32 %v5756_v32, %v5755_v11 }
 0x830   : > { %v5758_v42 = vadd.f32 %v5757_v59, %v5608_v57 }
 0x832   : > { %5759 = vst [vmem:[#allocation3] sm:$0x1] %v5758_v42 }
 0x834   : > { %v5530_v56 = vpop.f32.mrf.mxu2 }
 0x835   : > { %v5531_v54 = vadd.f32 %v5530_v56, %v5502_v62 }
 0x837   : > { %v5559_v61 = vpop.f32.mrf.mxu3 }
 0x838   : > { %v5560_v22 = vadd.f32 %v5559_v61, %v5531_v54 }
 0x83c   : > { %v5533_v33 = vpop.f32.mrf.mxu2 }
 0x83d   : > { %v5534_v9 = vadd.f32 %v5533_v33, %v5505_v35 }
 0x83f   : > { %v5562_v17 = vpop.f32.mrf.mxu3 }
 0x840   : > { %v5588_v30 = vpop.f32.mrf.mxu0  ;;  %v5563_v37 = vadd.f32 %v5562_v17, %v5534_v9 }
 0x841   : > { %v5589_v43 = vadd.f32 %v5588_v30, %v5560_v22 }
 0x843   : > { %v5600_v41 = vadd.f32 %v5589_v43, %v5047_v15  ;;  %v5591_v34 = vpop.f32.mrf.mxu1 }
 0x844   : > { %v5592_v2 = vadd.f32 %v5591_v34, %v5563_v37 }
 0x845   : > { %5604 = vst [vmem:[#allocation2 + $0x10] sm:$0xff] %v5600_v41 }
 0x846   : > { %v5601_v39 = vadd.f32 %v5592_v2, %v5048_v53 }
 0x847   : > { %v5536_v36 = vpop.f32.mrf.mxu2 }
 0x848   : > { %5605 = vst [vmem:[#allocation2] sm:$0xff] %v5601_v39  ;;  %v5565_v10 = vpop.f32.mrf.mxu3  ;;  %v5537_v29 = vadd.f32 %v5536_v36, %v5508_v24 }
 0x84a   : > { %v5566_v25 = vadd.f32 %v5565_v10, %v5537_v29 }
 0x84f   : > { %v5539_v45 = vpop.f32.mrf.mxu2 }
 0x850   : > { %v5568_v21 = vpop.f32.mrf.mxu3  ;;  %v5540_v48 = vadd.f32 %v5539_v45, %v5511_v19 }
 0x852   : > { %v5569_v49 = vadd.f32 %v5568_v21, %v5540_v48 }
 0x857   : > { %v5594_v51 = vpop.f32.mrf.mxu2 }
 0x858   : > { %v5595_v4 = vadd.f32 %v5594_v51, %v5566_v25  ;;  %v5597_v40 = vpop.f32.mrf.mxu3 }
 0x859   : > { %v5598_v44 = vadd.f32 %v5597_v40, %v5569_v49 }
 0x85a   : > { %v5602_v12 = vadd.f32 %v5595_v4, %v5049_v8 }
 0x85b   : > { %v5603_v14 = vadd.f32 %v5598_v44, %v5050_v0 }
 0x85c   : > { %5606 = vst [vmem:[#allocation2 + $0x18] sm:$0xff] %v5602_v12 }
 0x85d   : > { %5607 = vst [vmem:[#allocation2 + $0x8] sm:$0xff] %v5603_v14 }
 0x85e PF: > { %5762 = sbr.rel (%p5896_p4) target bundleno = 2157 (0x86d), region = 60 }
 0x863   : > { %v5763_v11 = vld [vmem:[%s14427_s5] sm:$0xff]  ;;  %v5767_v31 = vld [vmem:[#allocation2 + $0x10] sm:$0xff]  ;;  %v5764_v26 = vld [vmem:[%s14427_s5 + $0x8] sm:$0xff] }
 0x864   : > { %v5771_v32 = vmul.f32 0.01, %v5767_v31  ;;  %v5768_v57 = vld [vmem:[#allocation2] sm:$0xff]  ;;  %v5765_v59 = vld [vmem:[%s14427_s5 + $0x10] sm:$0xff]  ;;  %v5769_v13 = vld [vmem:[#allocation2 + $0x18] sm:$0xff] }
 0x865   : > { %v5772_v18 = vmul.f32 0.01, %v5768_v57  ;;  %v5773_v16 = vmul.f32 0.01, %v5769_v13  ;;  %v5766_v42 = vld [vmem:[%s14427_s5 + $0x18] sm:$0xff]  ;;  %v5770_v23 = vld [vmem:[#allocation2 + $0x8] sm:$0xff] }
 0x866   : > { %v5775_v60 = vsub.f32 %v5763_v11, %v5771_v32  ;;  %v5774_v50 = vmul.f32 0.01, %v5770_v23  ;;  %v5783_v52 = vld [vmem:[%s14428_s6] sm:$0x1] }
 0x867   : > { %v5784_v46 = vld [vmem:[#allocation3] sm:$0x1]  ;;  %v5776_v6 = vsub.f32 %v5764_v26, %v5772_v18  ;;  %v5777_v28 = vsub.f32 %v5765_v59, %v5773_v16 }
 0x868   : > { %v5785_v56 = vmul.f32 0.01, %v5784_v46  ;;  %5779 = vst [vmem:[#allocation4] sm:$0xff] %v5775_v60  ;;  %v5778_v62 = vsub.f32 %v5766_v42, %v5774_v50 }
 0x869   : > { %5780 = vst [vmem:[#allocation4 + $0x18] sm:$0xff] %v5776_v6 }
 0x86a   : > { %v5786_v58 = vsub.f32 %v5783_v52, %v5785_v56  ;;  %5781 = vst [vmem:[#allocation4 + $0x8] sm:$0xff] %v5777_v28 }
 0x86b   : > { %5782 = vst [vmem:[#allocation4 + $0x10] sm:$0xff] %v5778_v62 }
 0x86c   : > { %5787 = vst [vmem:[#allocation5] sm:$0x1] %v5786_v58 }
 0x86d PF: > { %p6171_p6 = scmp.eq.s32.totalorder %s7368_s28, 1  ;;  %s5802_s10 = sshll.u32 %s14429_s7, 4  ;;  %s5803_s10 = int_to_ptr.hbm [resolvable:$true] %s5802_s10 }
 0x86e   : > { %s7315_s12 = smov [#allocation6]   ;;  %s5792_s13 = sld [smem:[#allocation8]] }
 0x86f   : > { %6163 = dma.smem_to_hbm (%p6171_p6), %s7315_s12, 16, %s5803_s10, [#allocation7]  }
 0x870   : > { %s5812_s17 = sshll.u32 %s14430_s8, 4  ;;  %s7316_s18 = smov [#allocation8]   ;;  %s5813_s17 = int_to_ptr.hbm [resolvable:$true] %s5812_s17 }
 0x874   : > { %s5793_s16 = sadd.f32 %s12533_s14, %s5792_s13 }
 0x876   : > { %6161 = sst [smem:[#allocation8]] (%p6041_p5), %s5793_s16 }
 0x877   : > { %6165 = dma.smem_to_hbm (%p6171_p6), %s7316_s18, 16, %s5813_s17, [#allocation9]  }
 0x878   : > { %7302 = dma.done.wait (%p6171_p6), [#allocation7], 16  }
 0x879   : > { %7304 = vsyncadd (%p6171_p6), [#allocation7], 4294967280 }
 0x87a   : > { %7306 = dma.done.wait (%p6171_p6), [#allocation9], 16  }
 0x87b   : > { %7308 = vsyncadd (%p6171_p6), [#allocation9], 4294967280 }
 0x87c   : > { %5826 = sfence }
 0x87d PF: > { %s21_s27 = sadd.s32 1, %s7311_s27  }
 0x87e   : > { %p18_p7 = scmp.ge.s32.totalorder %s21_s27, 4  }
 0x880   :  { %20 = sbr.rel (!%p18_p7) target bundleno = 2 (0x2), region = 109 }
 0x885   :  { %5832 = vsyncpa [#allocation7], 1 }
 0x886   :  { %5834 = vsyncpa [#allocation7 + $0x1], 1 }
 0x887   :  { %5835 = vsyncpa [#allocation9], 1 }

</bundles_post_ra>
